<compile_context>
chip_gen: v7x
topology: tpu7x:2x2x1
jax: 0.10.0
libtpu: 0.0.40
codegen_flags: <defaults>
</compile_context>

<pallas_src>
import jax
import jax.numpy as jnp
from jax import lax
from jax.experimental import pallas as pl
from jax.experimental.pallas import tpu as pltpu

# ----------------------------- config ----------------------------------------
# Small-but-realistic Llama-like shapes: head_dim = 128 like production Llama,
# so per-head slices of packed [T, heads*head_dim] slabs are vreg-aligned.
NUM_HEADS = 4
NUM_KV_HEADS = 2
HEAD_SIZE = 128
HALF = HEAD_SIZE // 2                       # 64
NUM_GROUPS = NUM_HEADS // NUM_KV_HEADS      # 2
HIDDEN = NUM_HEADS * HEAD_SIZE              # 512
Q_DIM = NUM_HEADS * HEAD_SIZE               # 512
KV_DIM = NUM_KV_HEADS * HEAD_SIZE           # 256
QKV_DIM = Q_DIM + 2 * KV_DIM                # 1024
K_OFF = Q_DIM
V_OFF = Q_DIM + KV_DIM
ROPE_THETA = 10000.0
SOFTMAX_SCALE = HEAD_SIZE ** (-0.5)

SEQ = 256          # total prefill tokens (one sequence)
NUM_SLOTS = 512    # kv-cache slots
TR = 128           # projection row tile
TQ = 128           # flash-attention query tile
TKV = 128          # flash-attention kv tile
MASK_VALUE = -1e30  # finite additive mask (avoids inf-inf NaNs)


# ------------------- kernel 1: fused QKV projection + RoPE -------------------
def _qkv_rope_kernel(x_ref, wqkv_ref, cos_ref, sin_ref, q_ref, k_ref, v_ref):
    x = x_ref[...]                                             # [TR, HIDDEN] bf16
    qkv = jnp.dot(x, wqkv_ref[...], preferred_element_type=jnp.float32)

    cos = cos_ref[...]                                         # [TR, HEAD_SIZE] f32
    sin = sin_ref[...]                                         # concat(-sin, sin)

    def rope(head):
        # head: [TR, HEAD_SIZE].  Rolling by exactly HEAD_SIZE/2 is
        # direction-agnostic (shift == half the lane width), so no backend
        # roll-convention probe is needed.
        return head * cos + pltpu.roll(head, HALF, 1) * sin

    q_heads = [rope(qkv[:, h * HEAD_SIZE:(h + 1) * HEAD_SIZE])
               for h in range(NUM_HEADS)]
    q = jnp.concatenate(q_heads, axis=-1) * SOFTMAX_SCALE      # scale folded here
    q_ref[...] = q.astype(q_ref.dtype)

    k_heads = [rope(qkv[:, K_OFF + g * HEAD_SIZE:K_OFF + (g + 1) * HEAD_SIZE])
               for g in range(NUM_KV_HEADS)]
    k_ref[...] = jnp.concatenate(k_heads, axis=-1).astype(k_ref.dtype)
    v_ref[...] = qkv[:, V_OFF:].astype(v_ref.dtype)


def _qkv_rope_proj(x, w_qkv, cos_head, sin_head):
    T = x.shape[0]
    n_tiles = T // TR
    flops = 2 * T * HIDDEN * QKV_DIM
    bytes_accessed = (T * HIDDEN * 2 + HIDDEN * QKV_DIM * 2
                      + 2 * T * HEAD_SIZE * 4 + T * QKV_DIM * 2)
    return pl.pallas_call(
        _qkv_rope_kernel,
        out_shape=(
            jax.ShapeDtypeStruct((T, Q_DIM), jnp.bfloat16),
            jax.ShapeDtypeStruct((T, KV_DIM), jnp.bfloat16),
            jax.ShapeDtypeStruct((T, KV_DIM), jnp.bfloat16),
        ),
        grid=(n_tiles,),
        in_specs=[
            pl.BlockSpec((TR, HIDDEN), lambda i: (i, 0)),
            pl.BlockSpec((HIDDEN, QKV_DIM), lambda i: (0, 0)),   # VMEM-resident
            pl.BlockSpec((TR, HEAD_SIZE), lambda i: (i, 0)),
            pl.BlockSpec((TR, HEAD_SIZE), lambda i: (i, 0)),
        ],
        out_specs=(
            pl.BlockSpec((TR, Q_DIM), lambda i: (i, 0)),
            pl.BlockSpec((TR, KV_DIM), lambda i: (i, 0)),
            pl.BlockSpec((TR, KV_DIM), lambda i: (i, 0)),
        ),
        compiler_params=pltpu.CompilerParams(dimension_semantics=("parallel",)),
        cost_estimate=pl.CostEstimate(flops=flops, transcendentals=0,
                                      bytes_accessed=bytes_accessed),
    )(x, w_qkv, cos_head, sin_head)


# ------------- kernel 2: online-softmax flash attention + o_proj -------------
def _flash_attn_kernel(q_ref, k_ref, v_ref, wo_ref, out_ref, m_sc, l_sc, acc_sc):
    i = pl.program_id(0)
    j = pl.program_id(1)

    @pl.when(j == 0)
    def _init():
        m_sc[...] = jnp.full(m_sc.shape, MASK_VALUE, m_sc.dtype)
        l_sc[...] = jnp.zeros(l_sc.shape, l_sc.dtype)
        acc_sc[...] = jnp.zeros(acc_sc.shape, acc_sc.dtype)

    # Skip KV tiles that are strictly above the causal diagonal.
    @pl.when(j * TKV <= i * TQ + (TQ - 1))
    def _update():
        q = q_ref[...]                        # [TQ, Q_DIM]   bf16, pre-scaled
        k = k_ref[...]                        # [TKV, KV_DIM] bf16
        v = v_ref[...]                        # [TKV, KV_DIM] bf16

        row = i * TQ + lax.broadcasted_iota(jnp.int32, (TQ, TKV), 0)
        col = j * TKV + lax.broadcasted_iota(jnp.int32, (TQ, TKV), 1)
        bias = jnp.where(col <= row, jnp.float32(0.0), jnp.float32(MASK_VALUE))
        bias_g = jnp.concatenate([bias] * NUM_GROUPS, axis=0)   # [G*TQ, TKV]
        # TODO(synk): multi-sequence cu_seqlen prefill needs a row-valid guard
        # here (a fully-masked row would otherwise softmax to garbage).

        # One QK^T / PV pair per KV head: stack the GQA group's query heads
        # along rows so M = NUM_GROUPS*TQ (wider MXU op, fewer pushes).
        # TODO(synk): with many heads use lax.fori_loop instead of full unroll.
        for g in range(NUM_KV_HEADS):
            q_g = jnp.concatenate(
                [q[:, (g * NUM_GROUPS + r) * HEAD_SIZE:
                      (g * NUM_GROUPS + r + 1) * HEAD_SIZE]
                 for r in range(NUM_GROUPS)], axis=0)            # [G*TQ, D]
            k_g = k[:, g * HEAD_SIZE:(g + 1) * HEAD_SIZE]        # [TKV, D]
            v_g = v[:, g * HEAD_SIZE:(g + 1) * HEAD_SIZE]

            s = lax.dot_general(q_g, k_g, (((1,), (1,)), ((), ())),
                                preferred_element_type=jnp.float32)
            s = s + bias_g                                        # [G*TQ, TKV] f32

            m_prev = m_sc[g]
            m_new = jnp.maximum(m_prev, jnp.max(s, axis=-1, keepdims=True))
            alpha = jnp.exp(m_prev - m_new)
            p = jnp.exp(s - m_new)
            l_sc[g] = alpha * l_sc[g] + jnp.sum(p, axis=-1, keepdims=True)
            acc_sc[g] = alpha * acc_sc[g] + jnp.dot(
                p.astype(jnp.bfloat16), v_g, preferred_element_type=jnp.float32)
            m_sc[g] = m_new

    @pl.when(j == pl.num_programs(1) - 1)
    def _finalize():
        heads = []
        for g in range(NUM_KV_HEADS):
            o_g = acc_sc[g] * pl.reciprocal(l_sc[g], approx=True)  # [G*TQ, D]
            for r in range(NUM_GROUPS):
                heads.append(o_g[r * TQ:(r + 1) * TQ, :])
        attn = jnp.concatenate(heads, axis=-1)                     # [TQ, Q_DIM] f32
        out = jnp.dot(attn.astype(jnp.bfloat16), wo_ref[...],
                      preferred_element_type=jnp.float32)
        out_ref[...] = out.astype(out_ref.dtype)


def _flash_attention(q, k, v, w_o):
    T = q.shape[0]
    nq, nk = T // TQ, T // TKV
    flops = 2 * 2 * T * T * HEAD_SIZE * NUM_HEADS + 2 * T * Q_DIM * HIDDEN
    transcendentals = T * T * NUM_HEADS
    bytes_accessed = (T * Q_DIM * 2 + nq * T * KV_DIM * 2 * 2
                      + Q_DIM * HIDDEN * 2 + T * HIDDEN * 2)
    return pl.pallas_call(
        _flash_attn_kernel,
        out_shape=jax.ShapeDtypeStruct((T, HIDDEN), jnp.bfloat16),
        grid=(nq, nk),
        in_specs=[
            pl.BlockSpec((TQ, Q_DIM), lambda i, j: (i, 0)),
            pl.BlockSpec((TKV, KV_DIM), lambda i, j: (j, 0)),
            pl.BlockSpec((TKV, KV_DIM), lambda i, j: (j, 0)),
            pl.BlockSpec((Q_DIM, HIDDEN), lambda i, j: (0, 0)),   # VMEM-resident
        ],
        out_specs=pl.BlockSpec((TQ, HIDDEN), lambda i, j: (i, 0)),
        scratch_shapes=[
            pltpu.VMEM((NUM_KV_HEADS, NUM_GROUPS * TQ, 1), jnp.float32),   # m
            pltpu.VMEM((NUM_KV_HEADS, NUM_GROUPS * TQ, 1), jnp.float32),   # l
            pltpu.VMEM((NUM_KV_HEADS, NUM_GROUPS * TQ, HEAD_SIZE), jnp.float32),
        ],
        compiler_params=pltpu.CompilerParams(
            dimension_semantics=("parallel", "arbitrary")),
        cost_estimate=pl.CostEstimate(flops=flops,
                                      transcendentals=transcendentals,
                                      bytes_accessed=bytes_accessed),
    )(q, k, v, w_o)


# ------------------------------ forward pass ----------------------------------
def flash_llama_attention(hidden_states, cos_head, sin_head,
                          w_qkv, w_o, k_cache, v_cache, slots):
    T = hidden_states.shape[0]
    q, k, v = _qkv_rope_proj(hidden_states, w_qkv, cos_head, sin_head)
    out = _flash_attention(q, k, v, w_o)
    # reshape_and_cache: scatter post-RoPE K / V into the slot-indexed cache.
    # TODO(synk): fuse this scatter into kernel 1 (input_output_aliases +
    # scalar-prefetched slots) and add the decode-time paged_attention path.
    k_cache = k_cache.at[slots].set(k.reshape(T, NUM_KV_HEADS, HEAD_SIZE))
    v_cache = v_cache.at[slots].set(v.reshape(T, NUM_KV_HEADS, HEAD_SIZE))
    return out, k_cache, v_cache


# ----------------------------- pure-JAX reference -----------------------------
def _reference_forward(x, cos, sin, w_qkv, w_o):
    T = x.shape[0]
    xf = x.astype(jnp.float32)
    qkv = xf @ w_qkv.astype(jnp.float32)
    q = qkv[:, :Q_DIM].reshape(T, NUM_HEADS, HEAD_SIZE)
    k = qkv[:, K_OFF:V_OFF].reshape(T, NUM_KV_HEADS, HEAD_SIZE)
    v = qkv[:, V_OFF:].reshape(T, NUM_KV_HEADS, HEAD_SIZE)

    def rope(t):
        x1, x2 = t[..., :HALF], t[..., HALF:]
        c, s = cos[:, None, :], sin[:, None, :]
        return jnp.concatenate([x1 * c - x2 * s, x2 * c + x1 * s], axis=-1)

    q, k = rope(q), rope(k)
    kk = jnp.repeat(k, NUM_GROUPS, axis=1)
    vv = jnp.repeat(v, NUM_GROUPS, axis=1)
    s = jnp.einsum('qhd,khd->hqk', q, kk) * SOFTMAX_SCALE
    causal = jnp.tril(jnp.ones((T, T), bool))
    s = jnp.where(causal[None], s, MASK_VALUE)
    p = jax.nn.softmax(s, axis=-1)
    o = jnp.einsum('hqk,khd->qhd', p, vv).reshape(T, Q_DIM)
    return o @ w_o.astype(jnp.float32), k, v


# ---------------------------------- main ---------------------------------------
if __name__ == "__main__":
    key = jax.random.PRNGKey(0)
    k1, k2, k3 = jax.random.split(key, 3)

    hidden_states = jax.random.normal(k1, (SEQ, HIDDEN), jnp.float32).astype(jnp.bfloat16)
    w_qkv = (0.02 * jax.random.normal(k2, (HIDDEN, QKV_DIM), jnp.float32)).astype(jnp.bfloat16)
    w_o = (0.02 * jax.random.normal(k3, (Q_DIM, HIDDEN), jnp.float32)).astype(jnp.bfloat16)

    # Standard neox rotary tables for positions 0..T-1.
    pos = jnp.arange(SEQ, dtype=jnp.float32)[:, None]
    inv_freq = 1.0 / (ROPE_THETA ** (
        jnp.arange(0, HEAD_SIZE, 2, dtype=jnp.float32) / HEAD_SIZE))
    angles = pos * inv_freq[None, :]                       # [T, HEAD_SIZE // 2]
    cos, sin = jnp.cos(angles), jnp.sin(angles)
    cos_head = jnp.concatenate([cos, cos], axis=-1)        # [T, HEAD_SIZE]
    sin_head = jnp.concatenate([-sin, sin], axis=-1)       # signed partner coeffs

    k_cache = jnp.zeros((NUM_SLOTS, NUM_KV_HEADS, HEAD_SIZE), jnp.bfloat16)
    v_cache = jnp.zeros((NUM_SLOTS, NUM_KV_HEADS, HEAD_SIZE), jnp.bfloat16)
    slots = jnp.arange(SEQ, dtype=jnp.int32)

    fwd = jax.jit(flash_llama_attention)
    out, k_cache, v_cache = fwd(hidden_states, cos_head, sin_head,
                                w_qkv, w_o, k_cache, v_cache, slots)
    jax.block_until_ready((out, k_cache, v_cache))
    assert out.shape == (SEQ, HIDDEN)

    # Numerical check against the pure-JAX (f32) reference.
    ref_out, ref_k, ref_v = _reference_forward(hidden_states, cos, sin, w_qkv, w_o)
    err_out = float(jnp.max(jnp.abs(out.astype(jnp.float32) - ref_out)))
    err_k = float(jnp.max(jnp.abs(
        k_cache[slots].astype(jnp.float32) - ref_k)))
    err_v = float(jnp.max(jnp.abs(
        v_cache[slots].astype(jnp.float32) - ref_v)))
    assert err_out < 2e-2, f"attention output mismatch: max abs err {err_out}"
    assert err_k < 2e-2 and err_v < 2e-2, f"kv cache mismatch: {err_k}, {err_v}"
    print("KERNEL_OK")
</pallas_src>

<mosaic_0001>
module attributes {stable_mosaic.version = 11 : i64} {
  func.func @_flash_attn_kernel(%arg0: i32, %arg1: i32, %arg2: memref<128x512xbf16, #tpu.memory_space<vmem>>, %arg3: memref<128x256xbf16, #tpu.memory_space<vmem>>, %arg4: memref<128x256xbf16, #tpu.memory_space<vmem>>, %arg5: memref<512x512xbf16, #tpu.memory_space<vmem>>, %arg6: memref<128x512xbf16, #tpu.memory_space<vmem>>, %arg7: memref<2x256x1xf32, #tpu.memory_space<vmem>>, %arg8: memref<2x256x1xf32, #tpu.memory_space<vmem>>, %arg9: memref<2x256x128xf32, #tpu.memory_space<vmem>>) attributes {dimension_semantics = [#tpu.dimension_semantics<parallel>, #tpu.dimension_semantics<arbitrary>], iteration_bounds = array<i64: 2, 2>, scalar_prefetch = 0 : i64, scratch_operands = 3 : i64, tpu.core_type = #tpu.core_type<tc>, window_params = [{transform_indices = @transform_0, window_bounds = array<i64: 128, 512>}, {transform_indices = @transform_1, window_bounds = array<i64: 128, 256>}, {transform_indices = @transform_2, window_bounds = array<i64: 128, 256>}, {pipeline_mode = #tpu.pipeline_mode<synchronous>, transform_indices = @transform_3, window_bounds = array<i64: 512, 512>}, {transform_indices = @transform_4, window_bounds = array<i64: 128, 512>}]} {
    %c0_i32 = arith.constant 0 : i32
    %0 = arith.cmpi eq, %arg1, %c0_i32 : i32
    %1 = arith.extui %0 : i1 to i32
    %c0_i32_0 = arith.constant 0 : i32
    %2 = arith.cmpi ne, %1, %c0_i32_0 : i32
    scf.if %2 {
      %cst = arith.constant -1.000000e+30 : f32
      %12 = vector.broadcast %cst : f32 to vector<2x256x1xf32>
      %c0 = arith.constant 0 : index
      %c0_4 = arith.constant 0 : index
      %c0_5 = arith.constant 0 : index
      %13 = vector.load %arg7[%c0, %c0_4, %c0_5] : memref<2x256x1xf32, #tpu.memory_space<vmem>>, vector<2x256x1xf32>
      tpu.vector_store %arg7[%c0, %c0_4, %c0_5], %12 {strides = array<i32>} : memref<2x256x1xf32, #tpu.memory_space<vmem>>, vector<2x256x1xf32>,
      %cst_6 = arith.constant 0.000000e+00 : f32
      %14 = vector.broadcast %cst_6 : f32 to vector<2x256x1xf32>
      %c0_7 = arith.constant 0 : index
      %c0_8 = arith.constant 0 : index
      %c0_9 = arith.constant 0 : index
      %15 = vector.load %arg8[%c0_7, %c0_8, %c0_9] : memref<2x256x1xf32, #tpu.memory_space<vmem>>, vector<2x256x1xf32>
      tpu.vector_store %arg8[%c0_7, %c0_8, %c0_9], %14 {strides = array<i32>} : memref<2x256x1xf32, #tpu.memory_space<vmem>>, vector<2x256x1xf32>,
      %cst_10 = arith.constant 0.000000e+00 : f32
      %16 = vector.broadcast %cst_10 : f32 to vector<2x256x128xf32>
      %c0_11 = arith.constant 0 : index
      %c0_12 = arith.constant 0 : index
      %c0_13 = arith.constant 0 : index
      %17 = vector.load %arg9[%c0_11, %c0_12, %c0_13] : memref<2x256x128xf32, #tpu.memory_space<vmem>>, vector<2x256x128xf32>
      tpu.vector_store %arg9[%c0_11, %c0_12, %c0_13], %16 {strides = array<i32>} : memref<2x256x128xf32, #tpu.memory_space<vmem>>, vector<2x256x128xf32>,
    } else {
    }
    %c128_i32 = arith.constant 128 : i32
    %3 = arith.muli %arg1, %c128_i32 : i32
    %c128_i32_1 = arith.constant 128 : i32
    %4 = arith.muli %arg0, %c128_i32_1 : i32
    %c127_i32 = arith.constant 127 : i32
    %5 = arith.addi %4, %c127_i32 : i32
    %6 = arith.cmpi sle, %3, %5 : i32
    %7 = arith.extui %6 : i1 to i32
    %c0_i32_2 = arith.constant 0 : i32
    %8 = arith.cmpi ne, %7, %c0_i32_2 : i32
    scf.if %8 {
      %c0 = arith.constant 0 : index
      %c0_4 = arith.constant 0 : index
      %12 = vector.load %arg2[%c0, %c0_4] : memref<128x512xbf16, #tpu.memory_space<vmem>>, vector<128x512xbf16>
      %c0_5 = arith.constant 0 : index
      %c0_6 = arith.constant 0 : index
      %13 = vector.load %arg3[%c0_5, %c0_6] : memref<128x256xbf16, #tpu.memory_space<vmem>>, vector<128x256xbf16>
      %c0_7 = arith.constant 0 : index
      %c0_8 = arith.constant 0 : index
      %14 = vector.load %arg4[%c0_7, %c0_8] : memref<128x256xbf16, #tpu.memory_space<vmem>>, vector<128x256xbf16>
      %c128_i32_9 = arith.constant 128 : i32
      %15 = arith.muli %arg0, %c128_i32_9 : i32
      %16 = tpu.iota {dimensions = array<i32: 0>} : vector<128x128xi32>
      %17 = vector.broadcast %15 : i32 to vector<128x128xi32>
      %18 = arith.addi %17, %16 : vector<128x128xi32>
      %c128_i32_10 = arith.constant 128 : i32
      %19 = arith.muli %arg1, %c128_i32_10 : i32
      %20 = tpu.iota {dimensions = array<i32: 1>} : vector<128x128xi32>
      %21 = vector.broadcast %19 : i32 to vector<128x128xi32>
      %22 = arith.addi %21, %20 : vector<128x128xi32>
      %23 = arith.cmpi sle, %22, %18 : vector<128x128xi32>
      %cst = arith.constant 0.000000e+00 : f32
      %cst_11 = arith.constant -1.000000e+30 : f32
      %24 = vector.broadcast %cst : f32 to vector<128x128xf32>
      %25 = vector.broadcast %cst_11 : f32 to vector<128x128xf32>
      %26 = arith.select %23, %24, %25 : vector<128x128xi1>, vector<128x128xf32>
      %27 = tpu.concatenate %26, %26 in 0 : vector<128x128xf32>, vector<128x128xf32> -> vector<256x128xf32>
      %28 = vector.extract_strided_slice %12 {offsets = [0, 0], sizes = [128, 128], strides = [1, 1]} : vector<128x512xbf16> to vector<128x128xbf16>
      %29 = vector.extract_strided_slice %12 {offsets = [0, 128], sizes = [128, 128], strides = [1, 1]} : vector<128x512xbf16> to vector<128x128xbf16>
      %30 = tpu.concatenate %28, %29 in 0 : vector<128x128xbf16>, vector<128x128xbf16> -> vector<256x128xbf16>
      %31 = vector.extract_strided_slice %13 {offsets = [0, 0], sizes = [128, 128], strides = [1, 1]} : vector<128x256xbf16> to vector<128x128xbf16>
      %32 = vector.extract_strided_slice %14 {offsets = [0, 0], sizes = [128, 128], strides = [1, 1]} : vector<128x256xbf16> to vector<128x128xbf16>
      %cst_12 = arith.constant dense<0.000000e+00> : vector<256x128xf32>
      %33 = tpu.matmul %30, %31, %cst_12 {dimension_numbers = #tpu.dot_dimension_numbers<[1], [1], [0], [0], [0, 0, 1, 0], [], []>} : vector<256x128xbf16>, vector<128x128xbf16>, vector<256x128xf32> -> vector<256x128xf32>
      %34 = arith.addf %33, %27 : vector<256x128xf32>
      %c0_13 = arith.constant 0 : index
      %c0_14 = arith.constant 0 : index
      %c0_15 = arith.constant 0 : index
      %35 = vector.load %arg7[%c0_13, %c0_14, %c0_15] : memref<2x256x1xf32, #tpu.memory_space<vmem>>, vector<1x256x1xf32>
      %36 = vector.shape_cast %35 : vector<1x256x1xf32> to vector<256x1xf32>
      %cst_16 = arith.constant dense<0xFF800000> : vector<256xf32>
      %37 = vector.multi_reduction <maximumf>, %34, %cst_16 [1] : vector<256x128xf32> to vector<256xf32>
      %38 = vector.shape_cast %37 : vector<256xf32> to vector<256x1xf32>
      %39 = arith.maximumf %36, %38 : vector<256x1xf32>
      %40 = arith.subf %36, %39 : vector<256x1xf32>
      %41 = math.exp %40 : vector<256x1xf32>
      %42 = vector.broadcast %39 : vector<256x1xf32> to vector<256x128xf32>
      %43 = arith.subf %34, %42 : vector<256x128xf32>
      %44 = math.exp %43 : vector<256x128xf32>
      %c0_17 = arith.constant 0 : index
      %c0_18 = arith.constant 0 : index
      %c0_19 = arith.constant 0 : index
      %45 = vector.load %arg8[%c0_17, %c0_18, %c0_19] : memref<2x256x1xf32, #tpu.memory_space<vmem>>, vector<1x256x1xf32>
      %46 = vector.shape_cast %45 : vector<1x256x1xf32> to vector<256x1xf32>
      %47 = arith.mulf %41, %46 : vector<256x1xf32>
      %cst_20 = arith.constant dense<0.000000e+00> : vector<256xf32>
      %48 = vector.multi_reduction <add>, %44, %cst_20 [1] : vector<256x128xf32> to vector<256xf32>
      %49 = vector.shape_cast %48 : vector<256xf32> to vector<256x1xf32>
      %50 = arith.addf %47, %49 : vector<256x1xf32>
      %c0_21 = arith.constant 0 : index
      %c0_22 = arith.constant 0 : index
      %c0_23 = arith.constant 0 : index
      %51 = vector.load %arg8[%c0_21, %c0_22, %c0_23] : memref<2x256x1xf32, #tpu.memory_space<vmem>>, vector<1x256x1xf32>
      %52 = vector.shape_cast %51 : vector<1x256x1xf32> to vector<256x1xf32>
      %53 = vector.shape_cast %50 : vector<256x1xf32> to vector<1x256x1xf32>
      tpu.vector_store %arg8[%c0_21, %c0_22, %c0_23], %53 {strides = array<i32>} : memref<2x256x1xf32, #tpu.memory_space<vmem>>, vector<1x256x1xf32>,
      %c0_24 = arith.constant 0 : index
      %c0_25 = arith.constant 0 : index
      %c0_26 = arith.constant 0 : index
      %54 = vector.load %arg9[%c0_24, %c0_25, %c0_26] : memref<2x256x128xf32, #tpu.memory_space<vmem>>, vector<1x256x128xf32>
      %55 = vector.shape_cast %54 : vector<1x256x128xf32> to vector<256x128xf32>
      %56 = vector.broadcast %41 : vector<256x1xf32> to vector<256x128xf32>
      %57 = arith.mulf %56, %55 : vector<256x128xf32>
      %58 = arith.truncf %44 : vector<256x128xf32> to vector<256x128xbf16>
      %cst_27 = arith.constant dense<0.000000e+00> : vector<256x128xf32>
      %59 = tpu.matmul %58, %32, %cst_27 {dimension_numbers = #tpu.dot_dimension_numbers<[1], [0], [0], [1], [0, 0, 1, 1], [], []>} : vector<256x128xbf16>, vector<128x128xbf16>, vector<256x128xf32> -> vector<256x128xf32>
      %60 = arith.addf %57, %59 : vector<256x128xf32>
      %c0_28 = arith.constant 0 : index
      %c0_29 = arith.constant 0 : index
      %c0_30 = arith.constant 0 : index
      %61 = vector.load %arg9[%c0_28, %c0_29, %c0_30] : memref<2x256x128xf32, #tpu.memory_space<vmem>>, vector<1x256x128xf32>
      %62 = vector.shape_cast %61 : vector<1x256x128xf32> to vector<256x128xf32>
      %63 = vector.shape_cast %60 : vector<256x128xf32> to vector<1x256x128xf32>
      tpu.vector_store %arg9[%c0_28, %c0_29, %c0_30], %63 {strides = array<i32>} : memref<2x256x128xf32, #tpu.memory_space<vmem>>, vector<1x256x128xf32>,
      %c0_31 = arith.constant 0 : index
      %c0_32 = arith.constant 0 : index
      %c0_33 = arith.constant 0 : index
      %64 = vector.load %arg7[%c0_31, %c0_32, %c0_33] : memref<2x256x1xf32, #tpu.memory_space<vmem>>, vector<1x256x1xf32>
      %65 = vector.shape_cast %64 : vector<1x256x1xf32> to vector<256x1xf32>
      %66 = vector.shape_cast %39 : vector<256x1xf32> to vector<1x256x1xf32>
      tpu.vector_store %arg7[%c0_31, %c0_32, %c0_33], %66 {strides = array<i32>} : memref<2x256x1xf32, #tpu.memory_space<vmem>>, vector<1x256x1xf32>,
      %67 = vector.extract_strided_slice %12 {offsets = [0, 256], sizes = [128, 128], strides = [1, 1]} : vector<128x512xbf16> to vector<128x128xbf16>
      %68 = vector.extract_strided_slice %12 {offsets = [0, 384], sizes = [128, 128], strides = [1, 1]} : vector<128x512xbf16> to vector<128x128xbf16>
      %69 = tpu.concatenate %67, %68 in 0 : vector<128x128xbf16>, vector<128x128xbf16> -> vector<256x128xbf16>
      %70 = vector.extract_strided_slice %13 {offsets = [0, 128], sizes = [128, 128], strides = [1, 1]} : vector<128x256xbf16> to vector<128x128xbf16>
      %71 = vector.extract_strided_slice %14 {offsets = [0, 128], sizes = [128, 128], strides = [1, 1]} : vector<128x256xbf16> to vector<128x128xbf16>
      %cst_34 = arith.constant dense<0.000000e+00> : vector<256x128xf32>
      %72 = tpu.matmul %69, %70, %cst_34 {dimension_numbers = #tpu.dot_dimension_numbers<[1], [1], [0], [0], [0, 0, 1, 0], [], []>} : vector<256x128xbf16>, vector<128x128xbf16>, vector<256x128xf32> -> vector<256x128xf32>
      %73 = arith.addf %72, %27 : vector<256x128xf32>
      %c1 = arith.constant 1 : index
      %c0_35 = arith.constant 0 : index
      %c0_36 = arith.constant 0 : index
      %74 = vector.load %arg7[%c1, %c0_35, %c0_36] : memref<2x256x1xf32, #tpu.memory_space<vmem>>, vector<1x256x1xf32>
      %75 = vector.shape_cast %74 : vector<1x256x1xf32> to vector<256x1xf32>
      %cst_37 = arith.constant dense<0xFF800000> : vector<256xf32>
      %76 = vector.multi_reduction <maximumf>, %73, %cst_37 [1] : vector<256x128xf32> to vector<256xf32>
      %77 = vector.shape_cast %76 : vector<256xf32> to vector<256x1xf32>
      %78 = arith.maximumf %75, %77 : vector<256x1xf32>
      %79 = arith.subf %75, %78 : vector<256x1xf32>
      %80 = math.exp %79 : vector<256x1xf32>
      %81 = vector.broadcast %78 : vector<256x1xf32> to vector<256x128xf32>
      %82 = arith.subf %73, %81 : vector<256x128xf32>
      %83 = math.exp %82 : vector<256x128xf32>
      %c1_38 = arith.constant 1 : index
      %c0_39 = arith.constant 0 : index
      %c0_40 = arith.constant 0 : index
      %84 = vector.load %arg8[%c1_38, %c0_39, %c0_40] : memref<2x256x1xf32, #tpu.memory_space<vmem>>, vector<1x256x1xf32>
      %85 = vector.shape_cast %84 : vector<1x256x1xf32> to vector<256x1xf32>
      %86 = arith.mulf %80, %85 : vector<256x1xf32>
      %cst_41 = arith.constant dense<0.000000e+00> : vector<256xf32>
      %87 = vector.multi_reduction <add>, %83, %cst_41 [1] : vector<256x128xf32> to vector<256xf32>
      %88 = vector.shape_cast %87 : vector<256xf32> to vector<256x1xf32>
      %89 = arith.addf %86, %88 : vector<256x1xf32>
      %c1_42 = arith.constant 1 : index
      %c0_43 = arith.constant 0 : index
      %c0_44 = arith.constant 0 : index
      %90 = vector.load %arg8[%c1_42, %c0_43, %c0_44] : memref<2x256x1xf32, #tpu.memory_space<vmem>>, vector<1x256x1xf32>
      %91 = vector.shape_cast %90 : vector<1x256x1xf32> to vector<256x1xf32>
      %92 = vector.shape_cast %89 : vector<256x1xf32> to vector<1x256x1xf32>
      tpu.vector_store %arg8[%c1_42, %c0_43, %c0_44], %92 {strides = array<i32>} : memref<2x256x1xf32, #tpu.memory_space<vmem>>, vector<1x256x1xf32>,
      %c1_45 = arith.constant 1 : index
      %c0_46 = arith.constant 0 : index
      %c0_47 = arith.constant 0 : index
      %93 = vector.load %arg9[%c1_45, %c0_46, %c0_47] : memref<2x256x128xf32, #tpu.memory_space<vmem>>, vector<1x256x128xf32>
      %94 = vector.shape_cast %93 : vector<1x256x128xf32> to vector<256x128xf32>
      %95 = vector.broadcast %80 : vector<256x1xf32> to vector<256x128xf32>
      %96 = arith.mulf %95, %94 : vector<256x128xf32>
      %97 = arith.truncf %83 : vector<256x128xf32> to vector<256x128xbf16>
      %cst_48 = arith.constant dense<0.000000e+00> : vector<256x128xf32>
      %98 = tpu.matmul %97, %71, %cst_48 {dimension_numbers = #tpu.dot_dimension_numbers<[1], [0], [0], [1], [0, 0, 1, 1], [], []>} : vector<256x128xbf16>, vector<128x128xbf16>, vector<256x128xf32> -> vector<256x128xf32>
      %99 = arith.addf %96, %98 : vector<256x128xf32>
      %c1_49 = arith.constant 1 : index
      %c0_50 = arith.constant 0 : index
      %c0_51 = arith.constant 0 : index
      %100 = vector.load %arg9[%c1_49, %c0_50, %c0_51] : memref<2x256x128xf32, #tpu.memory_space<vmem>>, vector<1x256x128xf32>
      %101 = vector.shape_cast %100 : vector<1x256x128xf32> to vector<256x128xf32>
      %102 = vector.shape_cast %99 : vector<256x128xf32> to vector<1x256x128xf32>
      tpu.vector_store %arg9[%c1_49, %c0_50, %c0_51], %102 {strides = array<i32>} : memref<2x256x128xf32, #tpu.memory_space<vmem>>, vector<1x256x128xf32>,
      %c1_52 = arith.constant 1 : index
      %c0_53 = arith.constant 0 : index
      %c0_54 = arith.constant 0 : index
      %103 = vector.load %arg7[%c1_52, %c0_53, %c0_54] : memref<2x256x1xf32, #tpu.memory_space<vmem>>, vector<1x256x1xf32>
      %104 = vector.shape_cast %103 : vector<1x256x1xf32> to vector<256x1xf32>
      %105 = vector.shape_cast %78 : vector<256x1xf32> to vector<1x256x1xf32>
      tpu.vector_store %arg7[%c1_52, %c0_53, %c0_54], %105 {strides = array<i32>} : memref<2x256x1xf32, #tpu.memory_space<vmem>>, vector<1x256x1xf32>,
    } else {
    }
    %c1_i32 = arith.constant 1 : i32
    %9 = arith.cmpi eq, %arg1, %c1_i32 : i32
    %10 = arith.extui %9 : i1 to i32
    %c0_i32_3 = arith.constant 0 : i32
    %11 = arith.cmpi ne, %10, %c0_i32_3 : i32
    scf.if %11 {
      %c0 = arith.constant 0 : index
      %c0_4 = arith.constant 0 : index
      %c0_5 = arith.constant 0 : index
      %12 = vector.load %arg9[%c0, %c0_4, %c0_5] : memref<2x256x128xf32, #tpu.memory_space<vmem>>, vector<1x256x128xf32>
      %13 = vector.shape_cast %12 : vector<1x256x128xf32> to vector<256x128xf32>
      %c0_6 = arith.constant 0 : index
      %c0_7 = arith.constant 0 : index
      %c0_8 = arith.constant 0 : index
      %14 = vector.load %arg8[%c0_6, %c0_7, %c0_8] : memref<2x256x1xf32, #tpu.memory_space<vmem>>, vector<1x256x1xf32>
      %15 = vector.shape_cast %14 : vector<1x256x1xf32> to vector<256x1xf32>
      %16 = tpu.reciprocal %15 {approx = true} : vector<256x1xf32> -> vector<256x1xf32>
      %17 = vector.broadcast %16 : vector<256x1xf32> to vector<256x128xf32>
      %18 = arith.mulf %13, %17 : vector<256x128xf32>
      %19 = vector.extract_strided_slice %18 {offsets = [0, 0], sizes = [128, 128], strides = [1, 1]} : vector<256x128xf32> to vector<128x128xf32>
      %20 = vector.extract_strided_slice %18 {offsets = [128, 0], sizes = [128, 128], strides = [1, 1]} : vector<256x128xf32> to vector<128x128xf32>
      %c1 = arith.constant 1 : index
      %c0_9 = arith.constant 0 : index
      %c0_10 = arith.constant 0 : index
      %21 = vector.load %arg9[%c1, %c0_9, %c0_10] : memref<2x256x128xf32, #tpu.memory_space<vmem>>, vector<1x256x128xf32>
      %22 = vector.shape_cast %21 : vector<1x256x128xf32> to vector<256x128xf32>
      %c1_11 = arith.constant 1 : index
      %c0_12 = arith.constant 0 : index
      %c0_13 = arith.constant 0 : index
      %23 = vector.load %arg8[%c1_11, %c0_12, %c0_13] : memref<2x256x1xf32, #tpu.memory_space<vmem>>, vector<1x256x1xf32>
      %24 = vector.shape_cast %23 : vector<1x256x1xf32> to vector<256x1xf32>
      %25 = tpu.reciprocal %24 {approx = true} : vector<256x1xf32> -> vector<256x1xf32>
      %26 = vector.broadcast %25 : vector<256x1xf32> to vector<256x128xf32>
      %27 = arith.mulf %22, %26 : vector<256x128xf32>
      %28 = vector.extract_strided_slice %27 {offsets = [0, 0], sizes = [128, 128], strides = [1, 1]} : vector<256x128xf32> to vector<128x128xf32>
      %29 = vector.extract_strided_slice %27 {offsets = [128, 0], sizes = [128, 128], strides = [1, 1]} : vector<256x128xf32> to vector<128x128xf32>
      %30 = tpu.concatenate %19, %20, %28, %29 in 1 : vector<128x128xf32>, vector<128x128xf32>, vector<128x128xf32>, vector<128x128xf32> -> vector<128x512xf32>
      %31 = arith.truncf %30 : vector<128x512xf32> to vector<128x512xbf16>
      %c0_14 = arith.constant 0 : index
      %c0_15 = arith.constant 0 : index
      %32 = vector.load %arg5[%c0_14, %c0_15] : memref<512x512xbf16, #tpu.memory_space<vmem>>, vector<512x512xbf16>
      %cst = arith.constant dense<0.000000e+00> : vector<128x512xf32>
      %33 = tpu.matmul %31, %32, %cst {dimension_numbers = #tpu.dot_dimension_numbers<[1], [0], [0], [1], [0, 0, 1, 1], [], []>} : vector<128x512xbf16>, vector<512x512xbf16>, vector<128x512xf32> -> vector<128x512xf32>
      %34 = arith.truncf %33 : vector<128x512xf32> to vector<128x512xbf16>
      %c0_16 = arith.constant 0 : index
      %c0_17 = arith.constant 0 : index
      %35 = vector.load %arg6[%c0_16, %c0_17] : memref<128x512xbf16, #tpu.memory_space<vmem>>, vector<128x512xbf16>
      tpu.vector_store %arg6[%c0_16, %c0_17], %34 {strides = array<i32>} : memref<128x512xbf16, #tpu.memory_space<vmem>>, vector<128x512xbf16>,
    } else {
    }
    return
  }
  func.func @transform_0(%arg0: i32, %arg1: i32) -> (i32, i32) {
    %c0_i32 = arith.constant 0 : i32
    %c0_i32_0 = arith.constant 0 : i32
    return %arg0, %c0_i32 : i32, i32
  }
  func.func @transform_1(%arg0: i32, %arg1: i32) -> (i32, i32) {
    %c0_i32 = arith.constant 0 : i32
    %c0_i32_0 = arith.constant 0 : i32
    return %arg1, %c0_i32 : i32, i32
  }
  func.func @transform_2(%arg0: i32, %arg1: i32) -> (i32, i32) {
    %c0_i32 = arith.constant 0 : i32
    %c0_i32_0 = arith.constant 0 : i32
    return %arg1, %c0_i32 : i32, i32
  }
  func.func @transform_3(%arg0: i32, %arg1: i32) -> (i32, i32) {
    %c0_i32 = arith.constant 0 : i32
    %c0_i32_0 = arith.constant 0 : i32
    %c0_i32_1 = arith.constant 0 : i32
    return %c0_i32, %c0_i32_0 : i32, i32
  }
  func.func @transform_4(%arg0: i32, %arg1: i32) -> (i32, i32) {
    %c0_i32 = arith.constant 0 : i32
    %c0_i32_0 = arith.constant 0 : i32
    return %arg0, %c0_i32 : i32, i32
  }
}

module attributes {stable_mosaic.version = 11 : i64} {
  func.func @_qkv_rope_kernel(%arg0: i32, %arg1: memref<128x512xbf16, #tpu.memory_space<vmem>>, %arg2: memref<512x1024xbf16, #tpu.memory_space<vmem>>, %arg3: memref<128x128xf32, #tpu.memory_space<vmem>>, %arg4: memref<128x128xf32, #tpu.memory_space<vmem>>, %arg5: memref<128x512xbf16, #tpu.memory_space<vmem>>, %arg6: memref<128x256xbf16, #tpu.memory_space<vmem>>, %arg7: memref<128x256xbf16, #tpu.memory_space<vmem>>) attributes {dimension_semantics = [#tpu.dimension_semantics<parallel>], iteration_bounds = array<i64: 2>, scalar_prefetch = 0 : i64, scratch_operands = 0 : i64, tpu.core_type = #tpu.core_type<tc>, window_params = [{transform_indices = @transform_0, window_bounds = array<i64: 128, 512>}, {pipeline_mode = #tpu.pipeline_mode<synchronous>, transform_indices = @transform_1, window_bounds = array<i64: 512, 1024>}, {transform_indices = @transform_2, window_bounds = array<i64: 128, 128>}, {transform_indices = @transform_3, window_bounds = array<i64: 128, 128>}, {transform_indices = @transform_4, window_bounds = array<i64: 128, 512>}, {transform_indices = @transform_5, window_bounds = array<i64: 128, 256>}, {transform_indices = @transform_6, window_bounds = array<i64: 128, 256>}]} {
    %c0 = arith.constant 0 : index
    %c0_0 = arith.constant 0 : index
    %0 = vector.load %arg1[%c0, %c0_0] : memref<128x512xbf16, #tpu.memory_space<vmem>>, vector<128x512xbf16>
    %c0_1 = arith.constant 0 : index
    %c0_2 = arith.constant 0 : index
    %1 = vector.load %arg2[%c0_1, %c0_2] : memref<512x1024xbf16, #tpu.memory_space<vmem>>, vector<512x1024xbf16>
    %cst = arith.constant dense<0.000000e+00> : vector<128x1024xf32>
    %2 = tpu.matmul %0, %1, %cst {dimension_numbers = #tpu.dot_dimension_numbers<[1], [0], [0], [1], [0, 0, 1, 1], [], []>} : vector<128x512xbf16>, vector<512x1024xbf16>, vector<128x1024xf32> -> vector<128x1024xf32>
    %c0_3 = arith.constant 0 : index
    %c0_4 = arith.constant 0 : index
    %3 = vector.load %arg3[%c0_3, %c0_4] : memref<128x128xf32, #tpu.memory_space<vmem>>, vector<128x128xf32>
    %c0_5 = arith.constant 0 : index
    %c0_6 = arith.constant 0 : index
    %4 = vector.load %arg4[%c0_5, %c0_6] : memref<128x128xf32, #tpu.memory_space<vmem>>, vector<128x128xf32>
    %5 = vector.extract_strided_slice %2 {offsets = [0, 0], sizes = [128, 128], strides = [1, 1]} : vector<128x1024xf32> to vector<128x128xf32>
    %6 = arith.mulf %5, %3 : vector<128x128xf32>
    %c64_i32 = arith.constant 64 : i32
    %7 = tpu.dynamic_rotate %5 by %c64_i32 dim 1 : vector<128x128xf32>, i32 -> vector<128x128xf32>
    %8 = arith.mulf %7, %4 : vector<128x128xf32>
    %9 = arith.addf %6, %8 : vector<128x128xf32>
    %10 = vector.extract_strided_slice %2 {offsets = [0, 128], sizes = [128, 128], strides = [1, 1]} : vector<128x1024xf32> to vector<128x128xf32>
    %11 = arith.mulf %10, %3 : vector<128x128xf32>
    %c64_i32_7 = arith.constant 64 : i32
    %12 = tpu.dynamic_rotate %10 by %c64_i32_7 dim 1 : vector<128x128xf32>, i32 -> vector<128x128xf32>
    %13 = arith.mulf %12, %4 : vector<128x128xf32>
    %14 = arith.addf %11, %13 : vector<128x128xf32>
    %15 = vector.extract_strided_slice %2 {offsets = [0, 256], sizes = [128, 128], strides = [1, 1]} : vector<128x1024xf32> to vector<128x128xf32>
    %16 = arith.mulf %15, %3 : vector<128x128xf32>
    %c64_i32_8 = arith.constant 64 : i32
    %17 = tpu.dynamic_rotate %15 by %c64_i32_8 dim 1 : vector<128x128xf32>, i32 -> vector<128x128xf32>
    %18 = arith.mulf %17, %4 : vector<128x128xf32>
    %19 = arith.addf %16, %18 : vector<128x128xf32>
    %20 = vector.extract_strided_slice %2 {offsets = [0, 384], sizes = [128, 128], strides = [1, 1]} : vector<128x1024xf32> to vector<128x128xf32>
    %21 = arith.mulf %20, %3 : vector<128x128xf32>
    %c64_i32_9 = arith.constant 64 : i32
    %22 = tpu.dynamic_rotate %20 by %c64_i32_9 dim 1 : vector<128x128xf32>, i32 -> vector<128x128xf32>
    %23 = arith.mulf %22, %4 : vector<128x128xf32>
    %24 = arith.addf %21, %23 : vector<128x128xf32>
    %25 = tpu.concatenate %9, %14, %19, %24 in 1 : vector<128x128xf32>, vector<128x128xf32>, vector<128x128xf32>, vector<128x128xf32> -> vector<128x512xf32>
    %cst_10 = arith.constant 0.0883883461 : f32
    %26 = vector.broadcast %cst_10 : f32 to vector<128x512xf32>
    %27 = arith.mulf %25, %26 : vector<128x512xf32>
    %28 = arith.truncf %27 : vector<128x512xf32> to vector<128x512xbf16>
    %c0_11 = arith.constant 0 : index
    %c0_12 = arith.constant 0 : index
    %29 = vector.load %arg5[%c0_11, %c0_12] : memref<128x512xbf16, #tpu.memory_space<vmem>>, vector<128x512xbf16>
    tpu.vector_store %arg5[%c0_11, %c0_12], %28 {strides = array<i32>} : memref<128x512xbf16, #tpu.memory_space<vmem>>, vector<128x512xbf16>,
    %30 = vector.extract_strided_slice %2 {offsets = [0, 512], sizes = [128, 128], strides = [1, 1]} : vector<128x1024xf32> to vector<128x128xf32>
    %31 = arith.mulf %30, %3 : vector<128x128xf32>
    %c64_i32_13 = arith.constant 64 : i32
    %32 = tpu.dynamic_rotate %30 by %c64_i32_13 dim 1 : vector<128x128xf32>, i32 -> vector<128x128xf32>
    %33 = arith.mulf %32, %4 : vector<128x128xf32>
    %34 = arith.addf %31, %33 : vector<128x128xf32>
    %35 = vector.extract_strided_slice %2 {offsets = [0, 640], sizes = [128, 128], strides = [1, 1]} : vector<128x1024xf32> to vector<128x128xf32>
    %36 = arith.mulf %35, %3 : vector<128x128xf32>
    %c64_i32_14 = arith.constant 64 : i32
    %37 = tpu.dynamic_rotate %35 by %c64_i32_14 dim 1 : vector<128x128xf32>, i32 -> vector<128x128xf32>
    %38 = arith.mulf %37, %4 : vector<128x128xf32>
    %39 = arith.addf %36, %38 : vector<128x128xf32>
    %40 = tpu.concatenate %34, %39 in 1 : vector<128x128xf32>, vector<128x128xf32> -> vector<128x256xf32>
    %41 = arith.truncf %40 : vector<128x256xf32> to vector<128x256xbf16>
    %c0_15 = arith.constant 0 : index
    %c0_16 = arith.constant 0 : index
    %42 = vector.load %arg6[%c0_15, %c0_16] : memref<128x256xbf16, #tpu.memory_space<vmem>>, vector<128x256xbf16>
    tpu.vector_store %arg6[%c0_15, %c0_16], %41 {strides = array<i32>} : memref<128x256xbf16, #tpu.memory_space<vmem>>, vector<128x256xbf16>,
    %43 = vector.extract_strided_slice %2 {offsets = [0, 768], sizes = [128, 256], strides = [1, 1]} : vector<128x1024xf32> to vector<128x256xf32>
    %44 = arith.truncf %43 : vector<128x256xf32> to vector<128x256xbf16>
    %c0_17 = arith.constant 0 : index
    %c0_18 = arith.constant 0 : index
    %45 = vector.load %arg7[%c0_17, %c0_18] : memref<128x256xbf16, #tpu.memory_space<vmem>>, vector<128x256xbf16>
    tpu.vector_store %arg7[%c0_17, %c0_18], %44 {strides = array<i32>} : memref<128x256xbf16, #tpu.memory_space<vmem>>, vector<128x256xbf16>,
    return
  }
  func.func @transform_0(%arg0: i32) -> (i32, i32) {
    %c0_i32 = arith.constant 0 : i32
    %c0_i32_0 = arith.constant 0 : i32
    return %arg0, %c0_i32 : i32, i32
  }
  func.func @transform_1(%arg0: i32) -> (i32, i32) {
    %c0_i32 = arith.constant 0 : i32
    %c0_i32_0 = arith.constant 0 : i32
    %c0_i32_1 = arith.constant 0 : i32
    return %c0_i32, %c0_i32_0 : i32, i32
  }
  func.func @transform_2(%arg0: i32) -> (i32, i32) {
    %c0_i32 = arith.constant 0 : i32
    %c0_i32_0 = arith.constant 0 : i32
    return %arg0, %c0_i32 : i32, i32
  }
  func.func @transform_3(%arg0: i32) -> (i32, i32) {
    %c0_i32 = arith.constant 0 : i32
    %c0_i32_0 = arith.constant 0 : i32
    return %arg0, %c0_i32 : i32, i32
  }
  func.func @transform_4(%arg0: i32) -> (i32, i32) {
    %c0_i32 = arith.constant 0 : i32
    %c0_i32_0 = arith.constant 0 : i32
    return %arg0, %c0_i32 : i32, i32
  }
  func.func @transform_5(%arg0: i32) -> (i32, i32) {
    %c0_i32 = arith.constant 0 : i32
    %c0_i32_0 = arith.constant 0 : i32
    return %arg0, %c0_i32 : i32, i32
  }
  func.func @transform_6(%arg0: i32) -> (i32, i32) {
    %c0_i32 = arith.constant 0 : i32
    %c0_i32_0 = arith.constant 0 : i32
    return %arg0, %c0_i32 : i32, i32
  }
}

</mosaic_0001>

<bundles_post_ra>
// kernel: flash_llama_attention.2
= control target key start
LH: loop header
LB: loop body
LE: loop exit
PB: predicated region body
PF: predicated region fallthrough
CT: control target
= control target key end

     0   :  { %12 = vsyncpa [#allocation3], 0  ;;  %s7099_s0 = inlined_call_operand.hbm [shape: bf16[256,512], index: 0, kind: input, shape index: {}]   ;;  %s7100_s1 = inlined_call_operand.vmem [shape: bf16[512,1024], index: 1, kind: input, shape index: {}]   ;;  %s7101_s2 = inlined_call_operand.hbm [shape: f32[256,128], index: 2, kind: input, shape index: {}]   ;;  %s7102_s3 = inlined_call_operand.hbm [shape: f32[256,128], index: 3, kind: input, shape index: {}]   ;;  %s7103_s4 = inlined_call_operand.vmem [shape: bf16[256,512], index: 4, kind: output, shape index: {0}]   ;;  %s7104_s5 = inlined_call_operand.vmem [shape: bf16[256,256], index: 5, kind: output, shape index: {1}]   ;;  %s7105_s6 = inlined_call_operand.vmem [shape: bf16[256,256], index: 6, kind: output, shape index: {2}]  }
   0x1   :  { %14 = vsyncpa [#allocation3 + $0x1], 0 }
   0x2   :  { %15 = vsyncpa [#allocation5], 0 }
   0x3   :  { %17 = vsyncpa [#allocation5 + $0x1], 0  ;;  %s5089_s21 = smov 0   ;;  %s5091_s22 = smov 0  }
   0x4   :  { %s5093_s23 = smov 0   ;;  %s5095_s24 = smov 0  }
   0x5 LB: > { %s5108_s25 = sadd.s32 4294967295, %s5044_s24   ;;  %s5111_s26 = sadd.s32 1, %s5044_s24   ;;  %s5044_s24 = sphi %s5095_s24, %s7239_s24   ;;  %s5040_s23 = sphi %s5093_s23, %s7238_s23   ;;  %s5036_s22 = sphi %s5091_s22, %s7237_s22   ;;  %s5032_s21 = sphi %s5089_s21, %s7236_s21  }
   0x6   : > { %s27_s27 = ssub.s32 %s5044_s24, %s5111_s26  ;;  %s30_s28 = sadd.s32 1, %s5040_s23 }
   0x7   : > { %p28_p0 = scmp.eq.s32.totalorder %s27_s27, 0  ;;  %p37_p1 = scmp.ne.s32.totalorder %s5040_s23, %s5036_s22 }
   0x8   : > { %p38_p2 = scmp.eq.s32.totalorder %s5044_s24, 0  ;;  %p43_p3 = scmp.ne.s32.totalorder %s5036_s22, %s5032_s21 }
   0x9   : > { %s5121_s29 = scalar_select %p28_p0, %s5040_s23, %s30_s28  }
   0xa   : > { %p39_p4 = por %p38_p2, %p37_p1  ;;  %p44_p5 = scmp.eq.s32.totalorder %s5108_s25, 0 }
   0xb   : > { %p4823_p6 = scmp.lt.s32.totalorder %s5044_s24, 2  ;;  %s5130_s7 = sand.u32 1, %s5040_s23  }
   0xc   : > { %p5125_p7 = por %p44_p5, %p43_p3  ;;  %s243_s9 = sand.u32 1, %s5044_s24  }
   0xd   : > { %p5132_p8 = pnand %p4823_p6, %p39_p4  ;;  %s4235_s10 = sshll.u32 %s5130_s7, 7 }
   0xe   : > { %s7150_s30 = scalar_select %p5125_p7, 1, 0 }
   0xf   : > { %s4610_s11 = sshll.u32 %s5044_s24, 11  ;;  %s247_s12 = scalar_lea.vmem [#allocation4], %s4235_s10 }
  0x10   : > { %s254_s13 = sshll.u32 %s247_s12, 4  ;;  %s5146_s16 = scalar_lea.hbm %s7101_s2, %s4610_s11  ;;  %s5148_s13 = int_to_ptr.vmem [resolvable:$true] %s254_s13 }
  0x11   : > { %s5150_s17 = scalar_lea.sflag [#allocation5], %s243_s9  ;;  %s4916_s18 = scalar_lea.hbm %s5146_s16, 2048 }
  0x12   : > { %p4917_p9 = scmp.ne.s32.totalorder %s5146_s16, %s4916_s18  ;;  %p5156_p10 = pneg %p5132_p8 }
  0x13   : > { %s4921_s27 = scalar_lea.hbm %s7101_s2, 4096  ;;  %p4922_p13 = scmp.lt.u32.totalorder %s5146_s16, %s7101_s2 }
  0x14   : > { %p4919_p11 = pnand %p5156_p10, %p4917_p9  ;;  %p4923_p0 = scmp.lt.u32.totalorder %s4921_s27, %s4916_s18 }
  0x15   : > { %p4925_p2 = scmp.lt.u32.totalorder %s4916_s18, %s5146_s16 }
  0x16   : > { %p4920_p12 = pneg %p4919_p11  ;;  %p4924_p1 = por %p4923_p0, %p4922_p13 }
  0x18   : > { %p4926_p3 = por %p4925_p2, %p4924_p1 }
  0x1a   : > { %p4927_p4 = pnand %p4926_p3, %p4920_p12 }
  0x1c   : > { %4930 = shalt.err (!%p4927_p4)
}
  0x1d   : > { %s4931_s9 = scalar_lea.vmem %s5148_s13, 2048  ;;  %s5046_s14 = smov [#allocation4]  }
  0x1e   : > { %p4932_p5 = scmp.ne.s32.totalorder %s5148_s13, %s4931_s9  ;;  %s4936_s15 = sshll.u32 %s5046_s14, 4  ;;  %s4937_s15 = int_to_ptr.vmem [resolvable:$false] %s4936_s15 }
  0x1f   : > { %s4938_s20 = scalar_lea.vmem %s4937_s15, 4096  ;;  %p4939_p11 = scmp.lt.s32.totalorder %s5148_s13, %s4937_s15 }
  0x20   : > { %p4934_p6 = pnand %p4932_p5, %p5156_p10  ;;  %p4940_p7 = scmp.lt.s32.totalorder %s4938_s20, %s4931_s9 }
  0x22   : > { %p4935_p9 = pneg %p4934_p6  ;;  %p4941_p13 = por %p4940_p7, %p4939_p11 }
  0x24   : > { %p4942_p0 = pnand %p4941_p13, %p4935_p9 }
  0x26   : > { %4945 = shalt.err (!%p4942_p0)
}
  0x27   : > { %s7107_s18 = smov 128   ;;  %s7108_s21 = smov 8  }
  0x28   : > { %4819 = dma.hbm_to_vmem [thread:$0]  (!%p5132_p8), %s5146_s16, 2048, %s5148_s13, %s5150_s17, %s7107_s18, %s7107_s18, %s7108_s21  }
  0x29   : > { %s5188_s12 = scalar_lea.hbm %s7102_s3, %s4610_s11  ;;  %s268_s9 = scalar_lea.vmem [#allocation6], %s4235_s10 }
  0x2a   : > { %s275_s14 = sshll.u32 %s268_s9, 4  ;;  %p4241_p7 = scmp.ge.s32.totalorder %s5044_s24, 1  ;;  %s5193_s14 = int_to_ptr.vmem [resolvable:$true] %s275_s14 }
  0x2b   : > { %p283_p12 = scmp.lt.s32.totalorder %s5044_s24, 3  ;;  %s4231_s15 = sshll.u32 %s5130_s7, 8 }
  0x2c   : > { %s4609_s13 = sshll.u32 %s5044_s24, 12  ;;  %s225_s16 = scalar_lea.vmem [#allocation2], %s4231_s15 }
  0x2d   : > { %p5197_p1 = pnand %p4241_p7, %p283_p12  ;;  %s233_s18 = sshll.u32 %s225_s16, 4  ;;  %s5207_s18 = int_to_ptr.vmem [resolvable:$true] %s233_s18 }
  0x2e   : > { %s5205_s11 = scalar_lea.hbm %s7099_s0, %s4609_s13  ;;  %s222_s10 = scalar_lea.sflag [#allocation3], %s5130_s7 }
  0x2f   : > { %s7153_s20 = scalar_select %p5197_p1, 1, 0 }
  0x30   : > { %s4946_s28 = scalar_lea.hbm %s5205_s11, 4096  ;;  %s4951_s15 = scalar_lea.hbm %s7099_s0, 8192 }
  0x31   : > { %p4947_p2 = scmp.ne.s32.totalorder %s5205_s11, %s4946_s28  ;;  %p4952_p5 = scmp.lt.u32.totalorder %s5205_s11, %s7099_s0 }
  0x32   : > { %p4953_p6 = scmp.lt.u32.totalorder %s4951_s15, %s4946_s28  ;;  %p4955_p11 = scmp.lt.u32.totalorder %s4946_s28, %s5205_s11 }
  0x33   : > { %p4949_p3 = pnand %p4947_p2, %p5156_p10 }
  0x34   : > { %p4954_p9 = por %p4953_p6, %p4952_p5 }
  0x35   : > { %p4950_p4 = pneg %p4949_p3 }
  0x36   : > { %p4956_p13 = por %p4955_p11, %p4954_p9 }
  0x38   : > { %p4957_p0 = pnand %p4956_p13, %p4950_p4 }
  0x3a   : > { %4960 = shalt.err (!%p4957_p0)
}
  0x3b   : > { %s4961_s13 = scalar_lea.vmem %s5207_s18, 4096  ;;  %s5049_s27 = smov [#allocation2]  }
  0x3c   : > { %p4962_p7 = scmp.ne.s32.totalorder %s5207_s18, %s4961_s13  ;;  %s4966_s24 = sshll.u32 %s5049_s27, 4  ;;  %s4967_s24 = int_to_ptr.vmem [resolvable:$false] %s4966_s24 }
  0x3d   : > { %s4968_s9 = scalar_lea.vmem %s4967_s24, 8192  ;;  %p4969_p3 = scmp.lt.s32.totalorder %s5207_s18, %s4967_s24 }
  0x3e   : > { %p4964_p12 = pnand %p4962_p7, %p5156_p10  ;;  %p4970_p1 = scmp.lt.s32.totalorder %s4968_s9, %s4961_s13 }
  0x40   : > { %p4965_p2 = pneg %p4964_p12  ;;  %p4971_p5 = por %p4970_p1, %p4969_p3 }
  0x42   : > { %p4972_p6 = pnand %p4971_p5, %p4965_p2 }
  0x44   : > { %4975 = shalt.err (!%p4972_p6)
}
  0x45   : > { %s5050_s28 = smov 256   ;;  %s5051_s15 = smov 16  }
  0x46   : > { %4816 = dma.hbm_to_vmem [thread:$0]  (!%p5132_p8), %s5205_s11, 4096, %s5207_s18, %s222_s10, %s5050_s28, %s5050_s28, %s5051_s15  }
  0x47   : > { %s4976_s16 = scalar_lea.hbm %s5188_s12, 2048  ;;  %s4981_s27 = scalar_lea.hbm %s7102_s3, 4096 }
  0x48   : > { %p4977_p4 = scmp.ne.s32.totalorder %s5188_s12, %s4976_s16  ;;  %p4982_p11 = scmp.lt.u32.totalorder %s5188_s12, %s7102_s3 }
  0x49   : > { %p4983_p13 = scmp.lt.u32.totalorder %s4981_s27, %s4976_s16  ;;  %p4985_p7 = scmp.lt.u32.totalorder %s4976_s16, %s5188_s12 }
  0x4a   : > { %p4979_p1 = pnand %p4977_p4, %p5156_p10 }
  0x4b   : > { %p4984_p0 = por %p4983_p13, %p4982_p11 }
  0x4c   : > { %p4980_p9 = pneg %p4979_p1 }
  0x4d   : > { %p4986_p12 = por %p4985_p7, %p4984_p0 }
  0x4f   : > { %p4987_p2 = pnand %p4986_p12, %p4980_p9 }
  0x51   : > { %4990 = shalt.err (!%p4987_p2)
}
  0x52   : > { %s4991_s7 = scalar_lea.vmem %s5193_s14, 2048  ;;  %s5052_s18 = smov [#allocation6]  }
  0x53   : > { %p4992_p3 = scmp.ne.s32.totalorder %s5193_s14, %s4991_s7  ;;  %s4996_s11 = sshll.u32 %s5052_s18, 4  ;;  %s4997_s11 = int_to_ptr.vmem [resolvable:$false] %s4996_s11 }
  0x54   : > { %s4998_s10 = scalar_lea.vmem %s4997_s11, 4096  ;;  %p4999_p4 = scmp.lt.s32.totalorder %s5193_s14, %s4997_s11 }
  0x55   : > { %p4994_p5 = pnand %p4992_p3, %p5156_p10  ;;  %p5000_p1 = scmp.lt.s32.totalorder %s4998_s10, %s4991_s7 }
  0x57   : > { %p4995_p6 = pneg %p4994_p5  ;;  %p5001_p11 = por %p5000_p1, %p4999_p4 }
  0x59   : > { %p5002_p13 = pnand %p5001_p11, %p4995_p6 }
  0x5b   : > { %5005 = shalt.err (!%p5002_p13)
}
  0x5c   : > { %s7154_s28 = smov 8   ;;  %s7155_s15 = smov 128  }
  0x5d   : > { %4822 = dma.hbm_to_vmem [thread:$0]  (!%p5132_p8), %s5188_s12, 2048, %s5193_s14, %s5150_s17, %s7155_s15, %s7155_s15, %s7154_s28  }
  0x5e   : > { %p7156_p10 = scmp.ne.s32.totalorder %s7153_s20, 0 }
  0x60   : > { %287 = sbr.rel (%p7156_p10) target bundleno = 766 (0x2fe), region = 36 }
  0x67   : > { %s5261_s19 = sand.u32 1, %s5036_s22   ;;  %p7157_p9 = scmp.ne.s32.totalorder %s7150_s30, 0 }
  0x68   : > { %s4242_s16 = sshll.u32 %s5261_s19, 8  ;;  %s290_s21 = scalar_lea.sflag [#allocation3], %s5261_s19 }
  0x69   : > { %s5265_s13 = scalar_lea.vmem [#allocation2], %s4242_s16 }
  0x6a   : > { %5023 = dma.done.wait (%p7157_p9), %s290_s21, 4096  }
  0x6b   : > { %5025 = vsyncadd (%p7157_p9), %s290_s21, 4294963200  ;;  %s298_s8 = sand.u32 1, %s5108_s25   ;;  %s4243_s17 = sshll.u32 %s5261_s19, 7 }
  0x6c   : > { %s299_s12 = scalar_lea.sflag [#allocation5], %s298_s8  ;;  %s5275_s14 = scalar_lea.vmem [#allocation4], %s4243_s17 }
  0x6d   : > { %5027 = dma.done.wait (%p7157_p9), %s299_s12, 4096  }
  0x6e   : > { %5029 = vsyncadd (%p7157_p9), %s299_s12, 4294963200  ;;  %v419_v0 = vld [vmem:[%s7100_s1] sm:$0xff]  ;;  %v420_v2 = vld [vmem:[%s7100_s1 + $0x8] sm:$0xff]  ;;  %s5053_s28 = smov 64   ;;  %s4245_s15 = sshll.u32 %s5108_s25, 4 }
  0x6f   : > { %v423_v1 = vld [vmem:[%s7100_s1 + $0x20] sm:$0xff]  ;;  %v424_v4 = vld [vmem:[%s7100_s1 + $0x28] sm:$0xff]  ;;  %s6513_s16 = scalar_lea.vmem [#allocation6], %s4243_s17  ;;  %p367_p8 = scmp.lt.s32.totalorder %s4245_s15, 31 }
  0x70   : > { %v4287_v3 = vcombine.high %v419_v0, %v423_v1  ;;  %v4286_v5 = vcombine.low %v419_v0, %v423_v1  ;;  %v427_v6 = vld [vmem:[%s7100_s1 + $0x40] sm:$0xff]  ;;  %v4289_v8 = vcombine.high %v420_v2, %v424_v4  ;;  %v4288_v9 = vcombine.low %v420_v2, %v424_v4  ;;  %v428_v11 = vld [vmem:[%s7100_s1 + $0x48] sm:$0xff] }
  0x71   : > { %v431_v7 = vld [vmem:[%s7100_s1 + $0x60] sm:$0xff]  ;;  %v432_v12 = vld [vmem:[%s7100_s1 + $0x68] sm:$0xff]  ;;  %s7241_s15 = smov (!%p367_p8, %s4245_s15), 31 }
  0x72   : > { %v4295_v10 = vcombine.high %v427_v6, %v431_v7  ;;  %v435_v13 = vld [vmem:[%s7100_s1 + $0x80] sm:$0xff]  ;;  %2115 = vmatprep.subr.bf16.mxu0 %v4287_v3  ;;  %v4297_v14 = vcombine.high %v428_v11, %v432_v12  ;;  %v436_v16 = vld [vmem:[%s7100_s1 + $0x88] sm:$0xff]  ;;  %2341 = vmatprep.subr.bf16.mxu1 %v4289_v8  ;;  %v4294_v18 = vcombine.low %v427_v6, %v431_v7  ;;  %s4612_s25 = sshll.u32 %s7241_s15, 4  ;;  %s4613_s8 = sshll.u32 %s7241_s15, 3 }
  0x73   : > { %v439_v15 = vld [vmem:[%s7100_s1 + $0xa0] sm:$0xff]  ;;  %v440_v17 = vld [vmem:[%s7100_s1 + $0xa8] sm:$0xff]  ;;  %2116 = vmatpush1.bf16.msra.mxu0 %v4286_v5  ;;  %2342 = vmatpush1.bf16.msra.mxu1 %v4288_v9  ;;  %v4296_v19 = vcombine.low %v428_v11, %v432_v12  ;;  %s6547_s21 = scalar_lea.vmem %s7103_s4, %s4612_s25  ;;  %s6571_s27 = scalar_lea.vmem %s7105_s6, %s4613_s8 }
  0x74   : > { %2117 = vmatprep.subr.bf16.mxu0 %v4295_v10  ;;  %v4303_v20 = vcombine.high %v435_v13, %v439_v15  ;;  %2343 = vmatprep.subr.bf16.mxu1 %v4297_v14  ;;  %v4305_v21 = vcombine.high %v436_v16, %v440_v17  ;;  %v443_v22 = vld [vmem:[%s7100_s1 + $0xc0] sm:$0xff]  ;;  %v444_v24 = vld [vmem:[%s7100_s1 + $0xc8] sm:$0xff]  ;;  %v4302_v26 = vcombine.low %v435_v13, %v439_v15  ;;  %s6986_s7 = scalar_lea.vmem %s7104_s5, %s4613_s8 }
  0x75   : > { %v447_v23 = vld [vmem:[%s7100_s1 + $0xe0] sm:$0xff]  ;;  %v448_v25 = vld [vmem:[%s7100_s1 + $0xe8] sm:$0xff]  ;;  %v4304_v27 = vcombine.low %v436_v16, %v440_v17 }
  0x76   : > { %v4311_v28 = vcombine.high %v443_v22, %v447_v23  ;;  %v4313_v29 = vcombine.high %v444_v24, %v448_v25  ;;  %v451_v30 = vld [vmem:[%s7100_s1 + $0x100] sm:$0xff]  ;;  %v452_v32 = vld [vmem:[%s7100_s1 + $0x108] sm:$0xff]  ;;  %v4310_v34 = vcombine.low %v443_v22, %v447_v23  ;;  %v4312_v35 = vcombine.low %v444_v24, %v448_v25 }
  0x77   : > { %2118 = vmatpush1.bf16.msra.mxu0 %v4294_v18  ;;  %2344 = vmatpush1.bf16.msra.mxu1 %v4296_v19  ;;  %v455_v31 = vld [vmem:[%s7100_s1 + $0x120] sm:$0xff]  ;;  %v456_v33 = vld [vmem:[%s7100_s1 + $0x128] sm:$0xff] }
  0x78   : > { %2119 = vmatprep.subr.bf16.mxu0 %v4303_v20  ;;  %2345 = vmatprep.subr.bf16.mxu1 %v4305_v21  ;;  %v4319_v36 = vcombine.high %v451_v30, %v455_v31  ;;  %v4321_v37 = vcombine.high %v452_v32, %v456_v33  ;;  %v459_v38 = vld [vmem:[%s7100_s1 + $0x140] sm:$0xff]  ;;  %v460_v40 = vld [vmem:[%s7100_s1 + $0x148] sm:$0xff]  ;;  %v4318_v42 = vcombine.low %v451_v30, %v455_v31 }
  0x79   : > { %v463_v39 = vld [vmem:[%s7100_s1 + $0x160] sm:$0xff]  ;;  %v464_v41 = vld [vmem:[%s7100_s1 + $0x168] sm:$0xff]  ;;  %v4320_v43 = vcombine.low %v452_v32, %v456_v33 }
  0x7a   : > { %v4327_v44 = vcombine.high %v459_v38, %v463_v39  ;;  %v4329_v45 = vcombine.high %v460_v40, %v464_v41  ;;  %v467_v46 = vld [vmem:[%s7100_s1 + $0x180] sm:$0xff]  ;;  %v468_v48 = vld [vmem:[%s7100_s1 + $0x188] sm:$0xff]  ;;  %v4326_v50 = vcombine.low %v459_v38, %v463_v39  ;;  %v4328_v51 = vcombine.low %v460_v40, %v464_v41 }
  0x7b   : > { %2120 = vmatpush1.bf16.msra.mxu0 %v4302_v26  ;;  %2346 = vmatpush1.bf16.msra.mxu1 %v4304_v27  ;;  %v471_v47 = vld [vmem:[%s7100_s1 + $0x1a0] sm:$0xff]  ;;  %v472_v49 = vld [vmem:[%s7100_s1 + $0x1a8] sm:$0xff] }
  0x7c   : > { %2121 = vmatprep.subr.bf16.mxu0 %v4311_v28  ;;  %2347 = vmatprep.subr.bf16.mxu1 %v4313_v29  ;;  %v4335_v52 = vcombine.high %v467_v46, %v471_v47  ;;  %v4337_v53 = vcombine.high %v468_v48, %v472_v49  ;;  %v475_v54 = vld [vmem:[%s7100_s1 + $0x1c0] sm:$0xff]  ;;  %v476_v57 = vld [vmem:[%s7100_s1 + $0x1c8] sm:$0xff]  ;;  %v4334_v59 = vcombine.low %v467_v46, %v471_v47 }
  0x7d   : > { %v479_v55 = vld [vmem:[%s7100_s1 + $0x1e0] sm:$0xff]  ;;  %v480_v58 = vld [vmem:[%s7100_s1 + $0x1e8] sm:$0xff]  ;;  %v4336_v60 = vcombine.low %v468_v48, %v472_v49 }
  0x7e   : > { %v4861_v56 = vld [vmem:[%s5265_s13 + $0x4] ss:$16 sps:$4 sm:$0xff]   ;;  %v4343_v61 = vcombine.high %v475_v54, %v479_v55  ;;  %v4345_v62 = vcombine.high %v476_v57, %v480_v58  ;;  %v484_v1 = vld [vmem:[%s7100_s1 + $0x208] sm:$0xff]  ;;  %v4342_v3 = vcombine.low %v475_v54, %v479_v55  ;;  %v4344_v4 = vcombine.low %v476_v57, %v480_v58 }
  0x7f   : > { %2122 = vmatpush1.bf16.msra.mxu0 %v4310_v34  ;;  %2348 = vmatpush1.bf16.msra.mxu1 %v4312_v35  ;;  %v483_v63 = vld [vmem:[%s7100_s1 + $0x200] sm:$0xff]  ;;  %v488_v2 = vld [vmem:[%s7100_s1 + $0x228] sm:$0xff] }
  0x80   : > { %2123 = vmatprep.subr.bf16.mxu0 %v4319_v36  ;;  %2349 = vmatprep.subr.bf16.mxu1 %v4321_v37  ;;  %v487_v0 = vld [vmem:[%s7100_s1 + $0x220] sm:$0xff]  ;;  %v4353_v6 = vcombine.high %v484_v1, %v488_v2  ;;  %v492_v9 = vld [vmem:[%s7100_s1 + $0x248] sm:$0xff]  ;;  %v4352_v12 = vcombine.low %v484_v1, %v488_v2 }
  0x81   : > { %2147 = vmatprep.mubr.bf16.mxu0 %v4861_v56  ;;  %2373 = vmatprep.mubr.bf16.mxu1 %v4861_v56  ;;  %v4351_v5 = vcombine.high %v483_v63, %v487_v0  ;;  %v491_v7 = vld [vmem:[%s7100_s1 + $0x240] sm:$0xff]  ;;  %v496_v10 = vld [vmem:[%s7100_s1 + $0x268] sm:$0xff]  ;;  %v4350_v11 = vcombine.low %v483_v63, %v487_v0 }
  0x82   : > { %v495_v8 = vld [vmem:[%s7100_s1 + $0x260] sm:$0xff]  ;;  %v4361_v14 = vcombine.high %v492_v9, %v496_v10  ;;  %v500_v17 = vld [vmem:[%s7100_s1 + $0x288] sm:$0xff]  ;;  %v4360_v20 = vcombine.low %v492_v9, %v496_v10 }
  0x83   : > { %2124 = vmatpush1.bf16.msra.mxu0 %v4318_v42  ;;  %2350 = vmatpush1.bf16.msra.mxu1 %v4320_v43  ;;  %v4359_v13 = vcombine.high %v491_v7, %v495_v8  ;;  %v499_v15 = vld [vmem:[%s7100_s1 + $0x280] sm:$0xff]  ;;  %v504_v18 = vld [vmem:[%s7100_s1 + $0x2a8] sm:$0xff]  ;;  %v4358_v19 = vcombine.low %v491_v7, %v495_v8 }
  0x84   : > { %2125 = vmatprep.subr.bf16.mxu0 %v4327_v44  ;;  %2351 = vmatprep.subr.bf16.mxu1 %v4329_v45  ;;  %v503_v16 = vld [vmem:[%s7100_s1 + $0x2a0] sm:$0xff]  ;;  %v4369_v22 = vcombine.high %v500_v17, %v504_v18  ;;  %v508_v25 = vld [vmem:[%s7100_s1 + $0x2c8] sm:$0xff]  ;;  %v4368_v28 = vcombine.low %v500_v17, %v504_v18 }
  0x85   : > { %v4367_v21 = vcombine.high %v499_v15, %v503_v16  ;;  %v507_v23 = vld [vmem:[%s7100_s1 + $0x2c0] sm:$0xff]  ;;  %v512_v26 = vld [vmem:[%s7100_s1 + $0x2e8] sm:$0xff]  ;;  %v4366_v27 = vcombine.low %v499_v15, %v503_v16 }
  0x86   : > { %v511_v24 = vld [vmem:[%s7100_s1 + $0x2e0] sm:$0xff]  ;;  %v4377_v30 = vcombine.high %v508_v25, %v512_v26  ;;  %v516_v33 = vld [vmem:[%s7100_s1 + $0x308] sm:$0xff]  ;;  %v4376_v36 = vcombine.low %v508_v25, %v512_v26 }
  0x87   : > { %2126 = vmatpush1.bf16.msra.mxu0 %v4326_v50  ;;  %2352 = vmatpush1.bf16.msra.mxu1 %v4328_v51  ;;  %v4375_v29 = vcombine.high %v507_v23, %v511_v24  ;;  %v515_v31 = vld [vmem:[%s7100_s1 + $0x300] sm:$0xff]  ;;  %v520_v34 = vld [vmem:[%s7100_s1 + $0x328] sm:$0xff]  ;;  %v4374_v35 = vcombine.low %v507_v23, %v511_v24 }
  0x88   : > { %2127 = vmatprep.subr.bf16.mxu0 %v4335_v52  ;;  %2353 = vmatprep.subr.bf16.mxu1 %v4337_v53  ;;  %v519_v32 = vld [vmem:[%s7100_s1 + $0x320] sm:$0xff]  ;;  %v4385_v38 = vcombine.high %v516_v33, %v520_v34  ;;  %v524_v41 = vld [vmem:[%s7100_s1 + $0x348] sm:$0xff]  ;;  %v4384_v44 = vcombine.low %v516_v33, %v520_v34 }
  0x89   : > { %v4383_v37 = vcombine.high %v515_v31, %v519_v32  ;;  %v523_v39 = vld [vmem:[%s7100_s1 + $0x340] sm:$0xff]  ;;  %v528_v42 = vld [vmem:[%s7100_s1 + $0x368] sm:$0xff]  ;;  %v4382_v43 = vcombine.low %v515_v31, %v519_v32 }
  0x8a   : > { %v527_v40 = vld [vmem:[%s7100_s1 + $0x360] sm:$0xff]  ;;  %v4393_v46 = vcombine.high %v524_v41, %v528_v42  ;;  %v532_v49 = vld [vmem:[%s7100_s1 + $0x388] sm:$0xff]  ;;  %v4392_v52 = vcombine.low %v524_v41, %v528_v42 }
  0x8b   : > { %2128 = vmatpush1.bf16.msra.mxu0 %v4334_v59  ;;  %2354 = vmatpush1.bf16.msra.mxu1 %v4336_v60  ;;  %v4391_v45 = vcombine.high %v523_v39, %v527_v40  ;;  %v531_v47 = vld [vmem:[%s7100_s1 + $0x380] sm:$0xff]  ;;  %v536_v50 = vld [vmem:[%s7100_s1 + $0x3a8] sm:$0xff]  ;;  %v4390_v51 = vcombine.low %v523_v39, %v527_v40 }
  0x8c   : > { %2129 = vmatprep.subr.bf16.mxu0 %v4343_v61  ;;  %2355 = vmatprep.subr.bf16.mxu1 %v4345_v62  ;;  %v535_v48 = vld [vmem:[%s7100_s1 + $0x3a0] sm:$0xff]  ;;  %v4401_v54 = vcombine.high %v532_v49, %v536_v50  ;;  %v540_v57 = vld [vmem:[%s7100_s1 + $0x3c8] sm:$0xff]  ;;  %v4400_v60 = vcombine.low %v532_v49, %v536_v50 }
  0x8d   : > { %v4399_v53 = vcombine.high %v531_v47, %v535_v48  ;;  %v539_v55 = vld [vmem:[%s7100_s1 + $0x3c0] sm:$0xff]  ;;  %v544_v58 = vld [vmem:[%s7100_s1 + $0x3e8] sm:$0xff]  ;;  %v4398_v59 = vcombine.low %v531_v47, %v535_v48 }
  0x8e   : > { %v543_v56 = vld [vmem:[%s7100_s1 + $0x3e0] sm:$0xff]  ;;  %v4409_v62 = vcombine.high %v540_v57, %v544_v58  ;;  %v548_v1 = vld [vmem:[%s7100_s1 + $0x408] sm:$0xff] }
  0x8f   : > { %2130 = vmatpush1.bf16.msra.mxu0 %v4342_v3  ;;  %2356 = vmatpush1.bf16.msra.mxu1 %v4344_v4  ;;  %v4407_v61 = vcombine.high %v539_v55, %v543_v56  ;;  %v547_v63 = vld [vmem:[%s7100_s1 + $0x400] sm:$0xff]  ;;  %v552_v2 = vld [vmem:[%s7100_s1 + $0x428] sm:$0xff]  ;;  %v4406_v3 = vcombine.low %v539_v55, %v543_v56  ;;  %v4408_v4 = vcombine.low %v540_v57, %v544_v58 }
  0x90   : > { %2131 = vmatprep.subr.bf16.mxu0 %v4351_v5  ;;  %2357 = vmatprep.subr.bf16.mxu1 %v4353_v6  ;;  %v551_v0 = vld [vmem:[%s7100_s1 + $0x420] sm:$0xff]  ;;  %v4417_v6 = vcombine.high %v548_v1, %v552_v2  ;;  %v556_v10 = vld [vmem:[%s7100_s1 + $0x448] sm:$0xff] }
  0x91   : > { %v4415_v5 = vcombine.high %v547_v63, %v551_v0  ;;  %v555_v7 = vld [vmem:[%s7100_s1 + $0x440] sm:$0xff]  ;;  %v592_v47 = vld [vmem:[%s7100_s1 + $0x568] sm:$0xff] }
  0x92   : > { %v559_v8 = vld [vmem:[%s7100_s1 + $0x460] sm:$0xff]  ;;  %v596_v55 = vld [vmem:[%s7100_s1 + $0x588] sm:$0xff] }
  0x93   : > { %2132 = vmatpush1.bf16.msra.mxu0 %v4350_v11  ;;  %2358 = vmatpush1.bf16.msra.mxu1 %v4352_v12  ;;  %v5493_v9 = vld [vmem:[%s5265_s13] ss:$16 sps:$4 sm:$0xff]   ;;  %v560_v11 = vld [vmem:[%s7100_s1 + $0x468] sm:$0xff]  ;;  %v4414_v12 = vcombine.low %v547_v63, %v551_v0  ;;  %v5502_v15 = vld [vmem:[%s5265_s13 + $0x24] ss:$16 sps:$4 sm:$0xff]  }
  0x94   : > { %2133 = vmatprep.subr.bf16.mxu0 %v4359_v13  ;;  %2359 = vmatprep.subr.bf16.mxu1 %v4361_v14  ;;  %v4416_v13 = vcombine.low %v548_v1, %v552_v2  ;;  %v4423_v14 = vcombine.high %v555_v7, %v559_v8  ;;  %v4425_v16 = vcombine.high %v556_v10, %v560_v11  ;;  %v563_v17 = vld [vmem:[%s7100_s1 + $0x480] sm:$0xff]  ;;  %v600_v56 = vld [vmem:[%s7100_s1 + $0x5a8] sm:$0xff] }
  0x95   : > { %v567_v18 = vld [vmem:[%s7100_s1 + $0x4a0] sm:$0xff]  ;;  %v604_v0 = vld [vmem:[%s7100_s1 + $0x5c8] sm:$0xff] }
  0x96   : > { %v4431_v23 = vcombine.high %v563_v17, %v567_v18  ;;  %v571_v25 = vld [vmem:[%s7100_s1 + $0x4c0] sm:$0xff]  ;;  %v608_v1 = vld [vmem:[%s7100_s1 + $0x5e8] sm:$0xff] }
  0x97   : > { %2134 = vmatpush1.bf16.msra.mxu0 %v4358_v19  ;;  %2360 = vmatpush1.bf16.msra.mxu1 %v4360_v20  ;;  %v564_v19 = vld [vmem:[%s7100_s1 + $0x488] sm:$0xff]  ;;  %v575_v26 = vld [vmem:[%s7100_s1 + $0x4e0] sm:$0xff] }
  0x98   : > { %2135 = vmatprep.subr.bf16.mxu0 %v4367_v21  ;;  %2361 = vmatprep.subr.bf16.mxu1 %v4369_v22  ;;  %v568_v20 = vld [vmem:[%s7100_s1 + $0x4a8] sm:$0xff]  ;;  %v4422_v21 = vcombine.low %v555_v7, %v559_v8  ;;  %v4424_v22 = vcombine.low %v556_v10, %v560_v11  ;;  %v4439_v32 = vcombine.high %v571_v25, %v575_v26  ;;  %v5536_v34 = vld [vmem:[%s5265_s13 + $0x44] ss:$16 sps:$4 sm:$0xff]   ;;  %v5595_v63 = vld [vmem:[%s5265_s13 + $0x60] ss:$16 sps:$4 sm:$0xff]  }
  0x99   : > { %v4433_v24 = vcombine.high %v564_v19, %v568_v20  ;;  %v4432_v31 = vcombine.low %v564_v19, %v568_v20  ;;  %v4438_v39 = vcombine.low %v571_v25, %v575_v26  ;;  %v611_v7 = vld [vmem:[%s7100_s1 + $0x600] sm:$0xff]  ;;  %v612_v10 = vld [vmem:[%s7100_s1 + $0x608] sm:$0xff] }
  0x9a   : > { %v615_v8 = vld [vmem:[%s7100_s1 + $0x620] sm:$0xff]  ;;  %v616_v11 = vld [vmem:[%s7100_s1 + $0x628] sm:$0xff] }
  0x9b   : > { %2136 = vmatpush1.bf16.msra.mxu0 %v4366_v27  ;;  %2362 = vmatpush1.bf16.msra.mxu1 %v4368_v28  ;;  %v5527_v27 = vld [vmem:[%s5265_s13 + $0x20] ss:$16 sps:$4 sm:$0xff]   ;;  %v572_v28 = vld [vmem:[%s7100_s1 + $0x4c8] sm:$0xff]  ;;  %v5638_v26 = vld [vmem:[%s5265_s13 + $0xa4] ss:$16 sps:$4 sm:$0xff]  }
  0x9c   : > { %2137 = vmatprep.subr.bf16.mxu0 %v4375_v29  ;;  %2363 = vmatprep.subr.bf16.mxu1 %v4377_v30  ;;  %v576_v29 = vld [vmem:[%s7100_s1 + $0x4e8] sm:$0xff]  ;;  %v4430_v30 = vcombine.low %v563_v17, %v567_v18  ;;  %v619_v17 = vld [vmem:[%s7100_s1 + $0x640] sm:$0xff] }
  0x9d   : > { %v4441_v33 = vcombine.high %v572_v28, %v576_v29  ;;  %v4440_v40 = vcombine.low %v572_v28, %v576_v29  ;;  %v623_v18 = vld [vmem:[%s7100_s1 + $0x660] sm:$0xff]  ;;  %v620_v20 = vld [vmem:[%s7100_s1 + $0x648] sm:$0xff] }
  0x9e   : > { %v5629_v19 = vld [vmem:[%s5265_s13 + $0x80] ss:$16 sps:$4 sm:$0xff]  }
  0x9f   : > { %2138 = vmatpush1.bf16.msra.mxu0 %v4374_v35  ;;  %2364 = vmatpush1.bf16.msra.mxu1 %v4376_v36  ;;  %v579_v35 = vld [vmem:[%s7100_s1 + $0x500] sm:$0xff] }
  0xa0   : > { %2139 = vmatprep.subr.bf16.mxu0 %v4383_v37  ;;  %2365 = vmatprep.subr.bf16.mxu1 %v4385_v38  ;;  %v583_v36 = vld [vmem:[%s7100_s1 + $0x520] sm:$0xff]  ;;  %v580_v37 = vld [vmem:[%s7100_s1 + $0x508] sm:$0xff] }
  0xa1   : > { %v584_v38 = vld [vmem:[%s7100_s1 + $0x528] sm:$0xff]  ;;  %v4447_v41 = vcombine.high %v579_v35, %v583_v36  ;;  %v4446_v48 = vcombine.low %v579_v35, %v583_v36  ;;  %v627_v28 = vld [vmem:[%s7100_s1 + $0x680] sm:$0xff] }
  0xa2   : > { %v4449_v42 = vcombine.high %v580_v37, %v584_v38  ;;  %v4448_v49 = vcombine.low %v580_v37, %v584_v38  ;;  %v631_v29 = vld [vmem:[%s7100_s1 + $0x6a0] sm:$0xff] }
  0xa3   : > { %2140 = vmatpush1.bf16.msra.mxu0 %v4382_v43  ;;  %2366 = vmatpush1.bf16.msra.mxu1 %v4384_v44  ;;  %v587_v43 = vld [vmem:[%s7100_s1 + $0x540] sm:$0xff]  ;;  %v4495_v35 = vcombine.high %v627_v28, %v631_v29 }
  0xa4   : > { %2141 = vmatprep.subr.bf16.mxu0 %v4391_v45  ;;  %2367 = vmatprep.subr.bf16.mxu1 %v4393_v46  ;;  %v591_v44 = vld [vmem:[%s7100_s1 + $0x560] sm:$0xff]  ;;  %v588_v46 = vld [vmem:[%s7100_s1 + $0x548] sm:$0xff] }
  0xa5   : > { %v5561_v45 = vld [vmem:[%s5265_s13 + $0x40] ss:$16 sps:$4 sm:$0xff]   ;;  %v4455_v50 = vcombine.high %v587_v43, %v591_v44  ;;  %v4454_v57 = vcombine.low %v587_v43, %v591_v44  ;;  %v4456_v58 = vcombine.low %v588_v46, %v592_v47 }
  0xa6   : > { %v635_v37 = vld [vmem:[%s7100_s1 + $0x6c0] sm:$0xff] }
  0xa7   : > { %2142 = vmatpush1.bf16.msra.mxu0 %v4390_v51  ;;  %2368 = vmatpush1.bf16.msra.mxu1 %v4392_v52  ;;  %v4457_v51 = vcombine.high %v588_v46, %v592_v47  ;;  %v5570_v52 = vld [vmem:[%s5265_s13 + $0x64] ss:$16 sps:$4 sm:$0xff]  }
  0xa8   : > { %2143 = vmatprep.subr.bf16.mxu0 %v4399_v53  ;;  %2369 = vmatprep.subr.bf16.mxu1 %v4401_v54  ;;  %v595_v53 = vld [vmem:[%s7100_s1 + $0x580] sm:$0xff] }
  0xa9   : > { %v599_v54 = vld [vmem:[%s7100_s1 + $0x5a0] sm:$0xff] }
  0xaa   : > { %v4462_v2 = vcombine.low %v595_v53, %v599_v54  ;;  %v639_v38 = vld [vmem:[%s7100_s1 + $0x6e0] sm:$0xff] }
  0xab   : > { %2144 = vmatpush1.bf16.msra.mxu0 %v4398_v59  ;;  %2370 = vmatpush1.bf16.msra.mxu1 %v4400_v60  ;;  %v4463_v59 = vcombine.high %v595_v53, %v599_v54  ;;  %v4465_v60 = vcombine.high %v596_v55, %v600_v56  ;;  %v4503_v44 = vcombine.high %v635_v37, %v639_v38  ;;  %v5672_v47 = vld [vmem:[%s5265_s13 + $0xc4] ss:$16 sps:$4 sm:$0xff]  }
  0xac   : > { %2145 = vmatprep.subr.bf16.mxu0 %v4407_v61  ;;  %2371 = vmatprep.subr.bf16.mxu1 %v4409_v62  ;;  %v603_v61 = vld [vmem:[%s7100_s1 + $0x5c0] sm:$0xff]  ;;  %v4502_v53 = vcombine.low %v635_v37, %v639_v38  ;;  %v433_v37 = vld [vmem:[%s7100_s1 + $0x70] sm:$0xff] }
  0xad   : > { %v607_v62 = vld [vmem:[%s7100_s1 + $0x5e0] sm:$0xff] }
  0xaf   : > { %2146 = vmatpush1.bf16.msra.mxu0 %v4406_v3  ;;  %2372 = vmatpush1.bf16.msra.mxu1 %v4408_v4  ;;  %v4464_v3 = vcombine.low %v596_v55, %v600_v56  ;;  %v4471_v4 = vcombine.high %v603_v61, %v607_v62 }
  0xb0   : > { %2228 = vmatprep.subr.bf16.mxu0 %v4415_v5  ;;  %2454 = vmatprep.subr.bf16.mxu1 %v4417_v6  ;;  %v4473_v5 = vcombine.high %v604_v0, %v608_v1  ;;  %v5604_v6 = vld [vmem:[%s5265_s13 + $0x84] ss:$16 sps:$4 sm:$0xff]  }
  0xb2   : > { %2148 = vmatmul.mubr.bf16.vlgmr.msra.gmra.mrb[0].mxu0 %v5493_v9  ;;  %2374 = vmatmul.mubr.bf16.vlgmr.msra.gmra.mrb[0].mxu1 %v5493_v9 }
  0xb3   : > { %2229 = vmatpush1.bf16.msra.mxu0 %v4414_v12  ;;  %2455 = vmatpush1.bf16.msra.mxu1 %v4416_v13  ;;  %v4470_v12 = vcombine.low %v603_v61, %v607_v62  ;;  %v4472_v13 = vcombine.low %v604_v0, %v608_v1  ;;  %v656_v61 = vld [vmem:[%s7100_s1 + $0x768] sm:$0xff] }
  0xb4   : > { %2230 = vmatprep.subr.bf16.mxu0 %v4423_v14  ;;  %2456 = vmatprep.subr.bf16.mxu1 %v4425_v16  ;;  %v4479_v14 = vcombine.high %v611_v7, %v615_v8  ;;  %v4481_v16 = vcombine.high %v612_v10, %v616_v11 }
  0xb5   : > { %2157 = vmatprep.mubr.bf16.mxu0 %v5502_v15  ;;  %2383 = vmatprep.mubr.bf16.mxu1 %v5502_v15 }
  0xb7   : > { %2231 = vmatpush1.bf16.msra.mxu0 %v4422_v21  ;;  %2457 = vmatpush1.bf16.msra.mxu1 %v4424_v22  ;;  %v624_v21 = vld [vmem:[%s7100_s1 + $0x668] sm:$0xff]  ;;  %v4478_v22 = vcombine.low %v611_v7, %v615_v8 }
  0xb8   : > { %2232 = vmatprep.subr.bf16.mxu0 %v4431_v23  ;;  %2458 = vmatprep.subr.bf16.mxu1 %v4433_v24  ;;  %v4480_v23 = vcombine.low %v612_v10, %v616_v11  ;;  %v4487_v24 = vcombine.high %v619_v17, %v623_v18  ;;  %v4489_v25 = vcombine.high %v620_v20, %v624_v21  ;;  %v660_v7 = vld [vmem:[%s7100_s1 + $0x788] sm:$0xff] }
  0xb9   : > { %v664_v8 = vld [vmem:[%s7100_s1 + $0x7a8] sm:$0xff] }
  0xba   : > { %2158 = vmatmul.mubr.bf16.gmra.mrb[4].mxu0 %v5527_v27  ;;  %2384 = vmatmul.mubr.bf16.gmra.mrb[4].mxu1 %v5527_v27 }
  0xbb   : > { %2233 = vmatpush1.bf16.msra.mxu0 %v4430_v30  ;;  %2459 = vmatpush1.bf16.msra.mxu1 %v4432_v31  ;;  %v628_v30 = vld [vmem:[%s7100_s1 + $0x688] sm:$0xff] }
  0xbc   : > { %2234 = vmatprep.subr.bf16.mxu0 %v4439_v32  ;;  %2460 = vmatprep.subr.bf16.mxu1 %v4441_v33  ;;  %v632_v31 = vld [vmem:[%s7100_s1 + $0x6a8] sm:$0xff]  ;;  %v4486_v32 = vcombine.low %v619_v17, %v623_v18  ;;  %v4488_v33 = vcombine.low %v620_v20, %v624_v21  ;;  %v5731_v17 = vld [vmem:[%s5265_s13 + $0xe0] ss:$16 sps:$4 sm:$0xff]  }
  0xbd   : > { %2167 = vmatprep.mubr.bf16.mxu0 %v5536_v34  ;;  %2393 = vmatprep.mubr.bf16.mxu1 %v5536_v34  ;;  %v4497_v36 = vcombine.high %v628_v30, %v632_v31  ;;  %v4496_v43 = vcombine.low %v628_v30, %v632_v31  ;;  %v668_v18 = vld [vmem:[%s7100_s1 + $0x7c8] sm:$0xff]  ;;  %v422_v30 = vld [vmem:[%s7100_s1 + $0x18] sm:$0xff] }
  0xbe   : > { %v672_v20 = vld [vmem:[%s7100_s1 + $0x7e8] sm:$0xff]  ;;  %v426_v31 = vld [vmem:[%s7100_s1 + $0x38] sm:$0xff] }
  0xbf   : > { %2235 = vmatpush1.bf16.msra.mxu0 %v4438_v39  ;;  %2461 = vmatpush1.bf16.msra.mxu1 %v4440_v40  ;;  %v5663_v39 = vld [vmem:[%s5265_s13 + $0xa0] ss:$16 sps:$4 sm:$0xff]   ;;  %v636_v40 = vld [vmem:[%s7100_s1 + $0x6c8] sm:$0xff]  ;;  %v4293_v38 = vcombine.high %v422_v30, %v426_v31 }
  0xc0   : > { %2236 = vmatprep.subr.bf16.mxu0 %v4447_v41  ;;  %2462 = vmatprep.subr.bf16.mxu1 %v4449_v42  ;;  %v640_v41 = vld [vmem:[%s7100_s1 + $0x6e8] sm:$0xff]  ;;  %v4494_v42 = vcombine.low %v627_v28, %v631_v29  ;;  %v421_v28 = vld [vmem:[%s7100_s1 + $0x10] sm:$0xff] }
  0xc1   : > { %v4505_v46 = vcombine.high %v636_v40, %v640_v41  ;;  %v4504_v54 = vcombine.low %v636_v40, %v640_v41  ;;  %v425_v29 = vld [vmem:[%s7100_s1 + $0x30] sm:$0xff]  ;;  %v5764_v40 = vld [vmem:[%s5265_s13 + $0x8] ss:$16 sps:$4 sm:$0xff]  }
  0xc2   : > { %2168 = vmatmul.mubr.bf16.gmra.mrb[8].mxu0 %v5561_v45  ;;  %2394 = vmatmul.mubr.bf16.gmra.mrb[8].mxu1 %v5561_v45  ;;  %v4290_v41 = vcombine.low %v421_v28, %v425_v29 }
  0xc3   : > { %2237 = vmatpush1.bf16.msra.mxu0 %v4446_v48  ;;  %2463 = vmatpush1.bf16.msra.mxu1 %v4448_v49  ;;  %v643_v48 = vld [vmem:[%s7100_s1 + $0x700] sm:$0xff] }
  0xc4   : > { %2238 = vmatprep.subr.bf16.mxu0 %v4455_v50  ;;  %2464 = vmatprep.subr.bf16.mxu1 %v4457_v51  ;;  %v647_v49 = vld [vmem:[%s7100_s1 + $0x720] sm:$0xff]  ;;  %v644_v50 = vld [vmem:[%s7100_s1 + $0x708] sm:$0xff] }
  0xc5   : > { %2177 = vmatprep.mubr.bf16.mxu0 %v5570_v52  ;;  %2403 = vmatprep.mubr.bf16.mxu1 %v5570_v52  ;;  %v648_v51 = vld [vmem:[%s7100_s1 + $0x728] sm:$0xff]  ;;  %v4511_v55 = vcombine.high %v643_v48, %v647_v49  ;;  %v4510_v62 = vcombine.low %v643_v48, %v647_v49  ;;  %v437_v48 = vld [vmem:[%s7100_s1 + $0x90] sm:$0xff] }
  0xc6   : > { %v4513_v56 = vcombine.high %v644_v50, %v648_v51  ;;  %v4512_v0 = vcombine.low %v644_v50, %v648_v51  ;;  %v441_v49 = vld [vmem:[%s7100_s1 + $0xb0] sm:$0xff]  ;;  %v4292_v50 = vcombine.low %v422_v30, %v426_v31  ;;  %v5842_v31 = vld [vmem:[%s5265_s13 + $0x6c] ss:$16 sps:$4 sm:$0xff]  }
  0xc7   : > { %2239 = vmatpush1.bf16.msra.mxu0 %v4454_v57  ;;  %2465 = vmatpush1.bf16.msra.mxu1 %v4456_v58  ;;  %v651_v57 = vld [vmem:[%s7100_s1 + $0x740] sm:$0xff] }
  0xc8   : > { %2240 = vmatprep.subr.bf16.mxu0 %v4463_v59  ;;  %2466 = vmatprep.subr.bf16.mxu1 %v4465_v60  ;;  %v655_v58 = vld [vmem:[%s7100_s1 + $0x760] sm:$0xff]  ;;  %v652_v60 = vld [vmem:[%s7100_s1 + $0x748] sm:$0xff] }
  0xc9   : > { %v5697_v59 = vld [vmem:[%s5265_s13 + $0xc0] ss:$16 sps:$4 sm:$0xff]   ;;  %v4519_v1 = vcombine.high %v651_v57, %v655_v58  ;;  %v4518_v10 = vcombine.low %v651_v57, %v655_v58  ;;  %v4520_v11 = vcombine.low %v652_v60, %v656_v61 }
  0xca   : > { %2178 = vmatmul.mubr.bf16.gmra.mrb[12].mxu0 %v5595_v63  ;;  %2404 = vmatmul.mubr.bf16.gmra.mrb[12].mxu1 %v5595_v63  ;;  %v445_v57 = vld [vmem:[%s7100_s1 + $0xd0] sm:$0xff] }
  0xcb   : > { %2241 = vmatpush1.bf16.msra.mxu0 %v4462_v2  ;;  %2467 = vmatpush1.bf16.msra.mxu1 %v4464_v3  ;;  %v4521_v2 = vcombine.high %v652_v60, %v656_v61  ;;  %v5706_v3 = vld [vmem:[%s5265_s13 + $0xe4] ss:$16 sps:$4 sm:$0xff]   ;;  %v5799_v61 = vld [vmem:[%s5265_s13 + $0x28] ss:$16 sps:$4 sm:$0xff]  }
  0xcc   : > { %2242 = vmatprep.subr.bf16.mxu0 %v4471_v4  ;;  %2468 = vmatprep.subr.bf16.mxu1 %v4473_v5  ;;  %v659_v4 = vld [vmem:[%s7100_s1 + $0x780] sm:$0xff]  ;;  %v449_v58 = vld [vmem:[%s7100_s1 + $0xf0] sm:$0xff] }
  0xcd   : > { %2187 = vmatprep.mubr.bf16.mxu0 %v5604_v6  ;;  %2413 = vmatprep.mubr.bf16.mxu1 %v5604_v6  ;;  %v663_v5 = vld [vmem:[%s7100_s1 + $0x7a0] sm:$0xff] }
  0xce   : > { %v4526_v21 = vcombine.low %v659_v4, %v663_v5 }
  0xcf   : > { %2243 = vmatpush1.bf16.msra.mxu0 %v4470_v12  ;;  %2469 = vmatpush1.bf16.msra.mxu1 %v4472_v13  ;;  %v4527_v12 = vcombine.high %v659_v4, %v663_v5  ;;  %v4529_v13 = vcombine.high %v660_v7, %v664_v8  ;;  %v4315_v4 = vcombine.high %v445_v57, %v449_v58  ;;  %v5808_v5 = vld [vmem:[%s5265_s13 + $0x4c] ss:$16 sps:$4 sm:$0xff]  }
  0xd0   : > { %2244 = vmatprep.subr.bf16.mxu0 %v4479_v14  ;;  %2470 = vmatprep.subr.bf16.mxu1 %v4481_v16  ;;  %v667_v14 = vld [vmem:[%s7100_s1 + $0x7c0] sm:$0xff] }
  0xd1   : > { %v671_v16 = vld [vmem:[%s7100_s1 + $0x7e0] sm:$0xff] }
  0xd2   : > { %2188 = vmatmul.mubr.bf16.gmra.mrb[16].mxu0 %v5629_v19  ;;  %2414 = vmatmul.mubr.bf16.gmra.mrb[16].mxu1 %v5629_v19 }
  0xd3   : > { %2245 = vmatpush1.bf16.msra.mxu0 %v4478_v22  ;;  %2471 = vmatpush1.bf16.msra.mxu1 %v4480_v23  ;;  %v4528_v22 = vcombine.low %v660_v7, %v664_v8  ;;  %v4535_v23 = vcombine.high %v667_v14, %v671_v16  ;;  %v453_v7 = vld [vmem:[%s7100_s1 + $0x110] sm:$0xff] }
  0xd4   : > { %2246 = vmatprep.subr.bf16.mxu0 %v4487_v24  ;;  %2472 = vmatprep.subr.bf16.mxu1 %v4489_v25  ;;  %v4537_v24 = vcombine.high %v668_v18, %v672_v20  ;;  %v5740_v25 = vld [vmem:[%s5265_s13 + $0xc] ss:$16 sps:$4 sm:$0xff]   ;;  %v457_v8 = vld [vmem:[%s7100_s1 + $0x130] sm:$0xff] }
  0xd5   : > { %2197 = vmatprep.mubr.bf16.mxu0 %v5638_v26  ;;  %2423 = vmatprep.mubr.bf16.mxu1 %v5638_v26 }
  0xd7   : > { %2247 = vmatpush1.bf16.msra.mxu0 %v4486_v32  ;;  %2473 = vmatpush1.bf16.msra.mxu1 %v4488_v33  ;;  %v4534_v32 = vcombine.low %v667_v14, %v671_v16  ;;  %v4536_v33 = vcombine.low %v668_v18, %v672_v20  ;;  %v458_v14 = vld [vmem:[%s7100_s1 + $0x138] sm:$0xff]  ;;  %v4323_v16 = vcombine.high %v453_v7, %v457_v8  ;;  %v461_v18 = vld [vmem:[%s7100_s1 + $0x150] sm:$0xff] }
  0xd8   : > { %2248 = vmatprep.subr.bf16.mxu0 %v4495_v35  ;;  %2474 = vmatprep.subr.bf16.mxu1 %v4497_v36  ;;  %v4291_v35 = vcombine.high %v421_v28, %v425_v29  ;;  %v429_v36 = vld [vmem:[%s7100_s1 + $0x50] sm:$0xff]  ;;  %v462_v28 = vld [vmem:[%s7100_s1 + $0x158] sm:$0xff] }
  0xd9   : > { %v465_v20 = vld [vmem:[%s7100_s1 + $0x170] sm:$0xff]  ;;  %v466_v29 = vld [vmem:[%s7100_s1 + $0x178] sm:$0xff] }
  0xda   : > { %2198 = vmatmul.mubr.bf16.gmra.mrb[20].mxu0 %v5663_v39  ;;  %2424 = vmatmul.mubr.bf16.gmra.mrb[20].mxu1 %v5663_v39  ;;  %v4331_v30 = vcombine.high %v461_v18, %v465_v20 }
  0xdb   : > { %2249 = vmatpush1.bf16.msra.mxu0 %v4494_v42  ;;  %2475 = vmatpush1.bf16.msra.mxu1 %v4496_v43  ;;  %v430_v42 = vld [vmem:[%s7100_s1 + $0x58] sm:$0xff] }
  0xdc   : > { %2250 = vmatprep.subr.bf16.mxu0 %v4503_v44  ;;  %2476 = vmatprep.subr.bf16.mxu1 %v4505_v46  ;;  %v434_v43 = vld [vmem:[%s7100_s1 + $0x78] sm:$0xff]  ;;  %v4299_v44 = vcombine.high %v429_v36, %v433_v37 }
  0xdd   : > { %2207 = vmatprep.mubr.bf16.mxu0 %v5672_v47  ;;  %2433 = vmatprep.mubr.bf16.mxu1 %v5672_v47  ;;  %v5774_v46 = vld [vmem:[%s5265_s13 + $0x2c] ss:$16 sps:$4 sm:$0xff]   ;;  %v4301_v51 = vcombine.high %v430_v42, %v434_v43  ;;  %v4300_v60 = vcombine.low %v430_v42, %v434_v43  ;;  %v477_v43 = vld [vmem:[%s7100_s1 + $0x1d0] sm:$0xff] }
  0xdf   : > { %2251 = vmatpush1.bf16.msra.mxu0 %v4502_v53  ;;  %2477 = vmatpush1.bf16.msra.mxu1 %v4504_v54  ;;  %v4298_v53 = vcombine.low %v429_v36, %v433_v37  ;;  %v438_v54 = vld [vmem:[%s7100_s1 + $0x98] sm:$0xff]  ;;  %v4333_v36 = vcombine.high %v462_v28, %v466_v29  ;;  %v4330_v37 = vcombine.low %v461_v18, %v465_v20 }
  0xe0   : > { %2252 = vmatprep.subr.bf16.mxu0 %v4511_v55  ;;  %2478 = vmatprep.subr.bf16.mxu1 %v4513_v56  ;;  %v442_v55 = vld [vmem:[%s7100_s1 + $0xb8] sm:$0xff]  ;;  %v4307_v56 = vcombine.high %v437_v48, %v441_v49 }
  0xe1   : > { %v5910_v20 = vld [vmem:[%s5265_s13 + $0xac] ss:$16 sps:$4 sm:$0xff]  }
  0xe2   : > { %2208 = vmatmul.mubr.bf16.gmra.mrb[24].mxu0 %v5697_v59  ;;  %2434 = vmatmul.mubr.bf16.gmra.mrb[24].mxu1 %v5697_v59 }
  0xe3   : > { %2253 = vmatpush1.bf16.msra.mxu0 %v4510_v62  ;;  %2479 = vmatpush1.bf16.msra.mxu1 %v4512_v0  ;;  %v4309_v62 = vcombine.high %v438_v54, %v442_v55  ;;  %v4306_v0 = vcombine.low %v437_v48, %v441_v49  ;;  %v4332_v48 = vcombine.low %v462_v28, %v466_v29  ;;  %v5867_v49 = vld [vmem:[%s5265_s13 + $0x68] ss:$16 sps:$4 sm:$0xff]  }
  0xe4   : > { %2254 = vmatprep.subr.bf16.mxu0 %v4519_v1  ;;  %2480 = vmatprep.subr.bf16.mxu1 %v4521_v2  ;;  %v446_v1 = vld [vmem:[%s7100_s1 + $0xd8] sm:$0xff] }
  0xe5   : > { %2217 = vmatprep.mubr.bf16.mxu0 %v5706_v3  ;;  %2443 = vmatprep.mubr.bf16.mxu1 %v5706_v3  ;;  %v450_v2 = vld [vmem:[%s7100_s1 + $0xf8] sm:$0xff] }
  0xe7   : > { %2255 = vmatpush1.bf16.msra.mxu0 %v4518_v10  ;;  %2481 = vmatpush1.bf16.msra.mxu1 %v4520_v11  ;;  %v4308_v10 = vcombine.low %v438_v54, %v442_v55  ;;  %v4317_v11 = vcombine.high %v446_v1, %v450_v2  ;;  %v482_v54 = vld [vmem:[%s7100_s1 + $0x1f8] sm:$0xff] }
  0xe8   : > { %2256 = vmatprep.subr.bf16.mxu0 %v4527_v12  ;;  %2482 = vmatprep.subr.bf16.mxu1 %v4529_v13  ;;  %v4314_v12 = vcombine.low %v445_v57, %v449_v58  ;;  %v454_v13 = vld [vmem:[%s7100_s1 + $0x118] sm:$0xff]  ;;  %v485_v57 = vld [vmem:[%s7100_s1 + $0x210] sm:$0xff] }
  0xe9   : > { %v489_v58 = vld [vmem:[%s7100_s1 + $0x230] sm:$0xff] }
  0xea   : > { %2218 = vmatmul.mubr.bf16.gmra.mrb[28].mxu0 %v5731_v17  ;;  %2444 = vmatmul.mubr.bf16.gmra.mrb[28].mxu1 %v5731_v17 }
  0xeb   : > { %2257 = vmatpush1.bf16.msra.mxu0 %v4526_v21  ;;  %2483 = vmatpush1.bf16.msra.mxu1 %v4528_v22  ;;  %v4316_v21 = vcombine.low %v446_v1, %v450_v2  ;;  %v5833_v22 = vld [vmem:[%s5265_s13 + $0x48] ss:$16 sps:$4 sm:$0xff]  }
  0xec   : > { %2258 = vmatprep.subr.bf16.mxu0 %v4535_v23  ;;  %2484 = vmatprep.subr.bf16.mxu1 %v4537_v24  ;;  %v4325_v23 = vcombine.high %v454_v13, %v458_v14  ;;  %v4322_v24 = vcombine.low %v453_v7, %v457_v8  ;;  %v486_v1 = vld [vmem:[%s7100_s1 + $0x218] sm:$0xff]  ;;  %v493_v7 = vld [vmem:[%s7100_s1 + $0x250] sm:$0xff] }
  0xed   : > { %2260 = vmatprep.mubr.bf16.mxu0 %v5740_v25  ;;  %2486 = vmatprep.mubr.bf16.mxu1 %v5740_v25  ;;  %v490_v2 = vld [vmem:[%s7100_s1 + $0x238] sm:$0xff]  ;;  %v497_v8 = vld [vmem:[%s7100_s1 + $0x270] sm:$0xff] }
  0xee   : > { %v4363_v18 = vcombine.high %v493_v7, %v497_v8  ;;  %v4362_v29 = vcombine.low %v493_v7, %v497_v8 }
  0xef   : > { %2259 = vmatpush1.bf16.msra.mxu0 %v4534_v32  ;;  %2485 = vmatpush1.bf16.msra.mxu1 %v4536_v33  ;;  %v469_v32 = vld [vmem:[%s7100_s1 + $0x190] sm:$0xff] }
  0xf0   : > { %2567 = vmatprep.subr.bf16.mxu0 %v4291_v35  ;;  %2793 = vmatprep.subr.bf16.mxu1 %v4293_v38  ;;  %v473_v33 = vld [vmem:[%s7100_s1 + $0x1b0] sm:$0xff]  ;;  %v4324_v35 = vcombine.low %v454_v13, %v458_v14  ;;  %v470_v38 = vld [vmem:[%s7100_s1 + $0x198] sm:$0xff]  ;;  %v4354_v13 = vcombine.low %v485_v57, %v489_v58 }
  0xf1   : > { %v4339_v42 = vcombine.high %v469_v32, %v473_v33  ;;  %v494_v14 = vld [vmem:[%s7100_s1 + $0x258] sm:$0xff] }
  0xf2   : > { %2261 = vmatmul.mubr.bf16.vlgmr.msra.gmra.mrb[0].mxu0 %v5764_v40  ;;  %2487 = vmatmul.mubr.bf16.vlgmr.msra.gmra.mrb[0].mxu1 %v5764_v40 }
  0xf3   : > { %2568 = vmatpush1.bf16.msra.mxu0 %v4290_v41  ;;  %2270 = vmatprep.mubr.bf16.mxu0 %v5774_v46  ;;  %v474_v41 = vld [vmem:[%s7100_s1 + $0x1b8] sm:$0xff] }
  0xf4   : > { %2569 = vmatprep.subr.bf16.mxu0 %v4299_v44  ;;  %2496 = vmatprep.mubr.bf16.mxu1 %v5774_v46  ;;  %v481_v44 = vld [vmem:[%s7100_s1 + $0x1f0] sm:$0xff] }
  0xf5   : > { %2794 = vmatpush1.bf16.msra.mxu1 %v4292_v50  ;;  %v4341_v50 = vcombine.high %v470_v38, %v474_v41  ;;  %v4347_v55 = vcombine.high %v477_v43, %v481_v44 }
  0xf6   : > { %2795 = vmatprep.subr.bf16.mxu1 %v4301_v51  ;;  %v4338_v51 = vcombine.low %v469_v32, %v473_v33  ;;  %v506_v32 = vld [vmem:[%s7100_s1 + $0x2b8] sm:$0xff] }
  0xf7   : > { %2570 = vmatpush1.bf16.msra.mxu0 %v4298_v53  ;;  %v478_v53 = vld [vmem:[%s7100_s1 + $0x1d8] sm:$0xff] }
  0xf8   : > { %2571 = vmatprep.subr.bf16.mxu0 %v4307_v56  ;;  %v5876_v56 = vld [vmem:[%s5265_s13 + $0x8c] ss:$16 sps:$4 sm:$0xff]  }
  0xf9   : > { %2796 = vmatpush1.bf16.msra.mxu1 %v4300_v60  ;;  %v4340_v60 = vcombine.low %v470_v38, %v474_v41  ;;  %v5935_v38 = vld [vmem:[%s5265_s13 + $0xa8] ss:$16 sps:$4 sm:$0xff]  }
  0xfa   : > { %2271 = vmatmul.mubr.bf16.gmra.mrb[4].mxu0 %v5799_v61  ;;  %2797 = vmatprep.subr.bf16.mxu1 %v4309_v62  ;;  %v4349_v62 = vcombine.high %v478_v53, %v482_v54 }
  0xfb   : > { %2497 = vmatmul.mubr.bf16.gmra.mrb[4].mxu1 %v5799_v61  ;;  %2572 = vmatpush1.bf16.msra.mxu0 %v4306_v0  ;;  %v4346_v0 = vcombine.low %v477_v43, %v481_v44  ;;  %v510_v43 = vld [vmem:[%s7100_s1 + $0x2d8] sm:$0xff] }
  0xfc   : > { %2573 = vmatprep.subr.bf16.mxu0 %v4315_v4  ;;  %2280 = vmatprep.mubr.bf16.mxu0 %v5808_v5  ;;  %v4355_v4 = vcombine.high %v485_v57, %v489_v58  ;;  %v514_v44 = vld [vmem:[%s7100_s1 + $0x2f8] sm:$0xff] }
  0xfd   : > { %2506 = vmatprep.mubr.bf16.mxu1 %v5808_v5  ;;  %2798 = vmatpush1.bf16.msra.mxu1 %v4308_v10  ;;  %v4348_v10 = vcombine.low %v478_v53, %v482_v54  ;;  %v521_v53 = vld [vmem:[%s7100_s1 + $0x330] sm:$0xff]  ;;  %v518_v58 = vld [vmem:[%s7100_s1 + $0x318] sm:$0xff] }
  0xfe   : > { %2799 = vmatprep.subr.bf16.mxu1 %v4317_v11  ;;  %v5901_v11 = vld [vmem:[%s5265_s13 + $0x88] ss:$16 sps:$4 sm:$0xff]  }
  0xff   : > { %2574 = vmatpush1.bf16.msra.mxu0 %v4314_v12  ;;  %v4357_v12 = vcombine.high %v486_v1, %v490_v2 }
 0x100   : > { %2575 = vmatprep.subr.bf16.mxu0 %v4323_v16  ;;  %v498_v16 = vld [vmem:[%s7100_s1 + $0x278] sm:$0xff] }
 0x101   : > { %2800 = vmatpush1.bf16.msra.mxu1 %v4316_v21  ;;  %v501_v21 = vld [vmem:[%s7100_s1 + $0x290] sm:$0xff]  ;;  %v4365_v28 = vcombine.high %v494_v14, %v498_v16 }
 0x102   : > { %2281 = vmatmul.mubr.bf16.gmra.mrb[8].mxu0 %v5833_v22  ;;  %2801 = vmatprep.subr.bf16.mxu1 %v4325_v23  ;;  %v505_v23 = vld [vmem:[%s7100_s1 + $0x2b0] sm:$0xff] }
 0x103   : > { %2507 = vmatmul.mubr.bf16.gmra.mrb[8].mxu1 %v5833_v22  ;;  %2576 = vmatpush1.bf16.msra.mxu0 %v4322_v24  ;;  %v4356_v24 = vcombine.low %v486_v1, %v490_v2  ;;  %v4371_v33 = vcombine.high %v501_v21, %v505_v23  ;;  %v529_v1 = vld [vmem:[%s7100_s1 + $0x370] sm:$0xff]  ;;  %v4380_v2 = vcombine.low %v510_v43, %v514_v44 }
 0x104   : > { %2577 = vmatprep.subr.bf16.mxu0 %v4331_v30  ;;  %2290 = vmatprep.mubr.bf16.mxu0 %v5842_v31  ;;  %v502_v30 = vld [vmem:[%s7100_s1 + $0x298] sm:$0xff] }
 0x105   : > { %2516 = vmatprep.mubr.bf16.mxu1 %v5842_v31  ;;  %2802 = vmatpush1.bf16.msra.mxu1 %v4324_v35  ;;  %v509_v35 = vld [vmem:[%s7100_s1 + $0x2d0] sm:$0xff]  ;;  %v4373_v41 = vcombine.high %v502_v30, %v506_v32  ;;  %v4372_v54 = vcombine.low %v502_v30, %v506_v32 }
 0x106   : > { %2803 = vmatprep.subr.bf16.mxu1 %v4333_v36  ;;  %v513_v36 = vld [vmem:[%s7100_s1 + $0x2f0] sm:$0xff] }
 0x107   : > { %2578 = vmatpush1.bf16.msra.mxu0 %v4330_v37  ;;  %v4364_v37 = vcombine.low %v494_v14, %v498_v16  ;;  %v4378_v57 = vcombine.low %v509_v35, %v513_v36  ;;  %v5978_v14 = vld [vmem:[%s5265_s13 + $0xec] ss:$16 sps:$4 sm:$0xff]   ;;  %v533_v16 = vld [vmem:[%s7100_s1 + $0x390] sm:$0xff] }
 0x108   : > { %2579 = vmatprep.subr.bf16.mxu0 %v4339_v42  ;;  %v4370_v42 = vcombine.low %v501_v21, %v505_v23  ;;  %v541_v32 = vld [vmem:[%s7100_s1 + $0x3d0] sm:$0xff] }
 0x109   : > { %2804 = vmatpush1.bf16.msra.mxu1 %v4332_v48  ;;  %v4379_v48 = vcombine.high %v509_v35, %v513_v36  ;;  %v6003_v36 = vld [vmem:[%s5265_s13 + $0xe8] ss:$16 sps:$4 sm:$0xff]  }
 0x10a   : > { %2291 = vmatmul.mubr.bf16.gmra.mrb[12].mxu0 %v5867_v49  ;;  %2805 = vmatprep.subr.bf16.mxu1 %v4341_v50  ;;  %v5944_v50 = vld [vmem:[%s5265_s13 + $0xcc] ss:$16 sps:$4 sm:$0xff]  }
 0x10b   : > { %2517 = vmatmul.mubr.bf16.gmra.mrb[12].mxu1 %v5867_v49  ;;  %2580 = vmatpush1.bf16.msra.mxu0 %v4338_v51  ;;  %v517_v51 = vld [vmem:[%s7100_s1 + $0x310] sm:$0xff] }
 0x10c   : > { %2581 = vmatprep.subr.bf16.mxu0 %v4347_v55  ;;  %2300 = vmatprep.mubr.bf16.mxu0 %v5876_v56  ;;  %v4381_v55 = vcombine.high %v510_v43, %v514_v44  ;;  %v4386_v8 = vcombine.low %v517_v51, %v521_v53  ;;  %v546_v43 = vld [vmem:[%s7100_s1 + $0x3f8] sm:$0xff] }
 0x10d   : > { %2526 = vmatprep.mubr.bf16.mxu1 %v5876_v56  ;;  %2806 = vmatpush1.bf16.msra.mxu1 %v4340_v60  ;;  %v522_v60 = vld [vmem:[%s7100_s1 + $0x338] sm:$0xff] }
 0x10e   : > { %2807 = vmatprep.subr.bf16.mxu1 %v4349_v62  ;;  %v4387_v62 = vcombine.high %v517_v51, %v521_v53  ;;  %v4389_v7 = vcombine.high %v518_v58, %v522_v60  ;;  %v4388_v21 = vcombine.low %v518_v58, %v522_v60  ;;  %v553_v51 = vld [vmem:[%s7100_s1 + $0x430] sm:$0xff]  ;;  %v554_v58 = vld [vmem:[%s7100_s1 + $0x438] sm:$0xff] }
 0x10f   : > { %2582 = vmatpush1.bf16.msra.mxu0 %v4346_v0  ;;  %v525_v0 = vld [vmem:[%s7100_s1 + $0x350] sm:$0xff] }
 0x110   : > { %2583 = vmatprep.subr.bf16.mxu0 %v4355_v4  ;;  %v5969_v4 = vld [vmem:[%s5265_s13 + $0xc8] ss:$16 sps:$4 sm:$0xff]   ;;  %v4909_v60 = vld [vmem:[%s5265_s13 + $0x4] ss:$16 sps:$4 sm:$0xff]  }
 0x111   : > { %2808 = vmatpush1.bf16.msra.mxu1 %v4348_v10  ;;  %v526_v10 = vld [vmem:[%s7100_s1 + $0x358] sm:$0xff] }
 0x112   : > { %2301 = vmatmul.mubr.bf16.gmra.mrb[16].mxu0 %v5901_v11  ;;  %2809 = vmatprep.subr.bf16.mxu1 %v4357_v12  ;;  %v530_v12 = vld [vmem:[%s7100_s1 + $0x378] sm:$0xff] }
 0x113   : > { %2527 = vmatmul.mubr.bf16.gmra.mrb[16].mxu1 %v5901_v11  ;;  %2584 = vmatpush1.bf16.msra.mxu0 %v4354_v13  ;;  %v4395_v13 = vcombine.high %v525_v0, %v529_v1  ;;  %v4397_v23 = vcombine.high %v526_v10, %v530_v12  ;;  %v4396_v35 = vcombine.low %v526_v10, %v530_v12  ;;  %v558_v10 = vld [vmem:[%s7100_s1 + $0x458] sm:$0xff] }
 0x114   : > { %2585 = vmatprep.subr.bf16.mxu0 %v4363_v18  ;;  %2310 = vmatprep.mubr.bf16.mxu0 %v5910_v20  ;;  %v537_v18 = vld [vmem:[%s7100_s1 + $0x3b0] sm:$0xff]  ;;  %v562_v12 = vld [vmem:[%s7100_s1 + $0x478] sm:$0xff] }
 0x115   : > { %2536 = vmatprep.mubr.bf16.mxu1 %v5910_v20  ;;  %2810 = vmatpush1.bf16.msra.mxu1 %v4356_v24  ;;  %v4394_v24 = vcombine.low %v525_v0, %v529_v1  ;;  %v4403_v30 = vcombine.high %v533_v16, %v537_v18  ;;  %v557_v0 = vld [vmem:[%s7100_s1 + $0x450] sm:$0xff] }
 0x116   : > { %2811 = vmatprep.subr.bf16.mxu1 %v4365_v28  ;;  %v534_v28 = vld [vmem:[%s7100_s1 + $0x398] sm:$0xff]  ;;  %v561_v1 = vld [vmem:[%s7100_s1 + $0x470] sm:$0xff] }
 0x117   : > { %2586 = vmatpush1.bf16.msra.mxu0 %v4362_v29  ;;  %v538_v29 = vld [vmem:[%s7100_s1 + $0x3b8] sm:$0xff] }
 0x118   : > { %2587 = vmatprep.subr.bf16.mxu0 %v4371_v33  ;;  %v545_v33 = vld [vmem:[%s7100_s1 + $0x3f0] sm:$0xff]  ;;  %v4404_v53 = vcombine.low %v534_v28, %v538_v29 }
 0x119   : > { %2812 = vmatpush1.bf16.msra.mxu1 %v4364_v37  ;;  %v4405_v37 = vcombine.high %v534_v28, %v538_v29  ;;  %v4411_v44 = vcombine.high %v541_v32, %v545_v33  ;;  %v566_v28 = vld [vmem:[%s7100_s1 + $0x498] sm:$0xff] }
 0x11a   : > { %2311 = vmatmul.mubr.bf16.gmra.mrb[20].mxu0 %v5935_v38  ;;  %2813 = vmatprep.subr.bf16.mxu1 %v4373_v41  ;;  %v4402_v41 = vcombine.low %v533_v16, %v537_v18  ;;  %v565_v16 = vld [vmem:[%s7100_s1 + $0x490] sm:$0xff]  ;;  %v570_v29 = vld [vmem:[%s7100_s1 + $0x4b8] sm:$0xff] }
 0x11b   : > { %2537 = vmatmul.mubr.bf16.gmra.mrb[20].mxu1 %v5935_v38  ;;  %2588 = vmatpush1.bf16.msra.mxu0 %v4370_v42  ;;  %v542_v42 = vld [vmem:[%s7100_s1 + $0x3d8] sm:$0xff]  ;;  %v569_v18 = vld [vmem:[%s7100_s1 + $0x4b0] sm:$0xff] }
 0x11c   : > { %2589 = vmatprep.subr.bf16.mxu0 %v4379_v48  ;;  %2320 = vmatprep.mubr.bf16.mxu0 %v5944_v50  ;;  %v549_v48 = vld [vmem:[%s7100_s1 + $0x410] sm:$0xff] }
 0x11d   : > { %2546 = vmatprep.mubr.bf16.mxu1 %v5944_v50  ;;  %2814 = vmatpush1.bf16.msra.mxu1 %v4372_v54  ;;  %v4413_v54 = vcombine.high %v542_v42, %v546_v43 }
 0x11e   : > { %2815 = vmatprep.subr.bf16.mxu1 %v4381_v55  ;;  %v4410_v55 = vcombine.low %v541_v32, %v545_v33  ;;  %v573_v32 = vld [vmem:[%s7100_s1 + $0x4d0] sm:$0xff] }
 0x11f   : > { %2590 = vmatpush1.bf16.msra.mxu0 %v4378_v57  ;;  %v550_v57 = vld [vmem:[%s7100_s1 + $0x418] sm:$0xff]  ;;  %v577_v33 = vld [vmem:[%s7100_s1 + $0x4f0] sm:$0xff] }
 0x120   : > { %2591 = vmatprep.subr.bf16.mxu0 %v4387_v62  ;;  %v4419_v62 = vcombine.high %v549_v48, %v553_v51 }
 0x121   : > { %2816 = vmatpush1.bf16.msra.mxu1 %v4380_v2  ;;  %v4412_v2 = vcombine.low %v542_v42, %v546_v43  ;;  %v578_v42 = vld [vmem:[%s7100_s1 + $0x4f8] sm:$0xff]  ;;  %v4443_v43 = vcombine.high %v573_v32, %v577_v33 }
 0x122   : > { %2321 = vmatmul.mubr.bf16.gmra.mrb[24].mxu0 %v5969_v4  ;;  %2817 = vmatprep.subr.bf16.mxu1 %v4389_v7  ;;  %v4421_v7 = vcombine.high %v550_v57, %v554_v58 }
 0x123   : > { %2547 = vmatmul.mubr.bf16.gmra.mrb[24].mxu1 %v5969_v4  ;;  %2592 = vmatpush1.bf16.msra.mxu0 %v4386_v8  ;;  %v4418_v8 = vcombine.low %v549_v48, %v553_v51  ;;  %v4436_v48 = vcombine.low %v566_v28, %v570_v29 }
 0x124   : > { %2593 = vmatprep.subr.bf16.mxu0 %v4395_v13  ;;  %2330 = vmatprep.mubr.bf16.mxu0 %v5978_v14  ;;  %v4427_v13 = vcombine.high %v557_v0, %v561_v1 }
 0x125   : > { %2556 = vmatprep.mubr.bf16.mxu1 %v5978_v14  ;;  %2818 = vmatpush1.bf16.msra.mxu1 %v4388_v21  ;;  %v4420_v21 = vcombine.low %v550_v57, %v554_v58  ;;  %v589_v58 = vld [vmem:[%s7100_s1 + $0x550] sm:$0xff] }
 0x126   : > { %2819 = vmatprep.subr.bf16.mxu1 %v4397_v23  ;;  %v4429_v23 = vcombine.high %v558_v10, %v562_v12 }
 0x127   : > { %2594 = vmatpush1.bf16.msra.mxu0 %v4394_v24  ;;  %v4426_v24 = vcombine.low %v557_v0, %v561_v1 }
 0x128   : > { %2595 = vmatprep.subr.bf16.mxu0 %v4403_v30  ;;  %v4435_v30 = vcombine.high %v565_v16, %v569_v18 }
 0x129   : > { %2820 = vmatpush1.bf16.msra.mxu1 %v4396_v35  ;;  %v4428_v35 = vcombine.low %v558_v10, %v562_v12 }
 0x12a   : > { %2331 = vmatmul.mubr.bf16.gmra.mrb[28].mxu0 %v6003_v36  ;;  %2821 = vmatprep.subr.bf16.mxu1 %v4405_v37  ;;  %v4437_v37 = vcombine.high %v566_v28, %v570_v29 }
 0x12b   : > { %2557 = vmatmul.mubr.bf16.gmra.mrb[28].mxu1 %v6003_v36  ;;  %2596 = vmatpush1.bf16.msra.mxu0 %v4402_v41  ;;  %v4434_v41 = vcombine.low %v565_v16, %v569_v18  ;;  %v598_v16 = vld [vmem:[%s7100_s1 + $0x598] sm:$0xff] }
 0x12c   : > { %2597 = vmatprep.subr.bf16.mxu0 %v4411_v44  ;;  %2599 = vmatprep.mubr.bf16.mxu0 %v4909_v60  ;;  %v581_v44 = vld [vmem:[%s7100_s1 + $0x510] sm:$0xff]  ;;  %v602_v18 = vld [vmem:[%s7100_s1 + $0x5b8] sm:$0xff] }
 0x12d   : > { %2822 = vmatpush1.bf16.msra.mxu1 %v4404_v53  ;;  %2825 = vmatprep.mubr.bf16.mxu1 %v4909_v60  ;;  %v4442_v53 = vcombine.low %v573_v32, %v577_v33  ;;  %v593_v60 = vld [vmem:[%s7100_s1 + $0x570] sm:$0xff]  ;;  %v4469_v29 = vcombine.high %v598_v16, %v602_v18  ;;  %v610_v32 = vld [vmem:[%s7100_s1 + $0x5f8] sm:$0xff] }
 0x12e   : > { %2823 = vmatprep.subr.bf16.mxu1 %v4413_v54  ;;  %v582_v54 = vld [vmem:[%s7100_s1 + $0x518] sm:$0xff] }
 0x12f   : > { %2598 = vmatpush1.bf16.msra.mxu0 %v4410_v55  ;;  %v586_v55 = vld [vmem:[%s7100_s1 + $0x538] sm:$0xff] }
 0x130   : > { %2680 = vmatprep.subr.bf16.mxu0 %v4419_v62  ;;  %v4453_v0 = vcombine.high %v582_v54, %v586_v55  ;;  %v4452_v10 = vcombine.low %v582_v54, %v586_v55  ;;  %v626_v55 = vld [vmem:[%s7100_s1 + $0x678] sm:$0xff] }
 0x131   : > { %2824 = vmatpush1.bf16.msra.mxu1 %v4412_v2  ;;  %v594_v2 = vld [vmem:[%s7100_s1 + $0x578] sm:$0xff] }
 0x132   : > { %2600 = vmatmul.mubr.bf16.vlgmr.msra.gmra.mrb[32].mxu0 %v5493_v9  ;;  %2906 = vmatprep.subr.bf16.mxu1 %v4421_v7  ;;  %v4459_v7 = vcombine.high %v589_v58, %v593_v60 }
 0x133   : > { %2681 = vmatpush1.bf16.msra.mxu0 %v4418_v8  ;;  %2609 = vmatprep.mubr.bf16.mxu0 %v5502_v15  ;;  %v597_v8 = vld [vmem:[%s7100_s1 + $0x590] sm:$0xff] }
 0x134   : > { %2682 = vmatprep.subr.bf16.mxu0 %v4427_v13  ;;  %2826 = vmatmul.mubr.bf16.vlgmr.msra.gmra.mrb[32].mxu1 %v5493_v9  ;;  %v574_v9 = vld [vmem:[%s7100_s1 + $0x4d8] sm:$0xff]  ;;  %v4458_v13 = vcombine.low %v589_v58, %v593_v60  ;;  %v629_v58 = vld [vmem:[%s7100_s1 + $0x690] sm:$0xff] }
 0x135   : > { %2907 = vmatpush1.bf16.msra.mxu1 %v4420_v21  ;;  %2835 = vmatprep.mubr.bf16.mxu1 %v5502_v15  ;;  %v585_v15 = vld [vmem:[%s7100_s1 + $0x530] sm:$0xff]  ;;  %v4445_v51 = vcombine.high %v574_v9, %v578_v42  ;;  %v4444_v62 = vcombine.low %v574_v9, %v578_v42  ;;  %v614_v42 = vld [vmem:[%s7100_s1 + $0x618] sm:$0xff] }
 0x136   : > { %2908 = vmatprep.subr.bf16.mxu1 %v4429_v23  ;;  %v4451_v57 = vcombine.high %v581_v44, %v585_v15  ;;  %v4450_v1 = vcombine.low %v581_v44, %v585_v15  ;;  %v605_v23 = vld [vmem:[%s7100_s1 + $0x5d0] sm:$0xff] }
 0x137   : > { %2683 = vmatpush1.bf16.msra.mxu0 %v4426_v24  ;;  %v609_v24 = vld [vmem:[%s7100_s1 + $0x5f0] sm:$0xff] }
 0x138   : > { %2684 = vmatprep.subr.bf16.mxu0 %v4435_v30  ;;  %v4475_v33 = vcombine.high %v605_v23, %v609_v24  ;;  %v4474_v9 = vcombine.low %v605_v23, %v609_v24  ;;  %v621_v15 = vld [vmem:[%s7100_s1 + $0x650] sm:$0xff] }
 0x139   : > { %2909 = vmatpush1.bf16.msra.mxu1 %v4428_v35  ;;  %v613_v35 = vld [vmem:[%s7100_s1 + $0x610] sm:$0xff] }
 0x13a   : > { %2610 = vmatmul.mubr.bf16.gmra.mrb[36].mxu0 %v5527_v27  ;;  %2910 = vmatprep.subr.bf16.mxu1 %v4437_v37  ;;  %v4468_v37 = vcombine.low %v598_v16, %v602_v18  ;;  %v645_v18 = vld [vmem:[%s7100_s1 + $0x710] sm:$0xff] }
 0x13b   : > { %2685 = vmatpush1.bf16.msra.mxu0 %v4434_v41  ;;  %2619 = vmatprep.mubr.bf16.mxu0 %v5536_v34 }
 0x13c   : > { %2686 = vmatprep.subr.bf16.mxu0 %v4443_v43  ;;  %2836 = vmatmul.mubr.bf16.gmra.mrb[36].mxu1 %v5527_v27  ;;  %v590_v27 = vld [vmem:[%s7100_s1 + $0x558] sm:$0xff] }
 0x13d   : > { %2911 = vmatpush1.bf16.msra.mxu1 %v4436_v48  ;;  %2845 = vmatprep.mubr.bf16.mxu1 %v5536_v34  ;;  %v601_v34 = vld [vmem:[%s7100_s1 + $0x5b0] sm:$0xff]  ;;  %v4461_v12 = vcombine.high %v590_v27, %v594_v2  ;;  %v4460_v28 = vcombine.low %v590_v27, %v594_v2  ;;  %v618_v43 = vld [vmem:[%s7100_s1 + $0x638] sm:$0xff] }
 0x13e   : > { %2912 = vmatprep.subr.bf16.mxu1 %v4445_v51  ;;  %v4467_v21 = vcombine.high %v597_v8, %v601_v34  ;;  %v4466_v30 = vcombine.low %v597_v8, %v601_v34  ;;  %v625_v48 = vld [vmem:[%s7100_s1 + $0x670] sm:$0xff]  ;;  %v4484_v60 = vcombine.low %v614_v42, %v618_v43  ;;  %v634_v27 = vld [vmem:[%s7100_s1 + $0x6b8] sm:$0xff] }
 0x13f   : > { %2687 = vmatpush1.bf16.msra.mxu0 %v4442_v53  ;;  %v4485_v53 = vcombine.high %v614_v42, %v618_v43  ;;  %v641_v8 = vld [vmem:[%s7100_s1 + $0x6f0] sm:$0xff] }
 0x140   : > { %2688 = vmatprep.subr.bf16.mxu0 %v4451_v57  ;;  %v4491_v57 = vcombine.high %v621_v15, %v625_v48 }
 0x141   : > { %2913 = vmatpush1.bf16.msra.mxu1 %v4444_v62 }
 0x142   : > { %2620 = vmatmul.mubr.bf16.gmra.mrb[40].mxu0 %v5561_v45  ;;  %2914 = vmatprep.subr.bf16.mxu1 %v4453_v0  ;;  %v4490_v0 = vcombine.low %v621_v15, %v625_v48  ;;  %v662_v15 = vld [vmem:[%s7100_s1 + $0x798] sm:$0xff] }
 0x143   : > { %2689 = vmatpush1.bf16.msra.mxu0 %v4450_v1  ;;  %2629 = vmatprep.mubr.bf16.mxu0 %v5570_v52  ;;  %v630_v1 = vld [vmem:[%s7100_s1 + $0x698] sm:$0xff] }
 0x144   : > { %2690 = vmatprep.subr.bf16.mxu0 %v4459_v7  ;;  %2846 = vmatmul.mubr.bf16.gmra.mrb[40].mxu1 %v5561_v45  ;;  %v606_v45 = vld [vmem:[%s7100_s1 + $0x5d8] sm:$0xff]  ;;  %v637_v7 = vld [vmem:[%s7100_s1 + $0x6d0] sm:$0xff] }
 0x145   : > { %2915 = vmatpush1.bf16.msra.mxu1 %v4452_v10  ;;  %2855 = vmatprep.mubr.bf16.mxu1 %v5570_v52  ;;  %v617_v52 = vld [vmem:[%s7100_s1 + $0x630] sm:$0xff]  ;;  %v4477_v41 = vcombine.high %v606_v45, %v610_v32  ;;  %v4476_v51 = vcombine.low %v606_v45, %v610_v32  ;;  %v4501_v10 = vcombine.high %v630_v1, %v634_v27  ;;  %v666_v48 = vld [vmem:[%s7100_s1 + $0x7b8] sm:$0xff] }
 0x146   : > { %2916 = vmatprep.subr.bf16.mxu1 %v4461_v12  ;;  %v4483_v44 = vcombine.high %v613_v35, %v617_v52  ;;  %v4482_v54 = vcombine.low %v613_v35, %v617_v52  ;;  %v4507_v16 = vcombine.high %v637_v7, %v641_v8  ;;  %v4506_v24 = vcombine.low %v637_v7, %v641_v8  ;;  %v653_v45 = vld [vmem:[%s7100_s1 + $0x750] sm:$0xff] }
 0x147   : > { %2691 = vmatpush1.bf16.msra.mxu0 %v4458_v13  ;;  %v642_v13 = vld [vmem:[%s7100_s1 + $0x6f8] sm:$0xff]  ;;  %v657_v32 = vld [vmem:[%s7100_s1 + $0x770] sm:$0xff] }
 0x148   : > { %2692 = vmatprep.subr.bf16.mxu0 %v4467_v21  ;;  %v4500_v21 = vcombine.low %v630_v1, %v634_v27 }
 0x149   : > { %2917 = vmatpush1.bf16.msra.mxu1 %v4460_v28  ;;  %v646_v28 = vld [vmem:[%s7100_s1 + $0x718] sm:$0xff] }
 0x14a   : > { %2630 = vmatmul.mubr.bf16.gmra.mrb[44].mxu0 %v5595_v63  ;;  %2918 = vmatprep.subr.bf16.mxu1 %v4469_v29  ;;  %v650_v29 = vld [vmem:[%s7100_s1 + $0x738] sm:$0xff] }
 0x14b   : > { %2693 = vmatpush1.bf16.msra.mxu0 %v4466_v30  ;;  %2639 = vmatprep.mubr.bf16.mxu0 %v5604_v6  ;;  %v4517_v35 = vcombine.high %v646_v28, %v650_v29  ;;  %v4516_v42 = vcombine.low %v646_v28, %v650_v29 }
 0x14c   : > { %2694 = vmatprep.subr.bf16.mxu0 %v4475_v33  ;;  %2856 = vmatmul.mubr.bf16.gmra.mrb[44].mxu1 %v5595_v63  ;;  %v622_v63 = vld [vmem:[%s7100_s1 + $0x658] sm:$0xff] }
 0x14d   : > { %2919 = vmatpush1.bf16.msra.mxu1 %v4468_v37  ;;  %2865 = vmatprep.mubr.bf16.mxu1 %v5604_v6  ;;  %v633_v6 = vld [vmem:[%s7100_s1 + $0x6b0] sm:$0xff]  ;;  %v4493_v62 = vcombine.high %v622_v63, %v626_v55  ;;  %v4492_v34 = vcombine.low %v622_v63, %v626_v55  ;;  %v658_v37 = vld [vmem:[%s7100_s1 + $0x778] sm:$0xff]  ;;  %v4533_v55 = vcombine.high %v662_v15, %v666_v48 }
 0x14e   : > { %2920 = vmatprep.subr.bf16.mxu1 %v4477_v41  ;;  %v4499_v2 = vcombine.high %v629_v58, %v633_v6  ;;  %v4498_v12 = vcombine.low %v629_v58, %v633_v6  ;;  %v4523_v41 = vcombine.high %v653_v45, %v657_v32  ;;  %v674_v58 = vld [vmem:[%s7100_s1 + $0x7f8] sm:$0xff] }
 0x14f   : > { %2695 = vmatpush1.bf16.msra.mxu0 %v4474_v9  ;;  %v661_v9 = vld [vmem:[%s7100_s1 + $0x790] sm:$0xff] }
 0x150   : > { %2696 = vmatprep.subr.bf16.mxu0 %v4483_v44  ;;  %v4522_v44 = vcombine.low %v653_v45, %v657_v32 }
 0x151   : > { %2921 = vmatpush1.bf16.msra.mxu1 %v4476_v51 }
 0x152   : > { %2640 = vmatmul.mubr.bf16.gmra.mrb[48].mxu0 %v5629_v19  ;;  %2922 = vmatprep.subr.bf16.mxu1 %v4485_v53  ;;  %v669_v53 = vld [vmem:[%s7100_s1 + $0x7d0] sm:$0xff] }
 0x153   : > { %2697 = vmatpush1.bf16.msra.mxu0 %v4482_v54  ;;  %2649 = vmatprep.mubr.bf16.mxu0 %v5638_v26  ;;  %v673_v54 = vld [vmem:[%s7100_s1 + $0x7f0] sm:$0xff] }
 0x154   : > { %2698 = vmatprep.subr.bf16.mxu0 %v4491_v57  ;;  %2866 = vmatmul.mubr.bf16.gmra.mrb[48].mxu1 %v5629_v19  ;;  %v638_v19 = vld [vmem:[%s7100_s1 + $0x6d8] sm:$0xff]  ;;  %v4539_v6 = vcombine.high %v669_v53, %v673_v54 }
 0x155   : > { %2923 = vmatpush1.bf16.msra.mxu1 %v4484_v60  ;;  %2875 = vmatprep.mubr.bf16.mxu1 %v5638_v26  ;;  %v649_v26 = vld [vmem:[%s7100_s1 + $0x730] sm:$0xff]  ;;  %v4509_v23 = vcombine.high %v638_v19, %v642_v13  ;;  %v4508_v33 = vcombine.low %v638_v19, %v642_v13  ;;  %v4532_v60 = vcombine.low %v662_v15, %v666_v48 }
 0x156   : > { %2924 = vmatprep.subr.bf16.mxu1 %v4493_v62  ;;  %v4515_v30 = vcombine.high %v645_v18, %v649_v26  ;;  %v4514_v52 = vcombine.low %v645_v18, %v649_v26  ;;  %v4538_v62 = vcombine.low %v669_v53, %v673_v54 }
 0x157   : > { %2699 = vmatpush1.bf16.msra.mxu0 %v4490_v0 }
 0x158   : > { %2700 = vmatprep.subr.bf16.mxu0 %v4499_v2 }
 0x159   : > { %2925 = vmatpush1.bf16.msra.mxu1 %v4492_v34 }
 0x15a   : > { %2650 = vmatmul.mubr.bf16.gmra.mrb[52].mxu0 %v5663_v39  ;;  %2926 = vmatprep.subr.bf16.mxu1 %v4501_v10 }
 0x15b   : > { %2701 = vmatpush1.bf16.msra.mxu0 %v4498_v12  ;;  %2659 = vmatprep.mubr.bf16.mxu0 %v5672_v47 }
 0x15c   : > { %2702 = vmatprep.subr.bf16.mxu0 %v4507_v16  ;;  %2876 = vmatmul.mubr.bf16.gmra.mrb[52].mxu1 %v5663_v39  ;;  %v654_v39 = vld [vmem:[%s7100_s1 + $0x758] sm:$0xff] }
 0x15d   : > { %2927 = vmatpush1.bf16.msra.mxu1 %v4500_v21  ;;  %2885 = vmatprep.mubr.bf16.mxu1 %v5672_v47  ;;  %v665_v47 = vld [vmem:[%s7100_s1 + $0x7b0] sm:$0xff]  ;;  %v4525_v43 = vcombine.high %v654_v39, %v658_v37  ;;  %v4524_v63 = vcombine.low %v654_v39, %v658_v37 }
 0x15e   : > { %2928 = vmatprep.subr.bf16.mxu1 %v4509_v23  ;;  %v4531_v51 = vcombine.high %v661_v9, %v665_v47  ;;  %v4530_v57 = vcombine.low %v661_v9, %v665_v47 }
 0x15f   : > { %2703 = vmatpush1.bf16.msra.mxu0 %v4506_v24 }
 0x160   : > { %2704 = vmatprep.subr.bf16.mxu0 %v4515_v30 }
 0x161   : > { %2929 = vmatpush1.bf16.msra.mxu1 %v4508_v33 }
 0x162   : > { %2660 = vmatmul.mubr.bf16.gmra.mrb[56].mxu0 %v5697_v59  ;;  %2930 = vmatprep.subr.bf16.mxu1 %v4517_v35 }
 0x163   : > { %2705 = vmatpush1.bf16.msra.mxu0 %v4514_v52  ;;  %2669 = vmatprep.mubr.bf16.mxu0 %v5706_v3 }
 0x164   : > { %2706 = vmatprep.subr.bf16.mxu0 %v4523_v41  ;;  %2886 = vmatmul.mubr.bf16.gmra.mrb[56].mxu1 %v5697_v59  ;;  %v670_v59 = vld [vmem:[%s7100_s1 + $0x7d8] sm:$0xff] }
 0x165   : > { %2931 = vmatpush1.bf16.msra.mxu1 %v4516_v42  ;;  %2895 = vmatprep.mubr.bf16.mxu1 %v5706_v3  ;;  %v4541_v3 = vcombine.high %v670_v59, %v674_v58  ;;  %v4540_v0 = vcombine.low %v670_v59, %v674_v58 }
 0x166   : > { %2932 = vmatprep.subr.bf16.mxu1 %v4525_v43 }
 0x167   : > { %2707 = vmatpush1.bf16.msra.mxu0 %v4522_v44 }
 0x168   : > { %2708 = vmatprep.subr.bf16.mxu0 %v4531_v51 }
 0x169   : > { %2933 = vmatpush1.bf16.msra.mxu1 %v4524_v63 }
 0x16a   : > { %2670 = vmatmul.mubr.bf16.gmra.mrb[60].mxu0 %v5731_v17  ;;  %2934 = vmatprep.subr.bf16.mxu1 %v4533_v55 }
 0x16b   : > { %2709 = vmatpush1.bf16.msra.mxu0 %v4530_v57  ;;  %2712 = vmatprep.mubr.bf16.mxu0 %v5740_v25 }
 0x16c   : > { %2710 = vmatprep.subr.bf16.mxu0 %v4539_v6  ;;  %2896 = vmatmul.mubr.bf16.gmra.mrb[60].mxu1 %v5731_v17 }
 0x16d   : > { %2935 = vmatpush1.bf16.msra.mxu1 %v4532_v60  ;;  %2938 = vmatprep.mubr.bf16.mxu1 %v5740_v25 }
 0x16e   : > { %2936 = vmatprep.subr.bf16.mxu1 %v4541_v3 }
 0x16f   : > { %2711 = vmatpush1.bf16.msra.mxu0 %v4538_v62 }
 0x171   : > { %2937 = vmatpush1.bf16.msra.mxu1 %v4540_v0 }
 0x172   : > { %2713 = vmatmul.mubr.bf16.vlgmr.msra.gmra.mrb[32].mxu0 %v5764_v40 }
 0x173   : > { %2722 = vmatprep.mubr.bf16.mxu0 %v5774_v46 }
 0x174   : > { %2939 = vmatmul.mubr.bf16.vlgmr.msra.gmra.mrb[32].mxu1 %v5764_v40 }
 0x175   : > { %2948 = vmatprep.mubr.bf16.mxu1 %v5774_v46 }
 0x17a   : > { %2723 = vmatmul.mubr.bf16.gmra.mrb[36].mxu0 %v5799_v61 }
 0x17b   : > { %2732 = vmatprep.mubr.bf16.mxu0 %v5808_v5 }
 0x17c   : > { %2949 = vmatmul.mubr.bf16.gmra.mrb[36].mxu1 %v5799_v61 }
 0x17d   : > { %2958 = vmatprep.mubr.bf16.mxu1 %v5808_v5 }
 0x182   : > { %2733 = vmatmul.mubr.bf16.gmra.mrb[40].mxu0 %v5833_v22 }
 0x183   : > { %2742 = vmatprep.mubr.bf16.mxu0 %v5842_v31 }
 0x184   : > { %2959 = vmatmul.mubr.bf16.gmra.mrb[40].mxu1 %v5833_v22 }
 0x185   : > { %2968 = vmatprep.mubr.bf16.mxu1 %v5842_v31 }
 0x18a   : > { %2743 = vmatmul.mubr.bf16.gmra.mrb[44].mxu0 %v5867_v49 }
 0x18b   : > { %2752 = vmatprep.mubr.bf16.mxu0 %v5876_v56 }
 0x18c   : > { %2969 = vmatmul.mubr.bf16.gmra.mrb[44].mxu1 %v5867_v49 }
 0x18d   : > { %2978 = vmatprep.mubr.bf16.mxu1 %v5876_v56 }
 0x192   : > { %2753 = vmatmul.mubr.bf16.gmra.mrb[48].mxu0 %v5901_v11 }
 0x193   : > { %2762 = vmatprep.mubr.bf16.mxu0 %v5910_v20 }
 0x194   : > { %2979 = vmatmul.mubr.bf16.gmra.mrb[48].mxu1 %v5901_v11 }
 0x195   : > { %2988 = vmatprep.mubr.bf16.mxu1 %v5910_v20 }
 0x19a   : > { %2763 = vmatmul.mubr.bf16.gmra.mrb[52].mxu0 %v5935_v38 }
 0x19b   : > { %2772 = vmatprep.mubr.bf16.mxu0 %v5944_v50 }
 0x19c   : > { %2989 = vmatmul.mubr.bf16.gmra.mrb[52].mxu1 %v5935_v38 }
 0x19d   : > { %2998 = vmatprep.mubr.bf16.mxu1 %v5944_v50 }
 0x1a2   : > { %2773 = vmatmul.mubr.bf16.gmra.mrb[56].mxu0 %v5969_v4 }
 0x1a3   : > { %2782 = vmatprep.mubr.bf16.mxu0 %v5978_v14 }
 0x1a4   : > { %2999 = vmatmul.mubr.bf16.gmra.mrb[56].mxu1 %v5969_v4 }
 0x1a5   : > { %3008 = vmatprep.mubr.bf16.mxu1 %v5978_v14 }
 0x1aa   : > { %2783 = vmatmul.mubr.bf16.gmra.mrb[60].mxu0 %v6003_v36 }
 0x1ac   : > { %3009 = vmatmul.mubr.bf16.gmra.mrb[60].mxu1 %v6003_v36 }
 0x1c5   : > { %v6268_v17 = vpop.f32.mrb[0].mxu0  ;;  %v6270_v25 = vpop.f32.mrb[0].mxu1 }
 0x1c6   : > { %3067 = vrot.lane.b32.xlu0 %v6268_v17, %s5053_s28  ;;  %v6274_v40 = vpop.f32.mrb[1].mxu0  ;;  %v6276_v46 = vpop.f32.mrb[1].mxu1 }
 0x1c7   : > { %v6278_v61 = vpop.f32.mrb[2].mxu0  ;;  %v6280_v5 = vpop.f32.mrb[2].mxu1 }
 0x1c8   : > { %v6282_v22 = vpop.f32.mrb[3].mxu0  ;;  %3229 = vrot.lane.b32.xlu1 %v6280_v5, %s5053_s28  ;;  %v6286_v31 = vpop.f32.mrb[3].mxu1 }
 0x1ca   : > { %3227 = vrot.lane.b32.xlu0 %v6270_v25, %s5053_s28 }
 0x1cc   : > { %3149 = vrot.lane.b32.xlu1 %v6282_v22, %s5053_s28 }
 0x1cd   : > { %v6292_v49 = vpop.f32.mrb[4].mxu0 }
 0x1ce   : > { %v6294_v56 = vpop.f32.mrb[4].mxu1  ;;  %3147 = vrot.lane.b32.xlu0 %v6274_v40, %s5053_s28  ;;  %v6298_v11 = vpop.f32.mrb[5].mxu0 }
 0x1cf   : > { %v6300_v20 = vpop.f32.mrb[5].mxu1  ;;  %v6302_v38 = vpop.f32.mrb[6].mxu0 }
 0x1d0   : > { %v6304_v50 = vpop.f32.mrb[6].mxu1  ;;  %v6306_v4 = vpop.f32.mrb[7].mxu0  ;;  %3309 = vrot.lane.b32.xlu1 %v6286_v31, %s5053_s28 }
 0x1d1   : > { %v6308_v14 = vpop.f32.mrb[7].mxu1 }
 0x1d2   : > { %3307 = vrot.lane.b32.xlu0 %v6276_v46, %s5053_s28 }
 0x1d4   : > { %3071 = vrot.lane.b32.xlu1 %v6292_v49, %s5053_s28 }
 0x1d5   : > { %v6316_v36 = vpop.f32.mrb[8].mxu0 }
 0x1d6   : > { %v6318_v1 = vpop.f32.mrb[8].mxu1  ;;  %3069 = vrot.lane.b32.xlu0 %v6278_v61, %s5053_s28  ;;  %v6322_v27 = vpop.f32.mrb[9].mxu0 }
 0x1d7   : > { %v6324_v2 = vpop.f32.mrb[9].mxu1  ;;  %v6326_v7 = vpop.f32.mrb[10].mxu0 }
 0x1d8   : > { %v6328_v8 = vpop.f32.mrb[10].mxu1  ;;  %v6330_v34 = vpop.f32.mrb[11].mxu0  ;;  %3073 = vrot.lane.b32.xlu1 %v6302_v38, %s5053_s28 }
 0x1d9   : > { %v6332_v10 = vpop.f32.mrb[11].mxu1 }
 0x1da   : > { %3231 = vrot.lane.b32.xlu0 %v6294_v56, %s5053_s28 }
 0x1dc   : > { %3233 = vrot.lane.b32.xlu1 %v6304_v50, %s5053_s28 }
 0x1dd   : > { %v6340_v12 = vpop.f32.mrb[12].mxu0 }
 0x1de   : > { %v6342_v19 = vpop.f32.mrb[12].mxu1  ;;  %3151 = vrot.lane.b32.xlu0 %v6298_v11, %s5053_s28  ;;  %v6346_v13 = vpop.f32.mrb[13].mxu0 }
 0x1df   : > { %v6348_v16 = vpop.f32.mrb[13].mxu1  ;;  %v6350_v18 = vpop.f32.mrb[14].mxu0 }
 0x1e0   : > { %v6352_v26 = vpop.f32.mrb[14].mxu1  ;;  %v6354_v21 = vpop.f32.mrb[15].mxu0  ;;  %3153 = vrot.lane.b32.xlu1 %v6306_v4, %s5053_s28 }
 0x1e1   : > { %v6356_v23 = vpop.f32.mrb[15].mxu1 }
 0x1e2   : > { %3311 = vrot.lane.b32.xlu0 %v6300_v20, %s5053_s28 }
 0x1e4   : > { %3313 = vrot.lane.b32.xlu1 %v6308_v14, %s5053_s28 }
 0x1e5   : > { %v6364_v24 = vpop.f32.mrb[16].mxu0 }
 0x1e6   : > { %v6366_v28 = vpop.f32.mrb[16].mxu1  ;;  %3075 = vrot.lane.b32.xlu0 %v6316_v36, %s5053_s28  ;;  %v6370_v29 = vpop.f32.mrb[17].mxu0 }
 0x1e7   : > { %v6372_v30 = vpop.f32.mrb[17].mxu1  ;;  %v6374_v45 = vpop.f32.mrb[18].mxu0 }
 0x1e8   : > { %v6376_v32 = vpop.f32.mrb[18].mxu1  ;;  %v6378_v33 = vpop.f32.mrb[19].mxu0  ;;  %3077 = vrot.lane.b32.xlu1 %v6326_v7, %s5053_s28 }
 0x1e9   : > { %v6380_v35 = vpop.f32.mrb[19].mxu1 }
 0x1ea   : > { %3235 = vrot.lane.b32.xlu0 %v6318_v1, %s5053_s28 }
 0x1ec   : > { %3237 = vrot.lane.b32.xlu1 %v6328_v8, %s5053_s28 }
 0x1ed   : > { %v6388_v52 = vpop.f32.mrb[20].mxu0 }
 0x1ee   : > { %v6390_v39 = vpop.f32.mrb[20].mxu1  ;;  %3155 = vrot.lane.b32.xlu0 %v6322_v27, %s5053_s28  ;;  %v6394_v37 = vpop.f32.mrb[21].mxu0 }
 0x1ef   : > { %7158 = vst [vmem:[#allocation9_spill] sm:$0xff] %v6390_v39  ;;  %7159 = vst [vmem:[#allocation10_spill] sm:$0xff] %v6394_v37  ;;  %v6396_v41 = vpop.f32.mrb[21].mxu1  ;;  %v6398_v9 = vpop.f32.mrb[22].mxu0 }
 0x1f0   : > { %7160 = vst [vmem:[#allocation11_spill] sm:$0xff] %v6396_v41  ;;  %7161 = vst [vmem:[#allocation12_spill] sm:$0xff] %v6398_v9  ;;  %v6400_v47 = vpop.f32.mrb[22].mxu1  ;;  %v6402_v42 = vpop.f32.mrb[23].mxu0  ;;  %3157 = vrot.lane.b32.xlu1 %v6330_v34, %s5053_s28 }
 0x1f1   : > { %7162 = vst [vmem:[#allocation13_spill] sm:$0xff] %v6400_v47  ;;  %7163 = vst [vmem:[#allocation14_spill] sm:$0xff] %v6402_v42  ;;  %v6404_v43 = vpop.f32.mrb[23].mxu1 }
 0x1f2   : > { %7164 = vst [vmem:[#allocation15_spill] sm:$0xff] %v6404_v43  ;;  %3315 = vrot.lane.b32.xlu0 %v6324_v2, %s5053_s28 }
 0x1f4   : > { %3317 = vrot.lane.b32.xlu1 %v6332_v10, %s5053_s28 }
 0x1f5   : > { %v6412_v44 = vpop.f32.mrb[24].mxu0 }
 0x1f6   : > { %7165 = vst [vmem:[#allocation16_spill] sm:$0xff] %v6412_v44  ;;  %v6414_v15 = vpop.f32.mrb[24].mxu1  ;;  %3079 = vrot.lane.b32.xlu0 %v6340_v12, %s5053_s28  ;;  %v6418_v48 = vpop.f32.mrb[25].mxu0 }
 0x1f7   : > { %7166 = vst [vmem:[#allocation17_spill] sm:$0xff] %v6414_v15  ;;  %7167 = vst [vmem:[#allocation18_spill] sm:$0xff] %v6418_v48  ;;  %v6420_v51 = vpop.f32.mrb[25].mxu1  ;;  %v6422_v53 = vpop.f32.mrb[26].mxu0 }
 0x1f8   : > { %7168 = vst [vmem:[#allocation19_spill] sm:$0xff] %v6420_v51  ;;  %7169 = vst [vmem:[#allocation20_spill] sm:$0xff] %v6422_v53  ;;  %v6424_v54 = vpop.f32.mrb[26].mxu1  ;;  %v6426_v63 = vpop.f32.mrb[27].mxu0  ;;  %3081 = vrot.lane.b32.xlu1 %v6350_v18, %s5053_s28 }
 0x1f9   : > { %7170 = vst [vmem:[#allocation21_spill] sm:$0xff] %v6424_v54  ;;  %7171 = vst [vmem:[#allocation22_spill] sm:$0xff] %v6426_v63  ;;  %v6428_v55 = vpop.f32.mrb[27].mxu1 }
 0x1fa   : > { %7172 = vst [vmem:[#allocation23_spill] sm:$0xff] %v6428_v55  ;;  %3239 = vrot.lane.b32.xlu0 %v6342_v19, %s5053_s28 }
 0x1fc   : > { %3241 = vrot.lane.b32.xlu1 %v6352_v26, %s5053_s28 }
 0x1fd   : > { %v6436_v57 = vpop.f32.mrb[28].mxu0 }
 0x1fe   : > { %7173 = vst [vmem:[#allocation24_spill] sm:$0xff] %v6436_v57  ;;  %v6438_v59 = vpop.f32.mrb[28].mxu1  ;;  %3159 = vrot.lane.b32.xlu0 %v6346_v13, %s5053_s28  ;;  %v6442_v58 = vpop.f32.mrb[29].mxu0 }
 0x1ff   : > { %7174 = vst [vmem:[#allocation25_spill] sm:$0xff] %v6438_v59  ;;  %7175 = vst [vmem:[#allocation26_spill] sm:$0xff] %v6442_v58  ;;  %v6444_v6 = vpop.f32.mrb[29].mxu1  ;;  %v6446_v60 = vpop.f32.mrb[30].mxu0 }
 0x200   : > { %7176 = vst [vmem:[#allocation27_spill] sm:$0xff] %v6446_v60  ;;  %v6448_v3 = vpop.f32.mrb[30].mxu1  ;;  %v6450_v62 = vpop.f32.mrb[31].mxu0  ;;  %3161 = vrot.lane.b32.xlu1 %v6354_v21, %s5053_s28 }
 0x201   : > { %7177 = vst [vmem:[#allocation28_spill] sm:$0xff] %v6448_v3  ;;  %7178 = vst [vmem:[#allocation29_spill] sm:$0xff] %v6450_v62  ;;  %v6452_v0 = vpop.f32.mrb[31].mxu1 }
 0x202   : > { %3319 = vrot.lane.b32.xlu0 %v6348_v16, %s5053_s28 }
 0x204   : > { %3321 = vrot.lane.b32.xlu1 %v6356_v23, %s5053_s28 }
 0x206   : > { %3083 = vrot.lane.b32.xlu0 %v6364_v24, %s5053_s28 }
 0x208   : > { %3085 = vrot.lane.b32.xlu1 %v6374_v45, %s5053_s28 }
 0x20a   : > { %3243 = vrot.lane.b32.xlu0 %v6366_v28, %s5053_s28 }
 0x20c   : > { %3245 = vrot.lane.b32.xlu1 %v6376_v32, %s5053_s28 }
 0x20e   : > { %3163 = vrot.lane.b32.xlu0 %v6370_v29, %s5053_s28 }
 0x210   : > { %3165 = vrot.lane.b32.xlu1 %v6378_v33, %s5053_s28 }
 0x212   : > { %3323 = vrot.lane.b32.xlu0 %v6372_v30, %s5053_s28 }
 0x214   : > { %3325 = vrot.lane.b32.xlu1 %v6380_v35, %s5053_s28 }
 0x216   : > { %3087 = vrot.lane.b32.xlu0 %v6388_v52, %s5053_s28 }
 0x218   : > { %3089 = vrot.lane.b32.xlu1 %v6398_v9, %s5053_s28 }
 0x21a   : > { %3247 = vrot.lane.b32.xlu0 %v6390_v39, %s5053_s28 }
 0x21c   : > { %3249 = vrot.lane.b32.xlu1 %v6400_v47, %s5053_s28 }
 0x21e   : > { %3167 = vrot.lane.b32.xlu0 %v6394_v37, %s5053_s28 }
 0x220   : > { %3169 = vrot.lane.b32.xlu1 %v6402_v42, %s5053_s28 }
 0x222   : > { %3327 = vrot.lane.b32.xlu0 %v6396_v41, %s5053_s28 }
 0x224   : > { %3329 = vrot.lane.b32.xlu1 %v6404_v43, %s5053_s28 }
 0x226   : > { %3091 = vrot.lane.b32.xlu0 %v6412_v44, %s5053_s28  ;;  %v3020_v44 = vld [vmem:[%s5275_s14 + $0x8] sm:$0xff] }
 0x228   : > { %3093 = vrot.lane.b32.xlu1 %v6422_v53, %s5053_s28  ;;  %v3036_v53 = vld [vmem:[%s6513_s16 + $0x8] sm:$0xff] }
 0x22a   : > { %3251 = vrot.lane.b32.xlu0 %v6414_v15, %s5053_s28 }
 0x22c   : > { %3253 = vrot.lane.b32.xlu1 %v6424_v54, %s5053_s28  ;;  %v3035_v54 = vld [vmem:[%s6513_s16] sm:$0xff] }
 0x22e   : > { %3171 = vrot.lane.b32.xlu0 %v6418_v48, %s5053_s28 }
 0x230   : > { %3173 = vrot.lane.b32.xlu1 %v6426_v63, %s5053_s28  ;;  %v3019_v63 = vld [vmem:[%s5275_s14] sm:$0xff] }
 0x231   : > { %v3051_v48 = vmul.f32 %v3019_v63, %v6268_v17  ;;  %v3212_v17 = vmul.f32 %v3020_v44, %v6280_v5 }
 0x232   : > { %3331 = vrot.lane.b32.xlu0 %v6420_v51, %s5053_s28 }
 0x234   : > { %3333 = vrot.lane.b32.xlu1 %v6428_v55, %s5053_s28 }
 0x236   : > { %3095 = vrot.lane.b32.xlu0 %v6436_v57, %s5053_s28 }
 0x238   : > { %v3068_v15 = vpop.permute.xlu0 %3067  ;;  %3097 = vrot.lane.b32.xlu1 %v6446_v60, %s5053_s28 }
 0x239   : > { %v3099_v51 = vmul.f32 %v3068_v15, %v3035_v54  ;;  %v3131_v15 = vmul.f32 %v3019_v63, %v6274_v40 }
 0x23a   : > { %3255 = vrot.lane.b32.xlu0 %v6438_v59, %s5053_s28  ;;  %v3230_v55 = vpop.permute.xlu1 %3229 }
 0x23b   : > { %v3115_v59 = vadd.f32 %v3099_v51, %v3051_v48  ;;  %v3260_v60 = vmul.f32 %v3230_v55, %v3036_v53  ;;  %v3292_v55 = vmul.f32 %v3020_v44, %v6286_v31 }
 0x23c   : > { %v3228_v57 = vpop.permute.xlu0 %3227  ;;  %3257 = vrot.lane.b32.xlu1 %v6448_v3, %s5053_s28  ;;  %v3211_v3 = vmul.f32 %v3019_v63, %v6270_v25 }
 0x23d   : > { %v3259_v42 = vmul.f32 %v3228_v57, %v3035_v54  ;;  %v3371_v40 = vmul.f32 0.088388346, %v3115_v59  ;;  %v3276_v57 = vadd.f32 %v3260_v60, %v3212_v17 }
 0x23e   : > { %3175 = vrot.lane.b32.xlu0 %v6442_v58, %s5053_s28  ;;  %v3150_v43 = vpop.permute.xlu1 %3149  ;;  %v3291_v58 = vmul.f32 %v3019_v63, %v6276_v46  ;;  %v3052_v63 = vmul.f32 %v3020_v44, %v6278_v61 }
 0x23f   : > { %v3180_v9 = vmul.f32 %v3150_v43, %v3036_v53  ;;  %v3377_v59 = vmul.f32 0.088388346, %v3276_v57 }
 0x240   : > { %v3148_v47 = vpop.permute.xlu0 %3147  ;;  %3177 = vrot.lane.b32.xlu1 %v6450_v62, %s5053_s28  ;;  %v3275_v62 = vadd.f32 %v3259_v42, %v3211_v3 }
 0x241   : > { %v3179_v41 = vmul.f32 %v3148_v47, %v3035_v54 }
 0x242   : > { %3335 = vrot.lane.b32.xlu0 %v6444_v6, %s5053_s28  ;;  %v3310_v51 = vpop.permute.xlu1 %3309  ;;  %v3373_v17 = vmul.f32 0.088388346, %v3275_v62 }
 0x243   : > { %v3195_v48 = vadd.f32 %v3179_v41, %v3131_v15  ;;  %v3340_v47 = vmul.f32 %v3310_v51, %v3036_v53  ;;  %v3037_v51 = vld [vmem:[%s6513_s16 + $0x10] sm:$0xff] }
 0x244   : > { %v3308_v39 = vpop.permute.xlu0 %3307  ;;  %3337 = vrot.lane.b32.xlu1 %v6452_v0, %s5053_s28 }
 0x245   : > { %v3372_v5 = vmul.f32 0.088388346, %v3195_v48  ;;  %v3339_v37 = vmul.f32 %v3308_v39, %v3035_v54  ;;  %v6542_v25 = vpop.f32.mrb[32].mxu0  ;;  %v3356_v46 = vadd.f32 %v3340_v47, %v3292_v55  ;;  %v3132_v39 = vmul.f32 %v3020_v44, %v6282_v22 }
 0x246   : > { %3675 = vrot.lane.b32.xlu0 %v6542_v25, %s5053_s28  ;;  %v6551_v31 = vpop.f32.mrb[33].mxu0  ;;  %v3072_v43 = vpop.permute.xlu1 %3071 }
 0x247   : > { %v4615_v41 = vpack.c.bf16 %v3372_v5, %v3371_v40  ;;  %v3355_v42 = vadd.f32 %v3339_v37, %v3291_v58  ;;  %v6554_v54 = vpop.f32.mrb[34].mxu0  ;;  %v3378_v60 = vmul.f32 0.088388346, %v3356_v46  ;;  %v3196_v48 = vadd.f32 %v3180_v9, %v3132_v39  ;;  %v2940_v58 = vpop.f32.mrb[32].mxu1  ;;  %v3021_v9 = vld [vmem:[%s5275_s14 + $0x10] sm:$0xff] }
 0x248   : > { %v3070_v3 = vpop.permute.xlu0 %3069  ;;  %v6558_v15 = vpop.f32.mrb[35].mxu0  ;;  %3677 = vrot.lane.b32.xlu1 %v6554_v54, %s5053_s28  ;;  %v3101_v47 = vmul.f32 %v3072_v43, %v3037_v51 }
 0x249   : > { %3627 = vst [vmem:[%s6547_s21] sm:$0xff] %v4615_v41  ;;  %v3374_v22 = vmul.f32 0.088388346, %v3355_v42  ;;  %v3100_v37 = vmul.f32 %v3070_v3, %v3036_v53  ;;  %v4618_v55 = vpack.c.bf16 %v3378_v60, %v3377_v59  ;;  %v2942_v61 = vpop.f32.mrb[33].mxu1  ;;  %v3376_v39 = vmul.f32 0.088388346, %v3196_v48  ;;  %v6577_v42 = vld [vmem:[%s6513_s16 + $0x18] sm:$0xff] }
 0x24a   : > { %3755 = vrot.lane.b32.xlu0 %v6551_v31, %s5053_s28  ;;  %v3074_v62 = vpop.permute.xlu1 %3073  ;;  %v4663_v40 = vpack.c.bf16 %v2942_v61, %v2940_v58  ;;  %v2944_v57 = vpop.f32.mrb[34].mxu1  ;;  %v3053_v60 = vmul.f32 %v3021_v9, %v6292_v49  ;;  %v6590_v3 = vld [vmem:[%s5275_s14 + $0x18] sm:$0xff]  ;;  %v3133_v49 = vmul.f32 %v3021_v9, %v6298_v11 }
 0x24b   : > { %v4616_v44 = vpack.c.bf16 %v3374_v22, %v3373_v17  ;;  %v3116_v53 = vadd.f32 %v3100_v37, %v3052_v63  ;;  %3630 = vst [vmem:[%s6547_s21 + $0x18] sm:$0xff] %v4618_v55  ;;  %v2946_v46 = vpop.f32.mrb[35].mxu1  ;;  %v3102_v58 = vmul.f32 %v3074_v62, %v6577_v42  ;;  %v3134_v11 = vmul.f32 %v6590_v3, %v6306_v4 }
 0x24c   : > { %v3232_v5 = vpop.permute.xlu0 %3231  ;;  %3757 = vrot.lane.b32.xlu1 %v6558_v15, %s5053_s28  ;;  %4027 = vst [vmem:[%s6571_s27] sm:$0xff] %v4663_v40  ;;  %v4664_v63 = vpack.c.bf16 %v2946_v46, %v2944_v57  ;;  %v3117_v37 = vadd.f32 %v3101_v47, %v3053_v60  ;;  %v3213_v57 = vmul.f32 %v3021_v9, %v6294_v56 }
 0x24d   : > { %3628 = vst [vmem:[%s6547_s21 + $0x8] sm:$0xff] %v4616_v44  ;;  %v3375_v41 = vmul.f32 0.088388346, %v3116_v53  ;;  %v6581_v59 = vpop.f32.mrb[36].mxu0  ;;  %v3261_v44 = vmul.f32 %v3232_v5, %v3037_v51  ;;  %v3054_v46 = vmul.f32 %v6590_v3, %v6302_v38  ;;  %v3293_v47 = vmul.f32 %v3021_v9, %v6300_v20 }
 0x24e   : > { %7179 = vst [vmem:[#allocation30_spill] sm:$0xff] %v6581_v59  ;;  %3679 = vrot.lane.b32.xlu0 %v6581_v59, %s5053_s28  ;;  %v6587_v43 = vpop.f32.mrb[37].mxu0  ;;  %v3234_v48 = vpop.permute.xlu1 %3233  ;;  %4028 = vst [vmem:[%s6571_s27 + $0x8] sm:$0xff] %v4664_v63  ;;  %v3379_v60 = vmul.f32 0.088388346, %v3117_v37  ;;  %v3214_v37 = vmul.f32 %v6590_v3, %v6304_v50 }
 0x24f   : > { %7180 = vst [vmem:[#allocation31_spill] sm:$0xff] %v6587_v43  ;;  %v4617_v17 = vpack.c.bf16 %v3376_v39, %v3375_v41  ;;  %v6592_v22 = vpop.f32.mrb[38].mxu0  ;;  %v2950_v40 = vpop.f32.mrb[36].mxu1  ;;  %v3262_v56 = vmul.f32 %v3234_v48, %v6577_v42 }
 0x250   : > { %7181 = vst [vmem:[#allocation32_spill] sm:$0xff] %v6592_v22  ;;  %v3152_v55 = vpop.permute.xlu0 %3151  ;;  %v6596_v61 = vpop.f32.mrb[39].mxu0  ;;  %3681 = vrot.lane.b32.xlu1 %v6592_v22, %s5053_s28 }
 0x251   : > { %3629 = vst [vmem:[%s6547_s21 + $0x10] sm:$0xff] %v4617_v17  ;;  %v3181_v53 = vmul.f32 %v3152_v55, %v3037_v51  ;;  %v2952_v62 = vpop.f32.mrb[37].mxu1  ;;  %v3118_v17 = vadd.f32 %v3102_v58, %v3054_v46  ;;  %v3278_v50 = vadd.f32 %v3262_v56, %v3214_v37 }
 0x252   : > { %3759 = vrot.lane.b32.xlu0 %v6587_v43, %s5053_s28  ;;  %v3154_v39 = vpop.permute.xlu1 %3153  ;;  %v4665_v41 = vpack.c.bf16 %v2952_v62, %v2950_v40  ;;  %v2954_v63 = vpop.f32.mrb[38].mxu1  ;;  %v3277_v43 = vadd.f32 %v3261_v44, %v3213_v57 }
 0x253   : > { %v3197_v5 = vadd.f32 %v3181_v53, %v3133_v49  ;;  %v3182_v38 = vmul.f32 %v3154_v39, %v6577_v42  ;;  %v2956_v22 = vpop.f32.mrb[39].mxu1 }
 0x254   : > { %v3312_v55 = vpop.permute.xlu0 %3311  ;;  %3761 = vrot.lane.b32.xlu1 %v6596_v61, %s5053_s28  ;;  %4029 = vst [vmem:[%s6571_s27 + $0x10] sm:$0xff] %v4665_v41  ;;  %v4666_v9 = vpack.c.bf16 %v2956_v22, %v2954_v63  ;;  %v3383_v22 = vmul.f32 0.088388346, %v3118_v17 }
 0x255   : > { %v3380_v59 = vmul.f32 0.088388346, %v3197_v5  ;;  %v3341_v20 = vmul.f32 %v3312_v55, %v3037_v51  ;;  %v6614_v4 = vpop.f32.mrb[40].mxu0  ;;  %v3198_v58 = vadd.f32 %v3182_v38, %v3134_v11  ;;  %v3294_v51 = vmul.f32 %v6590_v3, %v6308_v14  ;;  %v6633_v14 = vld [vmem:[%s6513_s16 + $0x20] sm:$0xff] }
 0x256   : > { %3683 = vrot.lane.b32.xlu0 %v6614_v4, %s5053_s28  ;;  %v6621_v48 = vpop.f32.mrb[41].mxu0  ;;  %v3314_v53 = vpop.permute.xlu1 %3313  ;;  %4030 = vst [vmem:[%s6571_s27 + $0x18] sm:$0xff] %v4666_v9  ;;  %v3381_v5 = vmul.f32 0.088388346, %v3277_v43  ;;  %v3385_v55 = vmul.f32 0.088388346, %v3278_v50 }
 0x257   : > { %v4619_v49 = vpack.c.bf16 %v3380_v59, %v3379_v60  ;;  %v3357_v44 = vadd.f32 %v3341_v20, %v3293_v47  ;;  %v6625_v40 = vpop.f32.mrb[42].mxu0  ;;  %v3384_v57 = vmul.f32 0.088388346, %v3198_v58  ;;  %v3342_v46 = vmul.f32 %v3314_v53, %v6577_v42  ;;  %v2960_v59 = vpop.f32.mrb[40].mxu1  ;;  %v6640_v60 = vld [vmem:[%s5275_s14 + $0x20] sm:$0xff] }
 0x258   : > { %v3076_v62 = vpop.permute.xlu0 %3075  ;;  %v6629_v11 = vpop.f32.mrb[43].mxu0  ;;  %3685 = vrot.lane.b32.xlu1 %v6625_v40, %s5053_s28  ;;  %v3055_v53 = vmul.f32 %v6640_v60, %v6316_v36  ;;  %v3135_v36 = vmul.f32 %v6640_v60, %v6322_v27  ;;  %v3295_v27 = vmul.f32 %v6640_v60, %v6324_v2 }
 0x259   : > { %3631 = vst [vmem:[%s6547_s21 + $0x20] sm:$0xff] %v4619_v49  ;;  %v3382_v39 = vmul.f32 0.088388346, %v3357_v44  ;;  %v4621_v47 = vpack.c.bf16 %v3384_v57, %v3383_v22  ;;  %v3358_v41 = vadd.f32 %v3342_v46, %v3294_v51  ;;  %v2962_v63 = vpop.f32.mrb[41].mxu1  ;;  %v3103_v9 = vmul.f32 %v3076_v62, %v6633_v14  ;;  %v6646_v51 = vld [vmem:[%s6513_s16 + $0x28] sm:$0xff] }
 0x25a   : > { %3763 = vrot.lane.b32.xlu0 %v6621_v48, %s5053_s28  ;;  %v3078_v17 = vpop.permute.xlu1 %3077  ;;  %v4667_v56 = vpack.c.bf16 %v2962_v63, %v2960_v59  ;;  %v2964_v38 = vpop.f32.mrb[42].mxu1  ;;  %v6660_v57 = vld [vmem:[%s5275_s14 + $0x28] sm:$0xff] }
 0x25b   : > { %v4620_v43 = vpack.c.bf16 %v3382_v39, %v3381_v5  ;;  %3633 = vst [vmem:[%s6547_s21 + $0x30] sm:$0xff] %v4621_v47  ;;  %v3386_v20 = vmul.f32 0.088388346, %v3358_v41  ;;  %v2966_v58 = vpop.f32.mrb[43].mxu1  ;;  %v3119_v5 = vadd.f32 %v3103_v9, %v3055_v53  ;;  %v3104_v39 = vmul.f32 %v3078_v17, %v6646_v51 }
 0x25c   : > { %v3236_v37 = vpop.permute.xlu0 %3235  ;;  %3765 = vrot.lane.b32.xlu1 %v6629_v11, %s5053_s28  ;;  %4031 = vst [vmem:[%s6571_s27 + $0x20] sm:$0xff] %v4667_v56  ;;  %v4668_v44 = vpack.c.bf16 %v2966_v58, %v2964_v38  ;;  %v3215_v56 = vmul.f32 %v6640_v60, %v6318_v1  ;;  %v3056_v17 = vmul.f32 %v6660_v57, %v6326_v7 }
 0x25d   : > { %3632 = vst [vmem:[%s6547_s21 + $0x28] sm:$0xff] %v4620_v43  ;;  %v6650_v49 = vpop.f32.mrb[44].mxu0  ;;  %v4622_v22 = vpack.c.bf16 %v3386_v20, %v3385_v55  ;;  %v3263_v41 = vmul.f32 %v3236_v37, %v6633_v14  ;;  %v3136_v55 = vmul.f32 %v6660_v57, %v6330_v34 }
 0x25e   : > { %3687 = vrot.lane.b32.xlu0 %v6650_v49, %s5053_s28  ;;  %v6657_v50 = vpop.f32.mrb[45].mxu0  ;;  %v3238_v46 = vpop.permute.xlu1 %3237  ;;  %4032 = vst [vmem:[%s6571_s27 + $0x28] sm:$0xff] %v4668_v44  ;;  %v3387_v44 = vmul.f32 0.088388346, %v3119_v5  ;;  %v3120_v1 = vadd.f32 %v3104_v39, %v3056_v17  ;;  %v3216_v5 = vmul.f32 %v6660_v57, %v6328_v8 }
 0x25f   : > { %7182 = vst [vmem:[#allocation33_spill] sm:$0xff] %v6657_v50  ;;  %v6662_v62 = vpop.f32.mrb[46].mxu0  ;;  %3634 = vst [vmem:[%s6547_s21 + $0x38] sm:$0xff] %v4622_v22  ;;  %v2970_v43 = vpop.f32.mrb[44].mxu1  ;;  %v3264_v53 = vmul.f32 %v3238_v46, %v6646_v51 }
 0x260   : > { %7183 = vst [vmem:[#allocation34_spill] sm:$0xff] %v6662_v62  ;;  %v3156_v59 = vpop.permute.xlu0 %3155  ;;  %v6667_v47 = vpop.f32.mrb[47].mxu0  ;;  %3689 = vrot.lane.b32.xlu1 %v6662_v62, %s5053_s28  ;;  %v3279_v62 = vadd.f32 %v3263_v41, %v3215_v56  ;;  %v3296_v41 = vmul.f32 %v6660_v57, %v6332_v10  ;;  %v6709_v10 = vld [vmem:[%s6513_s16 + $0x30] sm:$0xff] }
 0x261   : > { %v3183_v63 = vmul.f32 %v3156_v59, %v6633_v14  ;;  %v2972_v38 = vpop.f32.mrb[45].mxu1  ;;  %v3280_v8 = vadd.f32 %v3264_v53, %v3216_v5  ;;  %v6716_v53 = vld [vmem:[%s5275_s14 + $0x30] sm:$0xff] }
 0x262   : > { %3767 = vrot.lane.b32.xlu0 %v6657_v50, %s5053_s28  ;;  %v3158_v9 = vpop.permute.xlu1 %3157  ;;  %v4669_v37 = vpack.c.bf16 %v2972_v38, %v2970_v43  ;;  %v2974_v58 = vpop.f32.mrb[46].mxu1  ;;  %v3391_v38 = vmul.f32 0.088388346, %v3120_v1 }
 0x263   : > { %v3199_v20 = vadd.f32 %v3183_v63, %v3135_v36  ;;  %v3184_v7 = vmul.f32 %v3158_v9, %v6646_v51  ;;  %v2976_v59 = vpop.f32.mrb[47].mxu1 }
 0x264   : > { %v3316_v22 = vpop.permute.xlu0 %3315  ;;  %3769 = vrot.lane.b32.xlu1 %v6667_v47, %s5053_s28  ;;  %4033 = vst [vmem:[%s6571_s27 + $0x30] sm:$0xff] %v4669_v37  ;;  %v4670_v36 = vpack.c.bf16 %v2976_v59, %v2974_v58  ;;  %v3389_v58 = vmul.f32 0.088388346, %v3279_v62 }
 0x265   : > { %v3388_v50 = vmul.f32 0.088388346, %v3199_v20  ;;  %v3343_v2 = vmul.f32 %v3316_v22, %v6633_v14  ;;  %v6690_v34 = vpop.f32.mrb[48].mxu0  ;;  %v3200_v46 = vadd.f32 %v3184_v7, %v3136_v55 }
 0x266   : > { %3691 = vrot.lane.b32.xlu0 %v6690_v34, %s5053_s28  ;;  %v6697_v39 = vpop.f32.mrb[49].mxu0  ;;  %v3318_v56 = vpop.permute.xlu1 %3317  ;;  %4034 = vst [vmem:[%s6571_s27 + $0x38] sm:$0xff] %v4670_v36  ;;  %v3393_v36 = vmul.f32 0.088388346, %v3280_v8  ;;  %v3057_v8 = vmul.f32 %v6716_v53, %v6340_v12  ;;  %v3137_v12 = vmul.f32 %v6716_v53, %v6346_v13  ;;  %v3297_v13 = vmul.f32 %v6716_v53, %v6348_v16 }
 0x267   : > { %v4623_v63 = vpack.c.bf16 %v3388_v50, %v3387_v44  ;;  %v3359_v43 = vadd.f32 %v3343_v2, %v3295_v27  ;;  %v6701_v17 = vpop.f32.mrb[50].mxu0  ;;  %v3392_v55 = vmul.f32 0.088388346, %v3200_v46  ;;  %v3344_v20 = vmul.f32 %v3318_v56, %v6646_v51  ;;  %v2980_v50 = vpop.f32.mrb[48].mxu1 }
 0x268   : > { %v3080_v9 = vpop.permute.xlu0 %3079  ;;  %v6705_v37 = vpop.f32.mrb[51].mxu0  ;;  %3693 = vrot.lane.b32.xlu1 %v6701_v17, %s5053_s28 }
 0x269   : > { %7184 = vst [vmem:[#allocation35_spill] sm:$0xff] %v6705_v37  ;;  %3635 = vst [vmem:[%s6547_s21 + $0x40] sm:$0xff] %v4623_v63  ;;  %v3390_v7 = vmul.f32 0.088388346, %v3359_v43  ;;  %v4625_v27 = vpack.c.bf16 %v3392_v55, %v3391_v38  ;;  %v3360_v44 = vadd.f32 %v3344_v20, %v3296_v41  ;;  %v2982_v1 = vpop.f32.mrb[49].mxu1  ;;  %v3105_v46 = vmul.f32 %v3080_v9, %v6709_v10  ;;  %v6722_v43 = vld [vmem:[%s6513_s16 + $0x38] sm:$0xff] }
 0x26a   : > { %3771 = vrot.lane.b32.xlu0 %v6697_v39, %s5053_s28  ;;  %v3082_v22 = vpop.permute.xlu1 %3081  ;;  %v4671_v59 = vpack.c.bf16 %v2982_v1, %v2980_v50  ;;  %v2984_v2 = vpop.f32.mrb[50].mxu1  ;;  %v6736_v9 = vld [vmem:[%s5275_s14 + $0x38] sm:$0xff] }
 0x26b   : > { %v4624_v62 = vpack.c.bf16 %v3390_v7, %v3389_v58  ;;  %3637 = vst [vmem:[%s6547_s21 + $0x50] sm:$0xff] %v4625_v27  ;;  %v3394_v5 = vmul.f32 0.088388346, %v3360_v44  ;;  %v2986_v41 = vpop.f32.mrb[51].mxu1  ;;  %v3121_v50 = vadd.f32 %v3105_v46, %v3057_v8  ;;  %v3106_v27 = vmul.f32 %v3082_v22, %v6722_v43 }
 0x26c   : > { %v3240_v63 = vpop.permute.xlu0 %3239  ;;  %3773 = vrot.lane.b32.xlu1 %v6705_v37, %s5053_s28  ;;  %4035 = vst [vmem:[%s6571_s27 + $0x40] sm:$0xff] %v4671_v59  ;;  %v4672_v38 = vpack.c.bf16 %v2986_v41, %v2984_v2  ;;  %v3058_v22 = vmul.f32 %v6736_v9, %v6350_v18  ;;  %v3138_v46 = vmul.f32 %v6736_v9, %v6354_v21 }
 0x26d   : > { %3636 = vst [vmem:[%s6547_s21 + $0x48] sm:$0xff] %v4624_v62  ;;  %v6726_v56 = vpop.f32.mrb[52].mxu0  ;;  %v4626_v55 = vpack.c.bf16 %v3394_v5, %v3393_v36  ;;  %v3265_v62 = vmul.f32 %v3240_v63, %v6709_v10  ;;  %v3217_v36 = vmul.f32 %v6716_v53, %v6342_v19 }
 0x26e   : > { %7185 = vst [vmem:[#allocation36_spill] sm:$0xff] %v6726_v56  ;;  %3695 = vrot.lane.b32.xlu0 %v6726_v56, %s5053_s28  ;;  %v6733_v20 = vpop.f32.mrb[53].mxu0  ;;  %v3242_v58 = vpop.permute.xlu1 %3241  ;;  %4036 = vst [vmem:[%s6571_s27 + $0x48] sm:$0xff] %v4672_v38  ;;  %v3122_v19 = vadd.f32 %v3106_v27, %v3058_v22 }
 0x26f   : > { %7186 = vst [vmem:[#allocation37_spill] sm:$0xff] %v6733_v20  ;;  %v6738_v7 = vpop.f32.mrb[54].mxu0  ;;  %3638 = vst [vmem:[%s6547_s21 + $0x58] sm:$0xff] %v4626_v55  ;;  %v2990_v2 = vpop.f32.mrb[52].mxu1  ;;  %v3395_v55 = vmul.f32 0.088388346, %v3121_v50  ;;  %v3281_v56 = vadd.f32 %v3265_v62, %v3217_v36  ;;  %v3218_v50 = vmul.f32 %v6736_v9, %v6352_v26 }
 0x270   : > { %7187 = vst [vmem:[#allocation38_spill] sm:$0xff] %v6738_v7  ;;  %v3160_v44 = vpop.permute.xlu0 %3159  ;;  %v6743_v1 = vpop.f32.mrb[55].mxu0  ;;  %3697 = vrot.lane.b32.xlu1 %v6738_v7, %s5053_s28 }
 0x271   : > { %v3185_v59 = vmul.f32 %v3160_v44, %v6709_v10  ;;  %v2992_v5 = vpop.f32.mrb[53].mxu1  ;;  %v3266_v44 = vmul.f32 %v3242_v58, %v6722_v43 }
 0x272   : > { %3775 = vrot.lane.b32.xlu0 %v6733_v20, %s5053_s28  ;;  %v3162_v41 = vpop.permute.xlu1 %3161  ;;  %v4673_v38 = vpack.c.bf16 %v2992_v5, %v2990_v2  ;;  %v2994_v8 = vpop.f32.mrb[54].mxu1 }
 0x273   : > { %v3201_v63 = vadd.f32 %v3185_v59, %v3137_v12  ;;  %v3186_v18 = vmul.f32 %v3162_v41, %v6722_v43  ;;  %v2996_v20 = vpop.f32.mrb[55].mxu1  ;;  %v3282_v26 = vadd.f32 %v3266_v44, %v3218_v50  ;;  %v3397_v41 = vmul.f32 0.088388346, %v3281_v56 }
 0x274   : > { %v3320_v7 = vpop.permute.xlu0 %3319  ;;  %3777 = vrot.lane.b32.xlu1 %v6743_v1, %s5053_s28  ;;  %4037 = vst [vmem:[%s6571_s27 + $0x50] sm:$0xff] %v4673_v38  ;;  %v4674_v12 = vpack.c.bf16 %v2996_v20, %v2994_v8  ;;  %v3399_v20 = vmul.f32 0.088388346, %v3122_v19  ;;  %v6792_v19 = vld [vmem:[%s5275_s14 + $0x40] sm:$0xff] }
 0x275   : > { %v3396_v37 = vmul.f32 0.088388346, %v3201_v63  ;;  %v3345_v16 = vmul.f32 %v3320_v7, %v6709_v10  ;;  %v6766_v21 = vpop.f32.mrb[56].mxu0  ;;  %v3202_v58 = vadd.f32 %v3186_v18, %v3138_v46  ;;  %v3298_v7 = vmul.f32 %v6736_v9, %v6356_v23  ;;  %v6785_v23 = vld [vmem:[%s6513_s16 + $0x40] sm:$0xff] }
 0x276   : > { %3699 = vrot.lane.b32.xlu0 %v6766_v21, %s5053_s28  ;;  %v6773_v27 = vpop.f32.mrb[57].mxu0  ;;  %v3322_v2 = vpop.permute.xlu1 %3321  ;;  %4038 = vst [vmem:[%s6571_s27 + $0x58] sm:$0xff] %v4674_v12  ;;  %v3401_v12 = vmul.f32 0.088388346, %v3282_v26  ;;  %v3059_v26 = vmul.f32 %v6792_v19, %v6364_v24  ;;  %v3139_v24 = vmul.f32 %v6792_v19, %v6370_v29  ;;  %v3299_v29 = vmul.f32 %v6792_v19, %v6372_v30 }
 0x277   : > { %7188 = vst [vmem:[#allocation39_spill] sm:$0xff] %v6773_v27  ;;  %v4627_v62 = vpack.c.bf16 %v3396_v37, %v3395_v55  ;;  %v3361_v59 = vadd.f32 %v3345_v16, %v3297_v13  ;;  %v6777_v36 = vpop.f32.mrb[58].mxu0  ;;  %v3400_v22 = vmul.f32 0.088388346, %v3202_v58  ;;  %v3346_v5 = vmul.f32 %v3322_v2, %v6722_v43  ;;  %v3000_v37 = vpop.f32.mrb[56].mxu1 }
 0x278   : > { %7189 = vst [vmem:[#allocation40_spill] sm:$0xff] %v6777_v36  ;;  %v3084_v46 = vpop.permute.xlu0 %3083  ;;  %v6781_v63 = vpop.f32.mrb[59].mxu0  ;;  %3701 = vrot.lane.b32.xlu1 %v6777_v36, %s5053_s28  ;;  %v7210_v36 = vld [vmem:[#allocation21_spill] sm:$0xff] }
 0x279   : > { %7190 = vst [vmem:[#allocation41_spill] sm:$0xff] %v6781_v63  ;;  %3639 = vst [vmem:[%s6547_s21 + $0x60] sm:$0xff] %v4627_v62  ;;  %v3398_v38 = vmul.f32 0.088388346, %v3361_v59  ;;  %v4629_v13 = vpack.c.bf16 %v3400_v22, %v3399_v20  ;;  %v3362_v8 = vadd.f32 %v3346_v5, %v3298_v7  ;;  %v3002_v55 = vpop.f32.mrb[57].mxu1  ;;  %v3107_v58 = vmul.f32 %v3084_v46, %v6785_v23  ;;  %v6798_v59 = vld [vmem:[%s6513_s16 + $0x48] sm:$0xff] }
 0x27a   : > { %3779 = vrot.lane.b32.xlu0 %v6773_v27, %s5053_s28  ;;  %v3086_v44 = vpop.permute.xlu1 %3085  ;;  %v4675_v18 = vpack.c.bf16 %v3002_v55, %v3000_v37  ;;  %v3004_v16 = vpop.f32.mrb[58].mxu1  ;;  %v6812_v46 = vld [vmem:[%s5275_s14 + $0x48] sm:$0xff] }
 0x27b   : > { %v4628_v56 = vpack.c.bf16 %v3398_v38, %v3397_v41  ;;  %3641 = vst [vmem:[%s6547_s21 + $0x70] sm:$0xff] %v4629_v13  ;;  %v3402_v50 = vmul.f32 0.088388346, %v3362_v8  ;;  %v3006_v7 = vpop.f32.mrb[59].mxu1  ;;  %v3123_v37 = vadd.f32 %v3107_v58, %v3059_v26  ;;  %v3108_v13 = vmul.f32 %v3086_v44, %v6798_v59 }
 0x27c   : > { %v3244_v62 = vpop.permute.xlu0 %3243  ;;  %3781 = vrot.lane.b32.xlu1 %v6781_v63, %s5053_s28  ;;  %4039 = vst [vmem:[%s6571_s27 + $0x60] sm:$0xff] %v4675_v18  ;;  %v4676_v20 = vpack.c.bf16 %v3006_v7, %v3004_v16  ;;  %v3060_v44 = vmul.f32 %v6812_v46, %v6374_v45  ;;  %v3140_v58 = vmul.f32 %v6812_v46, %v6378_v33 }
 0x27d   : > { %3640 = vst [vmem:[%s6547_s21 + $0x68] sm:$0xff] %v4628_v56  ;;  %v6802_v2 = vpop.f32.mrb[60].mxu0  ;;  %v4630_v22 = vpack.c.bf16 %v3402_v50, %v3401_v12  ;;  %v3267_v56 = vmul.f32 %v3244_v62, %v6785_v23  ;;  %v3219_v12 = vmul.f32 %v6792_v19, %v6366_v28 }
 0x27e   : > { %7191 = vst [vmem:[#allocation42_spill] sm:$0xff] %v6802_v2  ;;  %3703 = vrot.lane.b32.xlu0 %v6802_v2, %s5053_s28  ;;  %v6809_v5 = vpop.f32.mrb[61].mxu0  ;;  %v3246_v41 = vpop.permute.xlu1 %3245  ;;  %4040 = vst [vmem:[%s6571_s27 + $0x68] sm:$0xff] %v4676_v20  ;;  %v3124_v28 = vadd.f32 %v3108_v13, %v3060_v44 }
 0x27f   : > { %7192 = vst [vmem:[#allocation43_spill] sm:$0xff] %v6809_v5  ;;  %v6814_v38 = vpop.f32.mrb[62].mxu0  ;;  %3642 = vst [vmem:[%s6547_s21 + $0x78] sm:$0xff] %v4630_v22  ;;  %v3010_v16 = vpop.f32.mrb[60].mxu1  ;;  %v3403_v22 = vmul.f32 0.088388346, %v3123_v37  ;;  %v3283_v2 = vadd.f32 %v3267_v56, %v3219_v12  ;;  %v3220_v37 = vmul.f32 %v6812_v46, %v6376_v32 }
 0x280   : > { %7193 = vst [vmem:[#allocation44_spill] sm:$0xff] %v6814_v38  ;;  %v3164_v8 = vpop.permute.xlu0 %3163  ;;  %v6819_v55 = vpop.f32.mrb[63].mxu0  ;;  %3705 = vrot.lane.b32.xlu1 %v6814_v38, %s5053_s28 }
 0x281   : > { %7194 = vst [vmem:[#allocation45_spill] sm:$0xff] %v6819_v55  ;;  %v3187_v18 = vmul.f32 %v3164_v8, %v6785_v23  ;;  %v3012_v50 = vpop.f32.mrb[61].mxu1  ;;  %v3268_v8 = vmul.f32 %v3246_v41, %v6798_v59  ;;  %v3300_v41 = vmul.f32 %v6812_v46, %v6380_v35  ;;  %v3405_v32 = vmul.f32 0.088388346, %v3283_v2  ;;  %v6860_v2 = vld [vmem:[%s6513_s16 + $0x58] sm:$0xff] }
 0x282   : > { %3783 = vrot.lane.b32.xlu0 %v6809_v5, %s5053_s28  ;;  %v3166_v7 = vpop.permute.xlu1 %3165  ;;  %v4677_v20 = vpack.c.bf16 %v3012_v50, %v3010_v16  ;;  %v3014_v26 = vpop.f32.mrb[62].mxu1 }
 0x283   : > { %v3203_v62 = vadd.f32 %v3187_v18, %v3139_v24  ;;  %v3188_v45 = vmul.f32 %v3166_v7, %v6798_v59  ;;  %v3016_v5 = vpop.f32.mrb[63].mxu1  ;;  %v3284_v16 = vadd.f32 %v3268_v8, %v3220_v37  ;;  %v6854_v7 = vld [vmem:[%s5275_s14 + $0x50] sm:$0xff] }
 0x284   : > { %v3324_v38 = vpop.permute.xlu0 %3323  ;;  %3785 = vrot.lane.b32.xlu1 %v6819_v55, %s5053_s28  ;;  %4041 = vst [vmem:[%s6571_s27 + $0x70] sm:$0xff] %v4677_v20  ;;  %v4678_v33 = vpack.c.bf16 %v3016_v5, %v3014_v26 }
 0x285   : > { %v3404_v63 = vmul.f32 0.088388346, %v3203_v62  ;;  %v3347_v30 = vmul.f32 %v3324_v38, %v6785_v23  ;;  %v3204_v13 = vadd.f32 %v3188_v45, %v3140_v58  ;;  %v3407_v38 = vmul.f32 0.088388346, %v3124_v28 }
 0x286   : > { %v3326_v56 = vpop.permute.xlu1 %3325  ;;  %4042 = vst [vmem:[%s6571_s27 + $0x78] sm:$0xff] %v4678_v33  ;;  %v3409_v20 = vmul.f32 0.088388346, %v3284_v16  ;;  %v3061_v45 = vmul.f32 %v6854_v7, %v6388_v52  ;;  %v7196_v16 = vld [vmem:[#allocation12_spill] sm:$0xff] }
 0x287   : > { %v4631_v24 = vpack.c.bf16 %v3404_v63, %v3403_v22  ;;  %v3363_v18 = vadd.f32 %v3347_v30, %v3299_v29  ;;  %v3408_v12 = vmul.f32 0.088388346, %v3204_v13  ;;  %v3348_v5 = vmul.f32 %v3326_v56, %v6798_v59  ;;  %v6851_v63 = vld [vmem:[%s6513_s16 + $0x50] sm:$0xff]  ;;  %v6865_v30 = vld [vmem:[%s5275_s14 + $0x58] sm:$0xff] }
 0x288   : > { %v3088_v44 = vpop.permute.xlu0 %3087 }
 0x289   : > { %3643 = vst [vmem:[%s6547_s21 + $0x80] sm:$0xff] %v4631_v24  ;;  %v3406_v50 = vmul.f32 0.088388346, %v3363_v18  ;;  %v4633_v58 = vpack.c.bf16 %v3408_v12, %v3407_v38  ;;  %v3364_v35 = vadd.f32 %v3348_v5, %v3300_v41  ;;  %v3109_v28 = vmul.f32 %v3088_v44, %v6851_v63  ;;  %v7195_v41 = vld [vmem:[#allocation10_spill] sm:$0xff]  ;;  %v7197_v5 = vld [vmem:[#allocation9_spill] sm:$0xff]  ;;  %v7198_v44 = vld [vmem:[#allocation11_spill] sm:$0xff] }
 0x28a   : > { %v3090_v62 = vpop.permute.xlu1 %3089  ;;  %v3141_v24 = vmul.f32 %v6854_v7, %v7195_v41  ;;  %v3062_v12 = vmul.f32 %v6865_v30, %v7196_v16  ;;  %v3221_v52 = vmul.f32 %v6854_v7, %v7197_v5  ;;  %v7200_v41 = vld [vmem:[#allocation13_spill] sm:$0xff] }
 0x28b   : > { %v4632_v29 = vpack.c.bf16 %v3406_v50, %v3405_v32  ;;  %3645 = vst [vmem:[%s6547_s21 + $0x90] sm:$0xff] %v4633_v58  ;;  %v3410_v26 = vmul.f32 0.088388346, %v3364_v35  ;;  %v3110_v37 = vmul.f32 %v3090_v62, %v6860_v2  ;;  %v3125_v18 = vadd.f32 %v3109_v28, %v3061_v45  ;;  %v7199_v35 = vld [vmem:[#allocation14_spill] sm:$0xff] }
 0x28c   : > { %v3248_v22 = vpop.permute.xlu0 %3247  ;;  %v3301_v32 = vmul.f32 %v6854_v7, %v7198_v44  ;;  %v3222_v16 = vmul.f32 %v6865_v30, %v7200_v41 }
 0x28d   : > { %3644 = vst [vmem:[%s6547_s21 + $0x88] sm:$0xff] %v4632_v29  ;;  %v4634_v8 = vpack.c.bf16 %v3410_v26, %v3409_v20  ;;  %v3269_v56 = vmul.f32 %v3248_v22, %v6851_v63  ;;  %v3142_v29 = vmul.f32 %v6865_v30, %v7199_v35  ;;  %v3126_v62 = vadd.f32 %v3110_v37, %v3062_v12 }
 0x28e   : > { %v3250_v33 = vpop.permute.xlu1 %3249  ;;  %v3411_v28 = vmul.f32 0.088388346, %v3125_v18 }
 0x28f   : > { %3646 = vst [vmem:[%s6547_s21 + $0x98] sm:$0xff] %v4634_v8  ;;  %v3270_v20 = vmul.f32 %v3250_v33, %v6860_v2  ;;  %v3285_v8 = vadd.f32 %v3269_v56, %v3221_v52  ;;  %v3415_v44 = vmul.f32 0.088388346, %v3126_v62 }
 0x290   : > { %v3168_v13 = vpop.permute.xlu0 %3167 }
 0x291   : > { %v3189_v38 = vmul.f32 %v3168_v13, %v6851_v63  ;;  %v3286_v18 = vadd.f32 %v3270_v20, %v3222_v16 }
 0x292   : > { %v3170_v58 = vpop.permute.xlu1 %3169 }
 0x293   : > { %v3205_v50 = vadd.f32 %v3189_v38, %v3141_v24  ;;  %v3190_v26 = vmul.f32 %v3170_v58, %v6860_v2  ;;  %v7201_v38 = vld [vmem:[#allocation15_spill] sm:$0xff]  ;;  %v3417_v62 = vmul.f32 0.088388346, %v3286_v18 }
 0x294   : > { %v3328_v22 = vpop.permute.xlu0 %3327  ;;  %v3302_v5 = vmul.f32 %v6865_v30, %v7201_v38 }
 0x295   : > { %v3412_v45 = vmul.f32 0.088388346, %v3205_v50  ;;  %v3349_v13 = vmul.f32 %v3328_v22, %v6851_v63  ;;  %v3206_v24 = vadd.f32 %v3190_v26, %v3142_v29  ;;  %v3413_v50 = vmul.f32 0.088388346, %v3285_v8  ;;  %v6891_v22 = vld [vmem:[%s6513_s16 + $0x60] sm:$0xff]  ;;  %v6900_v8 = vld [vmem:[%s6513_s16 + $0x68] sm:$0xff] }
 0x296   : > { %v3330_v12 = vpop.permute.xlu1 %3329  ;;  %7202 = vst [vmem:[#allocation10_spill] sm:$0xff] %v6900_v8 }
 0x297   : > { %v4635_v37 = vpack.c.bf16 %v3412_v45, %v3411_v28  ;;  %v3365_v33 = vadd.f32 %v3349_v13, %v3301_v32  ;;  %v3416_v58 = vmul.f32 0.088388346, %v3206_v24  ;;  %v3350_v56 = vmul.f32 %v3330_v12, %v6860_v2  ;;  %v6894_v45 = vld [vmem:[%s5275_s14 + $0x60] sm:$0xff]  ;;  %v7203_v24 = vld [vmem:[#allocation16_spill] sm:$0xff] }
 0x298   : > { %v3092_v52 = vpop.permute.xlu0 %3091  ;;  %v3063_v38 = vmul.f32 %v6894_v45, %v7203_v24 }
 0x299   : > { %3647 = vst [vmem:[%s6547_s21 + $0xa0] sm:$0xff] %v4635_v37  ;;  %v3414_v35 = vmul.f32 0.088388346, %v3365_v33  ;;  %v4637_v29 = vpack.c.bf16 %v3416_v58, %v3415_v44  ;;  %v3366_v26 = vadd.f32 %v3350_v56, %v3302_v5  ;;  %v3111_v41 = vmul.f32 %v3092_v52, %v6891_v22  ;;  %v6905_v5 = vld [vmem:[%s5275_s14 + $0x68] sm:$0xff] }
 0x29a   : > { %v3094_v28 = vpop.permute.xlu1 %3093  ;;  %7204 = vst [vmem:[#allocation12_spill] sm:$0xff] %v6905_v5  ;;  %v7205_v44 = vld [vmem:[#allocation18_spill] sm:$0xff] }
 0x29b   : > { %v4636_v32 = vpack.c.bf16 %v3414_v35, %v3413_v50  ;;  %3649 = vst [vmem:[%s6547_s21 + $0xb0] sm:$0xff] %v4637_v29  ;;  %v3418_v20 = vmul.f32 0.088388346, %v3366_v26  ;;  %v3112_v33 = vmul.f32 %v3094_v28, %v6900_v8  ;;  %v3143_v18 = vmul.f32 %v6894_v45, %v7205_v44  ;;  %v7206_v50 = vld [vmem:[#allocation20_spill] sm:$0xff]  ;;  %v7207_v29 = vld [vmem:[#allocation17_spill] sm:$0xff] }
 0x29c   : > { %v3252_v13 = vpop.permute.xlu0 %3251  ;;  %v3127_v58 = vadd.f32 %v3111_v41, %v3063_v38  ;;  %v3064_v35 = vmul.f32 %v6905_v5, %v7206_v50  ;;  %v3223_v26 = vmul.f32 %v6894_v45, %v7207_v29 }
 0x29d   : > { %3648 = vst [vmem:[%s6547_s21 + $0xa8] sm:$0xff] %v4636_v32  ;;  %v4638_v16 = vpack.c.bf16 %v3418_v20, %v3417_v62  ;;  %v3271_v56 = vmul.f32 %v3252_v13, %v6891_v22  ;;  %v7208_v32 = vld [vmem:[#allocation19_spill] sm:$0xff] }
 0x29e   : > { %v3254_v37 = vpop.permute.xlu1 %3253  ;;  %v3303_v62 = vmul.f32 %v6894_v45, %v7208_v32  ;;  %v3128_v44 = vadd.f32 %v3112_v33, %v3064_v35  ;;  %v3224_v32 = vmul.f32 %v6905_v5, %v7210_v36 }
 0x29f   : > { %3650 = vst [vmem:[%s6547_s21 + $0xb8] sm:$0xff] %v4638_v16  ;;  %v7209_v16 = vld [vmem:[#allocation22_spill] sm:$0xff]  ;;  %v3272_v41 = vmul.f32 %v3254_v37, %v6900_v8  ;;  %v3287_v50 = vadd.f32 %v3271_v56, %v3223_v26 }
 0x2a0   : > { %v3172_v12 = vpop.permute.xlu0 %3171  ;;  %v3144_v24 = vmul.f32 %v6905_v5, %v7209_v16 }
 0x2a1   : > { %v3191_v52 = vmul.f32 %v3172_v12, %v6891_v22  ;;  %v3419_v12 = vmul.f32 0.088388346, %v3127_v58  ;;  %v3288_v58 = vadd.f32 %v3272_v41, %v3224_v32 }
 0x2a2   : > { %v3174_v28 = vpop.permute.xlu1 %3173 }
 0x2a3   : > { %v3207_v20 = vadd.f32 %v3191_v52, %v3143_v18  ;;  %v3192_v13 = vmul.f32 %v3174_v28, %v6900_v8  ;;  %v7211_v52 = vld [vmem:[#allocation23_spill] sm:$0xff]  ;;  %v3423_v28 = vmul.f32 0.088388346, %v3128_v44  ;;  %v3425_v44 = vmul.f32 0.088388346, %v3288_v58 }
 0x2a4   : > { %v3332_v38 = vpop.permute.xlu0 %3331  ;;  %v3304_v16 = vmul.f32 %v6905_v5, %v7211_v52  ;;  %v7212_v52 = vld [vmem:[#allocation24_spill] sm:$0xff] }
 0x2a5   : > { %v3420_v55 = vmul.f32 0.088388346, %v3207_v20  ;;  %v3351_v29 = vmul.f32 %v3332_v38, %v6891_v22  ;;  %v3208_v18 = vadd.f32 %v3192_v13, %v3144_v24  ;;  %v3421_v20 = vmul.f32 0.088388346, %v3287_v50  ;;  %v6940_v50 = vld [vmem:[%s6513_s16 + $0x78] sm:$0xff] }
 0x2a6   : > { %v3334_v35 = vpop.permute.xlu1 %3333 }
 0x2a7   : > { %v4639_v33 = vpack.c.bf16 %v3420_v55, %v3419_v12  ;;  %v3367_v37 = vadd.f32 %v3351_v29, %v3303_v62  ;;  %v3424_v27 = vmul.f32 0.088388346, %v3208_v18  ;;  %v3352_v56 = vmul.f32 %v3334_v35, %v6900_v8  ;;  %v6931_v55 = vld [vmem:[%s6513_s16 + $0x70] sm:$0xff]  ;;  %v7217_v8 = vld [vmem:[#allocation28_spill] sm:$0xff] }
 0x2a8   : > { %v3096_v26 = vpop.permute.xlu0 %3095  ;;  %v6934_v12 = vld [vmem:[%s5275_s14 + $0x70] sm:$0xff] }
 0x2a9   : > { %3651 = vst [vmem:[%s6547_s21 + $0xc0] sm:$0xff] %v4639_v33  ;;  %v3422_v36 = vmul.f32 0.088388346, %v3367_v37  ;;  %v4641_v24 = vpack.c.bf16 %v3424_v27, %v3423_v28  ;;  %v3368_v13 = vadd.f32 %v3352_v56, %v3304_v16  ;;  %v3113_v32 = vmul.f32 %v3096_v26, %v6931_v55  ;;  %v6945_v16 = vld [vmem:[%s5275_s14 + $0x78] sm:$0xff]  ;;  %v7213_v28 = vld [vmem:[#allocation26_spill] sm:$0xff] }
 0x2aa   : > { %v3098_v38 = vpop.permute.xlu1 %3097  ;;  %v3065_v27 = vmul.f32 %v6934_v12, %v7212_v52  ;;  %v3145_v58 = vmul.f32 %v6934_v12, %v7213_v28 }
 0x2ab   : > { %v4640_v62 = vpack.c.bf16 %v3422_v36, %v3421_v20  ;;  %3653 = vst [vmem:[%s6547_s21 + $0xd0] sm:$0xff] %v4641_v24  ;;  %v3426_v41 = vmul.f32 0.088388346, %v3368_v13  ;;  %v3114_v37 = vmul.f32 %v3098_v38, %v6940_v50  ;;  %v7214_v36 = vld [vmem:[#allocation27_spill] sm:$0xff]  ;;  %v7215_v13 = vld [vmem:[#allocation25_spill] sm:$0xff] }
 0x2ac   : > { %v3256_v29 = vpop.permute.xlu0 %3255  ;;  %v3129_v56 = vadd.f32 %v3113_v32, %v3065_v27  ;;  %v3066_v24 = vmul.f32 %v6945_v16, %v7214_v36 }
 0x2ad   : > { %3652 = vst [vmem:[%s6547_s21 + $0xc8] sm:$0xff] %v4640_v62  ;;  %v4642_v18 = vpack.c.bf16 %v3426_v41, %v3425_v44  ;;  %v3273_v20 = vmul.f32 %v3256_v29, %v6931_v55  ;;  %v3225_v62 = vmul.f32 %v6934_v12, %v7215_v13  ;;  %v3305_v44 = vmul.f32 %v6934_v12, %v6444_v6 }
 0x2ae   : > { %v3258_v33 = vpop.permute.xlu1 %3257  ;;  %v3130_v28 = vadd.f32 %v3114_v37, %v3066_v24  ;;  %v3226_v6 = vmul.f32 %v6945_v16, %v7217_v8 }
 0x2af   : > { %3654 = vst [vmem:[%s6547_s21 + $0xd8] sm:$0xff] %v4642_v18  ;;  %v7216_v18 = vld [vmem:[#allocation29_spill] sm:$0xff]  ;;  %v3274_v32 = vmul.f32 %v3258_v33, %v6940_v50  ;;  %v3289_v36 = vadd.f32 %v3273_v20, %v3225_v62 }
 0x2b0   : > { %v3176_v35 = vpop.permute.xlu0 %3175  ;;  %v3146_v52 = vmul.f32 %v6945_v16, %v7216_v18 }
 0x2b1   : > { %v3193_v26 = vmul.f32 %v3176_v35, %v6931_v55  ;;  %v3427_v35 = vmul.f32 0.088388346, %v3129_v56  ;;  %v3290_v18 = vadd.f32 %v3274_v32, %v3226_v6 }
 0x2b2   : > { %v3178_v38 = vpop.permute.xlu1 %3177 }
 0x2b3   : > { %v3209_v41 = vadd.f32 %v3193_v26, %v3145_v58  ;;  %v3194_v29 = vmul.f32 %v3178_v38, %v6940_v50  ;;  %v3306_v26 = vmul.f32 %v6945_v16, %v6452_v0  ;;  %v3431_v38 = vmul.f32 0.088388346, %v3130_v28  ;;  %v4910_v0 = vld [vmem:[%s6513_s16] sm:$0xff] }
 0x2b4   : > { %v3336_v27 = vpop.permute.xlu0 %3335 }
 0x2b5   : > { %v3428_v5 = vmul.f32 0.088388346, %v3209_v41  ;;  %v3353_v13 = vmul.f32 %v3336_v27, %v6931_v55  ;;  %v3210_v58 = vadd.f32 %v3194_v29, %v3146_v52  ;;  %v3429_v41 = vmul.f32 0.088388346, %v3289_v36 }
 0x2b6   : > { %v3338_v33 = vpop.permute.xlu1 %3337 }
 0x2b7   : > { %v4643_v37 = vpack.c.bf16 %v3428_v5, %v3427_v35  ;;  %v3369_v24 = vadd.f32 %v3353_v13, %v3305_v44  ;;  %v3432_v56 = vmul.f32 0.088388346, %v3210_v58  ;;  %v3354_v20 = vmul.f32 %v3338_v33, %v6940_v50  ;;  %v4911_v13 = vld [vmem:[%s5275_s14] sm:$0xff] }
 0x2b8   : > { %v3676_v62 = vpop.permute.xlu0 %3675  ;;  %v3433_v35 = vmul.f32 0.088388346, %v3290_v18  ;;  %v3659_v36 = vmul.f32 %v4911_v13, %v6542_v25  ;;  %v3739_v6 = vmul.f32 %v4911_v13, %v6551_v31  ;;  %v4913_v18 = vld [vmem:[%s5275_s14 + $0x8] sm:$0xff] }
 0x2b9   : > { %3655 = vst [vmem:[%s6547_s21 + $0xe0] sm:$0xff] %v4643_v37  ;;  %v3430_v8 = vmul.f32 0.088388346, %v3369_v24  ;;  %v4645_v52 = vpack.c.bf16 %v3432_v56, %v3431_v38  ;;  %v3370_v29 = vadd.f32 %v3354_v20, %v3306_v26  ;;  %v3707_v5 = vmul.f32 %v4910_v0, %v3676_v62  ;;  %v4912_v26 = vld [vmem:[%s6513_s16 + $0x8] sm:$0xff] }
 0x2ba   : > { %v3678_v44 = vpop.permute.xlu1 %3677  ;;  %v3660_v20 = vmul.f32 %v4913_v18, %v6554_v54  ;;  %v3740_v62 = vmul.f32 %v4913_v18, %v6558_v15 }
 0x2bb   : > { %v4644_v27 = vpack.c.bf16 %v3430_v8, %v3429_v41  ;;  %3657 = vst [vmem:[%s6547_s21 + $0xf0] sm:$0xff] %v4645_v52  ;;  %v3434_v28 = vmul.f32 0.088388346, %v3370_v29  ;;  %v3708_v24 = vmul.f32 %v4912_v26, %v3678_v44  ;;  %v3723_v33 = vadd.f32 %v3707_v5, %v3659_v36  ;;  %v4914_v29 = vld [vmem:[%s6513_s16 + $0x10] sm:$0xff]  ;;  %v7218_v44 = vld [vmem:[#allocation30_spill] sm:$0xff] }
 0x2bc   : > { %v3756_v32 = vpop.permute.xlu0 %3755  ;;  %v4915_v5 = vld [vmem:[%s5275_s14 + $0x10] sm:$0xff] }
 0x2bd   : > { %3656 = vst [vmem:[%s6547_s21 + $0xe8] sm:$0xff] %v4644_v27  ;;  %v3787_v58 = vmul.f32 %v4910_v0, %v3756_v32  ;;  %v4646_v37 = vpack.c.bf16 %v3434_v28, %v3433_v35  ;;  %v3724_v8 = vadd.f32 %v3708_v24, %v3660_v20  ;;  %v3661_v35 = vmul.f32 %v4915_v5, %v7218_v44  ;;  %v7219_v28 = vld [vmem:[#allocation31_spill] sm:$0xff] }
 0x2be   : > { %v3758_v56 = vpop.permute.xlu1 %3757  ;;  %v3741_v32 = vmul.f32 %v4915_v5, %v7219_v28 }
 0x2bf   : > { %v3803_v38 = vadd.f32 %v3787_v58, %v3739_v6  ;;  %3658 = vst [vmem:[%s6547_s21 + $0xf8] sm:$0xff] %v4646_v37  ;;  %v3788_v25 = vmul.f32 %v4912_v26, %v3758_v56  ;;  %v7220_v26 = vld [vmem:[#allocation32_spill] sm:$0xff] }
 0x2c0   : > { %v3680_v31 = vpop.permute.xlu0 %3679  ;;  %v3662_v24 = vmul.f32 %v6590_v3, %v7220_v26 }
 0x2c1   : > { %v4647_v41 = vpack.c.bf16 %v3803_v38, %v3723_v33  ;;  %v3804_v52 = vadd.f32 %v3788_v25, %v3740_v62  ;;  %v3709_v27 = vmul.f32 %v4914_v29, %v3680_v31  ;;  %v3742_v33 = vmul.f32 %v6590_v3, %v6596_v61 }
 0x2c2   : > { %v3682_v54 = vpop.permute.xlu1 %3681 }
 0x2c3   : > { %3915 = vst [vmem:[%s6986_s7] sm:$0xff] %v4647_v41  ;;  %v4648_v0 = vpack.c.bf16 %v3804_v52, %v3724_v8  ;;  %v3710_v36 = vmul.f32 %v3682_v54, %v6577_v42  ;;  %v3725_v6 = vadd.f32 %v3709_v27, %v3661_v35  ;;  %v3663_v52 = vmul.f32 %v6640_v60, %v6614_v4 }
 0x2c4   : > { %v3760_v15 = vpop.permute.xlu0 %3759 }
 0x2c5   : > { %v3789_v13 = vmul.f32 %v4914_v29, %v3760_v15  ;;  %3916 = vst [vmem:[%s6986_s7 + $0x8] sm:$0xff] %v4648_v0  ;;  %v3726_v20 = vadd.f32 %v3710_v36, %v3662_v24  ;;  %v3743_v29 = vmul.f32 %v6640_v60, %v6621_v48  ;;  %v3664_v0 = vmul.f32 %v6660_v57, %v6625_v40  ;;  %v7221_v40 = vld [vmem:[#allocation33_spill] sm:$0xff] }
 0x2c6   : > { %v3762_v37 = vpop.permute.xlu1 %3761  ;;  %v3744_v15 = vmul.f32 %v6660_v57, %v6629_v11  ;;  %v3745_v36 = vmul.f32 %v6716_v53, %v7221_v40  ;;  %v3746_v24 = vmul.f32 %v6736_v9, %v6667_v47 }
 0x2c7   : > { %v3805_v58 = vadd.f32 %v3789_v13, %v3741_v32  ;;  %v3790_v38 = vmul.f32 %v3762_v37, %v6577_v42  ;;  %v3665_v13 = vmul.f32 %v6716_v53, %v6650_v49  ;;  %v7222_v37 = vld [vmem:[#allocation34_spill] sm:$0xff] }
 0x2c8   : > { %v3684_v56 = vpop.permute.xlu0 %3683  ;;  %v3666_v26 = vmul.f32 %v6736_v9, %v7222_v37 }
 0x2c9   : > { %v4649_v18 = vpack.c.bf16 %v3805_v58, %v3725_v6  ;;  %v3806_v62 = vadd.f32 %v3790_v38, %v3742_v33  ;;  %v3711_v25 = vmul.f32 %v3684_v56, %v6633_v14 }
 0x2ca   : > { %v3686_v31 = vpop.permute.xlu1 %3685 }
 0x2cb   : > { %3917 = vst [vmem:[%s6986_s7 + $0x10] sm:$0xff] %v4649_v18  ;;  %v4650_v41 = vpack.c.bf16 %v3806_v62, %v3726_v20  ;;  %v3712_v42 = vmul.f32 %v3686_v31, %v6646_v51  ;;  %v3727_v61 = vadd.f32 %v3711_v25, %v3663_v52  ;;  %v3667_v25 = vmul.f32 %v6792_v19, %v6690_v34 }
 0x2cc   : > { %v3764_v8 = vpop.permute.xlu0 %3763  ;;  %v3747_v31 = vmul.f32 %v6792_v19, %v6697_v39  ;;  %v3668_v52 = vmul.f32 %v6812_v46, %v6701_v17  ;;  %v7225_v17 = vld [vmem:[#allocation37_spill] sm:$0xff] }
 0x2cd   : > { %v3791_v3 = vmul.f32 %v3764_v8, %v6633_v14  ;;  %3918 = vst [vmem:[%s6986_s7 + $0x18] sm:$0xff] %v4650_v41  ;;  %v3728_v48 = vadd.f32 %v3712_v42, %v3664_v0 }
 0x2ce   : > { %v3766_v54 = vpop.permute.xlu1 %3765 }
 0x2cf   : > { %v3807_v27 = vadd.f32 %v3791_v3, %v3743_v29  ;;  %v3792_v4 = vmul.f32 %v3766_v54, %v6646_v51  ;;  %v7223_v29 = vld [vmem:[#allocation35_spill] sm:$0xff] }
 0x2d0   : > { %v3688_v5 = vpop.permute.xlu0 %3687  ;;  %v3748_v3 = vmul.f32 %v6812_v46, %v7223_v29 }
 0x2d1   : > { %v4651_v44 = vpack.c.bf16 %v3807_v27, %v3727_v61  ;;  %v3808_v60 = vadd.f32 %v3792_v4, %v3744_v15  ;;  %v3713_v14 = vmul.f32 %v3688_v5, %v6709_v10  ;;  %v7224_v15 = vld [vmem:[#allocation36_spill] sm:$0xff]  ;;  %v3749_v5 = vmul.f32 %v6854_v7, %v7225_v17 }
 0x2d2   : > { %v3690_v35 = vpop.permute.xlu1 %3689  ;;  %v3669_v4 = vmul.f32 %v6854_v7, %v7224_v15 }
 0x2d3   : > { %3919 = vst [vmem:[%s6986_s7 + $0x20] sm:$0xff] %v4651_v44  ;;  %v4652_v28 = vpack.c.bf16 %v3808_v60, %v3728_v48  ;;  %v3714_v51 = vmul.f32 %v3690_v35, %v6722_v43  ;;  %v3729_v57 = vadd.f32 %v3713_v14, %v3665_v13  ;;  %v7226_v14 = vld [vmem:[#allocation38_spill] sm:$0xff] }
 0x2d4   : > { %v3768_v32 = vpop.permute.xlu0 %3767  ;;  %v3670_v35 = vmul.f32 %v6865_v30, %v7226_v14 }
 0x2d5   : > { %v3793_v11 = vmul.f32 %v3768_v32, %v6709_v10  ;;  %3920 = vst [vmem:[%s6986_s7 + $0x28] sm:$0xff] %v4652_v28  ;;  %v3730_v53 = vadd.f32 %v3714_v51, %v3666_v26  ;;  %v3750_v28 = vmul.f32 %v6865_v30, %v6743_v1 }
 0x2d6   : > { %v3770_v58 = vpop.permute.xlu1 %3769 }
 0x2d7   : > { %v3809_v6 = vadd.f32 %v3793_v11, %v3745_v36  ;;  %v3794_v49 = vmul.f32 %v3770_v58, %v6722_v43  ;;  %v7227_v58 = vld [vmem:[#allocation39_spill] sm:$0xff] }
 0x2d8   : > { %v3692_v33 = vpop.permute.xlu0 %3691  ;;  %v3751_v37 = vmul.f32 %v6894_v45, %v7227_v58 }
 0x2d9   : > { %v4653_v38 = vpack.c.bf16 %v3809_v6, %v3729_v57  ;;  %v3810_v56 = vadd.f32 %v3794_v49, %v3746_v24  ;;  %v3715_v10 = vmul.f32 %v3692_v33, %v6785_v23  ;;  %v3671_v6 = vmul.f32 %v6894_v45, %v6766_v21  ;;  %v7229_v33 = vld [vmem:[#allocation40_spill] sm:$0xff] }
 0x2da   : > { %v3694_v18 = vpop.permute.xlu1 %3693 }
 0x2db   : > { %3921 = vst [vmem:[%s6986_s7 + $0x30] sm:$0xff] %v4653_v38  ;;  %v4654_v20 = vpack.c.bf16 %v3810_v56, %v3730_v53  ;;  %v3716_v43 = vmul.f32 %v3694_v18, %v6798_v59  ;;  %v3731_v9 = vadd.f32 %v3715_v10, %v3667_v25  ;;  %v7230_v38 = vld [vmem:[#allocation12_spill] sm:$0xff]  ;;  %v7231_v56 = vld [vmem:[#allocation41_spill] sm:$0xff] }
 0x2dc   : > { %v3772_v62 = vpop.permute.xlu0 %3771  ;;  %v3672_v53 = vmul.f32 %v7230_v38, %v7229_v33  ;;  %v3752_v10 = vmul.f32 %v7230_v38, %v7231_v56 }
 0x2dd   : > { %v3795_v47 = vmul.f32 %v3772_v62, %v6785_v23  ;;  %3922 = vst [vmem:[%s6986_s7 + $0x38] sm:$0xff] %v4654_v20  ;;  %v3732_v39 = vadd.f32 %v3716_v43, %v3668_v52  ;;  %v7232_v43 = vld [vmem:[#allocation42_spill] sm:$0xff] }
 0x2de   : > { %v3774_v8 = vpop.permute.xlu1 %3773 }
 0x2df   : > { %v3811_v41 = vadd.f32 %v3795_v47, %v3747_v31  ;;  %v3796_v34 = vmul.f32 %v3774_v8, %v6798_v59 }
 0x2e0   : > { %v3696_v42 = vpop.permute.xlu0 %3695 }
 0x2e1   : > { %v4655_v61 = vpack.c.bf16 %v3811_v41, %v3731_v9  ;;  %v3812_v19 = vadd.f32 %v3796_v34, %v3748_v3  ;;  %v3717_v23 = vmul.f32 %v3696_v42, %v6851_v63  ;;  %v3673_v9 = vmul.f32 %v6934_v12, %v7232_v43  ;;  %v7233_v41 = vld [vmem:[#allocation43_spill] sm:$0xff] }
 0x2e2   : > { %v3698_v27 = vpop.permute.xlu1 %3697  ;;  %v3753_v8 = vmul.f32 %v6934_v12, %v7233_v41 }
 0x2e3   : > { %3923 = vst [vmem:[%s6986_s7 + $0x40] sm:$0xff] %v4655_v61  ;;  %v4656_v54 = vpack.c.bf16 %v3812_v19, %v3732_v39  ;;  %v3718_v59 = vmul.f32 %v3698_v27, %v6860_v2  ;;  %v3733_v44 = vadd.f32 %v3717_v23, %v3669_v4  ;;  %v7234_v61 = vld [vmem:[#allocation44_spill] sm:$0xff]  ;;  %v7235_v19 = vld [vmem:[#allocation45_spill] sm:$0xff] }
 0x2e4   : > { %v3776_v0 = vpop.permute.xlu0 %3775  ;;  %v3674_v39 = vmul.f32 %v6945_v16, %v7234_v61  ;;  %v3754_v23 = vmul.f32 %v6945_v16, %v7235_v19 }
 0x2e5   : > { %v3797_v46 = vmul.f32 %v3776_v0, %v6851_v63  ;;  %3924 = vst [vmem:[%s6986_s7 + $0x48] sm:$0xff] %v4656_v54  ;;  %v3734_v7 = vadd.f32 %v3718_v59, %v3670_v35 }
 0x2e6   : > { %v3778_v60 = vpop.permute.xlu1 %3777 }
 0x2e7   : > { %v3813_v48 = vadd.f32 %v3797_v46, %v3749_v5  ;;  %v3798_v32 = vmul.f32 %v3778_v60, %v6860_v2  ;;  %v7228_v2 = vld [vmem:[#allocation10_spill] sm:$0xff] }
 0x2e8   : > { %v3700_v13 = vpop.permute.xlu0 %3699 }
 0x2e9   : > { %v4657_v40 = vpack.c.bf16 %v3813_v48, %v3733_v44  ;;  %v3814_v36 = vadd.f32 %v3798_v32, %v3750_v28  ;;  %v3719_v63 = vmul.f32 %v3700_v13, %v6891_v22 }
 0x2ea   : > { %v3702_v11 = vpop.permute.xlu1 %3701 }
 0x2eb   : > { %3925 = vst [vmem:[%s6986_s7 + $0x50] sm:$0xff] %v4657_v40  ;;  %v4658_v51 = vpack.c.bf16 %v3814_v36, %v3734_v7  ;;  %v3720_v30 = vmul.f32 %v3702_v11, %v7228_v2  ;;  %v3735_v26 = vadd.f32 %v3719_v63, %v3671_v6 }
 0x2ec   : > { %v3780_v57 = vpop.permute.xlu0 %3779 }
 0x2ed   : > { %v3799_v1 = vmul.f32 %v3780_v57, %v6891_v22  ;;  %3926 = vst [vmem:[%s6986_s7 + $0x58] sm:$0xff] %v4658_v51  ;;  %v3736_v45 = vadd.f32 %v3720_v30, %v3672_v53 }
 0x2ee   : > { %v3782_v49 = vpop.permute.xlu1 %3781 }
 0x2ef   : > { %v3815_v24 = vadd.f32 %v3799_v1, %v3751_v37  ;;  %v3800_v21 = vmul.f32 %v3782_v49, %v7228_v2 }
 0x2f0   : > { %v3704_v18 = vpop.permute.xlu0 %3703 }
 0x2f1   : > { %v4659_v20 = vpack.c.bf16 %v3815_v24, %v3735_v26  ;;  %v3816_v62 = vadd.f32 %v3800_v21, %v3752_v10  ;;  %v3721_v22 = vmul.f32 %v3704_v18, %v6931_v55 }
 0x2f2   : > { %v3706_v25 = vpop.permute.xlu1 %3705 }
 0x2f3   : > { %3927 = vst [vmem:[%s6986_s7 + $0x60] sm:$0xff] %v4659_v20  ;;  %v4660_v31 = vpack.c.bf16 %v3816_v62, %v3736_v45  ;;  %v3722_v29 = vmul.f32 %v3706_v25, %v6940_v50  ;;  %v3737_v3 = vadd.f32 %v3721_v22, %v3673_v9 }
 0x2f4   : > { %v3784_v47 = vpop.permute.xlu0 %3783 }
 0x2f5   : > { %v3801_v52 = vmul.f32 %v3784_v47, %v6931_v55  ;;  %3928 = vst [vmem:[%s6986_s7 + $0x68] sm:$0xff] %v4660_v31  ;;  %v3738_v0 = vadd.f32 %v3722_v29, %v3674_v39 }
 0x2f6   : > { %v3786_v42 = vpop.permute.xlu1 %3785 }
 0x2f7   : > { %v3817_v34 = vadd.f32 %v3801_v52, %v3753_v8  ;;  %v3802_v27 = vmul.f32 %v3786_v42, %v6940_v50 }
 0x2f9   : > { %v4661_v54 = vpack.c.bf16 %v3817_v34, %v3737_v3  ;;  %v3818_v15 = vadd.f32 %v3802_v27, %v3754_v23 }
 0x2fb   : > { %3929 = vst [vmem:[%s6986_s7 + $0x70] sm:$0xff] %v4661_v54  ;;  %v4662_v12 = vpack.c.bf16 %v3818_v15, %v3738_v0 }
 0x2fd   : > { %3930 = vst [vmem:[%s6986_s7 + $0x78] sm:$0xff] %v4662_v12 }
 0x2fe PF: > { %p20_p0 = scmp.ge.s32.totalorder %s5111_s26, 4   ;;  %s7236_s21 = smov %s5036_s22 }
 0x2ff   : > { %s7237_s22 = smov %s5040_s23  ;;  %s7238_s23 = smov %s5121_s29 }
 0x300   : > { %s7239_s24 = smov %s5111_s26  ;;  %22 = sbr.rel (!%p20_p0) target bundleno = 5 (0x5), region = 124 }
 0x307   :  { %4105 = vsyncpa [#allocation3], 1 }
 0x308   :  { %4107 = vsyncpa [#allocation3 + $0x1], 1 }
 0x309   :  { %4108 = vsyncpa [#allocation5], 1 }
 0x30a   :  { %4110 = vsyncpa [#allocation5 + $0x1], 1 }

// kernel: flash_llama_attention.3
= control target key start
LH: loop header
LB: loop body
LE: loop exit
PB: predicated region body
PF: predicated region fallthrough
CT: control target
= control target key end

     0   :  { %9 = vsyncpa [#allocation6], 0  ;;  %s9909_s0 = inlined_call_operand.vmem [shape: bf16[256,512], index: 0, kind: input, shape index: {}]   ;;  %s9910_s1 = inlined_call_operand.vmem [shape: bf16[256,256], index: 1, kind: input, shape index: {}]   ;;  %s9911_s2 = inlined_call_operand.vmem [shape: bf16[256,256], index: 2, kind: input, shape index: {}]   ;;  %s9912_s3 = inlined_call_operand.vmem [shape: bf16[512,512], index: 3, kind: input, shape index: {}]   ;;  %s9913_s4 = inlined_call_operand.hbm [shape: bf16[256,512], index: 4, kind: output, shape index: {}]  }
   0x1   :  { %11 = vsyncpa [#allocation6 + $0x1], 0  ;;  %s7296_s15 = smov 0   ;;  %s7298_s16 = smov 0  }
   0x2   :  { %s7300_s17 = smov 0   ;;  %s7302_s18 = smov 0  }
   0x3   :  { %s7304_s19 = smov 0   ;;  %s7306_s20 = smov 0  }
   0x4   :  { %s7308_s21 = smov 0   ;;  %s7310_s22 = smov 0  }
   0x5 LB: > { %s5757_s23 = sadd.s32 4294967295, %s7261_s22   ;;  %s5758_s24 = sadd.s32 4294967294, %s7261_s22   ;;  %s7261_s22 = sphi %s7310_s22, %s17_s22   ;;  %s7257_s21 = sphi %s7308_s21, %s10253_s21   ;;  %s7253_s20 = sphi %s7306_s20, %s10252_s20   ;;  %s7249_s19 = sphi %s7304_s19, %s10251_s19   ;;  %s7245_s18 = sphi %s7302_s18, %s10250_s18   ;;  %s7241_s17 = sphi %s7300_s17, %s10249_s17   ;;  %s7237_s16 = sphi %s7298_s16, %s10248_s16   ;;  %s7233_s15 = sphi %s7296_s15, %s10247_s15  }
   0x6   : > { %s26_s25 = sadd.s32 1, %s7253_s20  ;;  %s29_s26 = sadd.s32 1, %s7257_s21 }
   0x7   : > { %p27_p0 = scmp.ge.s32.totalorder %s26_s25, 2  ;;  %p145_p1 = scmp.ne.s32.totalorder %s7241_s17, %s7237_s16 }
   0x8   : > { %p146_p2 = scmp.eq.s32.totalorder %s5757_s23, 3  ;;  %p151_p4 = scmp.ne.s32.totalorder %s7237_s16, %s7233_s15 }
   0x9   : > { %s10255_s25 = smov (%p27_p0, %s26_s25), 0  ;;  %s10257_s26 = smov (!%p27_p0, %s29_s26), %s7257_s21 }
   0xa   : > { %10015 = sst [smem:[#allocation8_spill]] %s10255_s25  ;;  %p7345_p3 = por %p146_p2, %p145_p1 }
   0xb   : > { %p31_p5 = scmp.ge.s32.totalorder %s10257_s26, 2  ;;  %p152_p6 = scmp.eq.s32.totalorder %s5758_s24, 3 }
   0xc   : > { %p5761_p7 = scmp.ge.s32.totalorder %s7261_s22, 1  ;;  %p203_p8 = scmp.lt.s32.totalorder %s7261_s22, 5 }
   0xd   : > { %s10259_s26 = smov (%p31_p5, %s10257_s26), 0  ;;  %p7355_p9 = por %p152_p6, %p151_p4 }
   0xe   : > { %10017 = sst [smem:[#allocation9_spill]] %s10259_s26  ;;  %p204_p10 = pnand %p5761_p7, %p203_p8 }
   0xf   : > { %s132_s29 = ssub.s32 %s7257_s21, %s10259_s26  ;;  %s135_s30 = sadd.s32 1, %s7241_s17 }
  0x10   : > { %p133_p11 = scmp.eq.s32.totalorder %s132_s29, 0  ;;  %207 = sbr.rel (%p204_p10) target bundleno = 2081 (0x821), region = 36 }
  0x11   : > { %s9915_s6 = sand.u32 (!%p204_p10), 1, %s7237_s16   ;;  %s5763_s7 = sshll.u32 (!%p204_p10), %s7249_s19, 4 }
  0x12   : > { %s7363_s5 = scalar_select %p133_p11, %s7241_s17, %s135_s30  }
  0x13   : > { %s5762_s8 = sshll.u32 (!%p204_p10), %s9915_s6, 8  ;;  %p243_p12 = scmp.lt.s32.totalorder (!%p204_p10), %s5763_s7, 31 }
  0x14   : > { %s5766_s9 = sshll.u32 (!%p204_p10), %s7245_s18, 4  ;;  %s7385_s25 = scalar_lea.vmem (!%p204_p10), [#allocation5], %s5762_s8 }
  0x15   : > { %p250_p13 = scmp.lt.s32.totalorder (!%p204_p10), %s5766_s9, 31  ;;  %p5772_p0 = scmp.ne.s32.totalorder (!%p204_p10), %s7245_s18, 0 }
  0x17   : > { %s10261_s7 = smov (!%p243_p12, %s5763_s7), 31  ;;  %s10263_s9 = smov (!%p250_p13, %s5766_s9), 31 }
  0x18   : > { %s6007_s10 = sshll.u32 %s10261_s7, 4  ;;  %s6008_s14 = sshll.u32 %s10263_s9, 3  ;;  %vm269_vm0 = vcmask (!%p5772_p0), 7168   ;;  %v7263_v0 = vmov (!%p5772_p0), -1e+30   ;;  %v7264_v1 = vmov (!%p5772_p0), 0.0  }
  0x19   : > { %s7373_s13 = scalar_lea.vmem %s9909_s0, %s6007_s10  ;;  %s7378_s29 = scalar_lea.vmem %s9910_s1, %s6008_s14  ;;  %270 = vst.msk [vmem:[#allocation2] sm:$0xff] (!%p5772_p0), %vm269_vm0, %v7263_v0  ;;  %271 = vst.msk [vmem:[#allocation2 + $0x8] sm:$0xff] (!%p5772_p0), %vm269_vm0, %v7263_v0 }
  0x1a   : > { %s7383_s6 = scalar_lea.vmem %s9911_s2, %s6008_s14  ;;  %268 = sbr.rel (%p5772_p0) target bundleno = 121 (0x79), region = 40  ;;  %272 = vst.msk [vmem:[#allocation2 + $0x10] sm:$0xff] (!%p5772_p0), %vm269_vm0, %v7263_v0  ;;  %273 = vst.msk [vmem:[#allocation2 + $0x18] sm:$0xff] (!%p5772_p0), %vm269_vm0, %v7263_v0 }
  0x1b   : > { %274 = vst.msk [vmem:[#allocation2 + $0x20] sm:$0xff] (!%p5772_p0), %vm269_vm0, %v7263_v0  ;;  %275 = vst.msk [vmem:[#allocation2 + $0x28] sm:$0xff] (!%p5772_p0), %vm269_vm0, %v7263_v0 }
  0x1c   : > { %276 = vst.msk [vmem:[#allocation2 + $0x30] sm:$0xff] (!%p5772_p0), %vm269_vm0, %v7263_v0  ;;  %277 = vst.msk [vmem:[#allocation2 + $0x38] sm:$0xff] (!%p5772_p0), %vm269_vm0, %v7263_v0 }
  0x1d   : > { %278 = vst.msk [vmem:[#allocation2 + $0x40] sm:$0xff] (!%p5772_p0), %vm269_vm0, %v7263_v0  ;;  %279 = vst.msk [vmem:[#allocation2 + $0x48] sm:$0xff] (!%p5772_p0), %vm269_vm0, %v7263_v0 }
  0x1e   : > { %280 = vst.msk [vmem:[#allocation2 + $0x50] sm:$0xff] (!%p5772_p0), %vm269_vm0, %v7263_v0  ;;  %281 = vst.msk [vmem:[#allocation2 + $0x58] sm:$0xff] (!%p5772_p0), %vm269_vm0, %v7263_v0 }
  0x1f   : > { %282 = vst.msk [vmem:[#allocation2 + $0x60] sm:$0xff] (!%p5772_p0), %vm269_vm0, %v7263_v0  ;;  %283 = vst.msk [vmem:[#allocation2 + $0x68] sm:$0xff] (!%p5772_p0), %vm269_vm0, %v7263_v0 }
  0x20   : > { %284 = vst.msk [vmem:[#allocation2 + $0x70] sm:$0xff] (!%p5772_p0), %vm269_vm0, %v7263_v0  ;;  %285 = vst.msk [vmem:[#allocation2 + $0x78] sm:$0xff] (!%p5772_p0), %vm269_vm0, %v7263_v0 }
  0x21   : > { %286 = vst.msk [vmem:[#allocation2 + $0x80] sm:$0xff] %vm269_vm0, %v7263_v0  ;;  %287 = vst.msk [vmem:[#allocation2 + $0x88] sm:$0xff] %vm269_vm0, %v7263_v0 }
  0x22   : > { %288 = vst.msk [vmem:[#allocation2 + $0x90] sm:$0xff] %vm269_vm0, %v7263_v0  ;;  %289 = vst.msk [vmem:[#allocation2 + $0x98] sm:$0xff] %vm269_vm0, %v7263_v0 }
  0x23   : > { %290 = vst.msk [vmem:[#allocation2 + $0xa0] sm:$0xff] %vm269_vm0, %v7263_v0  ;;  %291 = vst.msk [vmem:[#allocation2 + $0xa8] sm:$0xff] %vm269_vm0, %v7263_v0 }
  0x24   : > { %292 = vst.msk [vmem:[#allocation2 + $0xb0] sm:$0xff] %vm269_vm0, %v7263_v0  ;;  %293 = vst.msk [vmem:[#allocation2 + $0xb8] sm:$0xff] %vm269_vm0, %v7263_v0 }
  0x25   : > { %294 = vst.msk [vmem:[#allocation2 + $0xc0] sm:$0xff] %vm269_vm0, %v7263_v0  ;;  %295 = vst.msk [vmem:[#allocation2 + $0xc8] sm:$0xff] %vm269_vm0, %v7263_v0 }
  0x26   : > { %296 = vst.msk [vmem:[#allocation2 + $0xd0] sm:$0xff] %vm269_vm0, %v7263_v0  ;;  %297 = vst.msk [vmem:[#allocation2 + $0xd8] sm:$0xff] %vm269_vm0, %v7263_v0 }
  0x27   : > { %298 = vst.msk [vmem:[#allocation2 + $0xe0] sm:$0xff] %vm269_vm0, %v7263_v0  ;;  %299 = vst.msk [vmem:[#allocation2 + $0xe8] sm:$0xff] %vm269_vm0, %v7263_v0 }
  0x28   : > { %300 = vst.msk [vmem:[#allocation2 + $0xf0] sm:$0xff] %vm269_vm0, %v7263_v0  ;;  %301 = vst.msk [vmem:[#allocation2 + $0xf8] sm:$0xff] %vm269_vm0, %v7263_v0 }
  0x29   : > { %302 = vst.msk [vmem:[#allocation2 + $0x100] sm:$0xff] %vm269_vm0, %v7263_v0  ;;  %303 = vst.msk [vmem:[#allocation2 + $0x108] sm:$0xff] %vm269_vm0, %v7263_v0 }
  0x2a   : > { %304 = vst.msk [vmem:[#allocation2 + $0x110] sm:$0xff] %vm269_vm0, %v7263_v0  ;;  %305 = vst.msk [vmem:[#allocation2 + $0x118] sm:$0xff] %vm269_vm0, %v7263_v0 }
  0x2b   : > { %306 = vst.msk [vmem:[#allocation2 + $0x120] sm:$0xff] %vm269_vm0, %v7263_v0  ;;  %307 = vst.msk [vmem:[#allocation2 + $0x128] sm:$0xff] %vm269_vm0, %v7263_v0 }
  0x2c   : > { %308 = vst.msk [vmem:[#allocation2 + $0x130] sm:$0xff] %vm269_vm0, %v7263_v0  ;;  %309 = vst.msk [vmem:[#allocation2 + $0x138] sm:$0xff] %vm269_vm0, %v7263_v0 }
  0x2d   : > { %310 = vst.msk [vmem:[#allocation2 + $0x140] sm:$0xff] %vm269_vm0, %v7263_v0  ;;  %311 = vst.msk [vmem:[#allocation2 + $0x148] sm:$0xff] %vm269_vm0, %v7263_v0 }
  0x2e   : > { %312 = vst.msk [vmem:[#allocation2 + $0x150] sm:$0xff] %vm269_vm0, %v7263_v0  ;;  %313 = vst.msk [vmem:[#allocation2 + $0x158] sm:$0xff] %vm269_vm0, %v7263_v0 }
  0x2f   : > { %314 = vst.msk [vmem:[#allocation2 + $0x160] sm:$0xff] %vm269_vm0, %v7263_v0  ;;  %315 = vst.msk [vmem:[#allocation2 + $0x168] sm:$0xff] %vm269_vm0, %v7263_v0 }
  0x30   : > { %316 = vst.msk [vmem:[#allocation2 + $0x170] sm:$0xff] %vm269_vm0, %v7263_v0  ;;  %317 = vst.msk [vmem:[#allocation2 + $0x178] sm:$0xff] %vm269_vm0, %v7263_v0 }
  0x31   : > { %318 = vst.msk [vmem:[#allocation2 + $0x180] sm:$0xff] %vm269_vm0, %v7263_v0  ;;  %319 = vst.msk [vmem:[#allocation2 + $0x188] sm:$0xff] %vm269_vm0, %v7263_v0 }
  0x32   : > { %320 = vst.msk [vmem:[#allocation2 + $0x190] sm:$0xff] %vm269_vm0, %v7263_v0  ;;  %321 = vst.msk [vmem:[#allocation2 + $0x198] sm:$0xff] %vm269_vm0, %v7263_v0 }
  0x33   : > { %322 = vst.msk [vmem:[#allocation2 + $0x1a0] sm:$0xff] %vm269_vm0, %v7263_v0  ;;  %323 = vst.msk [vmem:[#allocation2 + $0x1a8] sm:$0xff] %vm269_vm0, %v7263_v0 }
  0x34   : > { %324 = vst.msk [vmem:[#allocation2 + $0x1b0] sm:$0xff] %vm269_vm0, %v7263_v0  ;;  %325 = vst.msk [vmem:[#allocation2 + $0x1b8] sm:$0xff] %vm269_vm0, %v7263_v0 }
  0x35   : > { %326 = vst.msk [vmem:[#allocation2 + $0x1c0] sm:$0xff] %vm269_vm0, %v7263_v0  ;;  %327 = vst.msk [vmem:[#allocation2 + $0x1c8] sm:$0xff] %vm269_vm0, %v7263_v0 }
  0x36   : > { %328 = vst.msk [vmem:[#allocation2 + $0x1d0] sm:$0xff] %vm269_vm0, %v7263_v0  ;;  %329 = vst.msk [vmem:[#allocation2 + $0x1d8] sm:$0xff] %vm269_vm0, %v7263_v0 }
  0x37   : > { %330 = vst.msk [vmem:[#allocation2 + $0x1e0] sm:$0xff] %vm269_vm0, %v7263_v0  ;;  %331 = vst.msk [vmem:[#allocation2 + $0x1e8] sm:$0xff] %vm269_vm0, %v7263_v0 }
  0x38   : > { %332 = vst.msk [vmem:[#allocation2 + $0x1f0] sm:$0xff] %vm269_vm0, %v7263_v0  ;;  %333 = vst.msk [vmem:[#allocation2 + $0x1f8] sm:$0xff] %vm269_vm0, %v7263_v0 }
  0x39   : > { %334 = vst.msk [vmem:[#allocation3] sm:$0xff] %vm269_vm0, %v7264_v1  ;;  %335 = vst.msk [vmem:[#allocation3 + $0x8] sm:$0xff] %vm269_vm0, %v7264_v1 }
  0x3a   : > { %336 = vst.msk [vmem:[#allocation3 + $0x10] sm:$0xff] %vm269_vm0, %v7264_v1  ;;  %337 = vst.msk [vmem:[#allocation3 + $0x18] sm:$0xff] %vm269_vm0, %v7264_v1 }
  0x3b   : > { %338 = vst.msk [vmem:[#allocation3 + $0x20] sm:$0xff] %vm269_vm0, %v7264_v1  ;;  %339 = vst.msk [vmem:[#allocation3 + $0x28] sm:$0xff] %vm269_vm0, %v7264_v1 }
  0x3c   : > { %340 = vst.msk [vmem:[#allocation3 + $0x30] sm:$0xff] %vm269_vm0, %v7264_v1  ;;  %341 = vst.msk [vmem:[#allocation3 + $0x38] sm:$0xff] %vm269_vm0, %v7264_v1 }
  0x3d   : > { %342 = vst.msk [vmem:[#allocation3 + $0x40] sm:$0xff] %vm269_vm0, %v7264_v1  ;;  %343 = vst.msk [vmem:[#allocation3 + $0x48] sm:$0xff] %vm269_vm0, %v7264_v1 }
  0x3e   : > { %344 = vst.msk [vmem:[#allocation3 + $0x50] sm:$0xff] %vm269_vm0, %v7264_v1  ;;  %345 = vst.msk [vmem:[#allocation3 + $0x58] sm:$0xff] %vm269_vm0, %v7264_v1 }
  0x3f   : > { %346 = vst.msk [vmem:[#allocation3 + $0x60] sm:$0xff] %vm269_vm0, %v7264_v1  ;;  %347 = vst.msk [vmem:[#allocation3 + $0x68] sm:$0xff] %vm269_vm0, %v7264_v1 }
  0x40   : > { %348 = vst.msk [vmem:[#allocation3 + $0x70] sm:$0xff] %vm269_vm0, %v7264_v1  ;;  %349 = vst.msk [vmem:[#allocation3 + $0x78] sm:$0xff] %vm269_vm0, %v7264_v1 }
  0x41   : > { %350 = vst.msk [vmem:[#allocation3 + $0x80] sm:$0xff] %vm269_vm0, %v7264_v1  ;;  %351 = vst.msk [vmem:[#allocation3 + $0x88] sm:$0xff] %vm269_vm0, %v7264_v1 }
  0x42   : > { %352 = vst.msk [vmem:[#allocation3 + $0x90] sm:$0xff] %vm269_vm0, %v7264_v1  ;;  %353 = vst.msk [vmem:[#allocation3 + $0x98] sm:$0xff] %vm269_vm0, %v7264_v1 }
  0x43   : > { %354 = vst.msk [vmem:[#allocation3 + $0xa0] sm:$0xff] %vm269_vm0, %v7264_v1  ;;  %355 = vst.msk [vmem:[#allocation3 + $0xa8] sm:$0xff] %vm269_vm0, %v7264_v1 }
  0x44   : > { %356 = vst.msk [vmem:[#allocation3 + $0xb0] sm:$0xff] %vm269_vm0, %v7264_v1  ;;  %357 = vst.msk [vmem:[#allocation3 + $0xb8] sm:$0xff] %vm269_vm0, %v7264_v1 }
  0x45   : > { %358 = vst.msk [vmem:[#allocation3 + $0xc0] sm:$0xff] %vm269_vm0, %v7264_v1  ;;  %359 = vst.msk [vmem:[#allocation3 + $0xc8] sm:$0xff] %vm269_vm0, %v7264_v1 }
  0x46   : > { %360 = vst.msk [vmem:[#allocation3 + $0xd0] sm:$0xff] %vm269_vm0, %v7264_v1  ;;  %361 = vst.msk [vmem:[#allocation3 + $0xd8] sm:$0xff] %vm269_vm0, %v7264_v1 }
  0x47   : > { %362 = vst.msk [vmem:[#allocation3 + $0xe0] sm:$0xff] %vm269_vm0, %v7264_v1  ;;  %363 = vst.msk [vmem:[#allocation3 + $0xe8] sm:$0xff] %vm269_vm0, %v7264_v1 }
  0x48   : > { %364 = vst.msk [vmem:[#allocation3 + $0xf0] sm:$0xff] %vm269_vm0, %v7264_v1  ;;  %365 = vst.msk [vmem:[#allocation3 + $0xf8] sm:$0xff] %vm269_vm0, %v7264_v1 }
  0x49   : > { %366 = vst.msk [vmem:[#allocation3 + $0x100] sm:$0xff] %vm269_vm0, %v7264_v1  ;;  %367 = vst.msk [vmem:[#allocation3 + $0x108] sm:$0xff] %vm269_vm0, %v7264_v1 }
  0x4a   : > { %368 = vst.msk [vmem:[#allocation3 + $0x110] sm:$0xff] %vm269_vm0, %v7264_v1  ;;  %369 = vst.msk [vmem:[#allocation3 + $0x118] sm:$0xff] %vm269_vm0, %v7264_v1 }
  0x4b   : > { %370 = vst.msk [vmem:[#allocation3 + $0x120] sm:$0xff] %vm269_vm0, %v7264_v1  ;;  %371 = vst.msk [vmem:[#allocation3 + $0x128] sm:$0xff] %vm269_vm0, %v7264_v1 }
  0x4c   : > { %372 = vst.msk [vmem:[#allocation3 + $0x130] sm:$0xff] %vm269_vm0, %v7264_v1  ;;  %373 = vst.msk [vmem:[#allocation3 + $0x138] sm:$0xff] %vm269_vm0, %v7264_v1 }
  0x4d   : > { %374 = vst.msk [vmem:[#allocation3 + $0x140] sm:$0xff] %vm269_vm0, %v7264_v1  ;;  %375 = vst.msk [vmem:[#allocation3 + $0x148] sm:$0xff] %vm269_vm0, %v7264_v1 }
  0x4e   : > { %376 = vst.msk [vmem:[#allocation3 + $0x150] sm:$0xff] %vm269_vm0, %v7264_v1  ;;  %377 = vst.msk [vmem:[#allocation3 + $0x158] sm:$0xff] %vm269_vm0, %v7264_v1 }
  0x4f   : > { %378 = vst.msk [vmem:[#allocation3 + $0x160] sm:$0xff] %vm269_vm0, %v7264_v1  ;;  %379 = vst.msk [vmem:[#allocation3 + $0x168] sm:$0xff] %vm269_vm0, %v7264_v1 }
  0x50   : > { %380 = vst.msk [vmem:[#allocation3 + $0x170] sm:$0xff] %vm269_vm0, %v7264_v1  ;;  %381 = vst.msk [vmem:[#allocation3 + $0x178] sm:$0xff] %vm269_vm0, %v7264_v1 }
  0x51   : > { %382 = vst.msk [vmem:[#allocation3 + $0x180] sm:$0xff] %vm269_vm0, %v7264_v1  ;;  %383 = vst.msk [vmem:[#allocation3 + $0x188] sm:$0xff] %vm269_vm0, %v7264_v1 }
  0x52   : > { %384 = vst.msk [vmem:[#allocation3 + $0x190] sm:$0xff] %vm269_vm0, %v7264_v1  ;;  %385 = vst.msk [vmem:[#allocation3 + $0x198] sm:$0xff] %vm269_vm0, %v7264_v1 }
  0x53   : > { %386 = vst.msk [vmem:[#allocation3 + $0x1a0] sm:$0xff] %vm269_vm0, %v7264_v1  ;;  %387 = vst.msk [vmem:[#allocation3 + $0x1a8] sm:$0xff] %vm269_vm0, %v7264_v1 }
  0x54   : > { %388 = vst.msk [vmem:[#allocation3 + $0x1b0] sm:$0xff] %vm269_vm0, %v7264_v1  ;;  %389 = vst.msk [vmem:[#allocation3 + $0x1b8] sm:$0xff] %vm269_vm0, %v7264_v1 }
  0x55   : > { %390 = vst.msk [vmem:[#allocation3 + $0x1c0] sm:$0xff] %vm269_vm0, %v7264_v1  ;;  %391 = vst.msk [vmem:[#allocation3 + $0x1c8] sm:$0xff] %vm269_vm0, %v7264_v1 }
  0x56   : > { %392 = vst.msk [vmem:[#allocation3 + $0x1d0] sm:$0xff] %vm269_vm0, %v7264_v1  ;;  %393 = vst.msk [vmem:[#allocation3 + $0x1d8] sm:$0xff] %vm269_vm0, %v7264_v1 }
  0x57   : > { %394 = vst.msk [vmem:[#allocation3 + $0x1e0] sm:$0xff] %vm269_vm0, %v7264_v1  ;;  %395 = vst.msk [vmem:[#allocation3 + $0x1e8] sm:$0xff] %vm269_vm0, %v7264_v1 }
  0x58   : > { %396 = vst.msk [vmem:[#allocation3 + $0x1f0] sm:$0xff] %vm269_vm0, %v7264_v1  ;;  %397 = vst.msk [vmem:[#allocation3 + $0x1f8] sm:$0xff] %vm269_vm0, %v7264_v1 }
  0x59   : > { %398 = vst [vmem:[#allocation4] sm:$0xff] %v7264_v1  ;;  %399 = vst [vmem:[#allocation4 + $0x8] sm:$0xff] %v7264_v1 }
  0x5a   : > { %400 = vst [vmem:[#allocation4 + $0x10] sm:$0xff] %v7264_v1  ;;  %401 = vst [vmem:[#allocation4 + $0x18] sm:$0xff] %v7264_v1 }
  0x5b   : > { %402 = vst [vmem:[#allocation4 + $0x20] sm:$0xff] %v7264_v1  ;;  %403 = vst [vmem:[#allocation4 + $0x28] sm:$0xff] %v7264_v1 }
  0x5c   : > { %404 = vst [vmem:[#allocation4 + $0x30] sm:$0xff] %v7264_v1  ;;  %405 = vst [vmem:[#allocation4 + $0x38] sm:$0xff] %v7264_v1 }
  0x5d   : > { %406 = vst [vmem:[#allocation4 + $0x40] sm:$0xff] %v7264_v1  ;;  %407 = vst [vmem:[#allocation4 + $0x48] sm:$0xff] %v7264_v1 }
  0x5e   : > { %408 = vst [vmem:[#allocation4 + $0x50] sm:$0xff] %v7264_v1  ;;  %409 = vst [vmem:[#allocation4 + $0x58] sm:$0xff] %v7264_v1 }
  0x5f   : > { %410 = vst [vmem:[#allocation4 + $0x60] sm:$0xff] %v7264_v1  ;;  %411 = vst [vmem:[#allocation4 + $0x68] sm:$0xff] %v7264_v1 }
  0x60   : > { %412 = vst [vmem:[#allocation4 + $0x70] sm:$0xff] %v7264_v1  ;;  %413 = vst [vmem:[#allocation4 + $0x78] sm:$0xff] %v7264_v1 }
  0x61   : > { %414 = vst [vmem:[#allocation4 + $0x80] sm:$0xff] %v7264_v1  ;;  %415 = vst [vmem:[#allocation4 + $0x88] sm:$0xff] %v7264_v1 }
  0x62   : > { %416 = vst [vmem:[#allocation4 + $0x90] sm:$0xff] %v7264_v1  ;;  %417 = vst [vmem:[#allocation4 + $0x98] sm:$0xff] %v7264_v1 }
  0x63   : > { %418 = vst [vmem:[#allocation4 + $0xa0] sm:$0xff] %v7264_v1  ;;  %419 = vst [vmem:[#allocation4 + $0xa8] sm:$0xff] %v7264_v1 }
  0x64   : > { %420 = vst [vmem:[#allocation4 + $0xb0] sm:$0xff] %v7264_v1  ;;  %421 = vst [vmem:[#allocation4 + $0xb8] sm:$0xff] %v7264_v1 }
  0x65   : > { %422 = vst [vmem:[#allocation4 + $0xc0] sm:$0xff] %v7264_v1  ;;  %423 = vst [vmem:[#allocation4 + $0xc8] sm:$0xff] %v7264_v1 }
  0x66   : > { %424 = vst [vmem:[#allocation4 + $0xd0] sm:$0xff] %v7264_v1  ;;  %425 = vst [vmem:[#allocation4 + $0xd8] sm:$0xff] %v7264_v1 }
  0x67   : > { %426 = vst [vmem:[#allocation4 + $0xe0] sm:$0xff] %v7264_v1  ;;  %427 = vst [vmem:[#allocation4 + $0xe8] sm:$0xff] %v7264_v1 }
  0x68   : > { %428 = vst [vmem:[#allocation4 + $0xf0] sm:$0xff] %v7264_v1  ;;  %429 = vst [vmem:[#allocation4 + $0xf8] sm:$0xff] %v7264_v1 }
  0x69   : > { %430 = vst [vmem:[#allocation4 + $0x100] sm:$0xff] %v7264_v1  ;;  %431 = vst [vmem:[#allocation4 + $0x108] sm:$0xff] %v7264_v1 }
  0x6a   : > { %432 = vst [vmem:[#allocation4 + $0x110] sm:$0xff] %v7264_v1  ;;  %433 = vst [vmem:[#allocation4 + $0x118] sm:$0xff] %v7264_v1 }
  0x6b   : > { %434 = vst [vmem:[#allocation4 + $0x120] sm:$0xff] %v7264_v1  ;;  %435 = vst [vmem:[#allocation4 + $0x128] sm:$0xff] %v7264_v1 }
  0x6c   : > { %436 = vst [vmem:[#allocation4 + $0x130] sm:$0xff] %v7264_v1  ;;  %437 = vst [vmem:[#allocation4 + $0x138] sm:$0xff] %v7264_v1 }
  0x6d   : > { %438 = vst [vmem:[#allocation4 + $0x140] sm:$0xff] %v7264_v1  ;;  %439 = vst [vmem:[#allocation4 + $0x148] sm:$0xff] %v7264_v1 }
  0x6e   : > { %440 = vst [vmem:[#allocation4 + $0x150] sm:$0xff] %v7264_v1  ;;  %441 = vst [vmem:[#allocation4 + $0x158] sm:$0xff] %v7264_v1 }
  0x6f   : > { %442 = vst [vmem:[#allocation4 + $0x160] sm:$0xff] %v7264_v1  ;;  %443 = vst [vmem:[#allocation4 + $0x168] sm:$0xff] %v7264_v1 }
  0x70   : > { %444 = vst [vmem:[#allocation4 + $0x170] sm:$0xff] %v7264_v1  ;;  %445 = vst [vmem:[#allocation4 + $0x178] sm:$0xff] %v7264_v1 }
  0x71   : > { %446 = vst [vmem:[#allocation4 + $0x180] sm:$0xff] %v7264_v1  ;;  %447 = vst [vmem:[#allocation4 + $0x188] sm:$0xff] %v7264_v1 }
  0x72   : > { %448 = vst [vmem:[#allocation4 + $0x190] sm:$0xff] %v7264_v1  ;;  %449 = vst [vmem:[#allocation4 + $0x198] sm:$0xff] %v7264_v1 }
  0x73   : > { %450 = vst [vmem:[#allocation4 + $0x1a0] sm:$0xff] %v7264_v1  ;;  %451 = vst [vmem:[#allocation4 + $0x1a8] sm:$0xff] %v7264_v1 }
  0x74   : > { %452 = vst [vmem:[#allocation4 + $0x1b0] sm:$0xff] %v7264_v1  ;;  %453 = vst [vmem:[#allocation4 + $0x1b8] sm:$0xff] %v7264_v1 }
  0x75   : > { %454 = vst [vmem:[#allocation4 + $0x1c0] sm:$0xff] %v7264_v1  ;;  %455 = vst [vmem:[#allocation4 + $0x1c8] sm:$0xff] %v7264_v1 }
  0x76   : > { %456 = vst [vmem:[#allocation4 + $0x1d0] sm:$0xff] %v7264_v1  ;;  %457 = vst [vmem:[#allocation4 + $0x1d8] sm:$0xff] %v7264_v1 }
  0x77   : > { %458 = vst [vmem:[#allocation4 + $0x1e0] sm:$0xff] %v7264_v1  ;;  %459 = vst [vmem:[#allocation4 + $0x1e8] sm:$0xff] %v7264_v1 }
  0x78   : > { %460 = vst [vmem:[#allocation4 + $0x1f0] sm:$0xff] %v7264_v1  ;;  %461 = vst [vmem:[#allocation4 + $0x1f8] sm:$0xff] %v7264_v1 }
  0x79 PF: > { %s5773_s26 = sshll.u32 %s7245_s18, 7  ;;  %s5774_s7 = sshll.u32 %s7249_s19, 7 }
  0x7a   : > { %s464_s8 = sadd.s32 127, %s5774_s7 }
  0x7b   : > { %p5775_p1 = scmp.gt.s32.totalorder %s5773_s26, %s464_s8 }
  0x7d   : > { %468 = sbr.rel (%p5775_p1) target bundleno = 1567 (0x61f), region = 44 }
  0x84   : > { %v6492_v2 = vld [vmem:[%s7378_s29] ss:$8 sps:$4 sm:$0xff]   ;;  %v6495_v3 = vld [vmem:[%s7378_s29 + $0x10] ss:$8 sps:$4 sm:$0xff]   ;;  %v6511_v18 = vld [vmem:[%s7373_s13 + $0x4] ss:$16 sps:$4 sm:$0xff]   ;;  %v533_v26 = vlaneseq  ;;  %v7743_v30 = vstv %s5774_s7 }
  0x85   : > { %6140 = vmatprep.subr.bf16.mxu0 %v6492_v2  ;;  %v6497_v4 = vld [vmem:[%s7378_s29 + $0x20] ss:$8 sps:$4 sm:$0xff]   ;;  %v6499_v6 = vld [vmem:[%s7378_s29 + $0x30] ss:$8 sps:$4 sm:$0xff]   ;;  %v6526_v19 = vld [vmem:[%s7373_s13 + $0x24] ss:$16 sps:$4 sm:$0xff]   ;;  %v569_v31 = vstv %s5773_s26 }
  0x86   : > { %6141 = vmatpush3.bf16.xpose.msra.mxu0 %v6492_v2  ;;  %v6509_v5 = vld [vmem:[%s7373_s13] ss:$16 sps:$4 sm:$0xff]   ;;  %v6527_v20 = vld [vmem:[%s7373_s13 + $0x44] ss:$16 sps:$4 sm:$0xff]   ;;  %v7738_v27 = vshrl.u32 %v533_v26, 7  ;;  %v568_v29 = vand.u32 127, %v533_v26 }
  0x87   : > { %6142 = vmatprep.subr.bf16.mxu0 %v6495_v3  ;;  %6156 = vmatprep.mubr.bf16.mxu0 %v6509_v5  ;;  %v6501_v7 = vld [vmem:[%s7378_s29 + $0x40] ss:$8 sps:$4 sm:$0xff]   ;;  %v6503_v8 = vld [vmem:[%s7378_s29 + $0x50] ss:$8 sps:$4 sm:$0xff]   ;;  %v6528_v21 = vld [vmem:[%s7373_s13 + $0x64] ss:$16 sps:$4 sm:$0xff]  }
  0x88   : > { %v6505_v9 = vld [vmem:[%s7378_s29 + $0x60] ss:$8 sps:$4 sm:$0xff]   ;;  %v6507_v10 = vld [vmem:[%s7378_s29 + $0x70] ss:$8 sps:$4 sm:$0xff]   ;;  %v6529_v22 = vld [vmem:[%s7373_s13 + $0x84] ss:$16 sps:$4 sm:$0xff]   ;;  %v7748_v33 = vadd.s32 %v569_v31, %v568_v29  ;;  %v551_v35 = vadd.s32 %v7743_v30, %v7738_v27 }
  0x89   : > { %v6512_v11 = vld [vmem:[%s7373_s13 + $0x20] ss:$16 sps:$4 sm:$0xff]   ;;  %v6530_v23 = vld [vmem:[%s7373_s13 + $0xa4] ss:$16 sps:$4 sm:$0xff]   ;;  %v536_v28 = vadd.s32 16, %v7738_v27  ;;  %v537_v34 = vadd.s32 24, %v7738_v27 }
  0x8a   : > { %v6514_v12 = vld [vmem:[%s7373_s13 + $0x40] ss:$16 sps:$4 sm:$0xff]   ;;  %v6531_v24 = vld [vmem:[%s7373_s13 + $0xc4] ss:$16 sps:$4 sm:$0xff]   ;;  %v535_v36 = vadd.s32 8, %v7738_v27  ;;  %v540_v38 = vadd.s32 48, %v7738_v27  ;;  %vm571_vm2 = vcmp.le.s32.totalorder %v7748_v33, %v551_v35 }
  0x8b   : > { %v6516_v13 = vld [vmem:[%s7373_s13 + $0x60] ss:$16 sps:$4 sm:$0xff]   ;;  %v6532_v25 = vld [vmem:[%s7373_s13 + $0xe4] ss:$16 sps:$4 sm:$0xff]   ;;  %v553_v32 = vadd.s32 %v7743_v30, %v536_v28  ;;  %v554_v37 = vadd.s32 %v7743_v30, %v537_v34  ;;  %v541_v40 = vadd.s32 56, %v7738_v27  ;;  %v538_v43 = vadd.s32 32, %v7738_v27 }
  0x8c   : > { %v6518_v14 = vld [vmem:[%s7373_s13 + $0x80] ss:$16 sps:$4 sm:$0xff]   ;;  %v552_v39 = vadd.s32 %v7743_v30, %v535_v36  ;;  %v7265_v41 = vmov -1e+30   ;;  %v557_v45 = vadd.s32 %v7743_v30, %v540_v38  ;;  %v539_v50 = vadd.s32 40, %v7738_v27 }
  0x8d   : > { %v6520_v15 = vld [vmem:[%s7373_s13 + $0xa0] ss:$16 sps:$4 sm:$0xff]   ;;  %vm573_vm1 = vcmp.le.s32.totalorder %v7748_v33, %v553_v32  ;;  %v7765_v44 = vsel %vm571_vm2, 0.0, %v7265_v41  ;;  %vm574_vm3 = vcmp.le.s32.totalorder %v7748_v33, %v554_v37  ;;  %v558_v49 = vadd.s32 %v7743_v30, %v541_v40 }
  0x8e   : > { %6143 = vmatpush3.bf16.xpose.msra.mxu0 %v6495_v3  ;;  %v6522_v16 = vld [vmem:[%s7373_s13 + $0xc0] ss:$16 sps:$4 sm:$0xff]   ;;  %v7761_v42 = vsel %vm573_vm1, 0.0, %v7265_v41  ;;  %10020 = vst [vmem:[#allocation11_spill] sm:$0xff] %v7765_v44  ;;  %vm572_vm4 = vcmp.le.s32.totalorder %v7748_v33, %v552_v39  ;;  %v7779_v52 = vsel %vm574_vm3, 0.0, %v7265_v41  ;;  %v555_v54 = vadd.s32 %v7743_v30, %v538_v43 }
  0x8f   : > { %6144 = vmatprep.subr.bf16.mxu0 %v6497_v4  ;;  %v6524_v17 = vld [vmem:[%s7373_s13 + $0xe0] ss:$16 sps:$4 sm:$0xff]   ;;  %10019 = vst [vmem:[#allocation10_spill] sm:$0xff] %v7761_v42  ;;  %10023 = vst [vmem:[#allocation14_spill] sm:$0xff] %v7779_v52  ;;  %v7784_v55 = vsel %vm572_vm4, 0.0, %v7265_v41  ;;  %vm577_vm5 = vcmp.le.s32.totalorder %v7748_v33, %v557_v45  ;;  %v544_v57 = vadd.s32 80, %v7738_v27  ;;  %vm578_vm6 = vcmp.le.s32.totalorder %v7748_v33, %v558_v49 }
  0x90   : > { %10024 = vst [vmem:[#allocation15_spill] sm:$0xff] %v7784_v55  ;;  %v556_v59 = vadd.s32 %v7743_v30, %v539_v50  ;;  %v545_v60 = vadd.s32 88, %v7738_v27  ;;  %v7799_v62 = vsel %vm577_vm5, 0.0, %v7265_v41  ;;  %vm575_vm7 = vcmp.le.s32.totalorder %v7748_v33, %v555_v54 }
  0x91   : > { %10027 = vst [vmem:[#allocation18_spill] sm:$0xff] %v7799_v62  ;;  %v542_v63 = vadd.s32 64, %v7738_v27  ;;  %v561_v0 = vadd.s32 %v7743_v30, %v544_v57  ;;  %v543_v1 = vadd.s32 72, %v7738_v27  ;;  %v7808_v3 = vsel %vm578_vm6, 0.0, %v7265_v41 }
  0x92   : > { %10028 = vst [vmem:[#allocation19_spill] sm:$0xff] %v7808_v3  ;;  %v7814_v5 = vsel %vm575_vm7, 0.0, %v7265_v41  ;;  %vm576_vm8 = vcmp.le.s32.totalorder %v7748_v33, %v556_v59  ;;  %v7266_v32 = vmov 0   ;;  %vm1532_vm1 = vcmask 7168  }
  0x93   : > { %10030 = vst [vmem:[#allocation21_spill] sm:$0xff] %v7814_v5  ;;  %vm581_vm9 = vcmp.le.s32.totalorder %v7748_v33, %v561_v0  ;;  %6491 = vset.pattern.permute.xlu1 %v7266_v32  ;;  %6490 = vset.pattern.permute.xlu0 %v7266_v32 }
  0x96   : > { %6145 = vmatpush3.bf16.xpose.msra.mxu0 %v6497_v4 }
  0x97   : > { %6146 = vmatprep.subr.bf16.mxu0 %v6499_v6 }
  0x9e   : > { %6147 = vmatpush3.bf16.xpose.msra.mxu0 %v6499_v6 }
  0x9f   : > { %6148 = vmatprep.subr.bf16.mxu0 %v6501_v7 }
  0xa6   : > { %6149 = vmatpush3.bf16.xpose.msra.mxu0 %v6501_v7  ;;  %v562_v7 = vadd.s32 %v7743_v30, %v545_v60 }
  0xa7   : > { %6150 = vmatprep.subr.bf16.mxu0 %v6503_v8 }
  0xa8   : > { %vm582_vm10 = vcmp.le.s32.totalorder %v7748_v33, %v562_v7 }
  0xae   : > { %6151 = vmatpush3.bf16.xpose.msra.mxu0 %v6503_v8 }
  0xaf   : > { %6152 = vmatprep.subr.bf16.mxu0 %v6505_v9 }
  0xb6   : > { %6153 = vmatpush3.bf16.xpose.msra.mxu0 %v6505_v9  ;;  %v559_v9 = vadd.s32 %v7743_v30, %v542_v63 }
  0xb7   : > { %6154 = vmatprep.subr.bf16.mxu0 %v6507_v10 }
  0xb8   : > { %vm579_vm11 = vcmp.le.s32.totalorder %v7748_v33, %v559_v9 }
  0xbe   : > { %6155 = vmatpush3.bf16.xpose.msra.mxu0 %v6507_v10 }
  0xc5   : > { %6157 = vmatmul.mubr.bf16.vlgmr.msra.gmra.mrb[0].mxu0 %v6512_v11 }
  0xc6   : > { %6160 = vmatprep.mubr.bf16.mxu0 %v6514_v12  ;;  %v560_v12 = vadd.s32 %v7743_v30, %v543_v1 }
  0xc8   : > { %vm580_vm12 = vcmp.le.s32.totalorder %v7748_v33, %v560_v12 }
  0xcd   : > { %6161 = vmatmul.mubr.bf16.gmra.mrb[4].mxu0 %v6516_v13  ;;  %v548_v13 = vadd.s32 112, %v7738_v27 }
  0xce   : > { %6164 = vmatprep.mubr.bf16.mxu0 %v6518_v14 }
  0xd5   : > { %6165 = vmatmul.mubr.bf16.gmra.mrb[8].mxu0 %v6520_v15  ;;  %v7829_v15 = vsel %vm576_vm8, 0.0, %v7265_v41 }
  0xd6   : > { %6168 = vmatprep.mubr.bf16.mxu0 %v6522_v16  ;;  %10033 = vst [vmem:[#allocation24_spill] sm:$0xff] %v7829_v15  ;;  %v549_v16 = vadd.s32 120, %v7738_v27 }
  0xd8   : > { %v566_v28 = vadd.s32 %v7743_v30, %v549_v16 }
  0xda   : > { %vm586_vm14 = vcmp.le.s32.totalorder %v7748_v33, %v566_v28 }
  0xdb   : > { %v7883_v40 = vsel %vm586_vm14, 0.0, %v7265_v41 }
  0xdc   : > { %10044 = vst [vmem:[#allocation35_spill] sm:$0xff] %v7883_v40 }
  0xdd   : > { %6169 = vmatmul.mubr.bf16.gmra.mrb[12].mxu0 %v6524_v17  ;;  %v7836_v17 = vsel %vm581_vm9, 0.0, %v7265_v41 }
  0xde   : > { %6172 = vmatprep.mubr.bf16.mxu0 %v6511_v18  ;;  %10034 = vst [vmem:[#allocation25_spill] sm:$0xff] %v7836_v17  ;;  %v546_v18 = vadd.s32 96, %v7738_v27 }
  0xe0   : > { %v563_v31 = vadd.s32 %v7743_v30, %v546_v18 }
  0xe2   : > { %vm583_vm15 = vcmp.le.s32.totalorder %v7748_v33, %v563_v31 }
  0xe3   : > { %v7889_v45 = vsel %vm583_vm15, 0.0, %v7265_v41 }
  0xe4   : > { %10046 = vst [vmem:[#allocation37_spill] sm:$0xff] %v7889_v45 }
  0xe5   : > { %6173 = vmatmul.mubr.bf16.gmra.mrb[16].mxu0 %v6526_v19 }
  0xe6   : > { %6176 = vmatprep.mubr.bf16.mxu0 %v6527_v20  ;;  %v565_v20 = vadd.s32 %v7743_v30, %v548_v13 }
  0xe8   : > { %vm585_vm13 = vcmp.le.s32.totalorder %v7748_v33, %v565_v20 }
  0xe9   : > { %v7877_v39 = vsel %vm585_vm13, 0.0, %v7265_v41 }
  0xea   : > { %10043 = vst [vmem:[#allocation34_spill] sm:$0xff] %v7877_v39 }
  0xed   : > { %6177 = vmatmul.mubr.bf16.gmra.mrb[20].mxu0 %v6528_v21  ;;  %v547_v21 = vadd.s32 104, %v7738_v27  ;;  %v7859_v27 = vsel %vm580_vm12, 0.0, %v7265_v41 }
  0xee   : > { %6180 = vmatprep.mubr.bf16.mxu0 %v6529_v22  ;;  %10039 = vst [vmem:[#allocation30_spill] sm:$0xff] %v7859_v27 }
  0xef   : > { %v564_v36 = vadd.s32 %v7743_v30, %v547_v21 }
  0xf1   : > { %vm584_vm0 = vcmp.le.s32.totalorder %v7748_v33, %v564_v36 }
  0xf2   : > { %v7893_v49 = vsel %vm584_vm0, 0.0, %v7265_v41 }
  0xf3   : > { %10047 = vst [vmem:[#allocation38_spill] sm:$0xff] %v7893_v49 }
  0xf5   : > { %6181 = vmatmul.mubr.bf16.gmra.mrb[24].mxu0 %v6530_v23  ;;  %v7848_v23 = vsel %vm582_vm10, 0.0, %v7265_v41 }
  0xf6   : > { %6184 = vmatprep.mubr.bf16.mxu0 %v6531_v24  ;;  %10036 = vst [vmem:[#allocation27_spill] sm:$0xff] %v7848_v23 }
  0xfd   : > { %6185 = vmatmul.mubr.bf16.gmra.mrb[28].mxu0 %v6532_v25  ;;  %v7854_v25 = vsel %vm579_vm11, 0.0, %v7265_v41 }
  0xfe   : > { %10038 = vst [vmem:[#allocation29_spill] sm:$0xff] %v7854_v25 }
 0x198   : > { %v6158_v46 = vpop.f32.mrb[0].mxu0 }
 0x199   : > { %v7771_v47 = vadd.f32 %v6158_v46, %v7761_v42  ;;  %v765_v48 = vpop.f32.mrb[1].mxu0 }
 0x19a   : > { %v7776_v51 = vadd.f32 %v765_v48, %v7765_v44  ;;  %v6159_v53 = vpop.f32.mrb[2].mxu0 }
 0x19b   : > { %10021 = vst [vmem:[#allocation12_spill] sm:$0xff] %v7771_v47  ;;  %928 = vmax.xlane.f32.xlu1 %v7771_v47  ;;  %v768_v56 = vpop.f32.mrb[3].mxu0  ;;  %v7790_v58 = vadd.f32 %v6159_v53, %v7779_v52 }
 0x19c   : > { %10022 = vst [vmem:[#allocation13_spill] sm:$0xff] %v7776_v51  ;;  %924 = vmax.xlane.f32.xlu0 %v7776_v51  ;;  %v7796_v61 = vadd.f32 %v768_v56, %v7784_v55  ;;  %v8239_v51 = vld [vmem:[#allocation2 + $0xe0] sm:$0xff] }
 0x19d   : > { %10025 = vst [vmem:[#allocation16_spill] sm:$0xff] %v7790_v58 }
 0x19e   : > { %10026 = vst [vmem:[#allocation17_spill] sm:$0xff] %v7796_v61 }
 0x19f   : > { %930 = vmax.xlane.f32.xlu1 %v7790_v58 }
 0x1a0   : > { %v6162_v2 = vpop.f32.mrb[4].mxu0  ;;  %926 = vmax.xlane.f32.xlu0 %v7796_v61  ;;  %v8225_v61 = vld [vmem:[#allocation2 + $0xf8] sm:$0xff] }
 0x1a1   : > { %v7811_v4 = vadd.f32 %v6162_v2, %v7799_v62  ;;  %v781_v6 = vpop.f32.mrb[5].mxu0 }
 0x1a2   : > { %v6163_v8 = vpop.f32.mrb[6].mxu0  ;;  %v7826_v14 = vadd.f32 %v781_v6, %v7814_v5 }
 0x1a3   : > { %10029 = vst [vmem:[#allocation20_spill] sm:$0xff] %v7811_v4  ;;  %v7820_v10 = vadd.f32 %v6163_v8, %v7808_v3  ;;  %v784_v11 = vpop.f32.mrb[7].mxu0 }
 0x1a4   : > { %10032 = vst [vmem:[#allocation23_spill] sm:$0xff] %v7826_v14  ;;  %936 = vmax.xlane.f32.xlu0 %v7811_v4  ;;  %v7841_v19 = vadd.f32 %v784_v11, %v7829_v15 }
 0x1a5   : > { %10031 = vst [vmem:[#allocation22_spill] sm:$0xff] %v7820_v10  ;;  %938 = vmax.xlane.f32.xlu1 %v7820_v10  ;;  %v8207_v10 = vld [vmem:[#allocation2 + $0xc8] sm:$0xff] }
 0x1a6   : > { %10035 = vst [vmem:[#allocation26_spill] sm:$0xff] %v7841_v19 }
 0x1a8   : > { %v6166_v22 = vpop.f32.mrb[8].mxu0  ;;  %932 = vmax.xlane.f32.xlu0 %v7826_v14  ;;  %v8221_v14 = vld [vmem:[#allocation2 + $0xf0] sm:$0xff] }
 0x1a9   : > { %v7851_v24 = vadd.f32 %v6166_v22, %v7836_v17  ;;  %v797_v26 = vpop.f32.mrb[9].mxu0  ;;  %934 = vmax.xlane.f32.xlu1 %v7841_v19  ;;  %10069 = vst [vmem:[#allocation60_spill] sm:$0xff] %v8221_v14 }
 0x1aa   : > { %v6167_v29 = vpop.f32.mrb[10].mxu0  ;;  %v7868_v37 = vadd.f32 %v797_v26, %v7854_v25 }
 0x1ab   : > { %10037 = vst [vmem:[#allocation28_spill] sm:$0xff] %v7851_v24  ;;  %v7863_v34 = vadd.f32 %v6167_v29, %v7848_v23  ;;  %v800_v35 = vpop.f32.mrb[11].mxu0 }
 0x1ac   : > { %10041 = vst [vmem:[#allocation32_spill] sm:$0xff] %v7868_v37  ;;  %944 = vmax.xlane.f32.xlu0 %v7851_v24  ;;  %v7873_v38 = vadd.f32 %v800_v35, %v7859_v27 }
 0x1ad   : > { %10040 = vst [vmem:[#allocation31_spill] sm:$0xff] %v7863_v34  ;;  %946 = vmax.xlane.f32.xlu1 %v7863_v34  ;;  %v8203_v34 = vld [vmem:[#allocation2 + $0xc0] sm:$0xff] }
 0x1ae   : > { %10042 = vst [vmem:[#allocation33_spill] sm:$0xff] %v7873_v38  ;;  %10068 = vst [vmem:[#allocation59_spill] sm:$0xff] %v8203_v34 }
 0x1b0   : > { %v6170_v30 = vpop.f32.mrb[12].mxu0  ;;  %940 = vmax.xlane.f32.xlu0 %v7868_v37 }
 0x1b1   : > { %v7886_v43 = vadd.f32 %v6170_v30, %v7877_v39  ;;  %v813_v46 = vpop.f32.mrb[13].mxu0  ;;  %942 = vmax.xlane.f32.xlu1 %v7873_v38 }
 0x1b2   : > { %v6171_v48 = vpop.f32.mrb[14].mxu0  ;;  %v7899_v53 = vadd.f32 %v813_v46, %v7889_v45 }
 0x1b3   : > { %10045 = vst [vmem:[#allocation36_spill] sm:$0xff] %v7886_v43  ;;  %v7896_v33 = vadd.f32 %v6171_v48, %v7883_v40  ;;  %v816_v50 = vpop.f32.mrb[15].mxu0 }
 0x1b4   : > { %10049 = vst [vmem:[#allocation40_spill] sm:$0xff] %v7899_v53  ;;  %952 = vmax.xlane.f32.xlu0 %v7886_v43  ;;  %v7904_v54 = vadd.f32 %v816_v50, %v7893_v49  ;;  %v8169_v43 = vld [vmem:[#allocation2 + $0xa0] sm:$0xff] }
 0x1b5   : > { %10048 = vst [vmem:[#allocation39_spill] sm:$0xff] %v7896_v33  ;;  %954 = vmax.xlane.f32.xlu1 %v7896_v33 }
 0x1b6   : > { %10050 = vst [vmem:[#allocation41_spill] sm:$0xff] %v7904_v54 }
 0x1b8   : > { %v6174_v56 = vpop.f32.mrb[16].mxu0  ;;  %948 = vmax.xlane.f32.xlu0 %v7899_v53  ;;  %v8175_v53 = vld [vmem:[#allocation2 + $0xa8] sm:$0xff] }
 0x1b9   : > { %v7908_v41 = vadd.f32 %v6174_v56, %v7761_v42  ;;  %v829_v57 = vpop.f32.mrb[17].mxu0  ;;  %950 = vmax.xlane.f32.xlu1 %v7904_v54  ;;  %v6533_v56 = vld [vmem:[%s7383_s6] ss:$8 sps:$4 sm:$0xff]   ;;  %v6554_v42 = vld [vmem:[%s7383_s6 + $0x70] ss:$8 sps:$4 sm:$0xff]  }
 0x1ba   : > { %v6175_v59 = vpop.f32.mrb[18].mxu0  ;;  %v7915_v0 = vadd.f32 %v829_v57, %v7765_v44  ;;  %v6535_v57 = vld [vmem:[%s7383_s6 + $0x4] ss:$8 sps:$4 sm:$0xff]   ;;  %6188 = vmatprep.subr.bf16.mxu1 %v6533_v56  ;;  %v8191_v54 = vld [vmem:[#allocation2 + $0xd8] sm:$0xff] }
 0x1bb   : > { %10051 = vst [vmem:[#allocation42_spill] sm:$0xff] %v7908_v41  ;;  %v7912_v60 = vadd.f32 %v6175_v59, %v7779_v52  ;;  %v832_v63 = vpop.f32.mrb[19].mxu0  ;;  %6284 = vmatprep.subr.bf16.mxu0 %v6535_v57  ;;  %v7974_v59 = vld [vmem:[#allocation2 + $0x10] sm:$0xff]  ;;  %6189 = vmatpush3.bf16.msra.mxu1 %v6533_v56  ;;  %v6553_v44 = vld [vmem:[%s7383_s6 + $0x64] ss:$8 sps:$4 sm:$0xff]  }
 0x1bc   : > { %10053 = vst [vmem:[#allocation44_spill] sm:$0xff] %v7915_v0  ;;  %960 = vmax.xlane.f32.xlu0 %v7908_v41  ;;  %v7920_v1 = vadd.f32 %v832_v63, %v7784_v55  ;;  %6285 = vmatpush3.bf16.msra.mxu0 %v6535_v57  ;;  %v7976_v63 = vld [vmem:[#allocation2] sm:$0xff]  ;;  %v8081_v55 = vld [vmem:[#allocation2 + $0x70] sm:$0xff] }
 0x1bd   : > { %10052 = vst [vmem:[#allocation43_spill] sm:$0xff] %v7912_v60  ;;  %962 = vmax.xlane.f32.xlu1 %v7912_v60 }
 0x1be   : > { %10054 = vst [vmem:[#allocation45_spill] sm:$0xff] %v7920_v1 }
 0x1c0   : > { %v6178_v2 = vpop.f32.mrb[20].mxu0  ;;  %956 = vmax.xlane.f32.xlu0 %v7915_v0 }
 0x1c1   : > { %v7924_v6 = vadd.f32 %v6178_v2, %v7799_v62  ;;  %v845_v7 = vpop.f32.mrb[21].mxu0  ;;  %958 = vmax.xlane.f32.xlu1 %v7920_v1  ;;  %v6536_v2 = vld [vmem:[%s7383_s6 + $0x10] ss:$8 sps:$4 sm:$0xff]  }
 0x1c2   : > { %v6179_v8 = vpop.f32.mrb[22].mxu0  ;;  %v7931_v12 = vadd.f32 %v845_v7, %v7814_v5  ;;  %v6538_v7 = vld [vmem:[%s7383_s6 + $0x14] ss:$8 sps:$4 sm:$0xff]   ;;  %6190 = vmatprep.subr.bf16.mxu1 %v6536_v2 }
 0x1c3   : > { %10055 = vst [vmem:[#allocation46_spill] sm:$0xff] %v7924_v6  ;;  %v7928_v9 = vadd.f32 %v6179_v8, %v7808_v3  ;;  %v848_v11 = vpop.f32.mrb[23].mxu0  ;;  %6286 = vmatprep.subr.bf16.mxu0 %v6538_v7  ;;  %6191 = vmatpush3.bf16.msra.mxu1 %v6536_v2  ;;  %v8008_v2 = vld [vmem:[#allocation2 + $0x30] sm:$0xff]  ;;  %v6551_v3 = vld [vmem:[%s7383_s6 + $0x60] ss:$8 sps:$4 sm:$0xff]  }
 0x1c4   : > { %10057 = vst [vmem:[#allocation48_spill] sm:$0xff] %v7931_v12  ;;  %968 = vmax.xlane.f32.xlu0 %v7924_v6  ;;  %v7936_v13 = vadd.f32 %v848_v11, %v7829_v15  ;;  %6287 = vmatpush3.bf16.msra.mxu0 %v6538_v7  ;;  %v6542_v7 = vld [vmem:[%s7383_s6 + $0x30] ss:$8 sps:$4 sm:$0xff]   ;;  %v6550_v5 = vld [vmem:[%s7383_s6 + $0x54] ss:$8 sps:$4 sm:$0xff]  }
 0x1c5   : > { %10056 = vst [vmem:[#allocation47_spill] sm:$0xff] %v7928_v9  ;;  %970 = vmax.xlane.f32.xlu1 %v7928_v9  ;;  %v8187_v1 = vld [vmem:[#allocation2 + $0xd0] sm:$0xff] }
 0x1c6   : > { %10058 = vst [vmem:[#allocation49_spill] sm:$0xff] %v7936_v13 }
 0x1c8   : > { %v6182_v16 = vpop.f32.mrb[24].mxu0  ;;  %964 = vmax.xlane.f32.xlu0 %v7931_v12  ;;  %v8141_v12 = vld [vmem:[#allocation2 + $0x88] sm:$0xff] }
 0x1c9   : > { %v7940_v18 = vadd.f32 %v6182_v16, %v7836_v17  ;;  %v861_v20 = vpop.f32.mrb[25].mxu0  ;;  %966 = vmax.xlane.f32.xlu1 %v7936_v13  ;;  %v8048_v17 = vld [vmem:[#allocation2 + $0x58] sm:$0xff] }
 0x1ca   : > { %v6183_v21 = vpop.f32.mrb[26].mxu0  ;;  %v7947_v28 = vadd.f32 %v861_v20, %v7854_v25  ;;  %v6547_v25 = vld [vmem:[%s7383_s6 + $0x44] ss:$8 sps:$4 sm:$0xff]   ;;  %v8157_v13 = vld [vmem:[#allocation2 + $0xb8] sm:$0xff] }
 0x1cb   : > { %10059 = vst [vmem:[#allocation50_spill] sm:$0xff] %v7940_v18  ;;  %v7944_v22 = vadd.f32 %v6183_v21, %v7848_v23  ;;  %v864_v26 = vpop.f32.mrb[27].mxu0  ;;  %v7986_v21 = vld [vmem:[#allocation2 + $0x18] sm:$0xff] }
 0x1cc   : > { %10061 = vst [vmem:[#allocation52_spill] sm:$0xff] %v7947_v28  ;;  %976 = vmax.xlane.f32.xlu0 %v7940_v18  ;;  %v7952_v29 = vadd.f32 %v864_v26, %v7859_v27  ;;  %v6548_v23 = vld [vmem:[%s7383_s6 + $0x50] ss:$8 sps:$4 sm:$0xff]   ;;  %v8106_v18 = vld [vmem:[#allocation2 + $0x68] sm:$0xff] }
 0x1cd   : > { %10060 = vst [vmem:[#allocation51_spill] sm:$0xff] %v7944_v22  ;;  %978 = vmax.xlane.f32.xlu1 %v7944_v22 }
 0x1ce   : > { %10062 = vst [vmem:[#allocation53_spill] sm:$0xff] %v7952_v29 }
 0x1d0   : > { %v6186_v31 = vpop.f32.mrb[28].mxu0  ;;  %972 = vmax.xlane.f32.xlu0 %v7947_v28 }
 0x1d1   : > { %v7956_v32 = vadd.f32 %v6186_v31, %v7877_v39  ;;  %v877_v35 = vpop.f32.mrb[29].mxu0  ;;  %974 = vmax.xlane.f32.xlu1 %v7952_v29  ;;  %v7993_v31 = vld [vmem:[#allocation2 + $0x8] sm:$0xff]  ;;  %v8042_v39 = vld [vmem:[#allocation2 + $0x50] sm:$0xff]  ;;  %v8135_v29 = vld [vmem:[#allocation2 + $0x80] sm:$0xff] }
 0x1d2   : > { %v6187_v36 = vpop.f32.mrb[30].mxu0  ;;  %v7963_v48 = vadd.f32 %v877_v35, %v7889_v45  ;;  %v6539_v35 = vld [vmem:[%s7383_s6 + $0x20] ss:$8 sps:$4 sm:$0xff]   ;;  %v6544_v45 = vld [vmem:[%s7383_s6 + $0x34] ss:$8 sps:$4 sm:$0xff]  }
 0x1d3   : > { %10063 = vst [vmem:[#allocation54_spill] sm:$0xff] %v7956_v32  ;;  %v7960_v30 = vadd.f32 %v6187_v36, %v7883_v40  ;;  %v880_v46 = vpop.f32.mrb[31].mxu0  ;;  %6192 = vmatprep.subr.bf16.mxu1 %v6539_v35  ;;  %v6545_v40 = vld [vmem:[%s7383_s6 + $0x40] ss:$8 sps:$4 sm:$0xff]  }
 0x1d4   : > { %10065 = vst [vmem:[#allocation56_spill] sm:$0xff] %v7963_v48  ;;  %984 = vmax.xlane.f32.xlu0 %v7956_v32  ;;  %v7968_v50 = vadd.f32 %v880_v46, %v7893_v49  ;;  %6193 = vmatpush3.bf16.msra.mxu1 %v6539_v35  ;;  %v8023_v49 = vld [vmem:[#allocation2 + $0x20] sm:$0xff]  ;;  %v8087_v32 = vld [vmem:[#allocation2 + $0x78] sm:$0xff] }
 0x1d5   : > { %10064 = vst [vmem:[#allocation55_spill] sm:$0xff] %v7960_v30  ;;  %986 = vmax.xlane.f32.xlu1 %v7960_v30  ;;  %6194 = vmatprep.subr.bf16.mxu1 %v6542_v7  ;;  %v8119_v30 = vld [vmem:[#allocation2 + $0x90] sm:$0xff] }
 0x1d6   : > { %10066 = vst [vmem:[#allocation57_spill] sm:$0xff] %v7968_v50 }
 0x1d8   : > { %980 = vmax.xlane.f32.xlu0 %v7963_v48  ;;  %6195 = vmatpush3.bf16.msra.mxu1 %v6542_v7  ;;  %v8031_v7 = vld [vmem:[#allocation2 + $0x28] sm:$0xff]  ;;  %v8099_v48 = vld [vmem:[#allocation2 + $0x60] sm:$0xff] }
 0x1d9   : > { %982 = vmax.xlane.f32.xlu1 %v7968_v50  ;;  %6196 = vmatprep.subr.bf16.mxu1 %v6545_v40 }
 0x1dc   : > { %6197 = vmatpush3.bf16.msra.mxu1 %v6545_v40 }
 0x1dd   : > { %6198 = vmatprep.subr.bf16.mxu1 %v6548_v23 }
 0x1e0   : > { %6199 = vmatpush3.bf16.msra.mxu1 %v6548_v23 }
 0x1e1   : > { %6200 = vmatprep.subr.bf16.mxu1 %v6551_v3 }
 0x1e4   : > { %6201 = vmatpush3.bf16.msra.mxu1 %v6551_v3 }
 0x1e5   : > { %6202 = vmatprep.subr.bf16.mxu1 %v6554_v42 }
 0x1e8   : > { %6203 = vmatpush3.bf16.msra.mxu1 %v6554_v42 }
 0x228   : > { %v929_v8 = vpop.xlane.xlu1 %928 }
 0x229   : > { %v7981_v11 = vmax.f32 %v7974_v59, %v929_v8  ;;  %v925_v16 = vpop.xlane.xlu0 %924  ;;  %v8013_v8 = vld [vmem:[#allocation2 + $0x38] sm:$0xff] }
 0x22a   : > { %v7984_v20 = vmax.f32 %v7976_v63, %v925_v16  ;;  %v6541_v16 = vld [vmem:[%s7383_s6 + $0x24] ss:$8 sps:$4 sm:$0xff]  }
 0x22b   : > { %2080 = vst.msk [vmem:[#allocation2 + $0x10] sm:$0xff] %vm1532_vm1, %v7981_v11  ;;  %1128 = vperm.xlu1 %6491, %v7981_v11   ;;  %6288 = vmatprep.subr.bf16.mxu0 %v6541_v16 }
 0x22c   : > { %2078 = vst.msk [vmem:[#allocation2] sm:$0xff] %vm1532_vm1, %v7984_v20  ;;  %v931_v36 = vpop.xlane.xlu1 %930  ;;  %1118 = vperm.xlu0 %6490, %v7984_v20   ;;  %6289 = vmatpush3.bf16.msra.mxu0 %v6541_v16 }
 0x22d   : > { %v8000_v46 = vmax.f32 %v7986_v21, %v931_v36  ;;  %v927_v56 = vpop.xlane.xlu0 %926  ;;  %6290 = vmatprep.subr.bf16.mxu0 %v6544_v45 }
 0x22e   : > { %v8003_v57 = vmax.f32 %v7993_v31, %v927_v56 }
 0x22f   : > { %2081 = vst.msk [vmem:[#allocation2 + $0x18] sm:$0xff] %vm1532_vm1, %v8000_v46  ;;  %1133 = vperm.xlu1 %6491, %v8000_v46  }
 0x230   : > { %2079 = vst.msk [vmem:[#allocation2 + $0x8] sm:$0xff] %vm1532_vm1, %v8003_v57  ;;  %6291 = vmatpush3.bf16.msra.mxu0 %v6544_v45  ;;  %v8059_v45 = vld [vmem:[#allocation2 + $0x40] sm:$0xff] }
 0x231   : > { %v937_v36 = vpop.xlane.xlu0 %936  ;;  %6292 = vmatprep.subr.bf16.mxu0 %v6547_v25 }
 0x232   : > { %v8017_v35 = vmax.f32 %v8008_v2, %v937_v36  ;;  %v939_v56 = vpop.xlane.xlu1 %938 }
 0x233   : > { %v8020_v26 = vmax.f32 %v8013_v8, %v939_v56  ;;  %1123 = vperm.xlu1 %6491, %v8003_v57  }
 0x234   : > { %2084 = vst.msk [vmem:[#allocation2 + $0x30] sm:$0xff] %vm1532_vm1, %v8017_v35  ;;  %6293 = vmatpush3.bf16.msra.mxu0 %v6547_v25 }
 0x235   : > { %2085 = vst.msk [vmem:[#allocation2 + $0x38] sm:$0xff] %vm1532_vm1, %v8020_v26  ;;  %v933_v36 = vpop.xlane.xlu0 %932  ;;  %6294 = vmatprep.subr.bf16.mxu0 %v6550_v5 }
 0x236   : > { %v8036_v56 = vmax.f32 %v8023_v49, %v933_v36  ;;  %v935_v27 = vpop.xlane.xlu1 %934 }
 0x237   : > { %v8039_v16 = vmax.f32 %v8031_v7, %v935_v27  ;;  %1148 = vperm.xlu1 %6491, %v8017_v35  }
 0x238   : > { %2082 = vst.msk [vmem:[#allocation2 + $0x20] sm:$0xff] %vm1532_vm1, %v8036_v56  ;;  %6295 = vmatpush3.bf16.msra.mxu0 %v6550_v5 }
 0x239   : > { %2083 = vst.msk [vmem:[#allocation2 + $0x28] sm:$0xff] %vm1532_vm1, %v8039_v16  ;;  %v945_v40 = vpop.xlane.xlu0 %944  ;;  %6296 = vmatprep.subr.bf16.mxu0 %v6553_v44 }
 0x23a   : > { %v947_v27 = vpop.xlane.xlu1 %946  ;;  %v8053_v36 = vmax.f32 %v8042_v39, %v945_v40  ;;  %v8067_v40 = vld [vmem:[#allocation2 + $0x48] sm:$0xff] }
 0x23b   : > { %v8056_v15 = vmax.f32 %v8048_v17, %v947_v27  ;;  %1138 = vperm.xlu1 %6491, %v8036_v56   ;;  %v8072_v27 = vld [vmem:[%s7378_s29 + $0x4] ss:$8 sps:$4 sm:$0xff]  }
 0x23c   : > { %2088 = vst.msk [vmem:[#allocation2 + $0x50] sm:$0xff] %vm1532_vm1, %v8053_v36  ;;  %10067 = vst [vmem:[#allocation58_spill] sm:$0xff] %v8072_v27  ;;  %6236 = vmatprep.subr.bf16.mxu1 %v8072_v27  ;;  %6297 = vmatpush3.bf16.msra.mxu0 %v6553_v44  ;;  %v8123_v44 = vld [vmem:[#allocation2 + $0x98] sm:$0xff] }
 0x23d   : > { %2089 = vst.msk [vmem:[#allocation2 + $0x58] sm:$0xff] %vm1532_vm1, %v8056_v15  ;;  %v941_v23 = vpop.xlane.xlu0 %940 }
 0x23e   : > { %v943_v52 = vpop.xlane.xlu1 %942  ;;  %v8075_v25 = vmax.f32 %v8059_v45, %v941_v23 }
 0x23f   : > { %v8078_v62 = vmax.f32 %v8067_v40, %v943_v52  ;;  %1143 = vperm.xlu1 %6491, %v8039_v16  }
 0x240   : > { %2086 = vst.msk [vmem:[#allocation2 + $0x40] sm:$0xff] %vm1532_vm1, %v8075_v25 }
 0x241   : > { %2087 = vst.msk [vmem:[#allocation2 + $0x48] sm:$0xff] %vm1532_vm1, %v8078_v62  ;;  %1163 = vperm.xlu0 %6490, %v8078_v62   ;;  %v953_v3 = vpop.xlane.xlu0 %952 }
 0x242   : > { %v955_v52 = vpop.xlane.xlu1 %954  ;;  %v8093_v23 = vmax.f32 %v8081_v55, %v953_v3  ;;  %v6556_v3 = vld [vmem:[%s7383_s6 + $0x74] ss:$8 sps:$4 sm:$0xff]  }
 0x243   : > { %v8096_v5 = vmax.f32 %v8087_v32, %v955_v52  ;;  %1153 = vperm.xlu1 %6491, %v8020_v26   ;;  %6298 = vmatprep.subr.bf16.mxu0 %v6556_v3 }
 0x244   : > { %2092 = vst.msk [vmem:[#allocation2 + $0x70] sm:$0xff] %vm1532_vm1, %v8093_v23  ;;  %6299 = vmatpush3.bf16.msra.mxu0 %v6556_v3  ;;  %v8153_v3 = vld [vmem:[#allocation2 + $0xb0] sm:$0xff] }
 0x245   : > { %2093 = vst.msk [vmem:[#allocation2 + $0x78] sm:$0xff] %vm1532_vm1, %v8096_v5  ;;  %1173 = vperm.xlu0 %6490, %v8056_v15   ;;  %v949_v42 = vpop.xlane.xlu0 %948 }
 0x246   : > { %v951_v52 = vpop.xlane.xlu1 %950  ;;  %v8113_v50 = vmax.f32 %v8099_v48, %v949_v42 }
 0x247   : > { %v8116_v28 = vmax.f32 %v8106_v18, %v951_v52  ;;  %1158 = vperm.xlu1 %6491, %v8075_v25  }
 0x248   : > { %2090 = vst.msk [vmem:[#allocation2 + $0x60] sm:$0xff] %vm1532_vm1, %v8113_v50 }
 0x249   : > { %2091 = vst.msk [vmem:[#allocation2 + $0x68] sm:$0xff] %vm1532_vm1, %v8116_v28  ;;  %1183 = vperm.xlu0 %6490, %v8116_v28   ;;  %v961_v42 = vpop.xlane.xlu0 %960 }
 0x24a   : > { %v963_v22 = vpop.xlane.xlu1 %962  ;;  %v8129_v52 = vmax.f32 %v8119_v30, %v961_v42 }
 0x24b   : > { %v8132_v6 = vmax.f32 %v8123_v44, %v963_v22  ;;  %1168 = vperm.xlu1 %6491, %v8053_v36  }
 0x24c   : > { %2096 = vst.msk [vmem:[#allocation2 + $0x90] sm:$0xff] %vm1532_vm1, %v8129_v52 }
 0x24d   : > { %2097 = vst.msk [vmem:[#allocation2 + $0x98] sm:$0xff] %vm1532_vm1, %v8132_v6  ;;  %1193 = vperm.xlu0 %6490, %v8096_v5   ;;  %v957_v42 = vpop.xlane.xlu0 %956 }
 0x24e   : > { %v959_v22 = vpop.xlane.xlu1 %958  ;;  %v8147_v9 = vmax.f32 %v8135_v29, %v957_v42 }
 0x24f   : > { %v8150_v41 = vmax.f32 %v8141_v12, %v959_v22  ;;  %1178 = vperm.xlu1 %6491, %v8113_v50  }
 0x250   : > { %2094 = vst.msk [vmem:[#allocation2 + $0x80] sm:$0xff] %vm1532_vm1, %v8147_v9 }
 0x251   : > { %2095 = vst.msk [vmem:[#allocation2 + $0x88] sm:$0xff] %vm1532_vm1, %v8150_v41  ;;  %1203 = vperm.xlu0 %6490, %v8150_v41   ;;  %v969_v0 = vpop.xlane.xlu0 %968 }
 0x252   : > { %v971_v42 = vpop.xlane.xlu1 %970  ;;  %v8163_v60 = vmax.f32 %v8153_v3, %v969_v0 }
 0x253   : > { %v8166_v22 = vmax.f32 %v8157_v13, %v971_v42  ;;  %1188 = vperm.xlu1 %6491, %v8093_v23  }
 0x254   : > { %2100 = vst.msk [vmem:[#allocation2 + $0xb0] sm:$0xff] %vm1532_vm1, %v8163_v60 }
 0x255   : > { %2101 = vst.msk [vmem:[#allocation2 + $0xb8] sm:$0xff] %vm1532_vm1, %v8166_v22  ;;  %1213 = vperm.xlu0 %6490, %v8132_v6   ;;  %v965_v0 = vpop.xlane.xlu0 %964 }
 0x256   : > { %v967_v42 = vpop.xlane.xlu1 %966  ;;  %v8181_v33 = vmax.f32 %v8169_v43, %v965_v0 }
 0x257   : > { %v8184_v24 = vmax.f32 %v8175_v53, %v967_v42  ;;  %1198 = vperm.xlu1 %6491, %v8147_v9  }
 0x258   : > { %2098 = vst.msk [vmem:[#allocation2 + $0xa0] sm:$0xff] %vm1532_vm1, %v8181_v33 }
 0x259   : > { %2099 = vst.msk [vmem:[#allocation2 + $0xa8] sm:$0xff] %vm1532_vm1, %v8184_v24  ;;  %1223 = vperm.xlu0 %6490, %v8184_v24   ;;  %v977_v37 = vpop.xlane.xlu0 %976 }
 0x25a   : > { %v979_v0 = vpop.xlane.xlu1 %978  ;;  %v8197_v27 = vmax.f32 %v8187_v1, %v977_v37  ;;  %v1020_v37 = vsub.f32 %v7976_v63, %v7984_v20  ;;  %v1023_v20 = vsub.f32 %v7986_v21, %v8000_v46 }
 0x25b   : > { %v8200_v42 = vmax.f32 %v8191_v54, %v979_v0  ;;  %1208 = vperm.xlu1 %6491, %v8129_v52  }
 0x25c   : > { %2104 = vst.msk [vmem:[#allocation2 + $0xd0] sm:$0xff] %vm1532_vm1, %v8197_v27  ;;  %v1058_v46 = vmul.f32 1.442695, %v1023_v20 }
 0x25d   : > { %2105 = vst.msk [vmem:[#allocation2 + $0xd8] sm:$0xff] %vm1532_vm1, %v8200_v42  ;;  %1233 = vperm.xlu0 %6490, %v8166_v22   ;;  %v973_v38 = vpop.xlane.xlu0 %972 }
 0x25e   : > { %v975_v0 = vpop.xlane.xlu1 %974  ;;  %v8215_v19 = vmax.f32 %v8203_v34, %v973_v38  ;;  %v1052_v38 = vmul.f32 1.442695, %v1020_v37  ;;  %v1021_v34 = vsub.f32 %v7993_v31, %v8003_v57  ;;  %v8245_v37 = vld [vmem:[#allocation2 + $0xe8] sm:$0xff] }
 0x25f   : > { %v8218_v4 = vmax.f32 %v8207_v10, %v975_v0  ;;  %1218 = vperm.xlu1 %6491, %v8181_v33  }
 0x260   : > { %2102 = vst.msk [vmem:[#allocation2 + $0xc0] sm:$0xff] %vm1532_vm1, %v8215_v19  ;;  %6581 = vpow2.f32 %v1052_v38  ;;  %v1054_v57 = vmul.f32 1.442695, %v1021_v34  ;;  %v10070_v38 = vsub.f32 %v7974_v59, %v7981_v11  ;;  %v1024_v34 = vsub.f32 %v8023_v49, %v8036_v56 }
 0x261   : > { %2103 = vst.msk [vmem:[#allocation2 + $0xc8] sm:$0xff] %vm1532_vm1, %v8218_v4  ;;  %1243 = vperm.xlu0 %6490, %v8218_v4   ;;  %v985_v63 = vpop.xlane.xlu0 %984  ;;  %6583 = vpow2.f32 %v1058_v46  ;;  %v1029_v46 = vsub.f32 %v8067_v40, %v8078_v62  ;;  %v1031_v59 = vsub.f32 %v8048_v17, %v8056_v15  ;;  %v10071_v62 = vsub.f32 %v8008_v2, %v8017_v35 }
 0x262   : > { %v987_v0 = vpop.xlane.xlu1 %986  ;;  %v8233_v47 = vmax.f32 %v8221_v14, %v985_v63  ;;  %v1025_v63 = vsub.f32 %v8031_v7, %v8039_v16  ;;  %v1027_v7 = vsub.f32 %v8013_v8, %v8020_v26  ;;  %v1056_v20 = vmul.f32 1.442695, %v10070_v38 }
 0x263   : > { %v8236_v58 = vmax.f32 %v8225_v61, %v987_v0  ;;  %1228 = vperm.xlu1 %6491, %v8163_v60   ;;  %6585 = vpow2.f32 %v1054_v57  ;;  %v1060_v8 = vmul.f32 1.442695, %v1024_v34  ;;  %v1070_v49 = vmul.f32 1.442695, %v1029_v46 }
 0x264   : > { %2108 = vst.msk [vmem:[#allocation2 + $0xf0] sm:$0xff] %vm1532_vm1, %v8233_v47  ;;  %v1062_v16 = vmul.f32 1.442695, %v1025_v63  ;;  %v1064_v56 = vmul.f32 1.442695, %v10071_v62  ;;  %v1028_v40 = vsub.f32 %v8059_v45, %v8075_v25  ;;  %v1033_v15 = vsub.f32 %v8106_v18, %v8116_v28 }
 0x265   : > { %2109 = vst.msk [vmem:[#allocation2 + $0xf8] sm:$0xff] %vm1532_vm1, %v8236_v58  ;;  %1253 = vperm.xlu0 %6490, %v8200_v42   ;;  %v981_v21 = vpop.xlane.xlu0 %980  ;;  %v1035_v45 = vsub.f32 %v8087_v32, %v8096_v5  ;;  %v10072_v18 = vsub.f32 %v8042_v39, %v8053_v36  ;;  %v1037_v32 = vsub.f32 %v8141_v12, %v8150_v41 }
 0x266   : > { %v983_v0 = vpop.xlane.xlu1 %982  ;;  %v8253_v14 = vmax.f32 %v8239_v51, %v981_v21  ;;  %v1066_v21 = vmul.f32 1.442695, %v1027_v7  ;;  %6587 = vpow2.f32 %v1062_v16  ;;  %v1068_v2 = vmul.f32 1.442695, %v1028_v40 }
 0x267   : > { %v8256_v31 = vmax.f32 %v8245_v37, %v983_v0  ;;  %1238 = vperm.xlu1 %6491, %v8215_v19   ;;  %6589 = vpow2.f32 %v1056_v20  ;;  %v1074_v0 = vmul.f32 1.442695, %v1031_v59  ;;  %v1078_v25 = vmul.f32 1.442695, %v1033_v15 }
 0x268   : > { %2106 = vst.msk [vmem:[#allocation2 + $0xe0] sm:$0xff] %vm1532_vm1, %v8253_v14  ;;  %6591 = vpow2.f32 %v1066_v21  ;;  %v1072_v28 = vmul.f32 1.442695, %v10072_v18  ;;  %v1032_v7 = vsub.f32 %v8099_v48, %v8113_v50  ;;  %v1082_v38 = vmul.f32 1.442695, %v1035_v45 }
 0x269   : > { %2107 = vst.msk [vmem:[#allocation2 + $0xe8] sm:$0xff] %vm1532_vm1, %v8256_v31  ;;  %1263 = vperm.xlu0 %6490, %v8256_v31   ;;  %6593 = vpow2.f32 %v1060_v8  ;;  %v1039_v48 = vsub.f32 %v8123_v44, %v8132_v6  ;;  %v1086_v50 = vmul.f32 1.442695, %v1037_v32  ;;  %v10073_v41 = vsub.f32 %v8081_v55, %v8093_v23 }
 0x26a   : > { %v8276_v26 = vpop.eup %6581  ;;  %6595 = vpow2.f32 %v1070_v49  ;;  %v1076_v39 = vmul.f32 1.442695, %v1032_v7  ;;  %v1036_v34 = vsub.f32 %v8135_v29, %v8147_v9  ;;  %v1041_v6 = vsub.f32 %v8175_v53, %v8184_v24 }
 0x26b   : > { %1248 = vperm.xlu1 %6491, %v8197_v27   ;;  %v8282_v11 = vpop.eup %6583  ;;  %6597 = vpow2.f32 %v1064_v56  ;;  %v1080_v12 = vmul.f32 1.442695, %v10073_v41  ;;  %v1090_v46 = vmul.f32 1.442695, %v1039_v48  ;;  %v1043_v9 = vsub.f32 %v8157_v13, %v8166_v22 }
 0x26c   : > { %6599 = vpow2.f32 %v1074_v0  ;;  %v1084_v55 = vmul.f32 1.442695, %v1036_v34  ;;  %v1094_v29 = vmul.f32 1.442695, %v1041_v6  ;;  %v10074_v24 = vsub.f32 %v8119_v30, %v8129_v52 }
 0x26d   : > { %1273 = vperm.xlu0 %6490, %v8236_v58   ;;  %v8290_v63 = vpop.eup %6585  ;;  %6601 = vpow2.f32 %v1068_v2  ;;  %v1040_v59 = vsub.f32 %v8169_v43, %v8181_v33  ;;  %v1098_v62 = vmul.f32 1.442695, %v1043_v9  ;;  %v1047_v13 = vsub.f32 %v8191_v54, %v8200_v42 }
 0x26e   : > { %6603 = vpow2.f32 %v1078_v25  ;;  %v1088_v53 = vmul.f32 1.442695, %v10074_v24  ;;  %v1045_v33 = vsub.f32 %v8207_v10, %v8218_v4  ;;  %v10075_v54 = vsub.f32 %v8153_v3, %v8163_v60  ;;  %v10076_v3 = vld [vmem:[#allocation59_spill] sm:$0xff]  ;;  %v10077_v25 = vld [vmem:[#allocation60_spill] sm:$0xff] }
 0x26f   : > { %1258 = vperm.xlu1 %6491, %v8253_v14   ;;  %6605 = vpow2.f32 %v1072_v28  ;;  %v1092_v30 = vmul.f32 1.442695, %v1040_v59  ;;  %v1106_v43 = vmul.f32 1.442695, %v1047_v13  ;;  %v1046_v40 = vsub.f32 %v8187_v1, %v8197_v27 }
 0x270   : > { %v8295_v17 = vpop.eup %6587  ;;  %6607 = vpow2.f32 %v1082_v38  ;;  %v1096_v42 = vmul.f32 1.442695, %v10075_v54  ;;  %v1102_v15 = vmul.f32 1.442695, %v1045_v33  ;;  %v1051_v4 = vsub.f32 %v8225_v61, %v8236_v58 }
 0x271   : > { %1599 = vperm.xlu0 %6490, %v8276_v26   ;;  %v8298_v35 = vpop.eup %6589  ;;  %6609 = vpow2.f32 %v1076_v39  ;;  %v1104_v60 = vmul.f32 1.442695, %v1046_v40  ;;  %v1044_v2 = vsub.f32 %v10076_v3, %v8215_v19  ;;  %v1049_v45 = vsub.f32 %v8245_v37, %v8256_v31 }
 0x272   : > { %v8303_v57 = vpop.eup %6591  ;;  %6611 = vpow2.f32 %v1086_v50  ;;  %v1114_v27 = vmul.f32 1.442695, %v1051_v4  ;;  %v1050_v18 = vsub.f32 %v10077_v25, %v8233_v47  ;;  %v1048_v31 = vsub.f32 %v8239_v51, %v8253_v14 }
 0x273   : > { %1268 = vperm.xlu1 %6491, %v8233_v47   ;;  %v8311_v16 = vpop.eup %6593  ;;  %6613 = vpow2.f32 %v1080_v12  ;;  %v1100_v61 = vmul.f32 1.442695, %v1044_v2  ;;  %v1110_v28 = vmul.f32 1.442695, %v1049_v45  ;;  %v10078_v12 = vld [vmem:[#allocation13_spill] sm:$0xff] }
 0x274   : > { %v8316_v5 = vpop.eup %6595  ;;  %6615 = vpow2.f32 %v1090_v46  ;;  %v1112_v37 = vmul.f32 1.442695, %v1050_v18  ;;  %v1108_v32 = vmul.f32 1.442695, %v1048_v31 }
 0x275   : > { %1614 = vperm.xlu0 %6490, %v8282_v11   ;;  %v8319_v36 = vpop.eup %6597  ;;  %6617 = vpow2.f32 %v1084_v55  ;;  %v10079_v55 = vld [vmem:[#allocation16_spill] sm:$0xff] }
 0x276   : > { %v8324_v20 = vpop.eup %6599  ;;  %6619 = vpow2.f32 %v1094_v29  ;;  %v10080_v29 = vld [vmem:[#allocation12_spill] sm:$0xff] }
 0x277   : > { %1604 = vperm.xlu1 %6491, %v8290_v63   ;;  %v8332_v21 = vpop.eup %6601  ;;  %6621 = vpow2.f32 %v1088_v53 }
 0x278   : > { %v8337_v44 = vpop.eup %6603  ;;  %6623 = vpow2.f32 %v1098_v62 }
 0x279   : > { %1624 = vperm.xlu0 %6490, %v8295_v17   ;;  %v8340_v23 = vpop.eup %6605  ;;  %6625 = vpow2.f32 %v1092_v30  ;;  %v10081_v30 = vld [vmem:[#allocation17_spill] sm:$0xff] }
 0x27a   : > { %v8345_v8 = vpop.eup %6607  ;;  %6627 = vpow2.f32 %v1106_v43 }
 0x27b   : > { %1609 = vperm.xlu1 %6491, %v8298_v35   ;;  %v8353_v49 = vpop.eup %6609  ;;  %6629 = vpow2.f32 %v1096_v42 }
 0x27c   : > { %v8358_v22 = vpop.eup %6611  ;;  %6631 = vpow2.f32 %v1102_v15  ;;  %v10082_v15 = vld [vmem:[#allocation23_spill] sm:$0xff] }
 0x27d   : > { %1634 = vperm.xlu0 %6490, %v8303_v57   ;;  %v8361_v52 = vpop.eup %6613  ;;  %6633 = vpow2.f32 %v1104_v60  ;;  %v10083_v60 = vld [vmem:[#allocation20_spill] sm:$0xff] }
 0x27e   : > { %v8366_v56 = vpop.eup %6615  ;;  %6635 = vpow2.f32 %v1114_v27 }
 0x27f   : > { %1619 = vperm.xlu1 %6491, %v8311_v16   ;;  %v8374_v0 = vpop.eup %6617  ;;  %6637 = vpow2.f32 %v1100_v61  ;;  %v10084_v61 = vld [vmem:[#allocation26_spill] sm:$0xff] }
 0x280   : > { %v8379_v10 = vpop.eup %6619  ;;  %6639 = vpow2.f32 %v1110_v28  ;;  %v503_v28 = vld [vmem:[%s7378_s29 + $0x10] sm:$0xff] }
 0x281   : > { %1644 = vperm.xlu0 %6490, %v8316_v5   ;;  %v8384_v1 = vpop.eup %6621  ;;  %6641 = vpow2.f32 %v1112_v37  ;;  %v504_v37 = vld [vmem:[%s7378_s29 + $0x18] sm:$0xff] }
 0x282   : > { %v8389_v58 = vpop.eup %6623  ;;  %6643 = vpow2.f32 %v1108_v32 }
 0x283   : > { %1629 = vperm.xlu1 %6491, %v8319_v36   ;;  %v8394_v19 = vpop.eup %6625 }
 0x284   : > { %v8397_v7 = vpop.eup %6627 }
 0x285   : > { %1654 = vperm.xlu0 %6490, %v8324_v20   ;;  %v8402_v38 = vpop.eup %6629 }
 0x286   : > { %v8405_v47 = vpop.eup %6631 }
 0x287   : > { %1639 = vperm.xlu1 %6491, %v8332_v21   ;;  %v8408_v39 = vpop.eup %6633 }
 0x288   : > { %v8411_v48 = vpop.eup %6635 }
 0x289   : > { %1664 = vperm.xlu0 %6490, %v8337_v44   ;;  %v8414_v51 = vpop.eup %6637 }
 0x28a   : > { %v8417_v41 = vpop.eup %6639 }
 0x28b   : > { %1649 = vperm.xlu1 %6491, %v8340_v23   ;;  %v8421_v46 = vpop.eup %6641 }
 0x28c   : > { %v8426_v59 = vpop.eup %6643 }
 0x28d   : > { %1674 = vperm.xlu0 %6490, %v8345_v8  }
 0x28f   : > { %1659 = vperm.xlu1 %6491, %v8353_v49  }
 0x291   : > { %1684 = vperm.xlu0 %6490, %v8358_v22  }
 0x293   : > { %1669 = vperm.xlu1 %6491, %v8361_v52  }
 0x295   : > { %1694 = vperm.xlu0 %6490, %v8366_v56  }
 0x297   : > { %1679 = vperm.xlu1 %6491, %v8374_v0  }
 0x299   : > { %1704 = vperm.xlu0 %6490, %v8379_v10  }
 0x29b   : > { %1689 = vperm.xlu1 %6491, %v8384_v1  }
 0x29d   : > { %1714 = vperm.xlu0 %6490, %v8389_v58  }
 0x29f   : > { %1699 = vperm.xlu1 %6491, %v8394_v19  }
 0x2a1   : > { %1734 = vperm.xlu0 %6490, %v8397_v7  }
 0x2a3   : > { %1709 = vperm.xlu1 %6491, %v8402_v38  }
 0x2a5   : > { %1724 = vperm.xlu0 %6490, %v8405_v47  }
 0x2a7   : > { %1729 = vperm.xlu1 %6491, %v8408_v39  }
 0x2a9   : > { %1754 = vperm.xlu0 %6490, %v8411_v48  }
 0x2aa   : > { %v1129_v14 = vpop.permute.xlu1 %1128 }
 0x2ab   : > { %1719 = vperm.xlu1 %6491, %v8414_v51   ;;  %v1119_v50 = vpop.permute.xlu0 %1118  ;;  %v1278_v24 = vsub.f32 %v10080_v29, %v1129_v14  ;;  %v10086_v29 = vld [vmem:[#allocation22_spill] sm:$0xff] }
 0x2ac   : > { %v1276_v34 = vsub.f32 %v10078_v12, %v1119_v50 }
 0x2ad   : > { %1744 = vperm.xlu0 %6490, %v8417_v41   ;;  %v1312_v33 = vmul.f32 1.442695, %v1278_v24 }
 0x2ae   : > { %v1134_v6 = vpop.permute.xlu1 %1133  ;;  %v1308_v53 = vmul.f32 1.442695, %v1276_v34  ;;  %v10085_v34 = vld [vmem:[#allocation33_spill] sm:$0xff] }
 0x2af   : > { %v1279_v9 = vsub.f32 %v10079_v55, %v1134_v6  ;;  %1749 = vperm.xlu1 %6491, %v8421_v46  }
 0x2b0   : > { %6645 = vpow2.f32 %v1308_v53 }
 0x2b1   : > { %v1314_v62 = vmul.f32 1.442695, %v1279_v9 }
 0x2b2   : > { %v1124_v13 = vpop.permute.xlu1 %1123 }
 0x2b3   : > { %v1277_v43 = vsub.f32 %v10081_v30, %v1124_v13  ;;  %1739 = vperm.xlu1 %6491, %v8426_v59   ;;  %6647 = vpow2.f32 %v1314_v62  ;;  %v5825_v62 = vcombine.high %v503_v28, %v504_v37 }
 0x2b5   : > { %v1310_v54 = vmul.f32 1.442695, %v1277_v43 }
 0x2b6   : > { %v1149_v42 = vpop.permute.xlu1 %1148 }
 0x2b7   : > { %6649 = vpow2.f32 %v1310_v54  ;;  %v1282_v3 = vsub.f32 %v10083_v60, %v1149_v42  ;;  %v505_v60 = vld [vmem:[%s7378_s29 + $0x20] sm:$0xff] }
 0x2b8   : > { %6651 = vpow2.f32 %v1312_v33  ;;  %v10087_v33 = vld [vmem:[#allocation31_spill] sm:$0xff] }
 0x2b9   : > { %v1320_v12 = vmul.f32 1.442695, %v1282_v3  ;;  %v506_v3 = vld [vmem:[%s7378_s29 + $0x28] sm:$0xff] }
 0x2ba   : > { %v1139_v40 = vpop.permute.xlu1 %1138  ;;  %v8432_v45 = vpop.eup %6645 }
 0x2bb   : > { %v1280_v4 = vsub.f32 %v10082_v15, %v1139_v40  ;;  %v10088_v40 = vld [vmem:[#allocation58_spill] sm:$0xff]  ;;  %v10089_v15 = vld [vmem:[#allocation32_spill] sm:$0xff] }
 0x2bd   : > { %v1316_v2 = vmul.f32 1.442695, %v1280_v4  ;;  %v8435_v18 = vpop.eup %6647 }
 0x2be   : > { %v1144_v27 = vpop.permute.xlu1 %1143 }
 0x2bf   : > { %v1281_v25 = vsub.f32 %v10084_v61, %v1144_v27  ;;  %6653 = vpow2.f32 %v1316_v2 }
 0x2c0   : > { %v1164_v31 = vpop.permute.xlu0 %1163 }
 0x2c1   : > { %v6650_v32 = vpop.eup %6649  ;;  %v1318_v14 = vmul.f32 1.442695, %v1281_v25  ;;  %v1285_v6 = vsub.f32 %v10085_v34, %v1164_v31  ;;  %v10090_v25 = vld [vmem:[#allocation41_spill] sm:$0xff]  ;;  %v10091_v31 = vld [vmem:[#allocation28_spill] sm:$0xff] }
 0x2c2   : > { %v6652_v50 = vpop.eup %6651  ;;  %v1154_v55 = vpop.permute.xlu1 %1153  ;;  %v1789_v9 = vpack.c.bf16 %v6650_v32, %v8432_v45 }
 0x2c3   : > { %6655 = vpow2.f32 %v1318_v14  ;;  %v1283_v24 = vsub.f32 %v10086_v29, %v1154_v55  ;;  %v1790_v53 = vpack.c.bf16 %v8435_v18, %v6652_v50  ;;  %v1326_v43 = vmul.f32 1.442695, %v1285_v6 }
 0x2c4   : > { %6204 = vmatprep.mubr.bf16.mxu1 %v1789_v9  ;;  %v1174_v13 = vpop.permute.xlu0 %1173  ;;  %6657 = vpow2.f32 %v1320_v12  ;;  %v5826_v12 = vcombine.high %v505_v60, %v506_v3  ;;  %v10094_v3 = vld [vmem:[#allocation45_spill] sm:$0xff] }
 0x2c5   : > { %v1322_v30 = vmul.f32 1.442695, %v1283_v24  ;;  %6205 = vmatmul.mubr.bf16.vlgmr.msra.gmra.mrb[0].mxu1 %v1790_v53  ;;  %v1287_v54 = vsub.f32 %v10087_v33, %v1174_v13  ;;  %v10092_v24 = vld [vmem:[#allocation39_spill] sm:$0xff] }
 0x2c6   : > { %v1159_v42 = vpop.permute.xlu1 %1158  ;;  %6237 = vmatpush3.bf16.xpose.msra.mxu1 %v10088_v40  ;;  %v508_v40 = vld [vmem:[%s7378_s29 + $0x38] sm:$0xff] }
 0x2c7   : > { %6659 = vpow2.f32 %v1322_v30  ;;  %v1284_v4 = vsub.f32 %v10089_v15, %v1159_v42  ;;  %6238 = vmatprep.subr.bf16.mxu1 %v5825_v62  ;;  %v1330_v61 = vmul.f32 1.442695, %v1287_v54  ;;  %v507_v42 = vld [vmem:[%s7378_s29 + $0x30] sm:$0xff] }
 0x2c8   : > { %v1184_v2 = vpop.permute.xlu0 %1183  ;;  %6661 = vpow2.f32 %v1326_v43  ;;  %v10093_v43 = vld [vmem:[#allocation40_spill] sm:$0xff] }
 0x2c9   : > { %v1324_v27 = vmul.f32 1.442695, %v1284_v4  ;;  %v1289_v28 = vsub.f32 %v10090_v25, %v1184_v2  ;;  %v6654_v34 = vpop.eup %6653 }
 0x2ca   : > { %v1169_v37 = vpop.permute.xlu1 %1168 }
 0x2cb   : > { %6663 = vpow2.f32 %v1324_v27  ;;  %v1286_v14 = vsub.f32 %v10091_v31, %v1169_v37  ;;  %v1334_v29 = vmul.f32 1.442695, %v1289_v28  ;;  %v5827_v28 = vcombine.high %v507_v42, %v508_v40 }
 0x2cc   : > { %1440 = vadd.xlane.f32.xlu0 %v6652_v50  ;;  %v1194_v6 = vpop.permute.xlu0 %1193  ;;  %6665 = vpow2.f32 %v1330_v61 }
 0x2cd   : > { %v8450_v55 = vpop.eup %6655  ;;  %v1328_v9 = vmul.f32 1.442695, %v1286_v14  ;;  %v1291_v53 = vsub.f32 %v10092_v24, %v1194_v6 }
 0x2ce   : > { %v1179_v13 = vpop.permute.xlu1 %1178  ;;  %v1791_v30 = vpack.c.bf16 %v8450_v55, %v6654_v34  ;;  %6239 = vmatpush3.bf16.xpose.msra.mxu1 %v5825_v62  ;;  %v6658_v54 = vpop.eup %6657  ;;  %v10095_v62 = vld [vmem:[#allocation36_spill] sm:$0xff] }
 0x2cf   : > { %6667 = vpow2.f32 %v1328_v9  ;;  %v1288_v33 = vsub.f32 %v10093_v43, %v1179_v13  ;;  %6240 = vmatprep.subr.bf16.mxu1 %v5826_v12  ;;  %v1338_v60 = vmul.f32 1.442695, %v1291_v53  ;;  %v10096_v9 = vld [vmem:[#allocation43_spill] sm:$0xff]  ;;  %v10097_v13 = vld [vmem:[#allocation44_spill] sm:$0xff] }
 0x2d0   : > { %1438 = vadd.xlane.f32.xlu0 %v6650_v32  ;;  %6208 = vmatprep.mubr.bf16.mxu1 %v1791_v30  ;;  %v1204_v50 = vpop.permute.xlu0 %1203  ;;  %6669 = vpow2.f32 %v1334_v29 }
 0x2d1   : > { %v6660_v15 = vpop.eup %6659  ;;  %v1332_v4 = vmul.f32 1.442695, %v1288_v33  ;;  %v1293_v2 = vsub.f32 %v10094_v3, %v1204_v50  ;;  %v509_v33 = vld [vmem:[%s7378_s29 + $0x40] sm:$0xff] }
 0x2d2   : > { %v1189_v27 = vpop.permute.xlu1 %1188  ;;  %v1792_v61 = vpack.c.bf16 %v6660_v15, %v6658_v54  ;;  %v8459_v37 = vpop.eup %6661 }
 0x2d3   : > { %6671 = vpow2.f32 %v1332_v4  ;;  %v1290_v25 = vsub.f32 %v10095_v62, %v1189_v27  ;;  %v1342_v6 = vmul.f32 1.442695, %v1293_v2  ;;  %v10099_v27 = vld [vmem:[#allocation42_spill] sm:$0xff] }
 0x2d4   : > { %1448 = vadd.xlane.f32.xlu0 %v6658_v54  ;;  %6209 = vmatmul.mubr.bf16.gmra.mrb[4].mxu1 %v1792_v61  ;;  %v1214_v32 = vpop.permute.xlu0 %1213  ;;  %6673 = vpow2.f32 %v1338_v60  ;;  %v510_v54 = vld [vmem:[%s7378_s29 + $0x48] sm:$0xff]  ;;  %v10098_v60 = vld [vmem:[#allocation49_spill] sm:$0xff] }
 0x2d5   : > { %v6664_v31 = vpop.eup %6663  ;;  %v1336_v14 = vmul.f32 1.442695, %v1290_v25  ;;  %v1295_v29 = vsub.f32 %v10096_v9, %v1214_v32  ;;  %v5828_v61 = vcombine.high %v509_v33, %v510_v54  ;;  %v512_v33 = vld [vmem:[%s7378_s29 + $0x58] sm:$0xff] }
 0x2d6   : > { %v1199_v24 = vpop.permute.xlu1 %1198  ;;  %v1793_v53 = vpack.c.bf16 %v8459_v37, %v6664_v31  ;;  %6241 = vmatpush3.bf16.xpose.msra.mxu1 %v5826_v12  ;;  %v8465_v43 = vpop.eup %6665 }
 0x2d7   : > { %6675 = vpow2.f32 %v1336_v14  ;;  %v1292_v30 = vsub.f32 %v10097_v13, %v1199_v24  ;;  %1436 = vadd.xlane.f32.xlu1 %v8432_v45  ;;  %6242 = vmatprep.subr.bf16.mxu1 %v5827_v28  ;;  %v1346_v4 = vmul.f32 1.442695, %v1295_v29 }
 0x2d8   : > { %1444 = vadd.xlane.f32.xlu0 %v6654_v34  ;;  %6212 = vmatprep.mubr.bf16.mxu1 %v1793_v53  ;;  %v1224_v42 = vpop.permute.xlu0 %1223  ;;  %6677 = vpow2.f32 %v1342_v6  ;;  %v10100_v6 = vld [vmem:[#allocation47_spill] sm:$0xff] }
 0x2d9   : > { %v6668_v40 = vpop.eup %6667  ;;  %v1340_v50 = vmul.f32 1.442695, %v1292_v30  ;;  %v1297_v3 = vsub.f32 %v10098_v60, %v1224_v42  ;;  %v511_v30 = vld [vmem:[%s7378_s29 + $0x50] sm:$0xff] }
 0x2da   : > { %v1209_v12 = vpop.permute.xlu1 %1208  ;;  %v1794_v2 = vpack.c.bf16 %v8465_v43, %v6668_v40  ;;  %v8473_v62 = vpop.eup %6669 }
 0x2db   : > { %6679 = vpow2.f32 %v1340_v50  ;;  %v1294_v45 = vsub.f32 %v10099_v27, %v1209_v12  ;;  %1442 = vadd.xlane.f32.xlu1 %v8435_v18  ;;  %v1350_v14 = vmul.f32 1.442695, %v1297_v3  ;;  %v10101_v18 = vld [vmem:[#allocation48_spill] sm:$0xff]  ;;  %v10103_v12 = vld [vmem:[#allocation46_spill] sm:$0xff] }
 0x2dc   : > { %1456 = vadd.xlane.f32.xlu0 %v6668_v40  ;;  %6213 = vmatmul.mubr.bf16.gmra.mrb[8].mxu1 %v1794_v2  ;;  %v1234_v34 = vpop.permute.xlu0 %1233  ;;  %6681 = vpow2.f32 %v1346_v4  ;;  %v10102_v4 = vld [vmem:[#allocation53_spill] sm:$0xff]  ;;  %v5829_v2 = vcombine.high %v511_v30, %v512_v33  ;;  %v514_v30 = vld [vmem:[%s7378_s29 + $0x68] sm:$0xff] }
 0x2dd   : > { %v6672_v25 = vpop.eup %6671  ;;  %v1344_v32 = vmul.f32 1.442695, %v1294_v45  ;;  %v1299_v9 = vsub.f32 %v10100_v6, %v1234_v34 }
 0x2de   : > { %v1219_v29 = vpop.permute.xlu1 %1218  ;;  %v1795_v24 = vpack.c.bf16 %v8473_v62, %v6672_v25  ;;  %6243 = vmatpush3.bf16.xpose.msra.mxu1 %v5827_v28  ;;  %v8478_v13 = vpop.eup %6673 }
 0x2df   : > { %6683 = vpow2.f32 %v1344_v32  ;;  %v1296_v53 = vsub.f32 %v10101_v18, %v1219_v29  ;;  %1450 = vadd.xlane.f32.xlu1 %v6660_v15  ;;  %6244 = vmatprep.subr.bf16.mxu1 %v5828_v61  ;;  %v1354_v50 = vmul.f32 1.442695, %v1299_v9 }
 0x2e0   : > { %1452 = vadd.xlane.f32.xlu0 %v6664_v31  ;;  %6216 = vmatprep.mubr.bf16.mxu1 %v1795_v24  ;;  %v1244_v54 = vpop.permute.xlu0 %1243  ;;  %6685 = vpow2.f32 %v1350_v14  ;;  %v10104_v14 = vld [vmem:[#allocation51_spill] sm:$0xff] }
 0x2e1   : > { %v6676_v42 = vpop.eup %6675  ;;  %v1348_v40 = vmul.f32 1.442695, %v1296_v53  ;;  %v1301_v60 = vsub.f32 %v10102_v4, %v1244_v54  ;;  %v513_v53 = vld [vmem:[%s7378_s29 + $0x60] sm:$0xff] }
 0x2e2   : > { %v1229_v3 = vpop.permute.xlu1 %1228  ;;  %v1796_v28 = vpack.c.bf16 %v8478_v13, %v6676_v42  ;;  %v8486_v27 = vpop.eup %6677 }
 0x2e3   : > { %6687 = vpow2.f32 %v1348_v40  ;;  %v1298_v15 = vsub.f32 %v10103_v12, %v1229_v3  ;;  %1446 = vadd.xlane.f32.xlu1 %v8450_v55  ;;  %v1358_v32 = vmul.f32 1.442695, %v1301_v60  ;;  %v10105_v55 = vld [vmem:[#allocation52_spill] sm:$0xff]  ;;  %v10107_v3 = vld [vmem:[#allocation50_spill] sm:$0xff] }
 0x2e4   : > { %1464 = vadd.xlane.f32.xlu0 %v6676_v42  ;;  %6217 = vmatmul.mubr.bf16.gmra.mrb[12].mxu1 %v1796_v28  ;;  %v1254_v31 = vpop.permute.xlu0 %1253  ;;  %6689 = vpow2.f32 %v1354_v50  ;;  %v10106_v50 = vld [vmem:[#allocation57_spill] sm:$0xff] }
 0x2e5   : > { %v6680_v45 = vpop.eup %6679  ;;  %v1352_v34 = vmul.f32 1.442695, %v1298_v15  ;;  %v1303_v6 = vsub.f32 %v10104_v14, %v1254_v31 }
 0x2e6   : > { %v1239_v9 = vpop.permute.xlu1 %1238  ;;  %v1797_v29 = vpack.c.bf16 %v8486_v27, %v6680_v45  ;;  %6245 = vmatpush3.bf16.xpose.msra.mxu1 %v5828_v61  ;;  %v6682_v18 = vpop.eup %6681 }
 0x2e7   : > { %6691 = vpow2.f32 %v1352_v34  ;;  %v1300_v24 = vsub.f32 %v10105_v55, %v1239_v9  ;;  %1458 = vadd.xlane.f32.xlu1 %v8465_v43  ;;  %6246 = vmatprep.subr.bf16.mxu1 %v5829_v2  ;;  %v1362_v40 = vmul.f32 1.442695, %v1303_v6  ;;  %v5830_v43 = vcombine.high %v513_v53, %v514_v30  ;;  %v516_v53 = vld [vmem:[%s7378_s29 + $0x78] sm:$0xff] }
 0x2e8   : > { %1460 = vadd.xlane.f32.xlu0 %v6672_v25  ;;  %6220 = vmatprep.mubr.bf16.mxu1 %v1797_v29  ;;  %v1264_v33 = vpop.permute.xlu0 %1263  ;;  %6693 = vpow2.f32 %v1358_v32  ;;  %v10108_v32 = vld [vmem:[#allocation55_spill] sm:$0xff] }
 0x2e9   : > { %v6684_v54 = vpop.eup %6683  ;;  %v1356_v42 = vmul.f32 1.442695, %v1300_v24  ;;  %v1305_v4 = vsub.f32 %v10106_v50, %v1264_v33  ;;  %v515_v24 = vld [vmem:[%s7378_s29 + $0x70] sm:$0xff]  ;;  %v10110_v50 = vld [vmem:[#allocation54_spill] sm:$0xff] }
 0x2ea   : > { %v1249_v60 = vpop.permute.xlu1 %1248  ;;  %v1798_v61 = vpack.c.bf16 %v6682_v18, %v6684_v54  ;;  %v8497_v12 = vpop.eup %6685 }
 0x2eb   : > { %6695 = vpow2.f32 %v1356_v42  ;;  %v1302_v28 = vsub.f32 %v10107_v3, %v1249_v60  ;;  %1454 = vadd.xlane.f32.xlu1 %v8459_v37  ;;  %v1366_v34 = vmul.f32 1.442695, %v1305_v4  ;;  %v10109_v37 = vld [vmem:[#allocation56_spill] sm:$0xff]  ;;  %v5831_v4 = vcombine.high %v515_v24, %v516_v53 }
 0x2ec   : > { %1472 = vadd.xlane.f32.xlu0 %v6684_v54  ;;  %6221 = vmatmul.mubr.bf16.gmra.mrb[16].mxu1 %v1798_v61  ;;  %v1274_v25 = vpop.permute.xlu0 %1273  ;;  %6697 = vpow2.f32 %v1362_v40  ;;  %v6838_v53 = vld [vmem:[%s7383_s6 + $0x14] ss:$8 sps:$4 sm:$0xff]  }
 0x2ed   : > { %v6688_v15 = vpop.eup %6687  ;;  %v1360_v31 = vmul.f32 1.442695, %v1302_v28  ;;  %v1307_v14 = vsub.f32 %v10108_v32, %v1274_v25 }
 0x2ee   : > { %v1259_v6 = vpop.permute.xlu1 %1258  ;;  %v1799_v9 = vpack.c.bf16 %v8497_v12, %v6688_v15  ;;  %6247 = vmatpush3.bf16.xpose.msra.mxu1 %v5829_v2  ;;  %v6690_v55 = vpop.eup %6689 }
 0x2ef   : > { %6699 = vpow2.f32 %v1360_v31  ;;  %v1304_v29 = vsub.f32 %v10109_v37, %v1259_v6  ;;  %1466 = vadd.xlane.f32.xlu1 %v8478_v13  ;;  %6248 = vmatprep.subr.bf16.mxu1 %v5830_v43  ;;  %v1370_v54 = vmul.f32 1.442695, %v1307_v14  ;;  %v6557_v6 = vld [vmem:[%s7373_s13 + $0x8] ss:$16 sps:$4 sm:$0xff]  }
 0x2f0   : > { %1468 = vadd.xlane.f32.xlu0 %v6680_v45  ;;  %6224 = vmatprep.mubr.bf16.mxu1 %v1799_v9  ;;  %6701 = vpow2.f32 %v1366_v34  ;;  %v8507_v31 = vpop.permute.xlu0 %1599 }
 0x2f1   : > { %v6692_v30 = vpop.eup %6691  ;;  %v1364_v33 = vmul.f32 1.442695, %v1304_v29  ;;  %v6559_v29 = vld [vmem:[%s7373_s13 + $0x28] ss:$16 sps:$4 sm:$0xff]  }
 0x2f2   : > { %v1269_v42 = vpop.permute.xlu1 %1268  ;;  %v1800_v40 = vpack.c.bf16 %v6690_v55, %v6692_v30  ;;  %v6694_v60 = vpop.eup %6693 }
 0x2f3   : > { %6703 = vpow2.f32 %v1364_v33  ;;  %v1306_v2 = vsub.f32 %v10110_v50, %v1269_v42  ;;  %1462 = vadd.xlane.f32.xlu1 %v8473_v62  ;;  %v6565_v33 = vld [vmem:[%s7373_s13 + $0x88] ss:$16 sps:$4 sm:$0xff]   ;;  %v6839_v42 = vld [vmem:[%s7383_s6 + $0x24] ss:$8 sps:$4 sm:$0xff]   ;;  %v6840_v50 = vld [vmem:[%s7383_s6 + $0x34] ss:$8 sps:$4 sm:$0xff]  }
 0x2f4   : > { %1480 = vadd.xlane.f32.xlu0 %v6692_v30  ;;  %6225 = vmatmul.mubr.bf16.gmra.mrb[20].mxu1 %v1800_v40  ;;  %6705 = vpow2.f32 %v1370_v54  ;;  %v8511_v14 = vpop.permute.xlu0 %1614  ;;  %v6563_v30 = vld [vmem:[%s7373_s13 + $0x68] ss:$16 sps:$4 sm:$0xff]  }
 0x2f5   : > { %v6696_v13 = vpop.eup %6695  ;;  %v1368_v61 = vmul.f32 1.442695, %v1306_v2 }
 0x2f6   : > { %v1801_v45 = vpack.c.bf16 %v6694_v60, %v6696_v13  ;;  %6249 = vmatpush3.bf16.xpose.msra.mxu1 %v5830_v43  ;;  %v6698_v3 = vpop.eup %6697 }
 0x2f7   : > { %6707 = vpow2.f32 %v1368_v61  ;;  %1474 = vadd.xlane.f32.xlu1 %v6682_v18  ;;  %6250 = vmatprep.subr.bf16.mxu1 %v5831_v4  ;;  %v6837_v18 = vld [vmem:[%s7383_s6 + $0x4] ss:$8 sps:$4 sm:$0xff]  }
 0x2f8   : > { %1476 = vadd.xlane.f32.xlu0 %v6688_v15  ;;  %6228 = vmatprep.mubr.bf16.mxu1 %v1801_v45  ;;  %v8517_v37 = vpop.permute.xlu0 %1624  ;;  %v6841_v61 = vld [vmem:[%s7383_s6 + $0x44] ss:$8 sps:$4 sm:$0xff]  }
 0x2f9   : > { %v6700_v28 = vpop.eup %6699 }
 0x2fa   : > { %v1802_v25 = vpack.c.bf16 %v6698_v3, %v6700_v28  ;;  %v6702_v62 = vpop.eup %6701 }
 0x2fb   : > { %1470 = vadd.xlane.f32.xlu1 %v8486_v27  ;;  %v8515_v27 = vpop.permute.xlu1 %1604 }
 0x2fc   : > { %1488 = vadd.xlane.f32.xlu0 %v6700_v28  ;;  %6229 = vmatmul.mubr.bf16.gmra.mrb[24].mxu1 %v1802_v25  ;;  %v6571_v25 = vld [vmem:[%s7373_s13 + $0xe8] ss:$16 sps:$4 sm:$0xff]  }
 0x2fd   : > { %v6704_v34 = vpop.eup %6703 }
 0x2fe   : > { %v1803_v32 = vpack.c.bf16 %v6702_v62, %v6704_v34  ;;  %6251 = vmatpush3.bf16.xpose.msra.mxu1 %v5831_v4  ;;  %v6706_v43 = vpop.eup %6705  ;;  %v6567_v4 = vld [vmem:[%s7373_s13 + $0xa8] ss:$16 sps:$4 sm:$0xff]  }
 0x2ff   : > { %1482 = vadd.xlane.f32.xlu1 %v6690_v55  ;;  %6332 = vmatprep.subr.bf16.mxu1 %v6837_v18  ;;  %v6561_v55 = vld [vmem:[%s7373_s13 + $0x48] ss:$16 sps:$4 sm:$0xff]   ;;  %v8521_v24 = vpop.permute.xlu1 %1609 }
 0x300   : > { %1484 = vadd.xlane.f32.xlu0 %v6696_v13  ;;  %6232 = vmatprep.mubr.bf16.mxu1 %v1803_v32  ;;  %v6569_v13 = vld [vmem:[%s7373_s13 + $0xc8] ss:$16 sps:$4 sm:$0xff]  }
 0x301   : > { %v6708_v15 = vpop.eup %6707 }
 0x302   : > { %v1804_v9 = vpack.c.bf16 %v6706_v43, %v6708_v15 }
 0x303   : > { %1478 = vadd.xlane.f32.xlu1 %v8497_v12  ;;  %v8523_v12 = vpop.permute.xlu0 %1634  ;;  %v8528_v54 = vpop.permute.xlu1 %1619 }
 0x304   : > { %1496 = vadd.xlane.f32.xlu0 %v6708_v15  ;;  %6233 = vmatmul.mubr.bf16.gmra.mrb[28].mxu1 %v1804_v9  ;;  %v6574_v15 = vld [vmem:[%s7373_s13 + $0x2c] ss:$16 sps:$4 sm:$0xff]  }
 0x305   : > { %6252 = vmatprep.mubr.bf16.mxu1 %v6557_v6  ;;  %v6575_v6 = vld [vmem:[%s7373_s13 + $0x4c] ss:$16 sps:$4 sm:$0xff]  }
 0x307   : > { %1490 = vadd.xlane.f32.xlu1 %v6698_v3  ;;  %v8531_v40 = vpop.permute.xlu0 %1644  ;;  %v8534_v2 = vpop.permute.xlu1 %1629  ;;  %v6842_v3 = vld [vmem:[%s7383_s6 + $0x54] ss:$8 sps:$4 sm:$0xff]  }
 0x308   : > { %1492 = vadd.xlane.f32.xlu0 %v6704_v34  ;;  %v6843_v34 = vld [vmem:[%s7383_s6 + $0x64] ss:$8 sps:$4 sm:$0xff]  }
 0x30b   : > { %1486 = vadd.xlane.f32.xlu1 %v6694_v60  ;;  %v8537_v60 = vpop.permute.xlu0 %1654  ;;  %v8541_v45 = vpop.permute.xlu1 %1639 }
 0x30c   : > { %6253 = vmatmul.mubr.bf16.vlgmr.msra.gmra.mrb[32].mxu1 %v6559_v29 }
 0x30d   : > { %6256 = vmatprep.mubr.bf16.mxu1 %v6561_v55  ;;  %6340 = vmatpush3.bf16.msra.mxu1 %v6837_v18 }
 0x30e   : > { %6333 = vmatprep.subr.bf16.mxu1 %v6838_v53 }
 0x30f   : > { %1498 = vadd.xlane.f32.xlu1 %v6706_v43  ;;  %v8544_v28 = vpop.permute.xlu0 %1664  ;;  %v8549_v32 = vpop.permute.xlu1 %1649  ;;  %v6844_v43 = vld [vmem:[%s7383_s6 + $0x74] ss:$8 sps:$4 sm:$0xff]  }
 0x311   : > { %6341 = vmatpush3.bf16.msra.mxu1 %v6838_v53  ;;  %v6576_v53 = vld [vmem:[%s7373_s13 + $0x6c] ss:$16 sps:$4 sm:$0xff]  }
 0x312   : > { %6334 = vmatprep.subr.bf16.mxu1 %v6839_v42 }
 0x313   : > { %1494 = vadd.xlane.f32.xlu1 %v6702_v62  ;;  %v6573_v62 = vld [vmem:[%s7373_s13 + $0xc] ss:$16 sps:$4 sm:$0xff]   ;;  %v8551_v18 = vpop.permute.xlu0 %1674  ;;  %v8556_v9 = vpop.permute.xlu1 %1659 }
 0x314   : > { %6257 = vmatmul.mubr.bf16.gmra.mrb[36].mxu1 %v6563_v30 }
 0x315   : > { %6260 = vmatprep.mubr.bf16.mxu1 %v6565_v33  ;;  %6342 = vmatpush3.bf16.msra.mxu1 %v6839_v42  ;;  %v6577_v33 = vld [vmem:[%s7373_s13 + $0x8c] ss:$16 sps:$4 sm:$0xff]  }
 0x316   : > { %6335 = vmatprep.subr.bf16.mxu1 %v6840_v50 }
 0x317   : > { %v8558_v29 = vpop.permute.xlu0 %1684  ;;  %v8560_v55 = vpop.permute.xlu1 %1669 }
 0x318   : > { %10111 = vst [vmem:[#allocation59_spill] sm:$0xff] %v8558_v29 }
 0x319   : > { %6343 = vmatpush3.bf16.msra.mxu1 %v6840_v50 }
 0x31a   : > { %6336 = vmatprep.subr.bf16.mxu1 %v6841_v61 }
 0x31b   : > { %v8563_v30 = vpop.permute.xlu0 %1694  ;;  %v8566_v42 = vpop.permute.xlu1 %1679 }
 0x31c   : > { %6261 = vmatmul.mubr.bf16.gmra.mrb[40].mxu1 %v6567_v4  ;;  %10112 = vst [vmem:[#allocation60_spill] sm:$0xff] %v8563_v30  ;;  %v6578_v4 = vld [vmem:[%s7373_s13 + $0xac] ss:$16 sps:$4 sm:$0xff]  }
 0x31d   : > { %6264 = vmatprep.mubr.bf16.mxu1 %v6569_v13  ;;  %6344 = vmatpush3.bf16.msra.mxu1 %v6841_v61  ;;  %v6579_v13 = vld [vmem:[%s7373_s13 + $0xcc] ss:$16 sps:$4 sm:$0xff]  }
 0x31e   : > { %6337 = vmatprep.subr.bf16.mxu1 %v6842_v3 }
 0x31f   : > { %v8568_v50 = vpop.permute.xlu0 %1704  ;;  %v8572_v61 = vpop.permute.xlu1 %1689 }
 0x320   : > { %10113 = vst [vmem:[#allocation13_spill] sm:$0xff] %v8568_v50  ;;  %v1374_v50 = vld [vmem:[#allocation3 + $0x10] sm:$0xff] }
 0x321   : > { %6345 = vmatpush3.bf16.msra.mxu1 %v6842_v3 }
 0x322   : > { %6338 = vmatprep.subr.bf16.mxu1 %v6843_v34 }
 0x323   : > { %v8574_v3 = vpop.permute.xlu0 %1714 }
 0x324   : > { %6265 = vmatmul.mubr.bf16.gmra.mrb[44].mxu1 %v6571_v25  ;;  %10114 = vst [vmem:[#allocation16_spill] sm:$0xff] %v8574_v3  ;;  %v6580_v25 = vld [vmem:[%s7373_s13 + $0xec] ss:$16 sps:$4 sm:$0xff]  }
 0x325   : > { %6268 = vmatprep.mubr.bf16.mxu1 %v6573_v62  ;;  %6346 = vmatpush3.bf16.msra.mxu1 %v6843_v34  ;;  %v8577_v62 = vpop.permute.xlu1 %1699 }
 0x326   : > { %6339 = vmatprep.subr.bf16.mxu1 %v6844_v43  ;;  %10115 = vst [vmem:[#allocation12_spill] sm:$0xff] %v8577_v62  ;;  %v1373_v62 = vld [vmem:[#allocation3 + $0x8] sm:$0xff] }
 0x327   : > { %v8579_v34 = vpop.permute.xlu0 %1734 }
 0x328   : > { %10116 = vst [vmem:[#allocation17_spill] sm:$0xff] %v8579_v34 }
 0x329   : > { %6347 = vmatpush3.bf16.msra.mxu1 %v6844_v43  ;;  %v8581_v43 = vpop.permute.xlu1 %1709 }
 0x32a   : > { %10117 = vst [vmem:[#allocation23_spill] sm:$0xff] %v8581_v43 }
 0x32c   : > { %6269 = vmatmul.mubr.bf16.gmra.mrb[48].mxu1 %v6574_v15  ;;  %v8583_v15 = vpop.permute.xlu0 %1724 }
 0x32d   : > { %6272 = vmatprep.mubr.bf16.mxu1 %v6575_v6  ;;  %10118 = vst [vmem:[#allocation20_spill] sm:$0xff] %v8583_v15  ;;  %v8585_v6 = vpop.permute.xlu1 %1729  ;;  %v1405_v15 = vmul.f32 %v8290_v63, %v1373_v62  ;;  %v1375_v62 = vld [vmem:[#allocation3 + $0x18] sm:$0xff] }
 0x32e   : > { %10119 = vst [vmem:[#allocation26_spill] sm:$0xff] %v8585_v6  ;;  %v1378_v6 = vld [vmem:[#allocation3 + $0x30] sm:$0xff] }
 0x334   : > { %6273 = vmatmul.mubr.bf16.gmra.mrb[52].mxu1 %v6576_v53  ;;  %v8587_v53 = vpop.permute.xlu0 %1754 }
 0x335   : > { %6276 = vmatprep.mubr.bf16.mxu1 %v6577_v33  ;;  %10120 = vst [vmem:[#allocation33_spill] sm:$0xff] %v8587_v53  ;;  %v8589_v33 = vpop.permute.xlu1 %1719 }
 0x336   : > { %10121 = vst [vmem:[#allocation22_spill] sm:$0xff] %v8589_v33  ;;  %v1372_v33 = vld [vmem:[#allocation3] sm:$0xff] }
 0x339   : > { %v8594_v29 = vpop.permute.xlu1 %1749 }
 0x33a   : > { %10123 = vst [vmem:[#allocation58_spill] sm:$0xff] %v8594_v29  ;;  %v1404_v29 = vmul.f32 %v8276_v26, %v1372_v33  ;;  %v1379_v26 = vld [vmem:[#allocation3 + $0x38] sm:$0xff] }
 0x33c   : > { %6277 = vmatmul.mubr.bf16.gmra.mrb[56].mxu1 %v6578_v4  ;;  %v8591_v4 = vpop.permute.xlu0 %1744 }
 0x33d   : > { %6280 = vmatprep.mubr.bf16.mxu1 %v6579_v13  ;;  %10122 = vst [vmem:[#allocation31_spill] sm:$0xff] %v8591_v4  ;;  %v1406_v13 = vmul.f32 %v8298_v35, %v1374_v50  ;;  %v8598_v53 = vpop.permute.xlu1 %1739  ;;  %v1410_v4 = vmul.f32 %v8319_v36, %v1378_v6  ;;  %v1376_v50 = vld [vmem:[#allocation3 + $0x20] sm:$0xff]  ;;  %v1407_v36 = vmul.f32 %v8282_v11, %v1375_v62  ;;  %v1377_v11 = vld [vmem:[#allocation3 + $0x28] sm:$0xff]  ;;  %v1386_v62 = vld [vmem:[#allocation3 + $0x70] sm:$0xff] }
 0x33e   : > { %v1408_v63 = vmul.f32 %v8311_v16, %v1376_v50  ;;  %v1411_v16 = vmul.f32 %v8303_v57, %v1379_v26  ;;  %v1383_v57 = vld [vmem:[#allocation3 + $0x58] sm:$0xff] }
 0x344   : > { %6281 = vmatmul.mubr.bf16.gmra.mrb[60].mxu1 %v6580_v25 }
 0x359   : > { %v1441_v3 = vpop.xlane.xlu0 %1440 }
 0x35a   : > { %v1502_v25 = vadd.f32 %v1441_v3, %v1406_v13 }
 0x35c   : > { %1535 = vst.msk [vmem:[#allocation3 + $0x10] sm:$0xff] %vm1532_vm1, %v1502_v25 }
 0x35d   : > { %v1439_v34 = vpop.xlane.xlu0 %1438 }
 0x35e   : > { %v1501_v43 = vadd.f32 %v1439_v34, %v1405_v15  ;;  %v1382_v15 = vld [vmem:[#allocation3 + $0x50] sm:$0xff] }
 0x35f   : > { %v1414_v6 = vmul.f32 %v8340_v23, %v1382_v15  ;;  %v1409_v23 = vmul.f32 %v8295_v17, %v1377_v11  ;;  %v1418_v15 = vmul.f32 %v8361_v52, %v1386_v62  ;;  %v1381_v17 = vld [vmem:[#allocation3 + $0x48] sm:$0xff] }
 0x360   : > { %1534 = vst.msk [vmem:[#allocation3 + $0x8] sm:$0xff] %vm1532_vm1, %v1501_v43  ;;  %v1413_v52 = vmul.f32 %v8316_v5, %v1381_v17  ;;  %v1385_v5 = vld [vmem:[#allocation3 + $0x68] sm:$0xff] }
 0x361   : > { %v1449_v35 = vpop.xlane.xlu0 %1448 }
 0x362   : > { %v1506_v30 = vadd.f32 %v1449_v35, %v1410_v4  ;;  %v1380_v4 = vld [vmem:[#allocation3 + $0x40] sm:$0xff] }
 0x363   : > { %v1412_v50 = vmul.f32 %v8332_v21, %v1380_v4  ;;  %v1415_v21 = vmul.f32 %v8324_v20, %v1383_v57  ;;  %v1387_v20 = vld [vmem:[#allocation3 + $0x78] sm:$0xff]  ;;  %v1394_v57 = vld [vmem:[#allocation3 + $0xb0] sm:$0xff] }
 0x364   : > { %1539 = vst.msk [vmem:[#allocation3 + $0x30] sm:$0xff] %vm1532_vm1, %v1506_v30  ;;  %v1437_v3 = vpop.xlane.xlu1 %1436 }
 0x365   : > { %v1500_v13 = vadd.f32 %v1437_v3, %v1404_v29  ;;  %v1445_v34 = vpop.xlane.xlu0 %1444 }
 0x366   : > { %v1504_v25 = vadd.f32 %v1445_v34, %v1408_v63 }
 0x367   : > { %1533 = vst.msk [vmem:[#allocation3] sm:$0xff] %vm1532_vm1, %v1500_v13 }
 0x368   : > { %1537 = vst.msk [vmem:[#allocation3 + $0x20] sm:$0xff] %vm1532_vm1, %v1504_v25  ;;  %v1443_v43 = vpop.xlane.xlu1 %1442 }
 0x369   : > { %v1503_v33 = vadd.f32 %v1443_v43, %v1407_v36  ;;  %v1457_v30 = vpop.xlane.xlu0 %1456  ;;  %v1384_v43 = vld [vmem:[#allocation3 + $0x60] sm:$0xff] }
 0x36a   : > { %v1510_v35 = vadd.f32 %v1457_v30, %v1414_v6 }
 0x36b   : > { %1536 = vst.msk [vmem:[#allocation3 + $0x18] sm:$0xff] %vm1532_vm1, %v1503_v33  ;;  %v1416_v33 = vmul.f32 %v8353_v49, %v1384_v43  ;;  %v1419_v49 = vmul.f32 %v8345_v8, %v1387_v20  ;;  %v1426_v43 = vmul.f32 %v8402_v38, %v1394_v57  ;;  %v1391_v8 = vld [vmem:[#allocation3 + $0x98] sm:$0xff] }
 0x36c   : > { %1543 = vst.msk [vmem:[#allocation3 + $0x50] sm:$0xff] %vm1532_vm1, %v1510_v35  ;;  %v1451_v29 = vpop.xlane.xlu1 %1450  ;;  %v1390_v35 = vld [vmem:[#allocation3 + $0x90] sm:$0xff] }
 0x36d   : > { %v1507_v3 = vadd.f32 %v1451_v29, %v1411_v16  ;;  %v1453_v63 = vpop.xlane.xlu0 %1452 }
 0x36e   : > { %v1508_v13 = vadd.f32 %v1453_v63, %v1412_v50  ;;  %v1422_v50 = vmul.f32 %v8384_v1, %v1390_v35  ;;  %v1388_v63 = vld [vmem:[#allocation3 + $0x80] sm:$0xff]  ;;  %v1417_v1 = vmul.f32 %v8337_v44, %v1385_v5  ;;  %v1389_v44 = vld [vmem:[#allocation3 + $0x88] sm:$0xff]  ;;  %v1402_v5 = vld [vmem:[#allocation3 + $0xf0] sm:$0xff] }
 0x36f   : > { %1540 = vst.msk [vmem:[#allocation3 + $0x38] sm:$0xff] %vm1532_vm1, %v1507_v3  ;;  %v1421_v38 = vmul.f32 %v8358_v22, %v1389_v44  ;;  %v1393_v22 = vld [vmem:[#allocation3 + $0xa8] sm:$0xff]  ;;  %v1434_v57 = vmul.f32 %v8421_v46, %v1402_v5  ;;  %v1568_v46 = vld [vmem:[#allocation4 + $0x18] sm:$0xff] }
 0x370   : > { %1541 = vst.msk [vmem:[#allocation3 + $0x40] sm:$0xff] %vm1532_vm1, %v1508_v13  ;;  %v1447_v34 = vpop.xlane.xlu1 %1446  ;;  %v1570_v5 = vld [vmem:[#allocation4 + $0x28] sm:$0xff] }
 0x371   : > { %v1505_v25 = vadd.f32 %v1447_v34, %v1409_v23  ;;  %v1465_v36 = vpop.xlane.xlu0 %1464  ;;  %v1420_v23 = vmul.f32 %v8374_v0, %v1388_v63  ;;  %v1423_v0 = vmul.f32 %v8366_v56, %v1391_v8  ;;  %v1395_v56 = vld [vmem:[#allocation3 + $0xb8] sm:$0xff]  ;;  %v1567_v8 = vld [vmem:[#allocation4 + $0x10] sm:$0xff] }
 0x372   : > { %v1514_v6 = vadd.f32 %v1465_v36, %v1418_v15  ;;  %v1759_v44 = vmul.f32 %v8521_v24, %v1567_v8 }
 0x373   : > { %1538 = vst.msk [vmem:[#allocation3 + $0x28] sm:$0xff] %vm1532_vm1, %v1505_v25 }
 0x374   : > { %1547 = vst.msk [vmem:[#allocation3 + $0x70] sm:$0xff] %vm1532_vm1, %v1514_v6  ;;  %v1459_v26 = vpop.xlane.xlu1 %1458 }
 0x375   : > { %v1511_v30 = vadd.f32 %v1459_v26, %v1415_v21  ;;  %v1461_v4 = vpop.xlane.xlu0 %1460  ;;  %v1392_v26 = vld [vmem:[#allocation3 + $0xa0] sm:$0xff] }
 0x376   : > { %v1512_v16 = vadd.f32 %v1461_v4, %v1416_v33 }
 0x377   : > { %1544 = vst.msk [vmem:[#allocation3 + $0x58] sm:$0xff] %vm1532_vm1, %v1511_v30  ;;  %v1424_v30 = vmul.f32 %v8394_v19, %v1392_v26  ;;  %v1427_v19 = vmul.f32 %v8389_v58, %v1395_v56  ;;  %v1399_v58 = vld [vmem:[#allocation3 + $0xd8] sm:$0xff]  ;;  %v1565_v26 = vld [vmem:[#allocation4] sm:$0xff] }
 0x378   : > { %1545 = vst.msk [vmem:[#allocation3 + $0x60] sm:$0xff] %vm1532_vm1, %v1512_v16  ;;  %v1455_v29 = vpop.xlane.xlu1 %1454  ;;  %v1398_v16 = vld [vmem:[#allocation3 + $0xd0] sm:$0xff] }
 0x379   : > { %v1509_v11 = vadd.f32 %v1455_v29, %v1413_v52  ;;  %v1473_v3 = vpop.xlane.xlu0 %1472 }
 0x37a   : > { %v1518_v62 = vadd.f32 %v1473_v3, %v1422_v50  ;;  %v1430_v50 = vmul.f32 %v8408_v39, %v1398_v16  ;;  %v1396_v3 = vld [vmem:[#allocation3 + $0xc0] sm:$0xff]  ;;  %v1425_v39 = vmul.f32 %v8379_v10, %v1393_v22  ;;  %v1571_v22 = vld [vmem:[#allocation4 + $0x30] sm:$0xff] }
 0x37b   : > { %1542 = vst.msk [vmem:[#allocation3 + $0x48] sm:$0xff] %vm1532_vm1, %v1509_v11 }
 0x37c   : > { %1551 = vst.msk [vmem:[#allocation3 + $0x90] sm:$0xff] %vm1532_vm1, %v1518_v62  ;;  %v1467_v13 = vpop.xlane.xlu1 %1466 }
 0x37d   : > { %v1515_v34 = vadd.f32 %v1467_v13, %v1419_v49  ;;  %v1469_v15 = vpop.xlane.xlu0 %1468  ;;  %v1428_v49 = vmul.f32 %v8414_v51, %v1396_v3  ;;  %v1431_v51 = vmul.f32 %v8397_v7, %v1399_v58  ;;  %v1757_v7 = vmul.f32 %v8507_v31, %v1565_v26 }
 0x37e   : > { %v1516_v25 = vadd.f32 %v1469_v15, %v1420_v23 }
 0x37f   : > { %1548 = vst.msk [vmem:[#allocation3 + $0x78] sm:$0xff] %vm1532_vm1, %v1515_v34 }
 0x380   : > { %1549 = vst.msk [vmem:[#allocation3 + $0x80] sm:$0xff] %vm1532_vm1, %v1516_v25  ;;  %v1463_v36 = vpop.xlane.xlu1 %1462 }
 0x381   : > { %v1513_v6 = vadd.f32 %v1463_v36, %v1417_v1  ;;  %v1481_v21 = vpop.xlane.xlu0 %1480  ;;  %v1400_v36 = vld [vmem:[#allocation3 + $0xe0] sm:$0xff] }
 0x382   : > { %v1522_v33 = vadd.f32 %v1481_v21, %v1426_v43  ;;  %v1432_v10 = vmul.f32 %v8426_v59, %v1400_v36  ;;  %v1397_v21 = vld [vmem:[#allocation3 + $0xc8] sm:$0xff]  ;;  %v1403_v59 = vld [vmem:[#allocation3 + $0xf8] sm:$0xff] }
 0x383   : > { %1546 = vst.msk [vmem:[#allocation3 + $0x68] sm:$0xff] %vm1532_vm1, %v1513_v6  ;;  %v1435_v31 = vmul.f32 %v8411_v48, %v1403_v59  ;;  %v1763_v48 = vmul.f32 %v8534_v2, %v1571_v22  ;;  %v1576_v2 = vld [vmem:[#allocation4 + $0x58] sm:$0xff] }
 0x384   : > { %1555 = vst.msk [vmem:[#allocation3 + $0xb0] sm:$0xff] %vm1532_vm1, %v1522_v33  ;;  %v1475_v17 = vpop.xlane.xlu1 %1474 }
 0x385   : > { %v1519_v4 = vadd.f32 %v1475_v17, %v1423_v0  ;;  %v1477_v35 = vpop.xlane.xlu0 %1476 }
 0x386   : > { %v1520_v52 = vadd.f32 %v1477_v35, %v1424_v30  ;;  %v1566_v30 = vld [vmem:[#allocation4 + $0x8] sm:$0xff] }
 0x387   : > { %1552 = vst.msk [vmem:[#allocation3 + $0x98] sm:$0xff] %vm1532_vm1, %v1519_v4  ;;  %v1429_v4 = vmul.f32 %v8405_v47, %v1397_v21  ;;  %v1758_v56 = vmul.f32 %v8515_v27, %v1566_v30 }
 0x388   : > { %1553 = vst.msk [vmem:[#allocation3 + $0xa0] sm:$0xff] %vm1532_vm1, %v1520_v52  ;;  %v1471_v29 = vpop.xlane.xlu1 %1470  ;;  %v1760_v52 = vmul.f32 %v8511_v14, %v1568_v46 }
 0x389   : > { %v1517_v20 = vadd.f32 %v1471_v29, %v1421_v38  ;;  %v1489_v11 = vpop.xlane.xlu0 %1488 }
 0x38a   : > { %v1526_v63 = vadd.f32 %v1489_v11, %v1430_v50 }
 0x38b   : > { %1550 = vst.msk [vmem:[#allocation3 + $0x88] sm:$0xff] %vm1532_vm1, %v1517_v20 }
 0x38c   : > { %1559 = vst.msk [vmem:[#allocation3 + $0xd0] sm:$0xff] %vm1532_vm1, %v1526_v63  ;;  %v1483_v62 = vpop.xlane.xlu1 %1482 }
 0x38d   : > { %v1523_v13 = vadd.f32 %v1483_v62, %v1427_v19  ;;  %v1485_v23 = vpop.xlane.xlu0 %1484  ;;  %v1401_v19 = vld [vmem:[#allocation3 + $0xe8] sm:$0xff] }
 0x38e   : > { %v1524_v34 = vadd.f32 %v1485_v23, %v1428_v49  ;;  %v1433_v27 = vmul.f32 %v8417_v41, %v1401_v19  ;;  %v1572_v23 = vld [vmem:[#allocation4 + $0x38] sm:$0xff]  ;;  %v10124_v19 = vld [vmem:[#allocation60_spill] sm:$0xff] }
 0x38f   : > { %1556 = vst.msk [vmem:[#allocation3 + $0xb8] sm:$0xff] %vm1532_vm1, %v1523_v13  ;;  %v1569_v13 = vld [vmem:[#allocation4 + $0x20] sm:$0xff] }
 0x390   : > { %1557 = vst.msk [vmem:[#allocation3 + $0xc0] sm:$0xff] %vm1532_vm1, %v1524_v34  ;;  %v1479_v15 = vpop.xlane.xlu1 %1478  ;;  %v1761_v34 = vmul.f32 %v8528_v54, %v1569_v13  ;;  %v1574_v54 = vld [vmem:[#allocation4 + $0x48] sm:$0xff] }
 0x391   : > { %v1521_v25 = vadd.f32 %v1479_v15, %v1425_v39  ;;  %v1497_v1 = vpop.xlane.xlu0 %1496  ;;  %v1764_v15 = vmul.f32 %v8523_v12, %v1572_v23 }
 0x392   : > { %v1530_v43 = vadd.f32 %v1497_v1, %v1434_v57 }
 0x393   : > { %1554 = vst.msk [vmem:[#allocation3 + $0xa8] sm:$0xff] %vm1532_vm1, %v1521_v25  ;;  %v1762_v25 = vmul.f32 %v8517_v37, %v1570_v5  ;;  %v1768_v37 = vmul.f32 %v8537_v60, %v1576_v2 }
 0x394   : > { %1563 = vst.msk [vmem:[#allocation3 + $0xf0] sm:$0xff] %vm1532_vm1, %v1530_v43  ;;  %v1491_v6 = vpop.xlane.xlu1 %1490 }
 0x395   : > { %v1527_v33 = vadd.f32 %v1491_v6, %v1431_v51  ;;  %v1493_v0 = vpop.xlane.xlu0 %1492  ;;  %v1575_v51 = vld [vmem:[#allocation4 + $0x50] sm:$0xff]  ;;  %v1573_v6 = vld [vmem:[#allocation4 + $0x40] sm:$0xff] }
 0x396   : > { %v1528_v17 = vadd.f32 %v1493_v0, %v1432_v10  ;;  %v1767_v10 = vmul.f32 %v8549_v32, %v1575_v51  ;;  %v1765_v12 = vmul.f32 %v8541_v45, %v1573_v6  ;;  %v1766_v0 = vmul.f32 %v8531_v40, %v1574_v54  ;;  %v1580_v32 = vld [vmem:[#allocation4 + $0x78] sm:$0xff]  ;;  %v1578_v45 = vld [vmem:[#allocation4 + $0x68] sm:$0xff] }
 0x397   : > { %1560 = vst.msk [vmem:[#allocation3 + $0xd8] sm:$0xff] %vm1532_vm1, %v1527_v33  ;;  %v1772_v40 = vmul.f32 %v8551_v18, %v1580_v32 }
 0x398   : > { %1561 = vst.msk [vmem:[#allocation3 + $0xe0] sm:$0xff] %vm1532_vm1, %v1528_v17  ;;  %v6206_v35 = vpop.f32.mrb[0].mxu1  ;;  %v1487_v16 = vpop.xlane.xlu1 %1486 }
 0x399   : > { %v2016_v38 = vadd.f32 %v6206_v35, %v1759_v44  ;;  %v1525_v29 = vadd.f32 %v1487_v16, %v1429_v4  ;;  %v1887_v50 = vpop.f32.mrb[1].mxu1  ;;  %v1579_v4 = vld [vmem:[#allocation4 + $0x70] sm:$0xff]  ;;  %v1577_v35 = vld [vmem:[#allocation4 + $0x60] sm:$0xff] }
 0x39a   : > { %v2014_v20 = vadd.f32 %v1887_v50, %v1757_v7  ;;  %v6207_v24 = vpop.f32.mrb[2].mxu1  ;;  %v1771_v16 = vmul.f32 %v8560_v55, %v1579_v4  ;;  %v1769_v60 = vmul.f32 %v8556_v9, %v1577_v35  ;;  %v1584_v55 = vld [vmem:[#allocation4 + $0x98] sm:$0xff]  ;;  %v1582_v9 = vld [vmem:[#allocation4 + $0x88] sm:$0xff] }
 0x39b   : > { %2048 = vst [vmem:[#allocation4 + $0x10] sm:$0xff] %v2016_v38  ;;  %1558 = vst.msk [vmem:[#allocation3 + $0xc8] sm:$0xff] %vm1532_vm1, %v1525_v29  ;;  %v2017_v47 = vadd.f32 %v6207_v24, %v1760_v52  ;;  %v1890_v11 = vpop.f32.mrb[3].mxu1  ;;  %v1770_v29 = vmul.f32 %v8544_v28, %v1578_v45  ;;  %v1776_v28 = vmul.f32 %v10124_v19, %v1584_v55  ;;  %v10136_v19 = vld [vmem:[#allocation31_spill] sm:$0xff] }
 0x39c   : > { %2046 = vst [vmem:[#allocation4] sm:$0xff] %v2014_v20  ;;  %v2015_v3 = vadd.f32 %v1890_v11, %v1758_v56  ;;  %v1499_v63 = vpop.xlane.xlu1 %1498 }
 0x39d   : > { %2049 = vst [vmem:[#allocation4 + $0x18] sm:$0xff] %v2017_v47  ;;  %v1531_v14 = vadd.f32 %v1499_v63, %v1435_v31  ;;  %v1583_v47 = vld [vmem:[#allocation4 + $0x90] sm:$0xff]  ;;  %v1581_v31 = vld [vmem:[#allocation4 + $0x80] sm:$0xff] }
 0x39e   : > { %2047 = vst [vmem:[#allocation4 + $0x8] sm:$0xff] %v2015_v3  ;;  %v1775_v3 = vmul.f32 %v8572_v61, %v1583_v47  ;;  %v1773_v18 = vmul.f32 %v8566_v42, %v1581_v31  ;;  %v1588_v61 = vld [vmem:[#allocation4 + $0xb8] sm:$0xff]  ;;  %v1586_v42 = vld [vmem:[#allocation4 + $0xa8] sm:$0xff]  ;;  %v10134_v47 = vld [vmem:[#allocation58_spill] sm:$0xff] }
 0x39f   : > { %1564 = vst.msk [vmem:[#allocation3 + $0xf8] sm:$0xff] %vm1532_vm1, %v1531_v14 }
 0x3a0   : > { %v1495_v62 = vpop.xlane.xlu1 %1494 }
 0x3a1   : > { %v1529_v49 = vadd.f32 %v1495_v62, %v1433_v27  ;;  %v10125_v62 = vld [vmem:[#allocation59_spill] sm:$0xff] }
 0x3a3   : > { %1562 = vst.msk [vmem:[#allocation3 + $0xe8] sm:$0xff] %vm1532_vm1, %v1529_v49  ;;  %v1774_v49 = vmul.f32 %v10125_v62, %v1582_v9  ;;  %v10135_v9 = vld [vmem:[#allocation33_spill] sm:$0xff] }
 0x3a7   : > { %v6210_v39 = vpop.f32.mrb[4].mxu1 }
 0x3a8   : > { %v2020_v57 = vadd.f32 %v6210_v39, %v1763_v48  ;;  %v1903_v58 = vpop.f32.mrb[5].mxu1  ;;  %v1587_v48 = vld [vmem:[#allocation4 + $0xb0] sm:$0xff]  ;;  %v1585_v39 = vld [vmem:[#allocation4 + $0xa0] sm:$0xff] }
 0x3a9   : > { %v2018_v41 = vadd.f32 %v1903_v58, %v1761_v34  ;;  %v6211_v1 = vpop.f32.mrb[6].mxu1  ;;  %v10127_v58 = vld [vmem:[#allocation12_spill] sm:$0xff] }
 0x3aa   : > { %2052 = vst [vmem:[#allocation4 + $0x30] sm:$0xff] %v2020_v57  ;;  %v2021_v36 = vadd.f32 %v6211_v1, %v1764_v15  ;;  %v1906_v43 = vpop.f32.mrb[7].mxu1  ;;  %v10126_v15 = vld [vmem:[#allocation23_spill] sm:$0xff]  ;;  %v10128_v1 = vld [vmem:[#allocation16_spill] sm:$0xff] }
 0x3ab   : > { %2050 = vst [vmem:[#allocation4 + $0x20] sm:$0xff] %v2018_v41  ;;  %v2019_v8 = vadd.f32 %v1906_v43, %v1762_v25  ;;  %v1779_v57 = vmul.f32 %v10126_v15, %v1587_v48  ;;  %v1777_v25 = vmul.f32 %v10127_v58, %v1585_v39  ;;  %v10139_v48 = vld [vmem:[#allocation11_spill] sm:$0xff] }
 0x3ac   : > { %2053 = vst [vmem:[#allocation4 + $0x38] sm:$0xff] %v2021_v36  ;;  %v1780_v36 = vmul.f32 %v10128_v1, %v1588_v61 }
 0x3ad   : > { %2051 = vst [vmem:[#allocation4 + $0x28] sm:$0xff] %v2019_v8  ;;  %v10129_v8 = vld [vmem:[#allocation13_spill] sm:$0xff] }
 0x3ae   : > { %v1778_v6 = vmul.f32 %v10129_v8, %v1586_v42  ;;  %v10141_v42 = vld [vmem:[#allocation15_spill] sm:$0xff] }
 0x3af   : > { %v6214_v21 = vpop.f32.mrb[8].mxu1 }
 0x3b0   : > { %v2024_v26 = vadd.f32 %v6214_v21, %v1767_v10  ;;  %v1919_v33 = vpop.f32.mrb[9].mxu1  ;;  %v1591_v21 = vld [vmem:[#allocation4 + $0xd0] sm:$0xff] }
 0x3b1   : > { %v2022_v46 = vadd.f32 %v1919_v33, %v1765_v12  ;;  %v6215_v17 = vpop.f32.mrb[10].mxu1  ;;  %v1592_v33 = vld [vmem:[#allocation4 + $0xd8] sm:$0xff] }
 0x3b2   : > { %2056 = vst [vmem:[#allocation4 + $0x50] sm:$0xff] %v2024_v26  ;;  %v2025_v30 = vadd.f32 %v6215_v17, %v1768_v37  ;;  %v1922_v44 = vpop.f32.mrb[11].mxu1  ;;  %v1589_v26 = vld [vmem:[#allocation4 + $0xc0] sm:$0xff] }
 0x3b3   : > { %2054 = vst [vmem:[#allocation4 + $0x40] sm:$0xff] %v2022_v46  ;;  %v2023_v7 = vadd.f32 %v1922_v44, %v1766_v0  ;;  %v1590_v0 = vld [vmem:[#allocation4 + $0xc8] sm:$0xff]  ;;  %v10130_v46 = vld [vmem:[#allocation26_spill] sm:$0xff] }
 0x3b4   : > { %2057 = vst [vmem:[#allocation4 + $0x58] sm:$0xff] %v2025_v30  ;;  %v1783_v17 = vmul.f32 %v10130_v46, %v1591_v21  ;;  %v10131_v30 = vld [vmem:[#allocation22_spill] sm:$0xff]  ;;  %v10155_v46 = vld [vmem:[#allocation27_spill] sm:$0xff] }
 0x3b5   : > { %2055 = vst [vmem:[#allocation4 + $0x48] sm:$0xff] %v2023_v7  ;;  %v1781_v44 = vmul.f32 %v10131_v30, %v1589_v26  ;;  %v10132_v7 = vld [vmem:[#allocation17_spill] sm:$0xff] }
 0x3b6   : > { %v1784_v35 = vmul.f32 %v10132_v7, %v1592_v33  ;;  %v10159_v7 = vld [vmem:[#allocation30_spill] sm:$0xff] }
 0x3b7   : > { %v6218_v59 = vpop.f32.mrb[12].mxu1 }
 0x3b8   : > { %v2028_v52 = vadd.f32 %v6218_v59, %v1771_v16  ;;  %v1935_v38 = vpop.f32.mrb[13].mxu1  ;;  %v10133_v16 = vld [vmem:[#allocation20_spill] sm:$0xff] }
 0x3b9   : > { %v2026_v50 = vadd.f32 %v1935_v38, %v1769_v60  ;;  %v6219_v56 = vpop.f32.mrb[14].mxu1  ;;  %v1782_v60 = vmul.f32 %v10133_v16, %v1590_v0 }
 0x3ba   : > { %2060 = vst [vmem:[#allocation4 + $0x70] sm:$0xff] %v2028_v52  ;;  %v2029_v20 = vadd.f32 %v6219_v56, %v1772_v40  ;;  %v1938_v24 = vpop.f32.mrb[15].mxu1  ;;  %v1593_v56 = vld [vmem:[#allocation4 + $0xe0] sm:$0xff] }
 0x3bb   : > { %2058 = vst [vmem:[#allocation4 + $0x60] sm:$0xff] %v2026_v50  ;;  %v2027_v11 = vadd.f32 %v1938_v24, %v1770_v29  ;;  %v1595_v29 = vld [vmem:[#allocation4 + $0xf0] sm:$0xff]  ;;  %v1594_v24 = vld [vmem:[#allocation4 + $0xe8] sm:$0xff]  ;;  %v1785_v31 = vmul.f32 %v8598_v53, %v1593_v56  ;;  %v10167_v56 = vld [vmem:[#allocation38_spill] sm:$0xff] }
 0x3bc   : > { %2061 = vst [vmem:[#allocation4 + $0x78] sm:$0xff] %v2029_v20  ;;  %v1596_v20 = vld [vmem:[#allocation4 + $0xf8] sm:$0xff] }
 0x3bd   : > { %2059 = vst [vmem:[#allocation4 + $0x68] sm:$0xff] %v2027_v11  ;;  %v1787_v11 = vmul.f32 %v10134_v47, %v1595_v29  ;;  %v10165_v29 = vld [vmem:[#allocation37_spill] sm:$0xff] }
 0x3bf   : > { %v6222_v63 = vpop.f32.mrb[16].mxu1 }
 0x3c0   : > { %v2032_v14 = vadd.f32 %v6222_v63, %v1775_v3  ;;  %v1951_v27 = vpop.f32.mrb[17].mxu1  ;;  %v1788_v3 = vmul.f32 %v10135_v9, %v1596_v20 }
 0x3c1   : > { %v2030_v22 = vadd.f32 %v1951_v27, %v1773_v18  ;;  %v6223_v13 = vpop.f32.mrb[18].mxu1 }
 0x3c2   : > { %2064 = vst [vmem:[#allocation4 + $0x90] sm:$0xff] %v2032_v14  ;;  %v2033_v23 = vadd.f32 %v6223_v13, %v1776_v28  ;;  %v1954_v5 = vpop.f32.mrb[19].mxu1  ;;  %v1786_v28 = vmul.f32 %v10136_v19, %v1594_v24 }
 0x3c3   : > { %2062 = vst [vmem:[#allocation4 + $0x80] sm:$0xff] %v2030_v22  ;;  %v2031_v34 = vadd.f32 %v1954_v5, %v1774_v49 }
 0x3c4   : > { %2065 = vst [vmem:[#allocation4 + $0x98] sm:$0xff] %v2033_v23  ;;  %v10137_v23 = vld [vmem:[#allocation10_spill] sm:$0xff] }
 0x3c5   : > { %2063 = vst [vmem:[#allocation4 + $0x88] sm:$0xff] %v2031_v34 }
 0x3c7   : > { %v6226_v41 = vpop.f32.mrb[20].mxu1 }
 0x3c8   : > { %v2036_v43 = vadd.f32 %v6226_v41, %v1779_v57  ;;  %v1967_v51 = vpop.f32.mrb[21].mxu1  ;;  %v10143_v57 = vld [vmem:[#allocation14_spill] sm:$0xff] }
 0x3c9   : > { %v2034_v2 = vadd.f32 %v1967_v51, %v1777_v25  ;;  %v6227_v54 = vpop.f32.mrb[22].mxu1  ;;  %v10145_v41 = vld [vmem:[#allocation18_spill] sm:$0xff]  ;;  %v10147_v51 = vld [vmem:[#allocation19_spill] sm:$0xff] }
 0x3ca   : > { %2068 = vst [vmem:[#allocation4 + $0xb0] sm:$0xff] %v2036_v43  ;;  %v2037_v10 = vadd.f32 %v6227_v54, %v1780_v36  ;;  %v1970_v12 = vpop.f32.mrb[23].mxu1 }
 0x3cb   : > { %2066 = vst [vmem:[#allocation4 + $0xa0] sm:$0xff] %v2034_v2  ;;  %v2035_v37 = vadd.f32 %v1970_v12, %v1778_v6  ;;  %v10149_v2 = vld [vmem:[#allocation21_spill] sm:$0xff] }
 0x3cc   : > { %2069 = vst [vmem:[#allocation4 + $0xb8] sm:$0xff] %v2037_v10  ;;  %v10151_v10 = vld [vmem:[#allocation24_spill] sm:$0xff] }
 0x3cd   : > { %2067 = vst [vmem:[#allocation4 + $0xa8] sm:$0xff] %v2035_v37  ;;  %v10153_v37 = vld [vmem:[#allocation25_spill] sm:$0xff] }
 0x3cf   : > { %v6230_v4 = vpop.f32.mrb[24].mxu1 }
 0x3d0   : > { %v2040_v32 = vadd.f32 %v6230_v4, %v1783_v17  ;;  %v1983_v45 = vpop.f32.mrb[25].mxu1 }
 0x3d1   : > { %v2038_v59 = vadd.f32 %v1983_v45, %v1781_v44  ;;  %v6231_v40 = vpop.f32.mrb[26].mxu1  ;;  %v10157_v44 = vld [vmem:[#allocation29_spill] sm:$0xff]  ;;  %v10161_v45 = vld [vmem:[#allocation34_spill] sm:$0xff] }
 0x3d2   : > { %2072 = vst [vmem:[#allocation4 + $0xd0] sm:$0xff] %v2040_v32  ;;  %v2041_v52 = vadd.f32 %v6231_v40, %v1784_v35  ;;  %v1986_v38 = vpop.f32.mrb[27].mxu1  ;;  %v10163_v40 = vld [vmem:[#allocation35_spill] sm:$0xff] }
 0x3d3   : > { %2070 = vst [vmem:[#allocation4 + $0xc0] sm:$0xff] %v2038_v59  ;;  %v2039_v50 = vadd.f32 %v1986_v38, %v1782_v60 }
 0x3d4   : > { %2073 = vst [vmem:[#allocation4 + $0xd8] sm:$0xff] %v2041_v52 }
 0x3d5   : > { %2071 = vst [vmem:[#allocation4 + $0xc8] sm:$0xff] %v2039_v50 }
 0x3d7   : > { %v6234_v55 = vpop.f32.mrb[28].mxu1 }
 0x3d8   : > { %v2044_v18 = vadd.f32 %v6234_v55, %v1787_v11  ;;  %v1999_v63 = vpop.f32.mrb[29].mxu1 }
 0x3d9   : > { %v2042_v14 = vadd.f32 %v1999_v63, %v1785_v31  ;;  %v6235_v27 = vpop.f32.mrb[30].mxu1 }
 0x3da   : > { %2076 = vst [vmem:[#allocation4 + $0xf0] sm:$0xff] %v2044_v18  ;;  %v2045_v62 = vadd.f32 %v6235_v27, %v1788_v3  ;;  %v2002_v49 = vpop.f32.mrb[31].mxu1 }
 0x3db   : > { %2074 = vst [vmem:[#allocation4 + $0xe0] sm:$0xff] %v2042_v14  ;;  %v2043_v22 = vadd.f32 %v2002_v49, %v1786_v28 }
 0x3dc   : > { %2077 = vst [vmem:[#allocation4 + $0xf8] sm:$0xff] %v2045_v62 }
 0x3dd   : > { %2075 = vst [vmem:[#allocation4 + $0xe8] sm:$0xff] %v2043_v22 }
 0x3df   : > { %v6254_v13 = vpop.f32.mrb[32].mxu1 }
 0x3e0   : > { %v8694_v5 = vadd.f32 %v6254_v13, %v10137_v23  ;;  %v2256_v53 = vpop.f32.mrb[33].mxu1 }
 0x3e1   : > { %v8697_v34 = vadd.f32 %v2256_v53, %v10139_v48  ;;  %v6255_v39 = vpop.f32.mrb[34].mxu1 }
 0x3e2   : > { %10138 = vst [vmem:[#allocation32_spill] sm:$0xff] %v8694_v5  ;;  %2420 = vmax.xlane.f32.xlu0 %v8694_v5  ;;  %v2259_v61 = vpop.f32.mrb[35].mxu1  ;;  %v8705_v58 = vadd.f32 %v6255_v39, %v10143_v57  ;;  %v9058_v5 = vld [vmem:[#allocation2 + $0x1e0] sm:$0xff] }
 0x3e3   : > { %10140 = vst [vmem:[#allocation41_spill] sm:$0xff] %v8697_v34  ;;  %v8701_v15 = vadd.f32 %v2259_v61, %v10141_v42  ;;  %2416 = vmax.xlane.f32.xlu1 %v8697_v34 }
 0x3e4   : > { %10144 = vst [vmem:[#allocation39_spill] sm:$0xff] %v8705_v58 }
 0x3e5   : > { %10142 = vst [vmem:[#allocation28_spill] sm:$0xff] %v8701_v15 }
 0x3e6   : > { %2418 = vmax.xlane.f32.xlu0 %v8701_v15  ;;  %v9048_v15 = vld [vmem:[#allocation2 + $0x1f8] sm:$0xff] }
 0x3e7   : > { %v6258_v25 = vpop.f32.mrb[36].mxu1  ;;  %2422 = vmax.xlane.f32.xlu1 %v8705_v58 }
 0x3e8   : > { %v8710_v1 = vadd.f32 %v6258_v25, %v10145_v41  ;;  %v2272_v36 = vpop.f32.mrb[37].mxu1 }
 0x3e9   : > { %v6259_v43 = vpop.f32.mrb[38].mxu1  ;;  %v8717_v54 = vadd.f32 %v2272_v36, %v10149_v2 }
 0x3ea   : > { %10146 = vst [vmem:[#allocation40_spill] sm:$0xff] %v8710_v1  ;;  %v8713_v8 = vadd.f32 %v6259_v43, %v10147_v51  ;;  %v2275_v6 = vpop.f32.mrb[39].mxu1  ;;  %2428 = vmax.xlane.f32.xlu0 %v8710_v1 }
 0x3eb   : > { %10150 = vst [vmem:[#allocation36_spill] sm:$0xff] %v8717_v54  ;;  %v8721_v12 = vadd.f32 %v2275_v6, %v10151_v10 }
 0x3ec   : > { %10148 = vst [vmem:[#allocation45_spill] sm:$0xff] %v8713_v8  ;;  %2430 = vmax.xlane.f32.xlu1 %v8713_v8  ;;  %v9038_v8 = vld [vmem:[#allocation2 + $0x1f0] sm:$0xff] }
 0x3ed   : > { %10152 = vst [vmem:[#allocation43_spill] sm:$0xff] %v8721_v12 }
 0x3ee   : > { %2424 = vmax.xlane.f32.xlu0 %v8717_v54  ;;  %v9028_v54 = vld [vmem:[#allocation2 + $0x1c8] sm:$0xff] }
 0x3ef   : > { %v6262_v21 = vpop.f32.mrb[40].mxu1 }
 0x3f0   : > { %v8725_v26 = vadd.f32 %v6262_v21, %v10153_v37  ;;  %v2288_v33 = vpop.f32.mrb[41].mxu1  ;;  %2426 = vmax.xlane.f32.xlu1 %v8721_v12  ;;  %v8821_v21 = vld [vmem:[#allocation2 + $0x110] sm:$0xff] }
 0x3f1   : > { %v6263_v0 = vpop.f32.mrb[42].mxu1  ;;  %v8733_v4 = vadd.f32 %v2288_v33, %v10157_v44 }
 0x3f2   : > { %10154 = vst [vmem:[#allocation44_spill] sm:$0xff] %v8725_v26  ;;  %v8729_v17 = vadd.f32 %v6263_v0, %v10155_v46  ;;  %v2291_v30 = vpop.f32.mrb[43].mxu1  ;;  %2436 = vmax.xlane.f32.xlu0 %v8725_v26  ;;  %v9018_v26 = vld [vmem:[#allocation2 + $0x1c0] sm:$0xff] }
 0x3f3   : > { %10158 = vst [vmem:[#allocation42_spill] sm:$0xff] %v8733_v4  ;;  %v8737_v35 = vadd.f32 %v2291_v30, %v10159_v7 }
 0x3f4   : > { %10156 = vst [vmem:[#allocation49_spill] sm:$0xff] %v8729_v17  ;;  %2438 = vmax.xlane.f32.xlu1 %v8729_v17 }
 0x3f5   : > { %10160 = vst [vmem:[#allocation47_spill] sm:$0xff] %v8737_v35 }
 0x3f6   : > { %2432 = vmax.xlane.f32.xlu0 %v8733_v4 }
 0x3f7   : > { %v6266_v32 = vpop.f32.mrb[44].mxu1 }
 0x3f8   : > { %v8741_v16 = vadd.f32 %v6266_v32, %v10161_v45  ;;  %v2304_v60 = vpop.f32.mrb[45].mxu1  ;;  %2434 = vmax.xlane.f32.xlu1 %v8737_v35  ;;  %v9010_v35 = vld [vmem:[#allocation2 + $0x1d8] sm:$0xff] }
 0x3f9   : > { %v6267_v59 = vpop.f32.mrb[46].mxu1  ;;  %v8749_v50 = vadd.f32 %v2304_v60, %v10165_v29 }
 0x3fa   : > { %10162 = vst [vmem:[#allocation48_spill] sm:$0xff] %v8741_v16  ;;  %v8745_v52 = vadd.f32 %v6267_v59, %v10163_v40  ;;  %v2307_v38 = vpop.f32.mrb[47].mxu1  ;;  %2444 = vmax.xlane.f32.xlu0 %v8741_v16  ;;  %v9002_v16 = vld [vmem:[#allocation2 + $0x1d0] sm:$0xff] }
 0x3fb   : > { %10166 = vst [vmem:[#allocation46_spill] sm:$0xff] %v8749_v50  ;;  %v8753_v20 = vadd.f32 %v2307_v38, %v10167_v56 }
 0x3fc   : > { %10164 = vst [vmem:[#allocation53_spill] sm:$0xff] %v8745_v52  ;;  %2446 = vmax.xlane.f32.xlu1 %v8745_v52 }
 0x3fd   : > { %10168 = vst [vmem:[#allocation51_spill] sm:$0xff] %v8753_v20 }
 0x3fe   : > { %2440 = vmax.xlane.f32.xlu0 %v8749_v50 }
 0x3ff   : > { %v6270_v24 = vpop.f32.mrb[48].mxu1 }
 0x400   : > { %v8757_v47 = vadd.f32 %v6270_v24, %v10137_v23  ;;  %v2320_v11 = vpop.f32.mrb[49].mxu1  ;;  %2442 = vmax.xlane.f32.xlu1 %v8753_v20  ;;  %v8995_v20 = vld [vmem:[#allocation2 + $0x1a8] sm:$0xff] }
 0x401   : > { %v6271_v31 = vpop.f32.mrb[50].mxu1  ;;  %v8765_v3 = vadd.f32 %v2320_v11, %v10139_v48  ;;  %v8860_v11 = vld [vmem:[#allocation2 + $0x120] sm:$0xff] }
 0x402   : > { %10169 = vst [vmem:[#allocation52_spill] sm:$0xff] %v8757_v47  ;;  %v8761_v55 = vadd.f32 %v6271_v31, %v10143_v57  ;;  %v2323_v9 = vpop.f32.mrb[51].mxu1  ;;  %2452 = vmax.xlane.f32.xlu0 %v8757_v47  ;;  %v8988_v47 = vld [vmem:[#allocation2 + $0x1a0] sm:$0xff] }
 0x403   : > { %10171 = vst [vmem:[#allocation50_spill] sm:$0xff] %v8765_v3  ;;  %v8769_v18 = vadd.f32 %v2323_v9, %v10141_v42 }
 0x404   : > { %10170 = vst [vmem:[#allocation57_spill] sm:$0xff] %v8761_v55  ;;  %2454 = vmax.xlane.f32.xlu1 %v8761_v55 }
 0x405   : > { %10172 = vst [vmem:[#allocation55_spill] sm:$0xff] %v8769_v18 }
 0x406   : > { %2448 = vmax.xlane.f32.xlu0 %v8765_v3 }
 0x407   : > { %v6274_v63 = vpop.f32.mrb[52].mxu1 }
 0x408   : > { %v8773_v19 = vadd.f32 %v6274_v63, %v10145_v41  ;;  %v2336_v28 = vpop.f32.mrb[53].mxu1  ;;  %2450 = vmax.xlane.f32.xlu1 %v8769_v18  ;;  %v8868_v63 = vld [vmem:[#allocation2 + $0x128] sm:$0xff]  ;;  %v8980_v18 = vld [vmem:[#allocation2 + $0x1b8] sm:$0xff] }
 0x409   : > { %v6275_v14 = vpop.f32.mrb[54].mxu1  ;;  %v8781_v49 = vadd.f32 %v2336_v28, %v10149_v2 }
 0x40a   : > { %10173 = vst [vmem:[#allocation56_spill] sm:$0xff] %v8773_v19  ;;  %v8777_v27 = vadd.f32 %v6275_v14, %v10147_v51  ;;  %v2339_v62 = vpop.f32.mrb[55].mxu1  ;;  %2460 = vmax.xlane.f32.xlu0 %v8773_v19 }
 0x40b   : > { %10175 = vst [vmem:[#allocation60_spill] sm:$0xff] %v8781_v49  ;;  %v8785_v22 = vadd.f32 %v2339_v62, %v10151_v10  ;;  %v8876_v62 = vld [vmem:[#allocation2 + $0x150] sm:$0xff] }
 0x40c   : > { %10174 = vst [vmem:[#allocation54_spill] sm:$0xff] %v8777_v27  ;;  %2462 = vmax.xlane.f32.xlu1 %v8777_v27  ;;  %v8948_v27 = vld [vmem:[#allocation2 + $0x198] sm:$0xff] }
 0x40d   : > { %10176 = vst [vmem:[#allocation59_spill] sm:$0xff] %v8785_v22 }
 0x40e   : > { %2456 = vmax.xlane.f32.xlu0 %v8781_v49 }
 0x40f   : > { %v6278_v13 = vpop.f32.mrb[56].mxu1 }
 0x410   : > { %v8789_v23 = vadd.f32 %v6278_v13, %v10153_v37  ;;  %v2352_v53 = vpop.f32.mrb[57].mxu1  ;;  %2458 = vmax.xlane.f32.xlu1 %v8785_v22  ;;  %v8823_v37 = vld [vmem:[#allocation2 + $0x100] sm:$0xff]  ;;  %v8972_v22 = vld [vmem:[#allocation2 + $0x1b0] sm:$0xff] }
 0x411   : > { %v6279_v48 = vpop.f32.mrb[58].mxu1  ;;  %v8797_v42 = vadd.f32 %v2352_v53, %v10157_v44  ;;  %v8831_v44 = vld [vmem:[#allocation2 + $0x108] sm:$0xff] }
 0x412   : > { %10177 = vst [vmem:[#allocation23_spill] sm:$0xff] %v8789_v23  ;;  %v8793_v39 = vadd.f32 %v6279_v48, %v10155_v46  ;;  %v2355_v61 = vpop.f32.mrb[59].mxu1  ;;  %2468 = vmax.xlane.f32.xlu0 %v8789_v23  ;;  %v8884_v48 = vld [vmem:[#allocation2 + $0x158] sm:$0xff]  ;;  %v8964_v23 = vld [vmem:[#allocation2 + $0x188] sm:$0xff] }
 0x413   : > { %10179 = vst [vmem:[#allocation16_spill] sm:$0xff] %v8797_v42  ;;  %v8801_v57 = vadd.f32 %v2355_v61, %v10159_v7  ;;  %v8836_v7 = vld [vmem:[#allocation2 + $0x118] sm:$0xff] }
 0x414   : > { %10178 = vst [vmem:[#allocation12_spill] sm:$0xff] %v8793_v39  ;;  %2470 = vmax.xlane.f32.xlu1 %v8793_v39 }
 0x415   : > { %10180 = vst [vmem:[#allocation13_spill] sm:$0xff] %v8801_v57 }
 0x416   : > { %2464 = vmax.xlane.f32.xlu0 %v8797_v42 }
 0x417   : > { %v6282_v25 = vpop.f32.mrb[60].mxu1 }
 0x418   : > { %v8805_v41 = vadd.f32 %v6282_v25, %v10161_v45  ;;  %v2368_v36 = vpop.f32.mrb[61].mxu1  ;;  %2466 = vmax.xlane.f32.xlu1 %v8801_v57  ;;  %v8956_v57 = vld [vmem:[#allocation2 + $0x180] sm:$0xff] }
 0x419   : > { %v6283_v43 = vpop.f32.mrb[62].mxu1  ;;  %v8813_v2 = vadd.f32 %v2368_v36, %v10165_v29  ;;  %v8855_v29 = vld [vmem:[#allocation2 + $0x138] sm:$0xff]  ;;  %v8892_v36 = vld [vmem:[#allocation2 + $0x140] sm:$0xff] }
 0x41a   : > { %10181 = vst [vmem:[#allocation26_spill] sm:$0xff] %v8805_v41  ;;  %v8809_v51 = vadd.f32 %v6283_v43, %v10163_v40  ;;  %v2371_v6 = vpop.f32.mrb[63].mxu1  ;;  %2476 = vmax.xlane.f32.xlu0 %v8805_v41  ;;  %v8847_v40 = vld [vmem:[#allocation2 + $0x130] sm:$0xff] }
 0x41b   : > { %10183 = vst [vmem:[#allocation17_spill] sm:$0xff] %v8813_v2  ;;  %v8817_v10 = vadd.f32 %v2371_v6, %v10167_v56 }
 0x41c   : > { %10182 = vst [vmem:[#allocation22_spill] sm:$0xff] %v8809_v51  ;;  %2478 = vmax.xlane.f32.xlu1 %v8809_v51  ;;  %v8932_v51 = vld [vmem:[#allocation2 + $0x168] sm:$0xff] }
 0x41d   : > { %10184 = vst [vmem:[#allocation20_spill] sm:$0xff] %v8817_v10 }
 0x41e   : > { %2472 = vmax.xlane.f32.xlu0 %v8813_v2 }
 0x420   : > { %2474 = vmax.xlane.f32.xlu1 %v8817_v10  ;;  %v8940_v10 = vld [vmem:[#allocation2 + $0x190] sm:$0xff] }
 0x46f   : > { %v2421_v33 = vpop.xlane.xlu0 %2420 }
 0x470   : > { %v8826_v0 = vmax.f32 %v8821_v21, %v2421_v33  ;;  %v2417_v46 = vpop.xlane.xlu1 %2416  ;;  %v8900_v33 = vld [vmem:[#allocation2 + $0x148] sm:$0xff] }
 0x471   : > { %v8829_v30 = vmax.f32 %v8823_v37, %v2417_v46 }
 0x472   : > { %3557 = vst.msk [vmem:[#allocation2 + $0x110] sm:$0xff] %vm1532_vm1, %v8826_v0  ;;  %2620 = vperm.xlu1 %6491, %v8826_v0  }
 0x473   : > { %3555 = vst.msk [vmem:[#allocation2 + $0x100] sm:$0xff] %vm1532_vm1, %v8829_v30  ;;  %2610 = vperm.xlu0 %6490, %v8829_v30   ;;  %v2419_v32 = vpop.xlane.xlu0 %2418 }
 0x474   : > { %v8842_v45 = vmax.f32 %v8831_v44, %v2419_v32  ;;  %v2423_v60 = vpop.xlane.xlu1 %2422 }
 0x475   : > { %v8845_v59 = vmax.f32 %v8836_v7, %v2423_v60  ;;  %v8908_v60 = vld [vmem:[#allocation2 + $0x170] sm:$0xff] }
 0x476   : > { %3556 = vst.msk [vmem:[#allocation2 + $0x108] sm:$0xff] %vm1532_vm1, %v8842_v45  ;;  %2615 = vperm.xlu1 %6491, %v8842_v45   ;;  %v2513_v17 = vsub.f32 %v8831_v44, %v8842_v45 }
 0x477   : > { %3558 = vst.msk [vmem:[#allocation2 + $0x118] sm:$0xff] %vm1532_vm1, %v8845_v59  ;;  %2625 = vperm.xlu0 %6490, %v8845_v59   ;;  %v2429_v38 = vpop.xlane.xlu0 %2428 }
 0x478   : > { %v8858_v56 = vmax.f32 %v8847_v40, %v2429_v38  ;;  %v2546_v45 = vmul.f32 1.442695, %v2513_v17 }
 0x479   : > { %v2431_v24 = vpop.xlane.xlu1 %2430 }
 0x47a   : > { %3561 = vst.msk [vmem:[#allocation2 + $0x130] sm:$0xff] %vm1532_vm1, %v8858_v56  ;;  %v8865_v31 = vmax.f32 %v8855_v29, %v2431_v24  ;;  %2640 = vperm.xlu1 %6491, %v8858_v56   ;;  %6709 = vpow2.f32 %v2546_v45  ;;  %v2518_v45 = vsub.f32 %v8847_v40, %v8858_v56 }
 0x47b   : > { %v2425_v9 = vpop.xlane.xlu0 %2424 }
 0x47c   : > { %3562 = vst.msk [vmem:[#allocation2 + $0x138] sm:$0xff] %vm1532_vm1, %v8865_v31  ;;  %v8873_v28 = vmax.f32 %v8860_v11, %v2425_v9  ;;  %2645 = vperm.xlu0 %6490, %v8865_v31   ;;  %v8916_v9 = vld [vmem:[#allocation2 + $0x178] sm:$0xff] }
 0x47d   : > { %v2427_v14 = vpop.xlane.xlu1 %2426 }
 0x47e   : > { %3559 = vst.msk [vmem:[#allocation2 + $0x120] sm:$0xff] %vm1532_vm1, %v8873_v28  ;;  %v8881_v13 = vmax.f32 %v8868_v63, %v2427_v14  ;;  %2630 = vperm.xlu1 %6491, %v8873_v28  }
 0x47f   : > { %v2437_v53 = vpop.xlane.xlu0 %2436 }
 0x480   : > { %3560 = vst.msk [vmem:[#allocation2 + $0x128] sm:$0xff] %vm1532_vm1, %v8881_v13  ;;  %v8889_v61 = vmax.f32 %v8876_v62, %v2437_v53  ;;  %2635 = vperm.xlu0 %6490, %v8881_v13  }
 0x481   : > { %v2439_v25 = vpop.xlane.xlu1 %2438 }
 0x482   : > { %3565 = vst.msk [vmem:[#allocation2 + $0x150] sm:$0xff] %vm1532_vm1, %v8889_v61  ;;  %v8897_v43 = vmax.f32 %v8884_v48, %v2439_v25  ;;  %2660 = vperm.xlu1 %6491, %v8889_v61   ;;  %v8924_v25 = vld [vmem:[#allocation2 + $0x160] sm:$0xff] }
 0x483   : > { %v2433_v6 = vpop.xlane.xlu0 %2432 }
 0x484   : > { %3566 = vst.msk [vmem:[#allocation2 + $0x158] sm:$0xff] %vm1532_vm1, %v8897_v43  ;;  %v8905_v46 = vmax.f32 %v8892_v36, %v2433_v6  ;;  %2665 = vperm.xlu0 %6490, %v8897_v43   ;;  %v9099_v40 = vpop.eup %6709 }
 0x485   : > { %v2435_v32 = vpop.xlane.xlu1 %2434 }
 0x486   : > { %3563 = vst.msk [vmem:[#allocation2 + $0x140] sm:$0xff] %vm1532_vm1, %v8905_v46  ;;  %v8913_v38 = vmax.f32 %v8900_v33, %v2435_v32  ;;  %2650 = vperm.xlu1 %6491, %v8905_v46  }
 0x487   : > { %v2445_v24 = vpop.xlane.xlu0 %2444 }
 0x488   : > { %3564 = vst.msk [vmem:[#allocation2 + $0x148] sm:$0xff] %vm1532_vm1, %v8913_v38  ;;  %v8921_v14 = vmax.f32 %v8908_v60, %v2445_v24  ;;  %2655 = vperm.xlu0 %6490, %v8913_v38  }
 0x489   : > { %v2447_v53 = vpop.xlane.xlu1 %2446 }
 0x48a   : > { %3569 = vst.msk [vmem:[#allocation2 + $0x170] sm:$0xff] %vm1532_vm1, %v8921_v14  ;;  %v8929_v6 = vmax.f32 %v8916_v9, %v2447_v53  ;;  %2680 = vperm.xlu1 %6491, %v8921_v14  }
 0x48b   : > { %v2441_v32 = vpop.xlane.xlu0 %2440 }
 0x48c   : > { %3570 = vst.msk [vmem:[#allocation2 + $0x178] sm:$0xff] %vm1532_vm1, %v8929_v6  ;;  %v8937_v24 = vmax.f32 %v8924_v25, %v2441_v32  ;;  %2685 = vperm.xlu0 %6490, %v8929_v6  }
 0x48d   : > { %v2443_v41 = vpop.xlane.xlu1 %2442 }
 0x48e   : > { %3567 = vst.msk [vmem:[#allocation2 + $0x160] sm:$0xff] %vm1532_vm1, %v8937_v24  ;;  %v8945_v53 = vmax.f32 %v8932_v51, %v2443_v41  ;;  %2670 = vperm.xlu1 %6491, %v8937_v24  }
 0x48f   : > { %v2453_v2 = vpop.xlane.xlu0 %2452 }
 0x490   : > { %3568 = vst.msk [vmem:[#allocation2 + $0x168] sm:$0xff] %vm1532_vm1, %v8945_v53  ;;  %v8953_v32 = vmax.f32 %v8940_v10, %v2453_v2  ;;  %2675 = vperm.xlu0 %6490, %v8945_v53  }
 0x491   : > { %v2455_v19 = vpop.xlane.xlu1 %2454 }
 0x492   : > { %3573 = vst.msk [vmem:[#allocation2 + $0x190] sm:$0xff] %vm1532_vm1, %v8953_v32  ;;  %v8961_v41 = vmax.f32 %v8948_v27, %v2455_v19  ;;  %2700 = vperm.xlu1 %6491, %v8953_v32  }
 0x493   : > { %v2449_v42 = vpop.xlane.xlu0 %2448 }
 0x494   : > { %3574 = vst.msk [vmem:[#allocation2 + $0x198] sm:$0xff] %vm1532_vm1, %v8961_v41  ;;  %v8969_v2 = vmax.f32 %v8956_v57, %v2449_v42  ;;  %2705 = vperm.xlu0 %6490, %v8961_v41  }
 0x495   : > { %v2451_v39 = vpop.xlane.xlu1 %2450 }
 0x496   : > { %3571 = vst.msk [vmem:[#allocation2 + $0x180] sm:$0xff] %vm1532_vm1, %v8969_v2  ;;  %v8977_v19 = vmax.f32 %v8964_v23, %v2451_v39  ;;  %2690 = vperm.xlu1 %6491, %v8969_v2  }
 0x497   : > { %v2461_v49 = vpop.xlane.xlu0 %2460 }
 0x498   : > { %3572 = vst.msk [vmem:[#allocation2 + $0x188] sm:$0xff] %vm1532_vm1, %v8977_v19  ;;  %v8985_v42 = vmax.f32 %v8972_v22, %v2461_v49  ;;  %2695 = vperm.xlu0 %6490, %v8977_v19  }
 0x499   : > { %v2463_v3 = vpop.xlane.xlu1 %2462 }
 0x49a   : > { %3577 = vst.msk [vmem:[#allocation2 + $0x1b0] sm:$0xff] %vm1532_vm1, %v8985_v42  ;;  %v8993_v39 = vmax.f32 %v8980_v18, %v2463_v3 }
 0x49b   : > { %v2457_v55 = vpop.xlane.xlu0 %2456 }
 0x49c   : > { %3578 = vst.msk [vmem:[#allocation2 + $0x1b8] sm:$0xff] %vm1532_vm1, %v8993_v39  ;;  %v9000_v49 = vmax.f32 %v8988_v47, %v2457_v55 }
 0x49d   : > { %v2459_v50 = vpop.xlane.xlu1 %2458 }
 0x49e   : > { %3575 = vst.msk [vmem:[#allocation2 + $0x1a0] sm:$0xff] %vm1532_vm1, %v9000_v49  ;;  %v9007_v52 = vmax.f32 %v8995_v20, %v2459_v50  ;;  %2710 = vperm.xlu1 %6491, %v9000_v49  }
 0x49f   : > { %v2469_v3 = vpop.xlane.xlu0 %2468 }
 0x4a0   : > { %3576 = vst.msk [vmem:[#allocation2 + $0x1a8] sm:$0xff] %vm1532_vm1, %v9007_v52  ;;  %v9015_v55 = vmax.f32 %v9002_v16, %v2469_v3  ;;  %2715 = vperm.xlu0 %6490, %v9007_v52  }
 0x4a1   : > { %v2471_v4 = vpop.xlane.xlu1 %2470 }
 0x4a2   : > { %3581 = vst.msk [vmem:[#allocation2 + $0x1d0] sm:$0xff] %vm1532_vm1, %v9015_v55  ;;  %v9023_v50 = vmax.f32 %v9010_v35, %v2471_v4  ;;  %2740 = vperm.xlu1 %6491, %v9015_v55   ;;  %v2512_v4 = vsub.f32 %v8823_v37, %v8829_v30 }
 0x4a3   : > { %v2465_v12 = vpop.xlane.xlu0 %2464 }
 0x4a4   : > { %3582 = vst.msk [vmem:[#allocation2 + $0x1d8] sm:$0xff] %vm1532_vm1, %v9023_v50  ;;  %v9033_v3 = vmax.f32 %v9018_v26, %v2465_v12  ;;  %2745 = vperm.xlu0 %6490, %v9023_v50   ;;  %v2514_v12 = vsub.f32 %v8821_v21, %v8826_v0  ;;  %v2544_v30 = vmul.f32 1.442695, %v2512_v4  ;;  %v2516_v0 = vsub.f32 %v8860_v11, %v8873_v28 }
 0x4a5   : > { %v2467_v1 = vpop.xlane.xlu1 %2466 }
 0x4a6   : > { %3579 = vst.msk [vmem:[#allocation2 + $0x1c0] sm:$0xff] %vm1532_vm1, %v9033_v3  ;;  %v9043_v44 = vmax.f32 %v9028_v54, %v2467_v1  ;;  %2730 = vperm.xlu1 %6491, %v9033_v3   ;;  %v2515_v1 = vsub.f32 %v8836_v7, %v8845_v59  ;;  %v9070_v59 = vld [vmem:[#allocation2 + $0x1e8] sm:$0xff]  ;;  %6711 = vpow2.f32 %v2544_v30  ;;  %v2556_v30 = vmul.f32 1.442695, %v2518_v45 }
 0x4a7   : > { %v2477_v58 = vpop.xlane.xlu0 %2476 }
 0x4a8   : > { %3580 = vst.msk [vmem:[#allocation2 + $0x1c8] sm:$0xff] %vm1532_vm1, %v9043_v44  ;;  %v9053_v37 = vmax.f32 %v9038_v8, %v2477_v58  ;;  %2735 = vperm.xlu0 %6490, %v9043_v44   ;;  %v2548_v58 = vmul.f32 1.442695, %v2514_v12  ;;  %v2517_v12 = vsub.f32 %v8868_v63, %v8881_v13  ;;  %v2519_v63 = vsub.f32 %v8855_v29, %v8865_v31 }
 0x4a9   : > { %v2479_v34 = vpop.xlane.xlu1 %2478  ;;  %v2522_v31 = vsub.f32 %v8876_v62, %v8889_v61 }
 0x4aa   : > { %3585 = vst.msk [vmem:[#allocation2 + $0x1f0] sm:$0xff] %vm1532_vm1, %v9053_v37  ;;  %v9065_v21 = vmax.f32 %v9048_v15, %v2479_v34  ;;  %2720 = vperm.xlu1 %6491, %v8985_v42   ;;  %v2550_v34 = vmul.f32 1.442695, %v2515_v1  ;;  %6713 = vpow2.f32 %v2548_v58  ;;  %v2554_v13 = vmul.f32 1.442695, %v2517_v12 }
 0x4ab   : > { %v2473_v7 = vpop.xlane.xlu0 %2472  ;;  %v2520_v1 = vsub.f32 %v8892_v36, %v8905_v46  ;;  %v2558_v56 = vmul.f32 1.442695, %v2519_v63  ;;  %v2521_v58 = vsub.f32 %v8900_v33, %v8913_v38  ;;  %v2523_v46 = vsub.f32 %v8884_v48, %v8897_v43 }
 0x4ac   : > { %v2543_v4 = vsub.f32 %v9048_v15, %v9065_v21  ;;  %3586 = vst.msk [vmem:[#allocation2 + $0x1f8] sm:$0xff] %vm1532_vm1, %v9065_v21  ;;  %v9077_v17 = vmax.f32 %v9058_v5, %v2473_v7  ;;  %2725 = vperm.xlu0 %6490, %v8993_v39   ;;  %v2552_v7 = vmul.f32 1.442695, %v2516_v0  ;;  %6715 = vpow2.f32 %v2550_v34 }
 0x4ad   : > { %v2475_v11 = vpop.xlane.xlu1 %2474  ;;  %v2560_v0 = vmul.f32 1.442695, %v2520_v1  ;;  %v2562_v34 = vmul.f32 1.442695, %v2521_v58  ;;  %v2564_v38 = vmul.f32 1.442695, %v2522_v31  ;;  %v2524_v12 = vsub.f32 %v8924_v25, %v8937_v24 }
 0x4ae   : > { %3583 = vst.msk [vmem:[#allocation2 + $0x1e0] sm:$0xff] %vm1532_vm1, %v9077_v17  ;;  %v9085_v28 = vmax.f32 %v9070_v59, %v2475_v11  ;;  %2750 = vperm.xlu1 %6491, %v9077_v17   ;;  %6717 = vpow2.f32 %v2552_v7  ;;  %v2566_v61 = vmul.f32 1.442695, %v2523_v46  ;;  %v2525_v11 = vsub.f32 %v8932_v51, %v8945_v53 }
 0x4af   : > { %6719 = vpow2.f32 %v2554_v13  ;;  %v2526_v43 = vsub.f32 %v8908_v60, %v8921_v14  ;;  %v2568_v45 = vmul.f32 1.442695, %v2524_v12  ;;  %v2527_v24 = vsub.f32 %v8916_v9, %v8929_v6 }
 0x4b0   : > { %3584 = vst.msk [vmem:[#allocation2 + $0x1e8] sm:$0xff] %vm1532_vm1, %v9085_v28  ;;  %2755 = vperm.xlu0 %6490, %v9085_v28   ;;  %v9104_v29 = vpop.eup %6711  ;;  %6721 = vpow2.f32 %v2556_v30  ;;  %v2570_v7 = vmul.f32 1.442695, %v2525_v11  ;;  %v2528_v63 = vsub.f32 %v8956_v57, %v8969_v2  ;;  %v2529_v13 = vsub.f32 %v8964_v23, %v8977_v19 }
 0x4b1   : > { %6723 = vpow2.f32 %v2558_v56  ;;  %v2572_v53 = vmul.f32 1.442695, %v2526_v43  ;;  %v2574_v14 = vmul.f32 1.442695, %v2527_v24  ;;  %v2530_v6 = vsub.f32 %v8940_v10, %v8953_v32 }
 0x4b2   : > { %2760 = vperm.xlu1 %6491, %v9053_v37   ;;  %6725 = vpow2.f32 %v2560_v0  ;;  %v2576_v30 = vmul.f32 1.442695, %v2528_v63  ;;  %v2531_v2 = vsub.f32 %v8948_v27, %v8961_v41  ;;  %v2578_v1 = vmul.f32 1.442695, %v2529_v13 }
 0x4b3   : > { %6727 = vpow2.f32 %v2562_v34  ;;  %v2580_v19 = vmul.f32 1.442695, %v2530_v6  ;;  %v2532_v56 = vsub.f32 %v8988_v47, %v9000_v49  ;;  %v2533_v58 = vsub.f32 %v8995_v20, %v9007_v52 }
 0x4b4   : > { %2765 = vperm.xlu0 %6490, %v9065_v21   ;;  %v9109_v36 = vpop.eup %6713  ;;  %6729 = vpow2.f32 %v2564_v38  ;;  %v2582_v32 = vmul.f32 1.442695, %v2531_v2  ;;  %v2534_v41 = vsub.f32 %v8972_v22, %v8985_v42  ;;  %v2535_v49 = vsub.f32 %v8980_v18, %v8993_v39 }
 0x4b5   : > { %6731 = vpow2.f32 %v2566_v61  ;;  %v2584_v31 = vmul.f32 1.442695, %v2532_v56  ;;  %v2586_v0 = vmul.f32 1.442695, %v2533_v58  ;;  %v2538_v46 = vsub.f32 %v9002_v16, %v9015_v55 }
 0x4b6   : > { %3097 = vperm.xlu1 %6491, %v9099_v40   ;;  %v9114_v33 = vpop.eup %6715  ;;  %6733 = vpow2.f32 %v2568_v45  ;;  %v2588_v20 = vmul.f32 1.442695, %v2534_v41  ;;  %v2590_v42 = vmul.f32 1.442695, %v2535_v49  ;;  %v2539_v34 = vsub.f32 %v9010_v35, %v9023_v50 }
 0x4b7   : > { %6735 = vpow2.f32 %v2570_v7  ;;  %v2596_v39 = vmul.f32 1.442695, %v2538_v46  ;;  %v2536_v38 = vsub.f32 %v9018_v26, %v9033_v3  ;;  %v2537_v12 = vsub.f32 %v9028_v54, %v9043_v44 }
 0x4b8   : > { %3092 = vperm.xlu0 %6490, %v9104_v29   ;;  %v9119_v62 = vpop.eup %6717  ;;  %6737 = vpow2.f32 %v2572_v53  ;;  %v2598_v55 = vmul.f32 1.442695, %v2539_v34  ;;  %v2540_v61 = vsub.f32 %v9058_v5, %v9077_v17  ;;  %v2541_v11 = vsub.f32 %v9070_v59, %v9085_v28  ;;  %v10189_v34 = vld [vmem:[#allocation45_spill] sm:$0xff] }
 0x4b9   : > { %v9124_v48 = vpop.eup %6719  ;;  %6739 = vpow2.f32 %v2574_v14  ;;  %v2592_v50 = vmul.f32 1.442695, %v2536_v38  ;;  %v2594_v3 = vmul.f32 1.442695, %v2537_v12  ;;  %v10185_v14 = vld [vmem:[#allocation32_spill] sm:$0xff] }
 0x4ba   : > { %3102 = vperm.xlu1 %6491, %v9109_v36   ;;  %v9129_v25 = vpop.eup %6721  ;;  %6741 = vpow2.f32 %v2576_v30  ;;  %v2600_v44 = vmul.f32 1.442695, %v2540_v61  ;;  %v2602_v5 = vmul.f32 1.442695, %v2541_v11  ;;  %v10186_v30 = vld [vmem:[#allocation41_spill] sm:$0xff]  ;;  %v10190_v38 = vld [vmem:[#allocation40_spill] sm:$0xff] }
 0x4bb   : > { %v9134_v51 = vpop.eup %6723  ;;  %6743 = vpow2.f32 %v2578_v1  ;;  %v10191_v61 = vld [vmem:[#allocation36_spill] sm:$0xff] }
 0x4bc   : > { %3107 = vperm.xlu0 %6490, %v9114_v33   ;;  %v9139_v60 = vpop.eup %6725  ;;  %6745 = vpow2.f32 %v2580_v19 }
 0x4bd   : > { %v9144_v9 = vpop.eup %6727  ;;  %6747 = vpow2.f32 %v2582_v32  ;;  %v10187_v32 = vld [vmem:[#allocation28_spill] sm:$0xff] }
 0x4be   : > { %3112 = vperm.xlu1 %6491, %v9119_v62   ;;  %v9149_v57 = vpop.eup %6729  ;;  %6749 = vpow2.f32 %v2584_v31  ;;  %v10188_v31 = vld [vmem:[#allocation39_spill] sm:$0xff] }
 0x4bf   : > { %v9154_v23 = vpop.eup %6731  ;;  %6751 = vpow2.f32 %v2586_v0 }
 0x4c0   : > { %3117 = vperm.xlu0 %6490, %v9124_v48   ;;  %v9159_v10 = vpop.eup %6733  ;;  %6753 = vpow2.f32 %v2588_v20 }
 0x4c1   : > { %v9164_v27 = vpop.eup %6735  ;;  %6755 = vpow2.f32 %v2590_v42 }
 0x4c2   : > { %3122 = vperm.xlu1 %6491, %v9129_v25   ;;  %v9169_v47 = vpop.eup %6737  ;;  %6757 = vpow2.f32 %v2596_v39 }
 0x4c3   : > { %v9174_v52 = vpop.eup %6739  ;;  %6759 = vpow2.f32 %v2598_v55 }
 0x4c4   : > { %3127 = vperm.xlu0 %6490, %v9134_v51   ;;  %v9179_v22 = vpop.eup %6741  ;;  %6761 = vpow2.f32 %v2592_v50 }
 0x4c5   : > { %v9184_v18 = vpop.eup %6743  ;;  %6763 = vpow2.f32 %v2594_v3 }
 0x4c6   : > { %3132 = vperm.xlu1 %6491, %v9139_v60   ;;  %v9189_v16 = vpop.eup %6745  ;;  %6765 = vpow2.f32 %v2600_v44 }
 0x4c7   : > { %v9194_v35 = vpop.eup %6747  ;;  %6767 = vpow2.f32 %v2602_v5  ;;  %v10192_v5 = vld [vmem:[#allocation43_spill] sm:$0xff] }
 0x4c8   : > { %3137 = vperm.xlu0 %6490, %v9144_v9   ;;  %v9199_v26 = vpop.eup %6749 }
 0x4c9   : > { %v9204_v54 = vpop.eup %6751 }
 0x4ca   : > { %3142 = vperm.xlu1 %6491, %v9149_v57   ;;  %v9207_v43 = vpop.eup %6753 }
 0x4cb   : > { %v9210_v17 = vpop.eup %6755 }
 0x4cc   : > { %3147 = vperm.xlu0 %6490, %v9154_v23   ;;  %v9213_v59 = vpop.eup %6757 }
 0x4cd   : > { %v9216_v28 = vpop.eup %6759 }
 0x4ce   : > { %3152 = vperm.xlu1 %6491, %v9159_v10   ;;  %v9219_v45 = vpop.eup %6761 }
 0x4cf   : > { %v9222_v24 = vpop.eup %6763 }
 0x4d0   : > { %3157 = vperm.xlu0 %6490, %v9164_v27   ;;  %v9225_v7 = vpop.eup %6765 }
 0x4d1   : > { %v9228_v53 = vpop.eup %6767 }
 0x4d2   : > { %3162 = vperm.xlu1 %6491, %v9169_v47  }
 0x4d4   : > { %3167 = vperm.xlu0 %6490, %v9174_v52  }
 0x4d6   : > { %3172 = vperm.xlu1 %6491, %v9179_v22  }
 0x4d8   : > { %3177 = vperm.xlu0 %6490, %v9184_v18  }
 0x4da   : > { %3182 = vperm.xlu1 %6491, %v9189_v16  }
 0x4dc   : > { %3187 = vperm.xlu0 %6490, %v9194_v35  }
 0x4de   : > { %3192 = vperm.xlu1 %6491, %v9199_v26  }
 0x4e0   : > { %3197 = vperm.xlu0 %6490, %v9204_v54  }
 0x4e2   : > { %3202 = vperm.xlu1 %6491, %v9207_v43  }
 0x4e4   : > { %3207 = vperm.xlu0 %6490, %v9210_v17  }
 0x4e6   : > { %3222 = vperm.xlu1 %6491, %v9213_v59  }
 0x4e8   : > { %3227 = vperm.xlu0 %6490, %v9216_v28  }
 0x4ea   : > { %3212 = vperm.xlu1 %6491, %v9219_v45  }
 0x4ec   : > { %3217 = vperm.xlu0 %6490, %v9222_v24  }
 0x4ee   : > { %3232 = vperm.xlu1 %6491, %v9225_v7  }
 0x4f0   : > { %3237 = vperm.xlu0 %6490, %v9228_v53  }
 0x4f1   : > { %v2621_v63 = vpop.permute.xlu1 %2620 }
 0x4f2   : > { %v2770_v13 = vsub.f32 %v10185_v14, %v2621_v63  ;;  %v2611_v6 = vpop.permute.xlu0 %2610 }
 0x4f3   : > { %v2768_v2 = vsub.f32 %v10186_v30, %v2611_v6 }
 0x4f4   : > { %v2804_v1 = vmul.f32 1.442695, %v2770_v13 }
 0x4f5   : > { %v2800_v19 = vmul.f32 1.442695, %v2768_v2  ;;  %v2616_v56 = vpop.permute.xlu1 %2615 }
 0x4f6   : > { %v2769_v58 = vsub.f32 %v10187_v32, %v2616_v56  ;;  %v2626_v41 = vpop.permute.xlu0 %2625  ;;  %6769 = vpow2.f32 %v2804_v1  ;;  %v10193_v56 = vld [vmem:[#allocation49_spill] sm:$0xff] }
 0x4f7   : > { %v2771_v49 = vsub.f32 %v10188_v31, %v2626_v41  ;;  %6771 = vpow2.f32 %v2800_v19  ;;  %v10194_v41 = vld [vmem:[#allocation44_spill] sm:$0xff] }
 0x4f8   : > { %v2802_v0 = vmul.f32 1.442695, %v2769_v58 }
 0x4f9   : > { %v2806_v20 = vmul.f32 1.442695, %v2771_v49  ;;  %v2641_v46 = vpop.permute.xlu1 %2640 }
 0x4fa   : > { %6773 = vpow2.f32 %v2802_v0  ;;  %v2774_v55 = vsub.f32 %v10190_v38, %v2641_v46  ;;  %v10195_v46 = vld [vmem:[#allocation42_spill] sm:$0xff] }
 0x4fb   : > { %6775 = vpow2.f32 %v2806_v20  ;;  %v2646_v42 = vpop.permute.xlu0 %2645 }
 0x4fc   : > { %v2775_v39 = vsub.f32 %v10189_v34, %v2646_v42  ;;  %v2812_v14 = vmul.f32 1.442695, %v2774_v55  ;;  %v10196_v55 = vld [vmem:[#allocation47_spill] sm:$0xff] }
 0x4fd   : > { %v2631_v12 = vpop.permute.xlu1 %2630 }
 0x4fe   : > { %v2814_v50 = vmul.f32 1.442695, %v2775_v39  ;;  %v2772_v3 = vsub.f32 %v10191_v61, %v2631_v12 }
 0x4ff   : > { %v2636_v11 = vpop.permute.xlu0 %2635 }
 0x500   : > { %v2808_v44 = vmul.f32 1.442695, %v2772_v3  ;;  %v2773_v63 = vsub.f32 %v10192_v5, %v2636_v11  ;;  %v6770_v6 = vpop.eup %6769  ;;  %6777 = vpow2.f32 %v2814_v50  ;;  %v10197_v5 = vld [vmem:[#allocation53_spill] sm:$0xff] }
 0x501   : > { %v2661_v13 = vpop.permute.xlu1 %2660  ;;  %v6772_v2 = vpop.eup %6771 }
 0x502   : > { %v2810_v30 = vmul.f32 1.442695, %v2773_v63  ;;  %6779 = vpow2.f32 %v2808_v44  ;;  %v2778_v31 = vsub.f32 %v10194_v41, %v2661_v13  ;;  %v10198_v13 = vld [vmem:[#allocation48_spill] sm:$0xff]  ;;  %v10199_v41 = vld [vmem:[#allocation46_spill] sm:$0xff] }
 0x503   : > { %v2666_v1 = vpop.permute.xlu0 %2665 }
 0x504   : > { %v6774_v19 = vpop.eup %6773  ;;  %6781 = vpow2.f32 %v2810_v30  ;;  %v2779_v32 = vsub.f32 %v10193_v56, %v2666_v1  ;;  %v2820_v50 = vmul.f32 1.442695, %v2778_v31 }
 0x505   : > { %v6776_v58 = vpop.eup %6775  ;;  %6783 = vpow2.f32 %v2812_v14  ;;  %v2651_v49 = vpop.permute.xlu1 %2650  ;;  %v3282_v0 = vpack.c.bf16 %v6774_v19, %v6772_v2 }
 0x506   : > { %v2822_v20 = vmul.f32 1.442695, %v2779_v32  ;;  %v2776_v42 = vsub.f32 %v10195_v46, %v2651_v49  ;;  %v3283_v34 = vpack.c.bf16 %v6776_v58, %v6770_v6 }
 0x507   : > { %6300 = vmatprep.mubr.bf16.mxu0 %v3282_v0  ;;  %v2656_v39 = vpop.permute.xlu0 %2655 }
 0x508   : > { %v2816_v38 = vmul.f32 1.442695, %v2776_v42  ;;  %v2777_v12 = vsub.f32 %v10196_v55, %v2656_v39  ;;  %6301 = vmatmul.mubr.bf16.vlgmr.msra.gmra.mrb[32].mxu0 %v3283_v34  ;;  %6785 = vpow2.f32 %v2822_v20  ;;  %v10200_v42 = vld [vmem:[#allocation51_spill] sm:$0xff] }
 0x509   : > { %v2681_v61 = vpop.permute.xlu1 %2680 }
 0x50a   : > { %v2818_v3 = vmul.f32 1.442695, %v2777_v12  ;;  %6787 = vpow2.f32 %v2816_v38  ;;  %v6778_v44 = vpop.eup %6777  ;;  %v2782_v30 = vsub.f32 %v10198_v13, %v2681_v61 }
 0x50b   : > { %v2686_v11 = vpop.permute.xlu0 %2685 }
 0x50c   : > { %6789 = vpow2.f32 %v2818_v3  ;;  %v2783_v63 = vsub.f32 %v10197_v5, %v2686_v11  ;;  %v6780_v14 = vpop.eup %6779  ;;  %v2828_v38 = vmul.f32 1.442695, %v2782_v30  ;;  %v10201_v3 = vld [vmem:[#allocation57_spill] sm:$0xff]  ;;  %v10202_v5 = vld [vmem:[#allocation52_spill] sm:$0xff] }
 0x50d   : > { %6791 = vpow2.f32 %v2820_v50  ;;  %v2671_v1 = vpop.permute.xlu1 %2670 }
 0x50e   : > { %v6782_v56 = vpop.eup %6781  ;;  %v2830_v32 = vmul.f32 1.442695, %v2783_v63  ;;  %v2780_v49 = vsub.f32 %v10199_v41, %v2671_v1  ;;  %v10203_v41 = vld [vmem:[#allocation50_spill] sm:$0xff] }
 0x50f   : > { %v6784_v0 = vpop.eup %6783  ;;  %2933 = vadd.xlane.f32.xlu0 %v6770_v6  ;;  %v2676_v31 = vpop.permute.xlu0 %2675  ;;  %v3284_v20 = vpack.c.bf16 %v6782_v56, %v6780_v14 }
 0x510   : > { %v2824_v46 = vmul.f32 1.442695, %v2780_v49  ;;  %v2781_v34 = vsub.f32 %v10200_v42, %v2676_v31  ;;  %v3285_v39 = vpack.c.bf16 %v6778_v44, %v6784_v0  ;;  %6793 = vpow2.f32 %v2830_v32 }
 0x511   : > { %v2701_v55 = vpop.permute.xlu1 %2700  ;;  %6304 = vmatprep.mubr.bf16.mxu0 %v3284_v20  ;;  %v10204_v20 = vld [vmem:[#allocation55_spill] sm:$0xff] }
 0x512   : > { %v2826_v12 = vmul.f32 1.442695, %v2781_v34  ;;  %2929 = vadd.xlane.f32.xlu1 %v6772_v2  ;;  %6305 = vmatmul.mubr.bf16.gmra.mrb[36].mxu0 %v3285_v39  ;;  %6795 = vpow2.f32 %v2824_v46  ;;  %v6786_v61 = vpop.eup %6785  ;;  %v2786_v63 = vsub.f32 %v10202_v5, %v2701_v55 }
 0x513   : > { %2931 = vadd.xlane.f32.xlu0 %v6774_v19  ;;  %v2706_v50 = vpop.permute.xlu0 %2705 }
 0x514   : > { %6797 = vpow2.f32 %v2826_v12  ;;  %v2787_v6 = vsub.f32 %v10201_v3, %v2706_v50  ;;  %v6788_v11 = vpop.eup %6787  ;;  %v2836_v34 = vmul.f32 1.442695, %v2786_v63  ;;  %v10205_v12 = vld [vmem:[#allocation60_spill] sm:$0xff] }
 0x515   : > { %6799 = vpow2.f32 %v2828_v38  ;;  %v2691_v13 = vpop.permute.xlu1 %2690 }
 0x516   : > { %v6790_v1 = vpop.eup %6789  ;;  %v2838_v30 = vmul.f32 1.442695, %v2787_v6  ;;  %v2784_v49 = vsub.f32 %v10203_v41, %v2691_v13  ;;  %2935 = vadd.xlane.f32.xlu1 %v6776_v58  ;;  %v10206_v13 = vld [vmem:[#allocation59_spill] sm:$0xff] }
 0x517   : > { %v6792_v32 = vpop.eup %6791  ;;  %2941 = vadd.xlane.f32.xlu0 %v6784_v0  ;;  %v2696_v2 = vpop.permute.xlu0 %2695  ;;  %v3286_v31 = vpack.c.bf16 %v6790_v1, %v6788_v11 }
 0x518   : > { %v2832_v19 = vmul.f32 1.442695, %v2784_v49  ;;  %v2785_v46 = vsub.f32 %v10204_v20, %v2696_v2  ;;  %v3287_v42 = vpack.c.bf16 %v6786_v61, %v6792_v32  ;;  %6801 = vpow2.f32 %v2838_v30 }
 0x519   : > { %6308 = vmatprep.mubr.bf16.mxu0 %v3286_v31  ;;  %v10207_v31 = vld [vmem:[#allocation12_spill] sm:$0xff] }
 0x51a   : > { %v2834_v39 = vmul.f32 1.442695, %v2785_v46  ;;  %2943 = vadd.xlane.f32.xlu1 %v6778_v44  ;;  %6309 = vmatmul.mubr.bf16.gmra.mrb[40].mxu0 %v3287_v42  ;;  %6803 = vpow2.f32 %v2832_v19  ;;  %v6794_v38 = vpop.eup %6793 }
 0x51b   : > { %2937 = vadd.xlane.f32.xlu0 %v6780_v14 }
 0x51c   : > { %6805 = vpow2.f32 %v2834_v39  ;;  %v6796_v55 = vpop.eup %6795  ;;  %v10209_v39 = vld [vmem:[#allocation16_spill] sm:$0xff] }
 0x51d   : > { %6807 = vpow2.f32 %v2836_v34  ;;  %v2711_v58 = vpop.permute.xlu1 %2710 }
 0x51e   : > { %v6798_v0 = vpop.eup %6797  ;;  %v2788_v50 = vsub.f32 %v10205_v12, %v2711_v58  ;;  %2939 = vadd.xlane.f32.xlu1 %v6782_v56 }
 0x51f   : > { %v6800_v3 = vpop.eup %6799  ;;  %2949 = vadd.xlane.f32.xlu0 %v6792_v32  ;;  %v2716_v6 = vpop.permute.xlu0 %2715  ;;  %v3288_v5 = vpack.c.bf16 %v6798_v0, %v6796_v55  ;;  %v10208_v32 = vld [vmem:[#allocation23_spill] sm:$0xff] }
 0x520   : > { %v2840_v63 = vmul.f32 1.442695, %v2788_v50  ;;  %v2789_v30 = vsub.f32 %v10206_v13, %v2716_v6  ;;  %v3289_v44 = vpack.c.bf16 %v6794_v38, %v6800_v3 }
 0x521   : > { %v2741_v41 = vpop.permute.xlu1 %2740  ;;  %6312 = vmatprep.mubr.bf16.mxu0 %v3288_v5 }
 0x522   : > { %v2842_v14 = vmul.f32 1.442695, %v2789_v30  ;;  %2951 = vadd.xlane.f32.xlu1 %v6786_v61  ;;  %6313 = vmatmul.mubr.bf16.gmra.mrb[44].mxu0 %v3289_v44  ;;  %6809 = vpow2.f32 %v2840_v63  ;;  %v6802_v2 = vpop.eup %6801  ;;  %v2794_v20 = vsub.f32 %v10208_v32, %v2741_v41  ;;  %v10211_v41 = vld [vmem:[#allocation56_spill] sm:$0xff] }
 0x523   : > { %2945 = vadd.xlane.f32.xlu0 %v6788_v11  ;;  %v2746_v49 = vpop.permute.xlu0 %2745  ;;  %v10210_v11 = vld [vmem:[#allocation13_spill] sm:$0xff] }
 0x524   : > { %6811 = vpow2.f32 %v2842_v14  ;;  %v2795_v56 = vsub.f32 %v10207_v31, %v2746_v49  ;;  %v6804_v19 = vpop.eup %6803  ;;  %v2852_v13 = vmul.f32 1.442695, %v2794_v20  ;;  %v10212_v49 = vld [vmem:[#allocation54_spill] sm:$0xff] }
 0x525   : > { %v2731_v46 = vpop.permute.xlu1 %2730 }
 0x526   : > { %v6806_v42 = vpop.eup %6805  ;;  %v2854_v34 = vmul.f32 1.442695, %v2795_v56  ;;  %v2792_v58 = vsub.f32 %v10209_v39, %v2731_v46  ;;  %2947 = vadd.xlane.f32.xlu1 %v6790_v1  ;;  %v10213_v39 = vld [vmem:[#allocation17_spill] sm:$0xff] }
 0x527   : > { %v6808_v12 = vpop.eup %6807  ;;  %2957 = vadd.xlane.f32.xlu0 %v6800_v3  ;;  %v2736_v61 = vpop.permute.xlu0 %2735  ;;  %v3290_v50 = vpack.c.bf16 %v6806_v42, %v6804_v19 }
 0x528   : > { %v2848_v6 = vmul.f32 1.442695, %v2792_v58  ;;  %v2793_v5 = vsub.f32 %v10210_v11, %v2736_v61  ;;  %v3291_v63 = vpack.c.bf16 %v6802_v2, %v6808_v12  ;;  %6813 = vpow2.f32 %v2854_v34 }
 0x529   : > { %v2721_v30 = vpop.permute.xlu1 %2720  ;;  %6316 = vmatprep.mubr.bf16.mxu0 %v3290_v50 }
 0x52a   : > { %v2850_v44 = vmul.f32 1.442695, %v2793_v5  ;;  %v2790_v14 = vsub.f32 %v10211_v41, %v2721_v30  ;;  %2959 = vadd.xlane.f32.xlu1 %v6794_v38  ;;  %6317 = vmatmul.mubr.bf16.gmra.mrb[48].mxu0 %v3291_v63  ;;  %6815 = vpow2.f32 %v2848_v6  ;;  %v10215_v5 = vld [vmem:[#allocation26_spill] sm:$0xff] }
 0x52b   : > { %2953 = vadd.xlane.f32.xlu0 %v6796_v55  ;;  %v2726_v1 = vpop.permute.xlu0 %2725  ;;  %v10214_v55 = vld [vmem:[#allocation20_spill] sm:$0xff] }
 0x52c   : > { %6817 = vpow2.f32 %v2850_v44  ;;  %v2844_v3 = vmul.f32 1.442695, %v2790_v14  ;;  %v2791_v31 = vsub.f32 %v10212_v49, %v2726_v1  ;;  %v6810_v56 = vpop.eup %6809 }
 0x52d   : > { %6819 = vpow2.f32 %v2852_v13  ;;  %v2751_v32 = vpop.permute.xlu1 %2750 }
 0x52e   : > { %v6812_v46 = vpop.eup %6811  ;;  %6821 = vpow2.f32 %v2844_v3  ;;  %v2846_v20 = vmul.f32 1.442695, %v2791_v31  ;;  %v2796_v34 = vsub.f32 %v10213_v39, %v2751_v32  ;;  %2955 = vadd.xlane.f32.xlu1 %v6798_v0  ;;  %v10216_v0 = vld [vmem:[#allocation22_spill] sm:$0xff] }
 0x52f   : > { %2965 = vadd.xlane.f32.xlu0 %v6808_v12  ;;  %v2756_v58 = vpop.permute.xlu0 %2755  ;;  %v3292_v38 = vpack.c.bf16 %v6812_v46, %v6810_v56 }
 0x530   : > { %6823 = vpow2.f32 %v2846_v20  ;;  %v2856_v61 = vmul.f32 1.442695, %v2796_v34  ;;  %v2797_v50 = vsub.f32 %v10214_v55, %v2756_v58 }
 0x531   : > { %v2761_v6 = vpop.permute.xlu1 %2760  ;;  %6320 = vmatprep.mubr.bf16.mxu0 %v3292_v38 }
 0x532   : > { %v2858_v11 = vmul.f32 1.442695, %v2797_v50  ;;  %v2798_v63 = vsub.f32 %v10215_v5, %v2761_v6  ;;  %2967 = vadd.xlane.f32.xlu1 %v6802_v2  ;;  %6825 = vpow2.f32 %v2856_v61  ;;  %v6814_v30 = vpop.eup %6813  ;;  %v10217_v6 = vsub.f32 %v9038_v8, %v9053_v37 }
 0x533   : > { %2961 = vadd.xlane.f32.xlu0 %v6804_v19  ;;  %v2766_v13 = vpop.permute.xlu0 %2765 }
 0x534   : > { %6827 = vpow2.f32 %v2858_v11  ;;  %v2860_v44 = vmul.f32 1.442695, %v2798_v63  ;;  %v2799_v12 = vsub.f32 %v10216_v0, %v2766_v13  ;;  %v6816_v41 = vpop.eup %6815  ;;  %v2604_v11 = vmul.f32 1.442695, %v10217_v6  ;;  %v2867_v6 = vld [vmem:[#allocation3 + $0x110] sm:$0xff] }
 0x535   : > { %v9265_v55 = vpop.permute.xlu1 %3097  ;;  %v2606_v63 = vmul.f32 1.442695, %v2543_v4 }
 0x536   : > { %v6818_v14 = vpop.eup %6817  ;;  %v2862_v1 = vmul.f32 1.442695, %v2799_v12  ;;  %2963 = vadd.xlane.f32.xlu1 %v6806_v42  ;;  %6829 = vpow2.f32 %v2860_v44 }
 0x537   : > { %v6820_v3 = vpop.eup %6819  ;;  %v3294_v49 = vpack.c.bf16 %v6818_v14, %v6816_v41  ;;  %v9263_v61 = vpop.permute.xlu0 %3092 }
 0x538   : > { %v6822_v31 = vpop.eup %6821  ;;  %6831 = vpow2.f32 %v2862_v1  ;;  %v3295_v32 = vpack.c.bf16 %v6814_v30, %v6820_v3 }
 0x539   : > { %2973 = vadd.xlane.f32.xlu0 %v6822_v31  ;;  %6324 = vmatprep.mubr.bf16.mxu1 %v3294_v49  ;;  %6833 = vpow2.f32 %v2604_v11 }
 0x53a   : > { %v6824_v2 = vpop.eup %6823  ;;  %6325 = vmatmul.mubr.bf16.vlgmr.msra.gmra.mrb[64].mxu1 %v3295_v32  ;;  %6835 = vpow2.f32 %v2606_v63  ;;  %v2899_v63 = vmul.f32 %v9109_v36, %v2867_v6 }
 0x53b   : > { %2975 = vadd.xlane.f32.xlu1 %v6824_v2  ;;  %v3293_v19 = vpack.c.bf16 %v6824_v2, %v6822_v31  ;;  %v9267_v50 = vpop.permute.xlu0 %3107 }
 0x53c   : > { %v6826_v20 = vpop.eup %6825 }
 0x53d   : > { %2969 = vadd.xlane.f32.xlu0 %v6810_v56  ;;  %6321 = vmatmul.mubr.bf16.gmra.mrb[52].mxu0 %v3293_v19  ;;  %v9269_v56 = vpop.permute.xlu1 %3102 }
 0x53e   : > { %v6828_v39 = vpop.eup %6827 }
 0x53f   : > { %2971 = vadd.xlane.f32.xlu1 %v6812_v46  ;;  %v3296_v34 = vpack.c.bf16 %v6828_v39, %v6826_v20  ;;  %v9271_v46 = vpop.permute.xlu0 %3117 }
 0x540   : > { %v6830_v58 = vpop.eup %6829 }
 0x541   : > { %2981 = vadd.xlane.f32.xlu0 %v6820_v3  ;;  %6328 = vmatprep.mubr.bf16.mxu1 %v3296_v34  ;;  %v9276_v5 = vpop.permute.xlu1 %3112 }
 0x542   : > { %v6832_v42 = vpop.eup %6831 }
 0x543   : > { %2983 = vadd.xlane.f32.xlu1 %v6814_v30  ;;  %v3297_v38 = vpack.c.bf16 %v6832_v42, %v6830_v58  ;;  %v9281_v13 = vpop.permute.xlu0 %3127  ;;  %v9287_v0 = vpop.eup %6833 }
 0x544   : > { %v9292_v8 = vpop.eup %6835 }
 0x545   : > { %2977 = vadd.xlane.f32.xlu0 %v6816_v41  ;;  %6329 = vmatmul.mubr.bf16.gmra.mrb[68].mxu1 %v3297_v38  ;;  %v9283_v30 = vpop.permute.xlu1 %3122 }
 0x547   : > { %2979 = vadd.xlane.f32.xlu1 %v6818_v14  ;;  %v9285_v44 = vpop.permute.xlu0 %3137 }
 0x549   : > { %2989 = vadd.xlane.f32.xlu0 %v6830_v58  ;;  %v9289_v12 = vpop.permute.xlu1 %3132 }
 0x54b   : > { %2991 = vadd.xlane.f32.xlu1 %v6832_v42  ;;  %v9294_v37 = vpop.permute.xlu0 %3147 }
 0x54d   : > { %2985 = vadd.xlane.f32.xlu0 %v6826_v20  ;;  %v9297_v15 = vpop.permute.xlu1 %3142 }
 0x54f   : > { %2987 = vadd.xlane.f32.xlu1 %v6828_v39  ;;  %v9299_v21 = vpop.permute.xlu0 %3157 }
 0x551   : > { %v9301_v4 = vpop.permute.xlu1 %3152 }
 0x553   : > { %v9303_v41 = vpop.permute.xlu0 %3167 }
 0x555   : > { %v9305_v14 = vpop.permute.xlu1 %3162 }
 0x557   : > { %v9307_v1 = vpop.permute.xlu0 %3177 }
 0x558   : > { %10218 = vst [vmem:[#allocation58_spill] sm:$0xff] %v9307_v1 }
 0x559   : > { %v9309_v3 = vpop.permute.xlu1 %3172 }
 0x55a   : > { %10219 = vst [vmem:[#allocation33_spill] sm:$0xff] %v9309_v3 }
 0x55b   : > { %v9311_v49 = vpop.permute.xlu0 %3187 }
 0x55c   : > { %10220 = vst [vmem:[#allocation31_spill] sm:$0xff] %v9311_v49 }
 0x55d   : > { %v9313_v31 = vpop.permute.xlu1 %3182 }
 0x55f   : > { %v9315_v32 = vpop.permute.xlu0 %3197 }
 0x560   : > { %3242 = vperm.xlu1 %6491, %v9287_v0   ;;  %10221 = vst [vmem:[#allocation10_spill] sm:$0xff] %v9315_v32  ;;  %v2865_v32 = vld [vmem:[#allocation3 + $0x100] sm:$0xff] }
 0x561   : > { %v9317_v2 = vpop.permute.xlu1 %3192 }
 0x562   : > { %10222 = vst [vmem:[#allocation11_spill] sm:$0xff] %v9317_v2 }
 0x563   : > { %3247 = vperm.xlu0 %6490, %v9292_v8   ;;  %v9319_v19 = vpop.permute.xlu0 %3207 }
 0x564   : > { %10223 = vst [vmem:[#allocation15_spill] sm:$0xff] %v9319_v19  ;;  %v2866_v19 = vld [vmem:[#allocation3 + $0x108] sm:$0xff] }
 0x565   : > { %v9321_v20 = vpop.permute.xlu1 %3202 }
 0x566   : > { %10224 = vst [vmem:[#allocation14_spill] sm:$0xff] %v9321_v20  ;;  %v2897_v20 = vmul.f32 %v9104_v29, %v2865_v32  ;;  %v2872_v29 = vld [vmem:[#allocation3 + $0x138] sm:$0xff] }
 0x567   : > { %v9323_v39 = vpop.permute.xlu0 %3227 }
 0x568   : > { %10225 = vst [vmem:[#allocation18_spill] sm:$0xff] %v9323_v39 }
 0x569   : > { %v9325_v34 = vpop.permute.xlu1 %3222 }
 0x56a   : > { %10226 = vst [vmem:[#allocation19_spill] sm:$0xff] %v9325_v34  ;;  %v2868_v34 = vld [vmem:[#allocation3 + $0x118] sm:$0xff] }
 0x56b   : > { %v9327_v58 = vpop.permute.xlu0 %3217  ;;  %v2900_v36 = vmul.f32 %v9114_v33, %v2868_v34  ;;  %v2870_v33 = vld [vmem:[#allocation3 + $0x128] sm:$0xff] }
 0x56c   : > { %10227 = vst [vmem:[#allocation21_spill] sm:$0xff] %v9327_v58  ;;  %v2898_v58 = vmul.f32 %v9099_v40, %v2866_v19  ;;  %v2904_v40 = vmul.f32 %v9134_v51, %v2872_v29  ;;  %v2876_v51 = vld [vmem:[#allocation3 + $0x158] sm:$0xff] }
 0x56d   : > { %v9329_v42 = vpop.permute.xlu1 %3212 }
 0x56e   : > { %10228 = vst [vmem:[#allocation24_spill] sm:$0xff] %v9329_v42 }
 0x56f   : > { %v9331_v38 = vpop.permute.xlu0 %3237 }
 0x570   : > { %10229 = vst [vmem:[#allocation25_spill] sm:$0xff] %v9331_v38  ;;  %v2871_v38 = vld [vmem:[#allocation3 + $0x130] sm:$0xff] }
 0x571   : > { %v9333_v11 = vpop.permute.xlu1 %3232 }
 0x572   : > { %10230 = vst [vmem:[#allocation27_spill] sm:$0xff] %v9333_v11 }
 0x59c   : > { %v2934_v2 = vpop.xlane.xlu0 %2933 }
 0x59d   : > { %v2995_v1 = vadd.f32 %v2934_v2, %v2899_v63  ;;  %v2903_v2 = vmul.f32 %v9129_v25, %v2871_v38  ;;  %v2869_v63 = vld [vmem:[#allocation3 + $0x120] sm:$0xff]  ;;  %v2902_v25 = vmul.f32 %v9124_v48, %v2870_v33  ;;  %v2874_v48 = vld [vmem:[#allocation3 + $0x148] sm:$0xff] }
 0x59e   : > { %v2901_v19 = vmul.f32 %v9119_v62, %v2869_v63  ;;  %v2908_v62 = vmul.f32 %v9154_v23, %v2876_v51  ;;  %v2879_v63 = vld [vmem:[#allocation3 + $0x170] sm:$0xff]  ;;  %v2880_v23 = vld [vmem:[#allocation3 + $0x178] sm:$0xff] }
 0x59f   : > { %3027 = vst.msk [vmem:[#allocation3 + $0x110] sm:$0xff] %vm1532_vm1, %v2995_v1  ;;  %v2930_v39 = vpop.xlane.xlu1 %2929  ;;  %v2883_v51 = vld [vmem:[#allocation3 + $0x190] sm:$0xff] }
 0x5a0   : > { %v2993_v42 = vadd.f32 %v2930_v39, %v2897_v20  ;;  %v2932_v49 = vpop.xlane.xlu0 %2931  ;;  %v2875_v39 = vld [vmem:[#allocation3 + $0x150] sm:$0xff] }
 0x5a1   : > { %v2994_v3 = vadd.f32 %v2932_v49, %v2898_v58 }
 0x5a2   : > { %3025 = vst.msk [vmem:[#allocation3 + $0x100] sm:$0xff] %vm1532_vm1, %v2993_v42  ;;  %v2907_v42 = vmul.f32 %v9149_v57, %v2875_v39  ;;  %v2906_v57 = vmul.f32 %v9144_v9, %v2874_v48  ;;  %v2878_v9 = vld [vmem:[#allocation3 + $0x168] sm:$0xff] }
 0x5a3   : > { %3026 = vst.msk [vmem:[#allocation3 + $0x108] sm:$0xff] %vm1532_vm1, %v2994_v3  ;;  %v2936_v6 = vpop.xlane.xlu1 %2935 }
 0x5a4   : > { %v2996_v32 = vadd.f32 %v2936_v6, %v2900_v36  ;;  %v2942_v1 = vpop.xlane.xlu0 %2941  ;;  %v2873_v36 = vld [vmem:[#allocation3 + $0x140] sm:$0xff] }
 0x5a5   : > { %v2999_v11 = vadd.f32 %v2942_v1, %v2903_v2  ;;  %v2905_v29 = vmul.f32 %v9139_v60, %v2873_v36  ;;  %v2912_v60 = vmul.f32 %v9174_v52, %v2880_v23  ;;  %v2915_v36 = vmul.f32 %v9189_v16, %v2883_v51  ;;  %v2884_v52 = vld [vmem:[#allocation3 + $0x198] sm:$0xff] }
 0x5a6   : > { %3028 = vst.msk [vmem:[#allocation3 + $0x118] sm:$0xff] %vm1532_vm1, %v2996_v32  ;;  %v2888_v23 = vld [vmem:[#allocation3 + $0x1b8] sm:$0xff] }
 0x5a7   : > { %3031 = vst.msk [vmem:[#allocation3 + $0x130] sm:$0xff] %vm1532_vm1, %v2999_v11  ;;  %v2944_v49 = vpop.xlane.xlu1 %2943  ;;  %v2892_v51 = vld [vmem:[#allocation3 + $0x1d8] sm:$0xff] }
 0x5a8   : > { %v3000_v20 = vadd.f32 %v2944_v49, %v2904_v40  ;;  %v2938_v3 = vpop.xlane.xlu0 %2937 }
 0x5a9   : > { %v2997_v34 = vadd.f32 %v2938_v3, %v2901_v19  ;;  %v2911_v19 = vmul.f32 %v9169_v47, %v2879_v63  ;;  %v2877_v3 = vld [vmem:[#allocation3 + $0x160] sm:$0xff]  ;;  %v2910_v47 = vmul.f32 %v9164_v27, %v2878_v9  ;;  %v2882_v27 = vld [vmem:[#allocation3 + $0x188] sm:$0xff]  ;;  %v2891_v9 = vld [vmem:[#allocation3 + $0x1d0] sm:$0xff] }
 0x5aa   : > { %3032 = vst.msk [vmem:[#allocation3 + $0x138] sm:$0xff] %vm1532_vm1, %v3000_v20  ;;  %v2914_v16 = vmul.f32 %v9184_v18, %v2882_v27 }
 0x5ab   : > { %3029 = vst.msk [vmem:[#allocation3 + $0x120] sm:$0xff] %vm1532_vm1, %v2997_v34  ;;  %v2940_v58 = vpop.xlane.xlu1 %2939 }
 0x5ac   : > { %v2998_v38 = vadd.f32 %v2940_v58, %v2902_v25  ;;  %v2950_v11 = vpop.xlane.xlu0 %2949  ;;  %v2909_v25 = vmul.f32 %v9159_v10, %v2877_v3  ;;  %v2916_v10 = vmul.f32 %v9194_v35, %v2884_v52  ;;  %v2920_v3 = vmul.f32 %v9210_v17, %v2888_v23  ;;  %v3061_v23 = vld [vmem:[#allocation4 + $0x118] sm:$0xff] }
 0x5ad   : > { %v3003_v6 = vadd.f32 %v2950_v11, %v2907_v42  ;;  %v2923_v17 = vmul.f32 %v9213_v59, %v2891_v9 }
 0x5ae   : > { %3030 = vst.msk [vmem:[#allocation3 + $0x128] sm:$0xff] %vm1532_vm1, %v2998_v38 }
 0x5af   : > { %3035 = vst.msk [vmem:[#allocation3 + $0x150] sm:$0xff] %vm1532_vm1, %v3003_v6  ;;  %v2952_v2 = vpop.xlane.xlu1 %2951 }
 0x5b0   : > { %v3004_v32 = vadd.f32 %v2952_v2, %v2908_v62  ;;  %v2946_v1 = vpop.xlane.xlu0 %2945  ;;  %v2881_v2 = vld [vmem:[#allocation3 + $0x180] sm:$0xff] }
 0x5b1   : > { %v3001_v40 = vadd.f32 %v2946_v1, %v2905_v29 }
 0x5b2   : > { %3036 = vst.msk [vmem:[#allocation3 + $0x158] sm:$0xff] %vm1532_vm1, %v3004_v32  ;;  %v2913_v32 = vmul.f32 %v9179_v22, %v2881_v2  ;;  %v2885_v22 = vld [vmem:[#allocation3 + $0x1a0] sm:$0xff] }
 0x5b3   : > { %3033 = vst.msk [vmem:[#allocation3 + $0x140] sm:$0xff] %vm1532_vm1, %v3001_v40  ;;  %v2948_v49 = vpop.xlane.xlu1 %2947 }
 0x5b4   : > { %v3002_v33 = vadd.f32 %v2948_v49, %v2906_v57  ;;  %v2958_v20 = vpop.xlane.xlu0 %2957  ;;  %v2887_v57 = vld [vmem:[#allocation3 + $0x1b0] sm:$0xff] }
 0x5b5   : > { %v3007_v39 = vadd.f32 %v2958_v20, %v2911_v19  ;;  %v2919_v35 = vmul.f32 %v9207_v43, %v2887_v57  ;;  %v3058_v57 = vld [vmem:[#allocation4 + $0x100] sm:$0xff] }
 0x5b6   : > { %3034 = vst.msk [vmem:[#allocation3 + $0x148] sm:$0xff] %vm1532_vm1, %v3002_v33 }
 0x5b7   : > { %3039 = vst.msk [vmem:[#allocation3 + $0x170] sm:$0xff] %vm1532_vm1, %v3007_v39  ;;  %v2960_v34 = vpop.xlane.xlu1 %2959 }
 0x5b8   : > { %v3008_v58 = vadd.f32 %v2960_v34, %v2912_v60  ;;  %v2954_v42 = vpop.xlane.xlu0 %2953  ;;  %v2886_v60 = vld [vmem:[#allocation3 + $0x1a8] sm:$0xff]  ;;  %v2917_v34 = vmul.f32 %v9199_v26, %v2885_v22  ;;  %v2924_v26 = vmul.f32 %v9216_v28, %v2892_v51  ;;  %v3065_v51 = vld [vmem:[#allocation4 + $0x138] sm:$0xff] }
 0x5b9   : > { %v3005_v38 = vadd.f32 %v2954_v42, %v2909_v25  ;;  %v2918_v43 = vmul.f32 %v9204_v54, %v2886_v60  ;;  %v3253_v60 = vmul.f32 %v9267_v50, %v3061_v23  ;;  %v3062_v50 = vld [vmem:[#allocation4 + $0x120] sm:$0xff] }
 0x5ba   : > { %3040 = vst.msk [vmem:[#allocation3 + $0x178] sm:$0xff] %vm1532_vm1, %v3008_v58 }
 0x5bb   : > { %3037 = vst.msk [vmem:[#allocation3 + $0x160] sm:$0xff] %vm1532_vm1, %v3005_v38  ;;  %v2956_v11 = vpop.xlane.xlu1 %2955 }
 0x5bc   : > { %v3006_v6 = vadd.f32 %v2956_v11, %v2910_v47  ;;  %v2966_v62 = vpop.xlane.xlu0 %2965  ;;  %v2889_v11 = vld [vmem:[#allocation3 + $0x1c0] sm:$0xff] }
 0x5bd   : > { %v3011_v29 = vadd.f32 %v2966_v62, %v2915_v36  ;;  %v2921_v54 = vmul.f32 %v9219_v45, %v2889_v11  ;;  %v3257_v11 = vmul.f32 %v9281_v13, %v3065_v51 }
 0x5be   : > { %3038 = vst.msk [vmem:[#allocation3 + $0x168] sm:$0xff] %vm1532_vm1, %v3006_v6  ;;  %v2890_v6 = vld [vmem:[#allocation3 + $0x1c8] sm:$0xff] }
 0x5bf   : > { %3043 = vst.msk [vmem:[#allocation3 + $0x190] sm:$0xff] %vm1532_vm1, %v3011_v29  ;;  %v2968_v48 = vpop.xlane.xlu1 %2967  ;;  %v2895_v29 = vld [vmem:[#allocation3 + $0x1f0] sm:$0xff]  ;;  %v2922_v59 = vmul.f32 %v9222_v24, %v2890_v6 }
 0x5c0   : > { %v3012_v1 = vadd.f32 %v2968_v48, %v2916_v10  ;;  %v2962_v63 = vpop.xlane.xlu0 %2961  ;;  %v2927_v28 = vmul.f32 %v9287_v0, %v2895_v29  ;;  %v3068_v29 = vld [vmem:[#allocation4 + $0x150] sm:$0xff] }
 0x5c1   : > { %v3009_v40 = vadd.f32 %v2962_v63, %v2913_v32  ;;  %v2896_v32 = vld [vmem:[#allocation3 + $0x1f8] sm:$0xff]  ;;  %v2893_v63 = vld [vmem:[#allocation3 + $0x1e0] sm:$0xff] }
 0x5c2   : > { %3044 = vst.msk [vmem:[#allocation3 + $0x198] sm:$0xff] %vm1532_vm1, %v3012_v1 }
 0x5c3   : > { %3041 = vst.msk [vmem:[#allocation3 + $0x180] sm:$0xff] %vm1532_vm1, %v3009_v40  ;;  %v2964_v49 = vpop.xlane.xlu1 %2963  ;;  %v3060_v40 = vld [vmem:[#allocation4 + $0x110] sm:$0xff] }
 0x5c4   : > { %v3010_v19 = vadd.f32 %v2964_v49, %v2914_v16  ;;  %v2928_v16 = vmul.f32 %v9292_v8, %v2896_v32  ;;  %v3252_v0 = vmul.f32 %v9269_v56, %v3060_v40 }
 0x5c6   : > { %3042 = vst.msk [vmem:[#allocation3 + $0x188] sm:$0xff] %vm1532_vm1, %v3010_v19  ;;  %v2974_v33 = vpop.xlane.xlu0 %2973  ;;  %v2894_v19 = vld [vmem:[#allocation3 + $0x1e8] sm:$0xff] }
 0x5c7   : > { %v3015_v20 = vadd.f32 %v2974_v33, %v2919_v35  ;;  %v2925_v35 = vmul.f32 %v9225_v7, %v2893_v63  ;;  %v3059_v33 = vld [vmem:[#allocation4 + $0x108] sm:$0xff]  ;;  %v2926_v8 = vmul.f32 %v9228_v53, %v2894_v19  ;;  %v3064_v53 = vld [vmem:[#allocation4 + $0x130] sm:$0xff]  ;;  %v3070_v19 = vld [vmem:[#allocation4 + $0x160] sm:$0xff] }
 0x5c8   : > { %v2976_v39 = vpop.xlane.xlu1 %2975  ;;  %v3251_v9 = vmul.f32 %v9265_v55, %v3059_v33  ;;  %v3256_v55 = vmul.f32 %v9283_v30, %v3064_v53  ;;  %v3069_v30 = vld [vmem:[#allocation4 + $0x158] sm:$0xff] }
 0x5c9   : > { %3047 = vst.msk [vmem:[#allocation3 + $0x1b0] sm:$0xff] %vm1532_vm1, %v3015_v20  ;;  %v3016_v18 = vadd.f32 %v2976_v39, %v2920_v3  ;;  %v3250_v20 = vmul.f32 %v9263_v61, %v3058_v57  ;;  %v3072_v57 = vld [vmem:[#allocation4 + $0x170] sm:$0xff] }
 0x5ca   : > { %v2970_v25 = vpop.xlane.xlu0 %2969  ;;  %v3264_v23 = vmul.f32 %v9305_v14, %v3072_v57  ;;  %v3077_v14 = vld [vmem:[#allocation4 + $0x198] sm:$0xff]  ;;  %v10240_v57 = vld [vmem:[#allocation15_spill] sm:$0xff] }
 0x5cb   : > { %3048 = vst.msk [vmem:[#allocation3 + $0x1b8] sm:$0xff] %vm1532_vm1, %v3016_v18  ;;  %v3013_v58 = vadd.f32 %v2970_v25, %v2917_v34 }
 0x5cc   : > { %v2972_v42 = vpop.xlane.xlu1 %2971 }
 0x5cd   : > { %3045 = vst.msk [vmem:[#allocation3 + $0x1a0] sm:$0xff] %vm1532_vm1, %v3013_v58  ;;  %v3014_v38 = vadd.f32 %v2972_v42, %v2918_v43 }
 0x5ce   : > { %v2982_v47 = vpop.xlane.xlu0 %2981 }
 0x5cf   : > { %3046 = vst.msk [vmem:[#allocation3 + $0x1a8] sm:$0xff] %vm1532_vm1, %v3014_v38  ;;  %v3019_v36 = vadd.f32 %v2982_v47, %v2923_v17  ;;  %v3063_v38 = vld [vmem:[#allocation4 + $0x128] sm:$0xff]  ;;  %v3254_v17 = vmul.f32 %v9276_v5, %v3062_v50 }
 0x5d0   : > { %v2984_v52 = vpop.xlane.xlu1 %2983  ;;  %v3067_v5 = vld [vmem:[#allocation4 + $0x148] sm:$0xff] }
 0x5d1   : > { %3051 = vst.msk [vmem:[#allocation3 + $0x1d0] sm:$0xff] %vm1532_vm1, %v3019_v36  ;;  %v3020_v62 = vadd.f32 %v2984_v52, %v2924_v26  ;;  %v3255_v52 = vmul.f32 %v9271_v46, %v3063_v38  ;;  %v3261_v46 = vmul.f32 %v9294_v37, %v3069_v30  ;;  %v3262_v37 = vmul.f32 %v9301_v4, %v3070_v19  ;;  %v3075_v4 = vld [vmem:[#allocation4 + $0x188] sm:$0xff] }
 0x5d2   : > { %v2978_v2 = vpop.xlane.xlu0 %2977 }
 0x5d3   : > { %3052 = vst.msk [vmem:[#allocation3 + $0x1d8] sm:$0xff] %vm1532_vm1, %v3020_v62  ;;  %v3017_v10 = vadd.f32 %v2978_v2, %v2921_v54 }
 0x5d4   : > { %v2980_v48 = vpop.xlane.xlu1 %2979 }
 0x5d5   : > { %3049 = vst.msk [vmem:[#allocation3 + $0x1c0] sm:$0xff] %vm1532_vm1, %v3017_v10  ;;  %v3018_v27 = vadd.f32 %v2980_v48, %v2922_v59  ;;  %v3066_v59 = vld [vmem:[#allocation4 + $0x140] sm:$0xff]  ;;  %v3260_v48 = vmul.f32 %v9297_v15, %v3068_v29  ;;  %v3073_v15 = vld [vmem:[#allocation4 + $0x178] sm:$0xff] }
 0x5d6   : > { %v2990_v1 = vpop.xlane.xlu0 %2989  ;;  %v3258_v13 = vmul.f32 %v9289_v12, %v3066_v59  ;;  %v3071_v12 = vld [vmem:[#allocation4 + $0x168] sm:$0xff]  ;;  %v10236_v29 = vld [vmem:[#allocation18_spill] sm:$0xff] }
 0x5d7   : > { %3050 = vst.msk [vmem:[#allocation3 + $0x1c8] sm:$0xff] %vm1532_vm1, %v3018_v27  ;;  %v3023_v45 = vadd.f32 %v2990_v1, %v2927_v28  ;;  %v3259_v1 = vmul.f32 %v9285_v44, %v3067_v5  ;;  %v3265_v44 = vmul.f32 %v9303_v41, %v3073_v15  ;;  %v10231_v41 = vld [vmem:[#allocation33_spill] sm:$0xff]  ;;  %v3079_v5 = vld [vmem:[#allocation4 + $0x1a8] sm:$0xff] }
 0x5d8   : > { %v2992_v49 = vpop.xlane.xlu1 %2991 }
 0x5d9   : > { %3055 = vst.msk [vmem:[#allocation3 + $0x1f0] sm:$0xff] %vm1532_vm1, %v3023_v45  ;;  %v3024_v24 = vadd.f32 %v2992_v49, %v2928_v16 }
 0x5da   : > { %v2986_v22 = vpop.xlane.xlu0 %2985 }
 0x5db   : > { %3056 = vst.msk [vmem:[#allocation3 + $0x1f8] sm:$0xff] %vm1532_vm1, %v3024_v24  ;;  %v3021_v3 = vadd.f32 %v2986_v22, %v2925_v35  ;;  %v6302_v39 = vpop.f32.mrb[32].mxu0 }
 0x5dc   : > { %v3493_v18 = vadd.f32 %v6302_v39, %v3252_v0  ;;  %v3364_v34 = vpop.f32.mrb[33].mxu0  ;;  %v2988_v25 = vpop.xlane.xlu1 %2987  ;;  %v3263_v0 = vmul.f32 %v9299_v21, %v3071_v12 }
 0x5dd   : > { %3053 = vst.msk [vmem:[#allocation3 + $0x1e0] sm:$0xff] %vm1532_vm1, %v3021_v3  ;;  %v3491_v7 = vadd.f32 %v3364_v34, %v3250_v20  ;;  %v3022_v56 = vadd.f32 %v2988_v25, %v2926_v8  ;;  %v6303_v58 = vpop.f32.mrb[34].mxu0  ;;  %v3076_v8 = vld [vmem:[#allocation4 + $0x190] sm:$0xff] }
 0x5de   : > { %3525 = vst [vmem:[#allocation4 + $0x110] sm:$0xff] %v3493_v18  ;;  %v3494_v61 = vadd.f32 %v6303_v58, %v3253_v60  ;;  %v3367_v43 = vpop.f32.mrb[35].mxu0  ;;  %v3074_v18 = vld [vmem:[#allocation4 + $0x180] sm:$0xff]  ;;  %v3268_v34 = vmul.f32 %v9313_v31, %v3076_v8 }
 0x5df   : > { %3523 = vst [vmem:[#allocation4 + $0x100] sm:$0xff] %v3491_v7  ;;  %3054 = vst.msk [vmem:[#allocation3 + $0x1e8] sm:$0xff] %vm1532_vm1, %v3022_v56  ;;  %v3492_v42 = vadd.f32 %v3367_v43, %v3251_v9  ;;  %v3266_v25 = vmul.f32 %v10231_v41, %v3074_v18  ;;  %v10232_v7 = vld [vmem:[#allocation31_spill] sm:$0xff]  ;;  %v3082_v31 = vld [vmem:[#allocation4 + $0x1c0] sm:$0xff] }
 0x5e0   : > { %3526 = vst [vmem:[#allocation4 + $0x118] sm:$0xff] %v3494_v61  ;;  %v3269_v21 = vmul.f32 %v10232_v7, %v3077_v14  ;;  %v10233_v61 = vld [vmem:[#allocation58_spill] sm:$0xff]  ;;  %v10242_v14 = vld [vmem:[#allocation27_spill] sm:$0xff]  ;;  %v10243_v7 = vld [vmem:[#allocation25_spill] sm:$0xff] }
 0x5e1   : > { %3524 = vst [vmem:[#allocation4 + $0x108] sm:$0xff] %v3492_v42  ;;  %v3267_v43 = vmul.f32 %v10233_v61, %v3075_v4 }
 0x5e2   : > { %v3248_v8 = vpop.permute.xlu0 %3247 }
 0x5e5   : > { %v6306_v47 = vpop.f32.mrb[36].mxu0 }
 0x5e6   : > { %v3497_v36 = vadd.f32 %v6306_v47, %v3256_v55  ;;  %v3380_v26 = vpop.f32.mrb[37].mxu0  ;;  %v3084_v55 = vld [vmem:[#allocation4 + $0x1d0] sm:$0xff] }
 0x5e7   : > { %v3495_v6 = vadd.f32 %v3380_v26, %v3254_v17  ;;  %v6307_v62 = vpop.f32.mrb[38].mxu0  ;;  %v3085_v17 = vld [vmem:[#allocation4 + $0x1d8] sm:$0xff]  ;;  %v3080_v47 = vld [vmem:[#allocation4 + $0x1b0] sm:$0xff]  ;;  %v3083_v26 = vld [vmem:[#allocation4 + $0x1c8] sm:$0xff] }
 0x5e8   : > { %3529 = vst [vmem:[#allocation4 + $0x130] sm:$0xff] %v3497_v36  ;;  %v3498_v54 = vadd.f32 %v6307_v62, %v3257_v11  ;;  %v3383_v2 = vpop.f32.mrb[39].mxu0  ;;  %v10234_v11 = vld [vmem:[#allocation19_spill] sm:$0xff] }
 0x5e9   : > { %3527 = vst [vmem:[#allocation4 + $0x120] sm:$0xff] %v3495_v6  ;;  %v3496_v10 = vadd.f32 %v3383_v2, %v3255_v52  ;;  %v3276_v36 = vmul.f32 %v10234_v11, %v3084_v55  ;;  %v3078_v52 = vld [vmem:[#allocation4 + $0x1a0] sm:$0xff]  ;;  %v10235_v6 = vld [vmem:[#allocation24_spill] sm:$0xff]  ;;  %v3081_v2 = vld [vmem:[#allocation4 + $0x1b8] sm:$0xff] }
 0x5ea   : > { %3530 = vst [vmem:[#allocation4 + $0x138] sm:$0xff] %v3498_v54  ;;  %v3274_v62 = vmul.f32 %v10235_v6, %v3082_v31 }
 0x5eb   : > { %3528 = vst [vmem:[#allocation4 + $0x128] sm:$0xff] %v3496_v10  ;;  %v3277_v10 = vmul.f32 %v10236_v29, %v3085_v17 }
 0x5ed   : > { %v6310_v32 = vpop.f32.mrb[40].mxu0 }
 0x5ee   : > { %v3501_v27 = vadd.f32 %v6310_v32, %v3260_v48  ;;  %v3396_v28 = vpop.f32.mrb[41].mxu0  ;;  %v10237_v48 = vld [vmem:[#allocation14_spill] sm:$0xff]  ;;  %v10238_v32 = vld [vmem:[#allocation21_spill] sm:$0xff] }
 0x5ef   : > { %v3499_v63 = vadd.f32 %v3396_v28, %v3258_v13  ;;  %v6311_v40 = vpop.f32.mrb[42].mxu0  ;;  %v3272_v13 = vmul.f32 %v10237_v48, %v3080_v47 }
 0x5f0   : > { %3533 = vst [vmem:[#allocation4 + $0x150] sm:$0xff] %v3501_v27  ;;  %v3502_v45 = vadd.f32 %v6311_v40, %v3261_v46  ;;  %v3399_v16 = vpop.f32.mrb[43].mxu0  ;;  %v3275_v46 = vmul.f32 %v10238_v32, %v3083_v26 }
 0x5f1   : > { %3531 = vst [vmem:[#allocation4 + $0x140] sm:$0xff] %v3499_v63  ;;  %v3500_v49 = vadd.f32 %v3399_v16, %v3259_v1  ;;  %v10239_v1 = vld [vmem:[#allocation11_spill] sm:$0xff] }
 0x5f2   : > { %3534 = vst [vmem:[#allocation4 + $0x158] sm:$0xff] %v3502_v45  ;;  %v3270_v63 = vmul.f32 %v10239_v1, %v3078_v52 }
 0x5f3   : > { %3532 = vst [vmem:[#allocation4 + $0x148] sm:$0xff] %v3500_v49  ;;  %v3273_v49 = vmul.f32 %v10240_v57, %v3081_v2 }
 0x5f5   : > { %v6314_v24 = vpop.f32.mrb[44].mxu0 }
 0x5f6   : > { %v3505_v35 = vadd.f32 %v6314_v24, %v3264_v23  ;;  %v3412_v33 = vpop.f32.mrb[45].mxu0  ;;  %v10241_v23 = vld [vmem:[#allocation10_spill] sm:$0xff] }
 0x5f7   : > { %v3503_v22 = vadd.f32 %v3412_v33, %v3262_v37  ;;  %v6315_v20 = vpop.f32.mrb[46].mxu0  ;;  %v3271_v37 = vmul.f32 %v10241_v23, %v3079_v5 }
 0x5f8   : > { %3537 = vst [vmem:[#allocation4 + $0x170] sm:$0xff] %v3505_v35  ;;  %v3506_v3 = vadd.f32 %v6315_v20, %v3265_v44  ;;  %v3415_v39 = vpop.f32.mrb[47].mxu0 }
 0x5f9   : > { %3535 = vst [vmem:[#allocation4 + $0x160] sm:$0xff] %v3503_v22  ;;  %v3504_v60 = vadd.f32 %v3415_v39, %v3263_v0  ;;  %v3088_v0 = vld [vmem:[#allocation4 + $0x1f0] sm:$0xff]  ;;  %v3243_v22 = vpop.permute.xlu1 %3242  ;;  %v3089_v39 = vld [vmem:[#allocation4 + $0x1f8] sm:$0xff] }
 0x5fa   : > { %3538 = vst [vmem:[#allocation4 + $0x178] sm:$0xff] %v3506_v3  ;;  %v3086_v3 = vld [vmem:[#allocation4 + $0x1e0] sm:$0xff]  ;;  %v3280_v18 = vmul.f32 %v3243_v22, %v3088_v0  ;;  %v3281_v41 = vmul.f32 %v3248_v8, %v3089_v39 }
 0x5fb   : > { %3536 = vst [vmem:[#allocation4 + $0x168] sm:$0xff] %v3504_v60  ;;  %v3087_v60 = vld [vmem:[#allocation4 + $0x1e8] sm:$0xff]  ;;  %v3278_v4 = vmul.f32 %v10242_v14, %v3086_v3 }
 0x5fd   : > { %v6318_v9 = vpop.f32.mrb[48].mxu0 }
 0x5fe   : > { %v3509_v56 = vadd.f32 %v6318_v9, %v3268_v34  ;;  %v3428_v58 = vpop.f32.mrb[49].mxu0 }
 0x5ff   : > { %v3507_v42 = vadd.f32 %v3428_v58, %v3266_v25  ;;  %v6319_v53 = vpop.f32.mrb[50].mxu0 }
 0x600   : > { %3541 = vst [vmem:[#allocation4 + $0x190] sm:$0xff] %v3509_v56  ;;  %v3510_v50 = vadd.f32 %v6319_v53, %v3269_v21  ;;  %v3431_v51 = vpop.f32.mrb[51].mxu0  ;;  %v3279_v21 = vmul.f32 %v10243_v7, %v3087_v60 }
 0x601   : > { %3539 = vst [vmem:[#allocation4 + $0x180] sm:$0xff] %v3507_v42  ;;  %v3508_v38 = vadd.f32 %v3431_v51, %v3267_v43 }
 0x602   : > { %3542 = vst [vmem:[#allocation4 + $0x198] sm:$0xff] %v3510_v50 }
 0x603   : > { %3540 = vst [vmem:[#allocation4 + $0x188] sm:$0xff] %v3508_v38 }
 0x60d   : > { %v6326_v54 = vpop.f32.mrb[64].mxu1 }
 0x60e   : > { %v3517_v59 = vadd.f32 %v6326_v54, %v3276_v36  ;;  %v3460_v30 = vpop.f32.mrb[65].mxu1 }
 0x60f   : > { %v3515_v27 = vadd.f32 %v3460_v30, %v3274_v62  ;;  %v6327_v28 = vpop.f32.mrb[66].mxu1 }
 0x610   : > { %3549 = vst [vmem:[#allocation4 + $0x1d0] sm:$0xff] %v3517_v59  ;;  %v3518_v40 = vadd.f32 %v6327_v28, %v3277_v10  ;;  %v6322_v45 = vpop.f32.mrb[52].mxu0  ;;  %v3463_v16 = vpop.f32.mrb[67].mxu1 }
 0x611   : > { %3547 = vst [vmem:[#allocation4 + $0x1c0] sm:$0xff] %v3515_v27  ;;  %v3513_v19 = vadd.f32 %v6322_v45, %v3272_v13  ;;  %v3516_v15 = vadd.f32 %v3463_v16, %v3275_v46  ;;  %v3444_v12 = vpop.f32.mrb[53].mxu0 }
 0x612   : > { %3550 = vst [vmem:[#allocation4 + $0x1d8] sm:$0xff] %v3518_v40  ;;  %v3511_v24 = vadd.f32 %v3444_v12, %v3270_v63  ;;  %v6323_v44 = vpop.f32.mrb[54].mxu0 }
 0x613   : > { %3545 = vst [vmem:[#allocation4 + $0x1b0] sm:$0xff] %v3513_v19  ;;  %3548 = vst [vmem:[#allocation4 + $0x1c8] sm:$0xff] %v3516_v15  ;;  %v3514_v35 = vadd.f32 %v6323_v44, %v3273_v49  ;;  %v3447_v33 = vpop.f32.mrb[55].mxu0 }
 0x614   : > { %3543 = vst [vmem:[#allocation4 + $0x1a0] sm:$0xff] %v3511_v24  ;;  %v3512_v20 = vadd.f32 %v3447_v33, %v3271_v37 }
 0x615   : > { %3546 = vst [vmem:[#allocation4 + $0x1b8] sm:$0xff] %v3514_v35 }
 0x616   : > { %3544 = vst [vmem:[#allocation4 + $0x1a8] sm:$0xff] %v3512_v20 }
 0x618   : > { %v6330_v34 = vpop.f32.mrb[68].mxu1 }
 0x619   : > { %v3521_v25 = vadd.f32 %v6330_v34, %v3280_v18  ;;  %v3476_v9 = vpop.f32.mrb[69].mxu1 }
 0x61a   : > { %v3519_v56 = vadd.f32 %v3476_v9, %v3278_v4  ;;  %v6331_v58 = vpop.f32.mrb[70].mxu1 }
 0x61b   : > { %3553 = vst [vmem:[#allocation4 + $0x1f0] sm:$0xff] %v3521_v25  ;;  %v3522_v61 = vadd.f32 %v6331_v58, %v3281_v41  ;;  %v3479_v43 = vpop.f32.mrb[71].mxu1 }
 0x61c   : > { %3551 = vst [vmem:[#allocation4 + $0x1e0] sm:$0xff] %v3519_v56  ;;  %v3520_v42 = vadd.f32 %v3479_v43, %v3279_v21 }
 0x61d   : > { %3554 = vst [vmem:[#allocation4 + $0x1f8] sm:$0xff] %v3522_v61 }
 0x61e   : > { %3552 = vst [vmem:[#allocation4 + $0x1e8] sm:$0xff] %v3520_v42 }
 0x61f PF: > { %p5840_p2 = scmp.ne.s32.totalorder %s7245_s18, 1 }
 0x620   : > { %v3639_v53 = vld [vmem:[#allocation3 + $0x80] sm:$0xff] (!%p5840_p2)  ;;  %v3640_v51 = vld [vmem:[#allocation3 + $0x88] sm:$0xff] (!%p5840_p2)  ;;  %v7267_v38 = vmov (!%p5840_p2), 0   ;;  %v3641_v31 = vld [vmem:[#allocation3 + $0x90] sm:$0xff] (!%p5840_p2) }
 0x621   : > { %3590 = sbr.rel (%p5840_p2) target bundleno = 2055 (0x807), region = 48  ;;  %v3623_v50 = vld [vmem:[#allocation3] sm:$0xff] (!%p5840_p2)  ;;  %6846 = vset.pattern.permute.xlu1 (!%p5840_p2), %v7267_v38  ;;  %6845 = vset.pattern.permute.xlu0 (!%p5840_p2), %v7267_v38  ;;  %7039 = vrcp.f32 (!%p5840_p2), %v3639_v53  ;;  %v3624_v55 = vld [vmem:[#allocation3 + $0x8] sm:$0xff] (!%p5840_p2)  ;;  %v3642_v17 = vld [vmem:[#allocation3 + $0x98] sm:$0xff] (!%p5840_p2) }
 0x622   : > { %7041 = vrcp.f32 (!%p5840_p2), %v3623_v50  ;;  %v3625_v47 = vld [vmem:[#allocation3 + $0x10] sm:$0xff] (!%p5840_p2)  ;;  %v3626_v11 = vld [vmem:[#allocation3 + $0x18] sm:$0xff] (!%p5840_p2)  ;;  %v3643_v26 = vld [vmem:[#allocation3 + $0xa0] sm:$0xff] (!%p5840_p2) }
 0x623   : > { %7043 = vrcp.f32 (!%p5840_p2), %v3640_v51  ;;  %v3644_v52 = vld [vmem:[#allocation3 + $0xa8] sm:$0xff] (!%p5840_p2)  ;;  %v6847_v62 = vld [vmem:[%s9912_s3 + $0x4] ss:$16 sps:$4 sm:$0xff] (!%p5840_p2)   ;;  %v6851_v59 = vld [vmem:[%s9912_s3] ss:$16 sps:$4 sm:$0xff] (!%p5840_p2)  }
 0x624   : > { %7045 = vrcp.f32 (!%p5840_p2), %v3624_v55  ;;  %v6849_v2 = vld [vmem:[%s9912_s3 + $0xc] ss:$16 sps:$4 sm:$0xff] (!%p5840_p2)   ;;  %v3627_v10 = vld [vmem:[#allocation3 + $0x20] sm:$0xff] (!%p5840_p2)  ;;  %4969 = vmatprep.subr.bf16.mxu0 (!%p5840_p2), %v6847_v62  ;;  %v6852_v30 = vld [vmem:[%s9912_s3 + $0x8] ss:$16 sps:$4 sm:$0xff] (!%p5840_p2)  }
 0x625   : > { %7047 = vrcp.f32 (!%p5840_p2), %v3641_v31  ;;  %5195 = vmatprep.subr.bf16.mxu1 (!%p5840_p2), %v6849_v2  ;;  %4970 = vmatpush1.bf16.msra.mxu0 (!%p5840_p2), %v6851_v59  ;;  %v6853_v5 = vld [vmem:[%s9912_s3 + $0x24] ss:$16 sps:$4 sm:$0xff] (!%p5840_p2)   ;;  %v3628_v13 = vld [vmem:[#allocation3 + $0x28] sm:$0xff] (!%p5840_p2)  ;;  %v6857_v27 = vld [vmem:[%s9912_s3 + $0x20] ss:$16 sps:$4 sm:$0xff] (!%p5840_p2)  }
 0x626   : > { %7049 = vrcp.f32 (!%p5840_p2), %v3642_v17  ;;  %5196 = vmatpush1.bf16.msra.mxu1 (!%p5840_p2), %v6852_v30  ;;  %v6855_v32 = vld [vmem:[%s9912_s3 + $0x2c] ss:$16 sps:$4 sm:$0xff] (!%p5840_p2)   ;;  %4971 = vmatprep.subr.bf16.mxu0 (!%p5840_p2), %v6853_v5  ;;  %v6858_v28 = vld [vmem:[%s9912_s3 + $0x28] ss:$16 sps:$4 sm:$0xff] (!%p5840_p2)   ;;  %v6859_v1 = vld [vmem:[%s9912_s3 + $0x44] ss:$16 sps:$4 sm:$0xff] (!%p5840_p2)  }
 0x627   : > { %7051 = vrcp.f32 (!%p5840_p2), %v3625_v47  ;;  %5197 = vmatprep.subr.bf16.mxu1 (!%p5840_p2), %v6855_v32  ;;  %v3645_v63 = vld [vmem:[#allocation3 + $0xb0] sm:$0xff] (!%p5840_p2)  ;;  %v6861_v40 = vld [vmem:[%s9912_s3 + $0x4c] ss:$16 sps:$4 sm:$0xff] (!%p5840_p2)   ;;  %v6864_v49 = vld [vmem:[%s9912_s3 + $0x48] ss:$16 sps:$4 sm:$0xff] (!%p5840_p2)  }
 0x628   : > { %7053 = vrcp.f32 %v3626_v11  ;;  %v3646_v16 = vld [vmem:[#allocation3 + $0xb8] sm:$0xff]  ;;  %v6863_v57 = vld [vmem:[%s9912_s3 + $0x40] ss:$16 sps:$4 sm:$0xff]   ;;  %v6865_v15 = vld [vmem:[%s9912_s3 + $0x64] ss:$16 sps:$4 sm:$0xff]  }
 0x629   : > { %7055 = vrcp.f32 %v3643_v26  ;;  %4972 = vmatpush1.bf16.msra.mxu0 %v6857_v27  ;;  %v6867_v12 = vld [vmem:[%s9912_s3 + $0x6c] ss:$16 sps:$4 sm:$0xff]   ;;  %v3629_v23 = vld [vmem:[#allocation3 + $0x30] sm:$0xff]  ;;  %v6870_v35 = vld [vmem:[%s9912_s3 + $0x68] ss:$16 sps:$4 sm:$0xff]  }
 0x62a   : > { %7057 = vrcp.f32 %v3644_v52  ;;  %5198 = vmatpush1.bf16.msra.mxu1 %v6858_v28  ;;  %4973 = vmatprep.subr.bf16.mxu0 %v6859_v1  ;;  %v3630_v37 = vld [vmem:[#allocation3 + $0x38] sm:$0xff]  ;;  %v6869_v24 = vld [vmem:[%s9912_s3 + $0x60] ss:$16 sps:$4 sm:$0xff]   ;;  %v6871_v0 = vld [vmem:[%s9912_s3 + $0x84] ss:$16 sps:$4 sm:$0xff]  }
 0x62b   : > { %v7040_v36 = vpop.eup %7039  ;;  %7059 = vrcp.f32 %v3627_v10  ;;  %5199 = vmatprep.subr.bf16.mxu1 %v6861_v40  ;;  %v3647_v22 = vld [vmem:[#allocation3 + $0xc0] sm:$0xff]  ;;  %v6873_v20 = vld [vmem:[%s9912_s3 + $0x8c] ss:$16 sps:$4 sm:$0xff]   ;;  %v6876_v60 = vld [vmem:[%s9912_s3 + $0x88] ss:$16 sps:$4 sm:$0xff]  }
 0x62c   : > { %v7042_v6 = vpop.eup %7041  ;;  %3769 = vperm.xlu0 %6845, %v7040_v36   ;;  %7061 = vrcp.f32 %v3628_v13  ;;  %v3648_v3 = vld [vmem:[#allocation3 + $0xc8] sm:$0xff]  ;;  %v6875_v39 = vld [vmem:[%s9912_s3 + $0x80] ss:$16 sps:$4 sm:$0xff]   ;;  %v6877_v14 = vld [vmem:[%s9912_s3 + $0xa4] ss:$16 sps:$4 sm:$0xff]  }
 0x62d   : > { %v7044_v54 = vpop.eup %7043  ;;  %3689 = vperm.xlu1 %6846, %v7042_v6   ;;  %7063 = vrcp.f32 %v3645_v63  ;;  %4974 = vmatpush1.bf16.msra.mxu0 %v6863_v57  ;;  %v6879_v4 = vld [vmem:[%s9912_s3 + $0xac] ss:$16 sps:$4 sm:$0xff]   ;;  %v3631_v34 = vld [vmem:[#allocation3 + $0x40] sm:$0xff]  ;;  %v6882_v7 = vld [vmem:[%s9912_s3 + $0xa8] ss:$16 sps:$4 sm:$0xff]  }
 0x62e   : > { %v7046_v29 = vpop.eup %7045  ;;  %7065 = vrcp.f32 %v3646_v16  ;;  %5200 = vmatpush1.bf16.msra.mxu1 %v6864_v49  ;;  %4975 = vmatprep.subr.bf16.mxu0 %v6865_v15  ;;  %v3632_v41 = vld [vmem:[#allocation3 + $0x48] sm:$0xff]  ;;  %v6881_v25 = vld [vmem:[%s9912_s3 + $0xa0] ss:$16 sps:$4 sm:$0xff]   ;;  %v6883_v56 = vld [vmem:[%s9912_s3 + $0xc4] ss:$16 sps:$4 sm:$0xff]  }
 0x62f   : > { %v7048_v48 = vpop.eup %7047  ;;  %5201 = vmatprep.subr.bf16.mxu1 %v6867_v12  ;;  %7067 = vrcp.f32 %v3629_v23  ;;  %v6885_v58 = vld [vmem:[%s9912_s3 + $0xcc] ss:$16 sps:$4 sm:$0xff]   ;;  %v3649_v61 = vld [vmem:[#allocation3 + $0xd0] sm:$0xff]  ;;  %v6888_v50 = vld [vmem:[%s9912_s3 + $0xc8] ss:$16 sps:$4 sm:$0xff]  }
 0x630   : > { %3774 = vperm.xlu0 %6845, %v7044_v54   ;;  %v7050_v46 = vpop.eup %7049  ;;  %7069 = vrcp.f32 %v3630_v37  ;;  %v6887_v43 = vld [vmem:[%s9912_s3 + $0xc0] ss:$16 sps:$4 sm:$0xff]   ;;  %v3650_v53 = vld [vmem:[#allocation3 + $0xd8] sm:$0xff]  ;;  %v6889_v38 = vld [vmem:[%s9912_s3 + $0xe4] ss:$16 sps:$4 sm:$0xff]  }
 0x631   : > { %3694 = vperm.xlu1 %6846, %v7046_v29   ;;  %v7052_v45 = vpop.eup %7051  ;;  %4976 = vmatpush1.bf16.msra.mxu0 %v6869_v24  ;;  %7071 = vrcp.f32 %v3647_v22  ;;  %v6891_v55 = vld [vmem:[%s9912_s3 + $0xec] ss:$16 sps:$4 sm:$0xff]   ;;  %v3633_v31 = vld [vmem:[#allocation3 + $0x50] sm:$0xff]  ;;  %v6894_v36 = vld [vmem:[%s9912_s3 + $0xe8] ss:$16 sps:$4 sm:$0xff]  }
 0x632   : > { %v7054_v19 = vpop.eup %7053  ;;  %5202 = vmatpush1.bf16.msra.mxu1 %v6870_v35  ;;  %4977 = vmatprep.subr.bf16.mxu0 %v6871_v0  ;;  %7073 = vrcp.f32 %v3648_v3  ;;  %v6893_v17 = vld [vmem:[%s9912_s3 + $0xe0] ss:$16 sps:$4 sm:$0xff]   ;;  %v3634_v11 = vld [vmem:[#allocation3 + $0x58] sm:$0xff]  ;;  %v6895_v26 = vld [vmem:[%s9912_s3 + $0x104] ss:$16 sps:$4 sm:$0xff]  }
 0x633   : > { %v7056_v44 = vpop.eup %7055  ;;  %5203 = vmatprep.subr.bf16.mxu1 %v6873_v20  ;;  %7075 = vrcp.f32 %v3631_v34  ;;  %v6897_v6 = vld [vmem:[%s9912_s3 + $0x10c] ss:$16 sps:$4 sm:$0xff]   ;;  %v3651_v62 = vld [vmem:[#allocation3 + $0xe0] sm:$0xff]  ;;  %v6900_v29 = vld [vmem:[%s9912_s3 + $0x108] ss:$16 sps:$4 sm:$0xff]  }
 0x634   : > { %3779 = vperm.xlu0 %6845, %v7048_v48   ;;  %v7058_v33 = vpop.eup %7057  ;;  %7077 = vrcp.f32 %v3632_v41  ;;  %v3652_v54 = vld [vmem:[#allocation3 + $0xe8] sm:$0xff]  ;;  %v6899_v2 = vld [vmem:[%s9912_s3 + $0x100] ss:$16 sps:$4 sm:$0xff]   ;;  %v6901_v59 = vld [vmem:[%s9912_s3 + $0x124] ss:$16 sps:$4 sm:$0xff]  }
 0x635   : > { %3784 = vperm.xlu1 %6846, %v7050_v46   ;;  %v7060_v8 = vpop.eup %7059  ;;  %4978 = vmatpush1.bf16.msra.mxu0 %v6875_v39  ;;  %7079 = vrcp.f32 %v3649_v61  ;;  %v6903_v5 = vld [vmem:[%s9912_s3 + $0x12c] ss:$16 sps:$4 sm:$0xff]   ;;  %v3635_v48 = vld [vmem:[#allocation3 + $0x60] sm:$0xff]  ;;  %v6906_v27 = vld [vmem:[%s9912_s3 + $0x128] ss:$16 sps:$4 sm:$0xff]  }
 0x636   : > { %v7062_v18 = vpop.eup %7061  ;;  %5204 = vmatpush1.bf16.msra.mxu1 %v6876_v60  ;;  %4979 = vmatprep.subr.bf16.mxu0 %v6877_v14  ;;  %7081 = vrcp.f32 %v3650_v53  ;;  %v3636_v13 = vld [vmem:[#allocation3 + $0x68] sm:$0xff]  ;;  %v6905_v32 = vld [vmem:[%s9912_s3 + $0x120] ss:$16 sps:$4 sm:$0xff]   ;;  %v6907_v1 = vld [vmem:[%s9912_s3 + $0x144] ss:$16 sps:$4 sm:$0xff]  }
 0x637   : > { %v7064_v9 = vpop.eup %7063  ;;  %5205 = vmatprep.subr.bf16.mxu1 %v6879_v4  ;;  %7083 = vrcp.f32 %v3633_v31  ;;  %v6909_v63 = vld [vmem:[%s9912_s3 + $0x14c] ss:$16 sps:$4 sm:$0xff]   ;;  %v3653_v40 = vld [vmem:[#allocation3 + $0xf0] sm:$0xff]  ;;  %v6912_v49 = vld [vmem:[%s9912_s3 + $0x148] ss:$16 sps:$4 sm:$0xff]  }
 0x638   : > { %3699 = vperm.xlu0 %6845, %v7052_v45   ;;  %v7066_v21 = vpop.eup %7065  ;;  %7085 = vrcp.f32 %v3634_v11  ;;  %v3654_v45 = vld [vmem:[#allocation3 + $0xf8] sm:$0xff]  ;;  %v6911_v16 = vld [vmem:[%s9912_s3 + $0x140] ss:$16 sps:$4 sm:$0xff]   ;;  %v6913_v15 = vld [vmem:[%s9912_s3 + $0x164] ss:$16 sps:$4 sm:$0xff]  }
 0x639   : > { %3704 = vperm.xlu1 %6846, %v7054_v19   ;;  %4980 = vmatpush1.bf16.msra.mxu0 %v6881_v25  ;;  %v7068_v42 = vpop.eup %7067  ;;  %7087 = vrcp.f32 %v3651_v62  ;;  %v6915_v12 = vld [vmem:[%s9912_s3 + $0x16c] ss:$16 sps:$4 sm:$0xff]   ;;  %v3637_v23 = vld [vmem:[#allocation3 + $0x70] sm:$0xff]  ;;  %v6918_v35 = vld [vmem:[%s9912_s3 + $0x168] ss:$16 sps:$4 sm:$0xff]  }
 0x63a   : > { %5206 = vmatpush1.bf16.msra.mxu1 %v6882_v7  ;;  %v7070_v51 = vpop.eup %7069  ;;  %4981 = vmatprep.subr.bf16.mxu0 %v6883_v56  ;;  %7089 = vrcp.f32 %v3652_v54  ;;  %v6917_v37 = vld [vmem:[%s9912_s3 + $0x160] ss:$16 sps:$4 sm:$0xff]   ;;  %v6919_v0 = vld [vmem:[%s9912_s3 + $0x184] ss:$16 sps:$4 sm:$0xff]   ;;  %v6921_v22 = vld [vmem:[%s9912_s3 + $0x18c] ss:$16 sps:$4 sm:$0xff]  }
 0x63b   : > { %5207 = vmatprep.subr.bf16.mxu1 %v6885_v58  ;;  %v7072_v47 = vpop.eup %7071  ;;  %7091 = vrcp.f32 %v3635_v48  ;;  %v3929_v20 = vld [vmem:[#allocation3 + $0x180] sm:$0xff]  ;;  %v6924_v60 = vld [vmem:[%s9912_s3 + $0x188] ss:$16 sps:$4 sm:$0xff]   ;;  %v6927_v4 = vld [vmem:[%s9912_s3 + $0x1ac] ss:$16 sps:$4 sm:$0xff]  }
 0x63c   : > { %3789 = vperm.xlu0 %6845, %v7056_v44   ;;  %v7074_v52 = vpop.eup %7073  ;;  %7093 = vrcp.f32 %v3636_v13  ;;  %v3638_v44 = vld [vmem:[#allocation3 + $0x78] sm:$0xff]  ;;  %v6923_v3 = vld [vmem:[%s9912_s3 + $0x180] ss:$16 sps:$4 sm:$0xff]   ;;  %v6925_v14 = vld [vmem:[%s9912_s3 + $0x1a4] ss:$16 sps:$4 sm:$0xff]  }
 0x63d   : > { %3794 = vperm.xlu1 %6846, %v7058_v33   ;;  %4982 = vmatpush1.bf16.msra.mxu0 %v6887_v43  ;;  %v7076_v10 = vpop.eup %7075  ;;  %7095 = vrcp.f32 %v3653_v40  ;;  %v3913_v34 = vld [vmem:[#allocation3 + $0x100] sm:$0xff]  ;;  %v6930_v7 = vld [vmem:[%s9912_s3 + $0x1a8] ss:$16 sps:$4 sm:$0xff]   ;;  %v6933_v58 = vld [vmem:[%s9912_s3 + $0x1cc] ss:$16 sps:$4 sm:$0xff]  }
 0x63e   : > { %5208 = vmatpush1.bf16.msra.mxu1 %v6888_v50  ;;  %4983 = vmatprep.subr.bf16.mxu0 %v6889_v38  ;;  %v7078_v30 = vpop.eup %7077  ;;  %7097 = vrcp.f32 %v3654_v45  ;;  %v6929_v41 = vld [vmem:[%s9912_s3 + $0x1a0] ss:$16 sps:$4 sm:$0xff]   ;;  %v3932_v43 = vld [vmem:[#allocation3 + $0x198] sm:$0xff]  ;;  %v6937_v38 = vld [vmem:[%s9912_s3 + $0x1e4] ss:$16 sps:$4 sm:$0xff]  }
 0x63f   : > { %5209 = vmatprep.subr.bf16.mxu1 %v6891_v55  ;;  %v7080_v46 = vpop.eup %7079  ;;  %7099 = vrcp.f32 %v3637_v23  ;;  %v3931_v61 = vld [vmem:[#allocation3 + $0x190] sm:$0xff]  ;;  %v6936_v50 = vld [vmem:[%s9912_s3 + $0x1c8] ss:$16 sps:$4 sm:$0xff]   ;;  %v6939_v55 = vld [vmem:[%s9912_s3 + $0x1ec] ss:$16 sps:$4 sm:$0xff]  }
 0x640   : > { %3709 = vperm.xlu0 %6845, %v7060_v8   ;;  %v7082_v28 = vpop.eup %7081  ;;  %7101 = vrcp.f32 %v3638_v44  ;;  %v3930_v8 = vld [vmem:[#allocation3 + $0x188] sm:$0xff]  ;;  %v3915_v31 = vld [vmem:[#allocation3 + $0x110] sm:$0xff]  ;;  %v3933_v62 = vld [vmem:[#allocation3 + $0x1a0] sm:$0xff] }
 0x641   : > { %3714 = vperm.xlu1 %6846, %v7062_v18   ;;  %4984 = vmatpush1.bf16.msra.mxu0 %v6893_v17  ;;  %v7084_v57 = vpop.eup %7083  ;;  %7103 = vrcp.f32 %v3929_v20  ;;  %v3916_v17 = vld [vmem:[#allocation3 + $0x118] sm:$0xff]  ;;  %v3935_v48 = vld [vmem:[#allocation3 + $0x1b0] sm:$0xff]  ;;  %v3937_v40 = vld [vmem:[#allocation3 + $0x1c0] sm:$0xff] }
 0x642   : > { %5210 = vmatpush1.bf16.msra.mxu1 %v6894_v36  ;;  %4985 = vmatprep.subr.bf16.mxu0 %v6895_v26  ;;  %v7086_v19 = vpop.eup %7085  ;;  %7105 = vrcp.f32 %v3930_v8  ;;  %v6942_v36 = vld [vmem:[%s9912_s3 + $0x1e8] ss:$16 sps:$4 sm:$0xff]   ;;  %v6945_v26 = vld [vmem:[%s9912_s3 + $0x204] ss:$16 sps:$4 sm:$0xff]  }
 0x643   : > { %5211 = vmatprep.subr.bf16.mxu1 %v6897_v6  ;;  %v7088_v24 = vpop.eup %7087  ;;  %7107 = vrcp.f32 %v3913_v34  ;;  %v6948_v6 = vld [vmem:[%s9912_s3 + $0x20c] ss:$16 sps:$4 sm:$0xff]   ;;  %v3939_v23 = vld [vmem:[#allocation3 + $0x1d0] sm:$0xff]  ;;  %v3941_v20 = vld [vmem:[#allocation3 + $0x1e0] sm:$0xff] }
 0x644   : > { %3799 = vperm.xlu0 %6845, %v7064_v9   ;;  %v7090_v33 = vpop.eup %7089  ;;  %v3914_v9 = vld [vmem:[#allocation3 + $0x108] sm:$0xff]  ;;  %v3943_v34 = vld [vmem:[#allocation3 + $0x1f0] sm:$0xff] }
 0x645   : > { %3804 = vperm.xlu1 %6846, %v7066_v21   ;;  %4986 = vmatpush1.bf16.msra.mxu0 %v6899_v2  ;;  %v7092_v39 = vpop.eup %7091  ;;  %v6931_v21 = vld [vmem:[%s9912_s3 + $0x1c4] ss:$16 sps:$4 sm:$0xff]   ;;  %7109 = vrcp.f32 %v3914_v9  ;;  %v3934_v2 = vld [vmem:[#allocation3 + $0x1a8] sm:$0xff] }
 0x646   : > { %5212 = vmatpush1.bf16.msra.mxu1 %v6900_v29  ;;  %4987 = vmatprep.subr.bf16.mxu0 %v6901_v59  ;;  %v7094_v18 = vpop.eup %7093  ;;  %7111 = vrcp.f32 %v3931_v61 }
 0x647   : > { %5213 = vmatprep.subr.bf16.mxu1 %v6903_v5  ;;  %v7096_v25 = vpop.eup %7095  ;;  %7113 = vrcp.f32 %v3932_v43 }
 0x648   : > { %3719 = vperm.xlu0 %6845, %v7068_v42   ;;  %v7098_v56 = vpop.eup %7097  ;;  %v6935_v42 = vld [vmem:[%s9912_s3 + $0x1c0] ss:$16 sps:$4 sm:$0xff]   ;;  %7115 = vrcp.f32 %v3915_v31 }
 0x649   : > { %3724 = vperm.xlu1 %6846, %v7070_v51   ;;  %4988 = vmatpush1.bf16.msra.mxu0 %v6905_v32  ;;  %v7100_v53 = vpop.eup %7099  ;;  %7117 = vrcp.f32 %v3916_v17  ;;  %v3936_v32 = vld [vmem:[#allocation3 + $0x1b8] sm:$0xff]  ;;  %v3607_v31 = vld [vmem:[#allocation4 + $0x80] sm:$0xff]  ;;  %v3608_v17 = vld [vmem:[#allocation4 + $0x88] sm:$0xff] }
 0x64a   : > { %5214 = vmatpush1.bf16.msra.mxu1 %v6906_v27  ;;  %4989 = vmatprep.subr.bf16.mxu0 %v6907_v1  ;;  %v7102_v51 = vpop.eup %7101  ;;  %7119 = vrcp.f32 %v3933_v62  ;;  %v3919_v27 = vld [vmem:[#allocation3 + $0x130] sm:$0xff]  ;;  %v3920_v1 = vld [vmem:[#allocation3 + $0x138] sm:$0xff] }
 0x64b   : > { %5215 = vmatprep.subr.bf16.mxu1 %v6909_v63  ;;  %v7104_v11 = vpop.eup %7103  ;;  %7121 = vrcp.f32 %v3934_v2  ;;  %v3609_v2 = vld [vmem:[#allocation4 + $0x90] sm:$0xff] }
 0x64c   : > { %3809 = vperm.xlu0 %6845, %v7072_v47   ;;  %v6941_v47 = vld [vmem:[%s9912_s3 + $0x1e0] ss:$16 sps:$4 sm:$0xff]  }
 0x64d   : > { %3814 = vperm.xlu1 %6846, %v7074_v52   ;;  %4990 = vmatpush1.bf16.msra.mxu0 %v6911_v16  ;;  %v7106_v52 = vpop.eup %7105  ;;  %v3938_v16 = vld [vmem:[#allocation3 + $0x1c8] sm:$0xff] }
 0x64e   : > { %5216 = vmatpush1.bf16.msra.mxu1 %v6912_v49  ;;  %4991 = vmatprep.subr.bf16.mxu0 %v6913_v15  ;;  %v7108_v54 = vpop.eup %7107  ;;  %v3921_v49 = vld [vmem:[#allocation3 + $0x140] sm:$0xff]  ;;  %v3922_v15 = vld [vmem:[#allocation3 + $0x148] sm:$0xff] }
 0x64f   : > { %5217 = vmatprep.subr.bf16.mxu1 %v6915_v12  ;;  %v7110_v29 = vpop.eup %7109 }
 0x650   : > { %3729 = vperm.xlu0 %6845, %v7076_v10   ;;  %v3917_v10 = vld [vmem:[#allocation3 + $0x120] sm:$0xff]  ;;  %v7112_v59 = vpop.eup %7111 }
 0x651   : > { %3734 = vperm.xlu1 %6846, %v7078_v30   ;;  %4992 = vmatpush1.bf16.msra.mxu0 %v6917_v37  ;;  %v3918_v30 = vld [vmem:[#allocation3 + $0x128] sm:$0xff]  ;;  %v7114_v5 = vpop.eup %7113  ;;  %7123 = vrcp.f32 %v3917_v10 }
 0x652   : > { %5218 = vmatpush1.bf16.msra.mxu1 %v6918_v35  ;;  %4993 = vmatprep.subr.bf16.mxu0 %v6919_v0  ;;  %7125 = vrcp.f32 %v3918_v30  ;;  %v7116_v13 = vpop.eup %7115  ;;  %v3923_v35 = vld [vmem:[#allocation3 + $0x150] sm:$0xff]  ;;  %v3924_v0 = vld [vmem:[#allocation3 + $0x158] sm:$0xff] }
 0x653   : > { %5219 = vmatprep.subr.bf16.mxu1 %v6921_v22  ;;  %7127 = vrcp.f32 %v3935_v48  ;;  %v6946_v30 = vld [vmem:[%s9912_s3 + $0x208] ss:$16 sps:$4 sm:$0xff]  }
 0x654   : > { %3819 = vperm.xlu0 %6845, %v7080_v46   ;;  %v7118_v46 = vpop.eup %7117  ;;  %7129 = vrcp.f32 %v3936_v32  ;;  %v6954_v32 = vld [vmem:[%s9912_s3 + $0x22c] ss:$16 sps:$4 sm:$0xff]  }
 0x655   : > { %3824 = vperm.xlu1 %6846, %v7082_v28   ;;  %4994 = vmatpush1.bf16.msra.mxu0 %v6923_v3  ;;  %v7120_v28 = vpop.eup %7119  ;;  %7131 = vrcp.f32 %v3919_v27 }
 0x656   : > { %5220 = vmatpush1.bf16.msra.mxu1 %v6924_v60  ;;  %4995 = vmatprep.subr.bf16.mxu0 %v6925_v14  ;;  %v7122_v63 = vpop.eup %7121  ;;  %7133 = vrcp.f32 %v3920_v1  ;;  %v3925_v60 = vld [vmem:[#allocation3 + $0x160] sm:$0xff]  ;;  %v3926_v14 = vld [vmem:[#allocation3 + $0x168] sm:$0xff]  ;;  %v3593_v1 = vld [vmem:[#allocation4 + $0x10] sm:$0xff] }
 0x657   : > { %5221 = vmatprep.subr.bf16.mxu1 %v6927_v4  ;;  %7135 = vrcp.f32 %v3937_v40  ;;  %v6949_v40 = vld [vmem:[%s9912_s3 + $0x220] ss:$16 sps:$4 sm:$0xff]  }
 0x658   : > { %3739 = vperm.xlu0 %6845, %v7084_v57   ;;  %7137 = vrcp.f32 %v3938_v16 }
 0x659   : > { %3744 = vperm.xlu1 %6846, %v7086_v19   ;;  %4996 = vmatpush1.bf16.msra.mxu0 %v6929_v41  ;;  %7139 = vrcp.f32 %v3921_v49  ;;  %v6957_v49 = vld [vmem:[%s9912_s3 + $0x244] ss:$16 sps:$4 sm:$0xff]  }
 0x65a   : > { %5222 = vmatpush1.bf16.msra.mxu1 %v6930_v7  ;;  %4997 = vmatprep.subr.bf16.mxu0 %v6931_v21  ;;  %7141 = vrcp.f32 %v3922_v15  ;;  %v3927_v7 = vld [vmem:[#allocation3 + $0x170] sm:$0xff] }
 0x65b   : > { %5223 = vmatprep.subr.bf16.mxu1 %v6933_v58  ;;  %v7124_v45 = vpop.eup %7123  ;;  %7143 = vrcp.f32 %v3939_v23 }
 0x65c   : > { %3829 = vperm.xlu0 %6845, %v7088_v24   ;;  %v7126_v57 = vpop.eup %7125  ;;  %v3940_v24 = vld [vmem:[#allocation3 + $0x1d8] sm:$0xff] }
 0x65d   : > { %3834 = vperm.xlu1 %6846, %v7090_v33   ;;  %4998 = vmatpush1.bf16.msra.mxu0 %v6935_v42  ;;  %v7128_v19 = vpop.eup %7127  ;;  %7145 = vrcp.f32 %v3940_v24  ;;  %v3612_v24 = vld [vmem:[#allocation4 + $0xa8] sm:$0xff] }
 0x65e   : > { %5224 = vmatpush1.bf16.msra.mxu1 %v6936_v50  ;;  %4999 = vmatprep.subr.bf16.mxu0 %v6937_v38  ;;  %v7130_v12 = vpop.eup %7129  ;;  %7147 = vrcp.f32 %v3923_v35  ;;  %v6958_v35 = vld [vmem:[%s9912_s3 + $0x248] ss:$16 sps:$4 sm:$0xff]  }
 0x65f   : > { %5225 = vmatprep.subr.bf16.mxu1 %v6939_v55  ;;  %v7132_v37 = vpop.eup %7131  ;;  %7149 = vrcp.f32 %v3924_v0 }
 0x660   : > { %3749 = vperm.xlu0 %6845, %v7092_v39   ;;  %v7134_v44 = vpop.eup %7133  ;;  %v3942_v39 = vld [vmem:[#allocation3 + $0x1e8] sm:$0xff]  ;;  %7151 = vrcp.f32 %v3941_v20 }
 0x661   : > { %3754 = vperm.xlu1 %6846, %v7094_v18   ;;  %5000 = vmatpush1.bf16.msra.mxu0 %v6941_v47  ;;  %v7136_v33 = vpop.eup %7135  ;;  %7153 = vrcp.f32 %v3942_v39  ;;  %v3591_v47 = vld [vmem:[#allocation4] sm:$0xff]  ;;  %v6966_v20 = vld [vmem:[%s9912_s3 + $0x26c] ss:$16 sps:$4 sm:$0xff]  }
 0x662   : > { %5226 = vmatpush1.bf16.msra.mxu1 %v6942_v36  ;;  %5082 = vmatprep.subr.bf16.mxu0 %v6945_v26  ;;  %v7138_v22 = vpop.eup %7137  ;;  %7155 = vrcp.f32 %v3925_v60  ;;  %v3595_v60 = vld [vmem:[#allocation4 + $0x20] sm:$0xff] }
 0x663   : > { %5308 = vmatprep.subr.bf16.mxu1 %v6948_v6  ;;  %v7140_v3 = vpop.eup %7139  ;;  %7157 = vrcp.f32 %v3926_v14  ;;  %v6961_v14 = vld [vmem:[%s9912_s3 + $0x260] ss:$16 sps:$4 sm:$0xff]  }
 0x664   : > { %3839 = vperm.xlu0 %6845, %v7096_v25   ;;  %v7142_v8 = vpop.eup %7141  ;;  %v3944_v25 = vld [vmem:[#allocation3 + $0x1f8] sm:$0xff]  ;;  %7159 = vrcp.f32 %v3943_v34 }
 0x665   : > { %3844 = vperm.xlu1 %6846, %v7098_v56   ;;  %v7144_v18 = vpop.eup %7143  ;;  %7161 = vrcp.f32 %v3944_v25  ;;  %v3928_v56 = vld [vmem:[#allocation3 + $0x178] sm:$0xff]  ;;  %v6969_v25 = vld [vmem:[%s9912_s3 + $0x284] ss:$16 sps:$4 sm:$0xff]  }
 0x666   : > { %7163 = vrcp.f32 %v3927_v7 }
 0x667   : > { %v7146_v4 = vpop.eup %7145  ;;  %7165 = vrcp.f32 %v3928_v56 }
 0x668   : > { %3759 = vperm.xlu0 %6845, %v7100_v53   ;;  %v7148_v41 = vpop.eup %7147 }
 0x669   : > { %3764 = vperm.xlu1 %6846, %v7102_v51   ;;  %v7150_v9 = vpop.eup %7149 }
 0x66a   : > { %v7152_v21 = vpop.eup %7151 }
 0x66b   : > { %v7154_v58 = vpop.eup %7153 }
 0x66c   : > { %4059 = vperm.xlu0 %6845, %v7104_v11   ;;  %v7156_v61 = vpop.eup %7155  ;;  %v3592_v11 = vld [vmem:[#allocation4 + $0x8] sm:$0xff] }
 0x66d   : > { %4064 = vperm.xlu1 %6846, %v7106_v52   ;;  %v7158_v43 = vpop.eup %7157 }
 0x66e   : > { %v7160_v42 = vpop.eup %7159 }
 0x66f   : > { %v7162_v53 = vpop.eup %7161 }
 0x670   : > { %3979 = vperm.xlu0 %6845, %v7108_v54   ;;  %v7164_v50 = vpop.eup %7163 }
 0x671   : > { %3984 = vperm.xlu1 %6846, %v7110_v29   ;;  %v7166_v51 = vpop.eup %7165  ;;  %v3610_v29 = vld [vmem:[#allocation4 + $0x98] sm:$0xff] }
 0x674   : > { %4069 = vperm.xlu0 %6845, %v7112_v59   ;;  %v6943_v59 = vld [vmem:[%s9912_s3 + $0x200] ss:$16 sps:$4 sm:$0xff]  }
 0x675   : > { %4074 = vperm.xlu1 %6846, %v7114_v5  }
 0x678   : > { %3989 = vperm.xlu0 %6845, %v7116_v13   ;;  %v6951_v13 = vld [vmem:[%s9912_s3 + $0x224] ss:$16 sps:$4 sm:$0xff]  }
 0x679   : > { %3994 = vperm.xlu1 %6846, %v7118_v46  }
 0x67c   : > { %4079 = vperm.xlu0 %6845, %v7120_v28  }
 0x67d   : > { %4084 = vperm.xlu1 %6846, %v7122_v63   ;;  %v3594_v63 = vld [vmem:[#allocation4 + $0x18] sm:$0xff] }
 0x680   : > { %3999 = vperm.xlu0 %6845, %v7124_v45   ;;  %v6952_v45 = vld [vmem:[%s9912_s3 + $0x228] ss:$16 sps:$4 sm:$0xff]  }
 0x681   : > { %4004 = vperm.xlu1 %6846, %v7126_v57  }
 0x684   : > { %4089 = vperm.xlu0 %6845, %v7128_v19   ;;  %v6960_v19 = vld [vmem:[%s9912_s3 + $0x24c] ss:$16 sps:$4 sm:$0xff]  }
 0x685   : > { %4094 = vperm.xlu1 %6846, %v7130_v12  }
 0x688   : > { %4009 = vperm.xlu0 %6845, %v7132_v37   ;;  %v3611_v37 = vld [vmem:[#allocation4 + $0xa0] sm:$0xff] }
 0x689   : > { %4014 = vperm.xlu1 %6846, %v7134_v44   ;;  %v6955_v44 = vld [vmem:[%s9912_s3 + $0x240] ss:$16 sps:$4 sm:$0xff]  }
 0x68c   : > { %4099 = vperm.xlu0 %6845, %v7136_v33  }
 0x68d   : > { %4104 = vperm.xlu1 %6846, %v7138_v22   ;;  %v6963_v22 = vld [vmem:[%s9912_s3 + $0x264] ss:$16 sps:$4 sm:$0xff]  }
 0x690   : > { %4019 = vperm.xlu0 %6845, %v7140_v3  }
 0x691   : > { %4024 = vperm.xlu1 %6846, %v7142_v8  }
 0x694   : > { %4109 = vperm.xlu0 %6845, %v7144_v18   ;;  %v3596_v18 = vld [vmem:[#allocation4 + $0x28] sm:$0xff] }
 0x695   : > { %4114 = vperm.xlu1 %6846, %v7146_v4   ;;  %v6964_v4 = vld [vmem:[%s9912_s3 + $0x268] ss:$16 sps:$4 sm:$0xff]  }
 0x698   : > { %4029 = vperm.xlu0 %6845, %v7148_v41  }
 0x699   : > { %4034 = vperm.xlu1 %6846, %v7150_v9   ;;  %v6972_v9 = vld [vmem:[%s9912_s3 + $0x28c] ss:$16 sps:$4 sm:$0xff]  }
 0x69c   : > { %4119 = vperm.xlu0 %6845, %v7152_v21  }
 0x69d   : > { %4124 = vperm.xlu1 %6846, %v7154_v58   ;;  %v3613_v58 = vld [vmem:[#allocation4 + $0xb0] sm:$0xff] }
 0x6a0   : > { %4039 = vperm.xlu0 %6845, %v7156_v61   ;;  %v3614_v61 = vld [vmem:[#allocation4 + $0xb8] sm:$0xff] }
 0x6a1   : > { %4044 = vperm.xlu1 %6846, %v7158_v43   ;;  %v6967_v43 = vld [vmem:[%s9912_s3 + $0x280] ss:$16 sps:$4 sm:$0xff]  }
 0x6a4   : > { %4129 = vperm.xlu0 %6845, %v7160_v42   ;;  %v6970_v42 = vld [vmem:[%s9912_s3 + $0x288] ss:$16 sps:$4 sm:$0xff]  }
 0x6a5   : > { %4134 = vperm.xlu1 %6846, %v7162_v53  }
 0x6a8   : > { %4049 = vperm.xlu0 %6845, %v7164_v50  }
 0x6a9   : > { %4054 = vperm.xlu1 %6846, %v7166_v51   ;;  %v6975_v51 = vld [vmem:[%s9912_s3 + $0x2a4] ss:$16 sps:$4 sm:$0xff]  }
 0x6ab   : > { %v3770_v38 = vpop.permute.xlu0 %3769 }
 0x6ac   : > { %v3690_v55 = vpop.permute.xlu1 %3689  ;;  %v3863_v26 = vmul.f32 %v3770_v38, %v3607_v31  ;;  %v6978_v38 = vld [vmem:[%s9912_s3 + $0x2ac] ss:$16 sps:$4 sm:$0xff]  }
 0x6ad   : > { %v3847_v62 = vmul.f32 %v3690_v55, %v3591_v47  ;;  %v3597_v47 = vld [vmem:[#allocation4 + $0x30] sm:$0xff] }
 0x6af   : > { %v3775_v36 = vpop.permute.xlu0 %3774 }
 0x6b0   : > { %v3864_v52 = vmul.f32 %v3775_v36, %v3608_v17  ;;  %v3695_v6 = vpop.permute.xlu1 %3694  ;;  %v6973_v36 = vld [vmem:[%s9912_s3 + $0x2a0] ss:$16 sps:$4 sm:$0xff]  }
 0x6b1   : > { %v3848_v54 = vmul.f32 %v3695_v6, %v3592_v11  ;;  %v3598_v11 = vld [vmem:[#allocation4 + $0x38] sm:$0xff] }
 0x6b2   : > { %v4170_v10 = vpack.c.bf16 %v3864_v52, %v3863_v26  ;;  %v6976_v26 = vld [vmem:[%s9912_s3 + $0x2a8] ss:$16 sps:$4 sm:$0xff]  }
 0x6b3   : > { %v4169_v5 = vpack.c.bf16 %v3848_v54, %v3847_v62  ;;  %v3780_v48 = vpop.permute.xlu0 %3779  ;;  %v6981_v62 = vld [vmem:[%s9912_s3 + $0x2c4] ss:$16 sps:$4 sm:$0xff]   ;;  %v6984_v54 = vld [vmem:[%s9912_s3 + $0x2cc] ss:$16 sps:$4 sm:$0xff]  }
 0x6b4   : > { %v3865_v46 = vmul.f32 %v3780_v48, %v3609_v2  ;;  %v3785_v27 = vpop.permute.xlu1 %3784  ;;  %5001 = vmatprep.mubr.bf16.mxu0 %v4170_v10  ;;  %5227 = vmatprep.mubr.bf16.mxu1 %v4170_v10  ;;  %v6982_v48 = vld [vmem:[%s9912_s3 + $0x2c8] ss:$16 sps:$4 sm:$0xff]  }
 0x6b5   : > { %v3866_v28 = vmul.f32 %v3785_v27, %v3610_v29  ;;  %5002 = vmatmul.mubr.bf16.vlgmr.msra.gmra.mrb[0].mxu0 %v4169_v5  ;;  %5228 = vmatmul.mubr.bf16.vlgmr.msra.gmra.mrb[0].mxu1 %v4169_v5  ;;  %v6979_v5 = vld [vmem:[%s9912_s3 + $0x2c0] ss:$16 sps:$4 sm:$0xff]   ;;  %v6990_v27 = vld [vmem:[%s9912_s3 + $0x2ec] ss:$16 sps:$4 sm:$0xff]  }
 0x6b6   : > { %5083 = vmatpush1.bf16.msra.mxu0 %v6943_v59  ;;  %5309 = vmatpush1.bf16.msra.mxu1 %v6946_v30  ;;  %v3615_v59 = vld [vmem:[#allocation4 + $0xc0] sm:$0xff]  ;;  %v3616_v30 = vld [vmem:[#allocation4 + $0xc8] sm:$0xff] }
 0x6b7   : > { %v4174_v16 = vpack.c.bf16 %v3866_v28, %v3865_v46  ;;  %v3700_v57 = vpop.permute.xlu0 %3699  ;;  %5084 = vmatprep.subr.bf16.mxu0 %v6951_v13  ;;  %5310 = vmatprep.subr.bf16.mxu1 %v6954_v32  ;;  %v6987_v46 = vld [vmem:[%s9912_s3 + $0x2e4] ss:$16 sps:$4 sm:$0xff]  }
 0x6b8   : > { %v3849_v15 = vmul.f32 %v3700_v57, %v3593_v1  ;;  %v3705_v12 = vpop.permute.xlu1 %3704  ;;  %v6988_v57 = vld [vmem:[%s9912_s3 + $0x2e8] ss:$16 sps:$4 sm:$0xff]  }
 0x6b9   : > { %v3850_v23 = vmul.f32 %v3705_v12, %v3594_v63  ;;  %5011 = vmatprep.mubr.bf16.mxu0 %v4174_v16  ;;  %5237 = vmatprep.mubr.bf16.mxu1 %v4174_v16  ;;  %v6985_v16 = vld [vmem:[%s9912_s3 + $0x2e0] ss:$16 sps:$4 sm:$0xff]   ;;  %v6996_v12 = vld [vmem:[%s9912_s3 + $0x30c] ss:$16 sps:$4 sm:$0xff]  }
 0x6ba   : > { %5085 = vmatpush1.bf16.msra.mxu0 %v6949_v40  ;;  %5311 = vmatpush1.bf16.msra.mxu1 %v6952_v45  ;;  %v3599_v40 = vld [vmem:[#allocation4 + $0x40] sm:$0xff]  ;;  %v3600_v45 = vld [vmem:[#allocation4 + $0x48] sm:$0xff] }
 0x6bb   : > { %v4173_v33 = vpack.c.bf16 %v3850_v23, %v3849_v15  ;;  %v3790_v0 = vpop.permute.xlu0 %3789  ;;  %5086 = vmatprep.subr.bf16.mxu0 %v6957_v49  ;;  %5312 = vmatprep.subr.bf16.mxu1 %v6960_v19  ;;  %v6993_v15 = vld [vmem:[%s9912_s3 + $0x304] ss:$16 sps:$4 sm:$0xff]  }
 0x6bc   : > { %v3867_v3 = vmul.f32 %v3790_v0, %v3611_v37  ;;  %v3795_v39 = vpop.permute.xlu1 %3794  ;;  %v6994_v0 = vld [vmem:[%s9912_s3 + $0x308] ss:$16 sps:$4 sm:$0xff]  }
 0x6bd   : > { %v3868_v8 = vmul.f32 %v3795_v39, %v3612_v24  ;;  %5012 = vmatmul.mubr.bf16.gmra.mrb[4].mxu0 %v4173_v33  ;;  %5238 = vmatmul.mubr.bf16.gmra.mrb[4].mxu1 %v4173_v33  ;;  %v6991_v33 = vld [vmem:[%s9912_s3 + $0x300] ss:$16 sps:$4 sm:$0xff]   ;;  %v7002_v39 = vld [vmem:[%s9912_s3 + $0x32c] ss:$16 sps:$4 sm:$0xff]  }
 0x6be   : > { %5087 = vmatpush1.bf16.msra.mxu0 %v6955_v44  ;;  %5313 = vmatpush1.bf16.msra.mxu1 %v6958_v35  ;;  %v3617_v44 = vld [vmem:[#allocation4 + $0xd0] sm:$0xff]  ;;  %v3618_v35 = vld [vmem:[#allocation4 + $0xd8] sm:$0xff] }
 0x6bf   : > { %v4178_v34 = vpack.c.bf16 %v3868_v8, %v3867_v3  ;;  %v3710_v41 = vpop.permute.xlu0 %3709  ;;  %5088 = vmatprep.subr.bf16.mxu0 %v6963_v22  ;;  %5314 = vmatprep.subr.bf16.mxu1 %v6966_v20  ;;  %v6999_v3 = vld [vmem:[%s9912_s3 + $0x324] ss:$16 sps:$4 sm:$0xff]  }
 0x6c0   : > { %v3851_v7 = vmul.f32 %v3710_v41, %v3595_v60  ;;  %v3715_v21 = vpop.permute.xlu1 %3714  ;;  %v7000_v41 = vld [vmem:[%s9912_s3 + $0x328] ss:$16 sps:$4 sm:$0xff]  }
 0x6c1   : > { %v3852_v56 = vmul.f32 %v3715_v21, %v3596_v18  ;;  %5021 = vmatprep.mubr.bf16.mxu0 %v4178_v34  ;;  %5247 = vmatprep.mubr.bf16.mxu1 %v4178_v34  ;;  %v6997_v34 = vld [vmem:[%s9912_s3 + $0x320] ss:$16 sps:$4 sm:$0xff]   ;;  %v7008_v21 = vld [vmem:[%s9912_s3 + $0x34c] ss:$16 sps:$4 sm:$0xff]  }
 0x6c2   : > { %5089 = vmatpush1.bf16.msra.mxu0 %v6961_v14  ;;  %5315 = vmatpush1.bf16.msra.mxu1 %v6964_v4  ;;  %v3601_v14 = vld [vmem:[#allocation4 + $0x50] sm:$0xff]  ;;  %v3602_v4 = vld [vmem:[#allocation4 + $0x58] sm:$0xff] }
 0x6c3   : > { %v4177_v53 = vpack.c.bf16 %v3852_v56, %v3851_v7  ;;  %v3800_v50 = vpop.permute.xlu0 %3799  ;;  %5090 = vmatprep.subr.bf16.mxu0 %v6969_v25  ;;  %5316 = vmatprep.subr.bf16.mxu1 %v6972_v9  ;;  %v7005_v7 = vld [vmem:[%s9912_s3 + $0x344] ss:$16 sps:$4 sm:$0xff]  }
 0x6c4   : > { %v3869_v55 = vmul.f32 %v3800_v50, %v3613_v58  ;;  %v3805_v31 = vpop.permute.xlu1 %3804  ;;  %v7006_v50 = vld [vmem:[%s9912_s3 + $0x348] ss:$16 sps:$4 sm:$0xff]  }
 0x6c5   : > { %v3870_v17 = vmul.f32 %v3805_v31, %v3614_v61  ;;  %5022 = vmatmul.mubr.bf16.gmra.mrb[8].mxu0 %v4177_v53  ;;  %5248 = vmatmul.mubr.bf16.gmra.mrb[8].mxu1 %v4177_v53  ;;  %v7003_v53 = vld [vmem:[%s9912_s3 + $0x340] ss:$16 sps:$4 sm:$0xff]   ;;  %v7014_v31 = vld [vmem:[%s9912_s3 + $0x36c] ss:$16 sps:$4 sm:$0xff]  }
 0x6c6   : > { %5091 = vmatpush1.bf16.msra.mxu0 %v6967_v43  ;;  %5317 = vmatpush1.bf16.msra.mxu1 %v6970_v42  ;;  %v3619_v43 = vld [vmem:[#allocation4 + $0xe0] sm:$0xff]  ;;  %v3620_v42 = vld [vmem:[#allocation4 + $0xe8] sm:$0xff] }
 0x6c7   : > { %v4182_v52 = vpack.c.bf16 %v3870_v17, %v3869_v55  ;;  %v3720_v6 = vpop.permute.xlu0 %3719  ;;  %5092 = vmatprep.subr.bf16.mxu0 %v6975_v51  ;;  %5318 = vmatprep.subr.bf16.mxu1 %v6978_v38  ;;  %v7011_v55 = vld [vmem:[%s9912_s3 + $0x364] ss:$16 sps:$4 sm:$0xff]  }
 0x6c8   : > { %v3853_v2 = vmul.f32 %v3720_v6, %v3597_v47  ;;  %v3725_v29 = vpop.permute.xlu1 %3724  ;;  %v7012_v6 = vld [vmem:[%s9912_s3 + $0x368] ss:$16 sps:$4 sm:$0xff]  }
 0x6c9   : > { %v3854_v10 = vmul.f32 %v3725_v29, %v3598_v11  ;;  %5031 = vmatprep.mubr.bf16.mxu0 %v4182_v52  ;;  %5257 = vmatprep.mubr.bf16.mxu1 %v4182_v52  ;;  %v7009_v52 = vld [vmem:[%s9912_s3 + $0x360] ss:$16 sps:$4 sm:$0xff]   ;;  %v7020_v29 = vld [vmem:[%s9912_s3 + $0x38c] ss:$16 sps:$4 sm:$0xff]  }
 0x6ca   : > { %5093 = vmatpush1.bf16.msra.mxu0 %v6973_v36  ;;  %5319 = vmatpush1.bf16.msra.mxu1 %v6976_v26  ;;  %v3603_v36 = vld [vmem:[#allocation4 + $0x60] sm:$0xff]  ;;  %v3604_v26 = vld [vmem:[#allocation4 + $0x68] sm:$0xff] }
 0x6cb   : > { %v4181_v13 = vpack.c.bf16 %v3854_v10, %v3853_v2  ;;  %v3810_v32 = vpop.permute.xlu0 %3809  ;;  %5094 = vmatprep.subr.bf16.mxu0 %v6981_v62  ;;  %5320 = vmatprep.subr.bf16.mxu1 %v6984_v54  ;;  %v7017_v2 = vld [vmem:[%s9912_s3 + $0x384] ss:$16 sps:$4 sm:$0xff]  }
 0x6cc   : > { %v3871_v28 = vmul.f32 %v3810_v32, %v3615_v59  ;;  %v3815_v1 = vpop.permute.xlu1 %3814  ;;  %v7018_v32 = vld [vmem:[%s9912_s3 + $0x388] ss:$16 sps:$4 sm:$0xff]  }
 0x6cd   : > { %v3872_v63 = vmul.f32 %v3815_v1, %v3616_v30  ;;  %5032 = vmatmul.mubr.bf16.gmra.mrb[12].mxu0 %v4181_v13  ;;  %5258 = vmatmul.mubr.bf16.gmra.mrb[12].mxu1 %v4181_v13  ;;  %v7015_v13 = vld [vmem:[%s9912_s3 + $0x380] ss:$16 sps:$4 sm:$0xff]   ;;  %v7026_v1 = vld [vmem:[%s9912_s3 + $0x3ac] ss:$16 sps:$4 sm:$0xff]  }
 0x6ce   : > { %5095 = vmatpush1.bf16.msra.mxu0 %v6979_v5  ;;  %5321 = vmatpush1.bf16.msra.mxu1 %v6982_v48  ;;  %v3621_v5 = vld [vmem:[#allocation4 + $0xf0] sm:$0xff]  ;;  %v3622_v48 = vld [vmem:[#allocation4 + $0xf8] sm:$0xff] }
 0x6cf   : > { %v4186_v49 = vpack.c.bf16 %v3872_v63, %v3871_v28  ;;  %v3730_v19 = vpop.permute.xlu0 %3729  ;;  %5096 = vmatprep.subr.bf16.mxu0 %v6987_v46  ;;  %5322 = vmatprep.subr.bf16.mxu1 %v6990_v27  ;;  %v7023_v28 = vld [vmem:[%s9912_s3 + $0x3a4] ss:$16 sps:$4 sm:$0xff]  }
 0x6d0   : > { %v3855_v23 = vmul.f32 %v3730_v19, %v3599_v40  ;;  %v3735_v37 = vpop.permute.xlu1 %3734  ;;  %v7024_v19 = vld [vmem:[%s9912_s3 + $0x3a8] ss:$16 sps:$4 sm:$0xff]  }
 0x6d1   : > { %v3856_v24 = vmul.f32 %v3735_v37, %v3600_v45  ;;  %5041 = vmatprep.mubr.bf16.mxu0 %v4186_v49  ;;  %5267 = vmatprep.mubr.bf16.mxu1 %v4186_v49  ;;  %v7021_v49 = vld [vmem:[%s9912_s3 + $0x3a0] ss:$16 sps:$4 sm:$0xff]   ;;  %v7032_v37 = vld [vmem:[%s9912_s3 + $0x3cc] ss:$16 sps:$4 sm:$0xff]  }
 0x6d2   : > { %5097 = vmatpush1.bf16.msra.mxu0 %v6985_v16  ;;  %5323 = vmatpush1.bf16.msra.mxu1 %v6988_v57  ;;  %v3605_v16 = vld [vmem:[#allocation4 + $0x70] sm:$0xff]  ;;  %v3606_v57 = vld [vmem:[#allocation4 + $0x78] sm:$0xff] }
 0x6d3   : > { %v4185_v22 = vpack.c.bf16 %v3856_v24, %v3855_v23  ;;  %v3820_v20 = vpop.permute.xlu0 %3819  ;;  %5098 = vmatprep.subr.bf16.mxu0 %v6993_v15  ;;  %5324 = vmatprep.subr.bf16.mxu1 %v6996_v12  ;;  %v7029_v23 = vld [vmem:[%s9912_s3 + $0x3c4] ss:$16 sps:$4 sm:$0xff]  }
 0x6d4   : > { %v3873_v8 = vmul.f32 %v3820_v20, %v3617_v44  ;;  %v3825_v60 = vpop.permute.xlu1 %3824  ;;  %v7030_v20 = vld [vmem:[%s9912_s3 + $0x3c8] ss:$16 sps:$4 sm:$0xff]  }
 0x6d5   : > { %v3874_v18 = vmul.f32 %v3825_v60, %v3618_v35  ;;  %5042 = vmatmul.mubr.bf16.gmra.mrb[16].mxu0 %v4185_v22  ;;  %5268 = vmatmul.mubr.bf16.gmra.mrb[16].mxu1 %v4185_v22  ;;  %v7027_v22 = vld [vmem:[%s9912_s3 + $0x3c0] ss:$16 sps:$4 sm:$0xff]   ;;  %v7038_v60 = vld [vmem:[%s9912_s3 + $0x3ec] ss:$16 sps:$4 sm:$0xff]  }
 0x6d6   : > { %5099 = vmatpush1.bf16.msra.mxu0 %v6991_v33  ;;  %5325 = vmatpush1.bf16.msra.mxu1 %v6994_v0  ;;  %v3896_v33 = vld [vmem:[#allocation4 + $0x180] sm:$0xff]  ;;  %v3897_v0 = vld [vmem:[#allocation4 + $0x188] sm:$0xff] }
 0x6d7   : > { %v4190_v25 = vpack.c.bf16 %v3874_v18, %v3873_v8  ;;  %v3740_v9 = vpop.permute.xlu0 %3739  ;;  %5100 = vmatprep.subr.bf16.mxu0 %v6999_v3  ;;  %5326 = vmatprep.subr.bf16.mxu1 %v7002_v39  ;;  %v7035_v8 = vld [vmem:[%s9912_s3 + $0x3e4] ss:$16 sps:$4 sm:$0xff]  }
 0x6d8   : > { %v3857_v56 = vmul.f32 %v3740_v9, %v3601_v14  ;;  %v3745_v58 = vpop.permute.xlu1 %3744  ;;  %v7036_v9 = vld [vmem:[%s9912_s3 + $0x3e8] ss:$16 sps:$4 sm:$0xff]  }
 0x6d9   : > { %v3858_v61 = vmul.f32 %v3745_v58, %v3602_v4  ;;  %5051 = vmatprep.mubr.bf16.mxu0 %v4190_v25  ;;  %5277 = vmatprep.mubr.bf16.mxu1 %v4190_v25  ;;  %v7033_v25 = vld [vmem:[%s9912_s3 + $0x3e0] ss:$16 sps:$4 sm:$0xff]  }
 0x6da   : > { %5101 = vmatpush1.bf16.msra.mxu0 %v6997_v34  ;;  %5327 = vmatpush1.bf16.msra.mxu1 %v7000_v41  ;;  %v3880_v34 = vld [vmem:[#allocation4 + $0x100] sm:$0xff]  ;;  %v3881_v41 = vld [vmem:[#allocation4 + $0x108] sm:$0xff] }
 0x6db   : > { %v4189_v51 = vpack.c.bf16 %v3858_v61, %v3857_v56  ;;  %v3830_v38 = vpop.permute.xlu0 %3829  ;;  %5102 = vmatprep.subr.bf16.mxu0 %v7005_v7  ;;  %5328 = vmatprep.subr.bf16.mxu1 %v7008_v21 }
 0x6dc   : > { %v3875_v17 = vmul.f32 %v3830_v38, %v3619_v43  ;;  %v3835_v47 = vpop.permute.xlu1 %3834  ;;  %v3898_v43 = vld [vmem:[#allocation4 + $0x190] sm:$0xff] }
 0x6dd   : > { %v3876_v11 = vmul.f32 %v3835_v47, %v3620_v42  ;;  %5052 = vmatmul.mubr.bf16.gmra.mrb[20].mxu0 %v4189_v51  ;;  %5278 = vmatmul.mubr.bf16.gmra.mrb[20].mxu1 %v4189_v51  ;;  %v3899_v42 = vld [vmem:[#allocation4 + $0x198] sm:$0xff] }
 0x6de   : > { %5103 = vmatpush1.bf16.msra.mxu0 %v7003_v53  ;;  %5329 = vmatpush1.bf16.msra.mxu1 %v7006_v50 }
 0x6df   : > { %v4194_v62 = vpack.c.bf16 %v3876_v11, %v3875_v17  ;;  %v3750_v54 = vpop.permute.xlu0 %3749  ;;  %5104 = vmatprep.subr.bf16.mxu0 %v7011_v55  ;;  %5330 = vmatprep.subr.bf16.mxu1 %v7014_v31  ;;  %v3882_v31 = vld [vmem:[#allocation4 + $0x110] sm:$0xff]  ;;  %v3883_v17 = vld [vmem:[#allocation4 + $0x118] sm:$0xff] }
 0x6e0   : > { %v3859_v10 = vmul.f32 %v3750_v54, %v3603_v36  ;;  %v3755_v59 = vpop.permute.xlu1 %3754 }
 0x6e1   : > { %v3860_v30 = vmul.f32 %v3755_v59, %v3604_v26  ;;  %5061 = vmatprep.mubr.bf16.mxu0 %v4194_v62  ;;  %5287 = vmatprep.mubr.bf16.mxu1 %v4194_v62  ;;  %v3901_v62 = vld [vmem:[#allocation4 + $0x1a8] sm:$0xff] }
 0x6e2   : > { %5105 = vmatpush1.bf16.msra.mxu0 %v7009_v52  ;;  %5331 = vmatpush1.bf16.msra.mxu1 %v7012_v6  ;;  %v3900_v6 = vld [vmem:[#allocation4 + $0x1a0] sm:$0xff] }
 0x6e3   : > { %v4193_v46 = vpack.c.bf16 %v3860_v30, %v3859_v10  ;;  %v3840_v27 = vpop.permute.xlu0 %3839  ;;  %5106 = vmatprep.subr.bf16.mxu0 %v7017_v2  ;;  %5332 = vmatprep.subr.bf16.mxu1 %v7020_v29  ;;  %v3884_v30 = vld [vmem:[#allocation4 + $0x120] sm:$0xff] }
 0x6e4   : > { %v3877_v63 = vmul.f32 %v3840_v27, %v3621_v5  ;;  %v3845_v40 = vpop.permute.xlu1 %3844  ;;  %v3885_v5 = vld [vmem:[#allocation4 + $0x128] sm:$0xff] }
 0x6e5   : > { %v3878_v45 = vmul.f32 %v3845_v40, %v3622_v48  ;;  %5062 = vmatmul.mubr.bf16.gmra.mrb[24].mxu0 %v4193_v46  ;;  %5288 = vmatmul.mubr.bf16.gmra.mrb[24].mxu1 %v4193_v46 }
 0x6e6   : > { %5107 = vmatpush1.bf16.msra.mxu0 %v7015_v13  ;;  %5333 = vmatpush1.bf16.msra.mxu1 %v7018_v32 }
 0x6e7   : > { %v4198_v15 = vpack.c.bf16 %v3878_v45, %v3877_v63  ;;  %v3760_v12 = vpop.permute.xlu0 %3759  ;;  %5108 = vmatprep.subr.bf16.mxu0 %v7023_v28  ;;  %5334 = vmatprep.subr.bf16.mxu1 %v7026_v1  ;;  %v3902_v28 = vld [vmem:[#allocation4 + $0x1b0] sm:$0xff]  ;;  %v3903_v1 = vld [vmem:[#allocation4 + $0x1b8] sm:$0xff] }
 0x6e8   : > { %v3861_v24 = vmul.f32 %v3760_v12, %v3605_v16  ;;  %v3765_v44 = vpop.permute.xlu1 %3764 }
 0x6e9   : > { %v3862_v35 = vmul.f32 %v3765_v44, %v3606_v57  ;;  %5071 = vmatprep.mubr.bf16.mxu0 %v4198_v15  ;;  %5297 = vmatprep.mubr.bf16.mxu1 %v4198_v15  ;;  %v3904_v44 = vld [vmem:[#allocation4 + $0x1c0] sm:$0xff] }
 0x6ea   : > { %5109 = vmatpush1.bf16.msra.mxu0 %v7021_v49  ;;  %5335 = vmatpush1.bf16.msra.mxu1 %v7024_v19  ;;  %v3886_v49 = vld [vmem:[#allocation4 + $0x130] sm:$0xff]  ;;  %v3887_v19 = vld [vmem:[#allocation4 + $0x138] sm:$0xff] }
 0x6eb   : > { %v4197_v3 = vpack.c.bf16 %v3862_v35, %v3861_v24  ;;  %v4060_v39 = vpop.permute.xlu0 %4059  ;;  %5110 = vmatprep.subr.bf16.mxu0 %v7029_v23  ;;  %5336 = vmatprep.subr.bf16.mxu1 %v7032_v37  ;;  %v3905_v35 = vld [vmem:[#allocation4 + $0x1c8] sm:$0xff] }
 0x6ec   : > { %v4153_v18 = vmul.f32 %v4060_v39, %v3896_v33  ;;  %v4065_v14 = vpop.permute.xlu1 %4064  ;;  %v3888_v39 = vld [vmem:[#allocation4 + $0x140] sm:$0xff] }
 0x6ed   : > { %v4154_v4 = vmul.f32 %v4065_v14, %v3897_v0  ;;  %5072 = vmatmul.mubr.bf16.gmra.mrb[28].mxu0 %v4197_v3  ;;  %5298 = vmatmul.mubr.bf16.gmra.mrb[28].mxu1 %v4197_v3 }
 0x6ee   : > { %5111 = vmatpush1.bf16.msra.mxu0 %v7027_v22  ;;  %5337 = vmatpush1.bf16.msra.mxu1 %v7030_v20 }
 0x6ef   : > { %v4172_v7 = vpack.c.bf16 %v4154_v4, %v4153_v18  ;;  %v3980_v21 = vpop.permute.xlu0 %3979  ;;  %5112 = vmatprep.subr.bf16.mxu0 %v7035_v8  ;;  %5338 = vmatprep.subr.bf16.mxu1 %v7038_v60  ;;  %v3889_v8 = vld [vmem:[#allocation4 + $0x148] sm:$0xff] }
 0x6f0   : > { %v4137_v56 = vmul.f32 %v3980_v21, %v3880_v34  ;;  %v3985_v58 = vpop.permute.xlu1 %3984 }
 0x6f1   : > { %v4138_v61 = vmul.f32 %v3985_v58, %v3881_v41  ;;  %5114 = vmatprep.mubr.bf16.mxu0 %v4172_v7  ;;  %5340 = vmatprep.mubr.bf16.mxu1 %v4172_v7  ;;  %v3906_v41 = vld [vmem:[#allocation4 + $0x1d0] sm:$0xff] }
 0x6f2   : > { %5113 = vmatpush1.bf16.msra.mxu0 %v7033_v25  ;;  %5339 = vmatpush1.bf16.msra.mxu1 %v7036_v9  ;;  %v3907_v25 = vld [vmem:[#allocation4 + $0x1d8] sm:$0xff] }
 0x6f3   : > { %v4171_v53 = vpack.c.bf16 %v4138_v61, %v4137_v56  ;;  %v4070_v50 = vpop.permute.xlu0 %4069  ;;  %v3890_v61 = vld [vmem:[#allocation4 + $0x150] sm:$0xff] }
 0x6f4   : > { %v4155_v51 = vmul.f32 %v4070_v50, %v3898_v43  ;;  %v4075_v38 = vpop.permute.xlu1 %4074  ;;  %v3891_v43 = vld [vmem:[#allocation4 + $0x158] sm:$0xff] }
 0x6f5   : > { %v4156_v55 = vmul.f32 %v4075_v38, %v3899_v42  ;;  %5115 = vmatmul.mubr.bf16.vlgmr.msra.gmra.mrb[0].mxu0 %v4171_v53  ;;  %5341 = vmatmul.mubr.bf16.vlgmr.msra.gmra.mrb[0].mxu1 %v4171_v53 }
 0x6f7   : > { %v4176_v47 = vpack.c.bf16 %v4156_v55, %v4155_v51  ;;  %v3990_v11 = vpop.permute.xlu0 %3989  ;;  %v3908_v55 = vld [vmem:[#allocation4 + $0x1e0] sm:$0xff] }
 0x6f8   : > { %v4139_v36 = vmul.f32 %v3990_v11, %v3882_v31  ;;  %v3995_v26 = vpop.permute.xlu1 %3994  ;;  %v3909_v31 = vld [vmem:[#allocation4 + $0x1e8] sm:$0xff] }
 0x6f9   : > { %v4140_v52 = vmul.f32 %v3995_v26, %v3883_v17  ;;  %5124 = vmatprep.mubr.bf16.mxu0 %v4176_v47  ;;  %5350 = vmatprep.mubr.bf16.mxu1 %v4176_v47 }
 0x6fb   : > { %v4175_v54 = vpack.c.bf16 %v4140_v52, %v4139_v36  ;;  %v4080_v2 = vpop.permute.xlu0 %4079  ;;  %v3892_v52 = vld [vmem:[#allocation4 + $0x160] sm:$0xff] }
 0x6fc   : > { %v4157_v29 = vmul.f32 %v4080_v2, %v3900_v6  ;;  %v4085_v10 = vpop.permute.xlu1 %4084  ;;  %v3893_v6 = vld [vmem:[#allocation4 + $0x168] sm:$0xff] }
 0x6fd   : > { %v4158_v59 = vmul.f32 %v4085_v10, %v3901_v62  ;;  %5125 = vmatmul.mubr.bf16.gmra.mrb[4].mxu0 %v4175_v54  ;;  %5351 = vmatmul.mubr.bf16.gmra.mrb[4].mxu1 %v4175_v54 }
 0x6ff   : > { %v4180_v48 = vpack.c.bf16 %v4158_v59, %v4157_v29  ;;  %v4000_v13 = vpop.permute.xlu0 %3999  ;;  %v3910_v59 = vld [vmem:[#allocation4 + $0x1f0] sm:$0xff] }
 0x700   : > { %v4141_v32 = vmul.f32 %v4000_v13, %v3884_v30  ;;  %v4005_v46 = vpop.permute.xlu1 %4004  ;;  %v3911_v30 = vld [vmem:[#allocation4 + $0x1f8] sm:$0xff] }
 0x701   : > { %v4142_v27 = vmul.f32 %v4005_v46, %v3885_v5  ;;  %5134 = vmatprep.mubr.bf16.mxu0 %v4180_v48  ;;  %5360 = vmatprep.mubr.bf16.mxu1 %v4180_v48 }
 0x703   : > { %v4179_v63 = vpack.c.bf16 %v4142_v27, %v4141_v32  ;;  %v4090_v40 = vpop.permute.xlu0 %4089  ;;  %v3894_v27 = vld [vmem:[#allocation4 + $0x170] sm:$0xff] }
 0x704   : > { %v4159_v45 = vmul.f32 %v4090_v40, %v3902_v28  ;;  %v4095_v16 = vpop.permute.xlu1 %4094  ;;  %v3895_v28 = vld [vmem:[#allocation4 + $0x178] sm:$0xff] }
 0x705   : > { %v4160_v57 = vmul.f32 %v4095_v16, %v3903_v1  ;;  %5135 = vmatmul.mubr.bf16.gmra.mrb[8].mxu0 %v4179_v63  ;;  %5361 = vmatmul.mubr.bf16.gmra.mrb[8].mxu1 %v4179_v63 }
 0x707   : > { %v4184_v15 = vpack.c.bf16 %v4160_v57, %v4159_v45  ;;  %v4010_v12 = vpop.permute.xlu0 %4009 }
 0x708   : > { %v4143_v23 = vmul.f32 %v4010_v12, %v3886_v49  ;;  %v4015_v37 = vpop.permute.xlu1 %4014 }
 0x709   : > { %v4144_v24 = vmul.f32 %v4015_v37, %v3887_v19  ;;  %5144 = vmatprep.mubr.bf16.mxu0 %v4184_v15  ;;  %5370 = vmatprep.mubr.bf16.mxu1 %v4184_v15 }
 0x70b   : > { %v4183_v33 = vpack.c.bf16 %v4144_v24, %v4143_v23  ;;  %v4100_v0 = vpop.permute.xlu0 %4099 }
 0x70c   : > { %v4161_v22 = vmul.f32 %v4100_v0, %v3904_v44  ;;  %v4105_v20 = vpop.permute.xlu1 %4104 }
 0x70d   : > { %v4162_v3 = vmul.f32 %v4105_v20, %v3905_v35  ;;  %5145 = vmatmul.mubr.bf16.gmra.mrb[12].mxu0 %v4183_v33  ;;  %5371 = vmatmul.mubr.bf16.gmra.mrb[12].mxu1 %v4183_v33 }
 0x70f   : > { %v4188_v60 = vpack.c.bf16 %v4162_v3, %v4161_v22  ;;  %v4020_v18 = vpop.permute.xlu0 %4019 }
 0x710   : > { %v4145_v14 = vmul.f32 %v4020_v18, %v3888_v39  ;;  %v4025_v4 = vpop.permute.xlu1 %4024 }
 0x711   : > { %v4146_v34 = vmul.f32 %v4025_v4, %v3889_v8  ;;  %5154 = vmatprep.mubr.bf16.mxu0 %v4188_v60  ;;  %5380 = vmatprep.mubr.bf16.mxu1 %v4188_v60 }
 0x713   : > { %v4187_v9 = vpack.c.bf16 %v4146_v34, %v4145_v14  ;;  %v4110_v7 = vpop.permute.xlu0 %4109 }
 0x714   : > { %v4163_v21 = vmul.f32 %v4110_v7, %v3906_v41  ;;  %v4115_v56 = vpop.permute.xlu1 %4114 }
 0x715   : > { %v4164_v58 = vmul.f32 %v4115_v56, %v3907_v25  ;;  %5155 = vmatmul.mubr.bf16.gmra.mrb[16].mxu0 %v4187_v9  ;;  %5381 = vmatmul.mubr.bf16.gmra.mrb[16].mxu1 %v4187_v9 }
 0x717   : > { %v4192_v42 = vpack.c.bf16 %v4164_v58, %v4163_v21  ;;  %v4030_v53 = vpop.permute.xlu0 %4029 }
 0x718   : > { %v4147_v50 = vmul.f32 %v4030_v53, %v3890_v61  ;;  %v4035_v51 = vpop.permute.xlu1 %4034 }
 0x719   : > { %v4148_v38 = vmul.f32 %v4035_v51, %v3891_v43  ;;  %5164 = vmatprep.mubr.bf16.mxu0 %v4192_v42  ;;  %5390 = vmatprep.mubr.bf16.mxu1 %v4192_v42 }
 0x71b   : > { %v4191_v17 = vpack.c.bf16 %v4148_v38, %v4147_v50  ;;  %v4120_v47 = vpop.permute.xlu0 %4119 }
 0x71c   : > { %v4165_v11 = vmul.f32 %v4120_v47, %v3908_v55  ;;  %v4125_v36 = vpop.permute.xlu1 %4124 }
 0x71d   : > { %v4166_v26 = vmul.f32 %v4125_v36, %v3909_v31  ;;  %5165 = vmatmul.mubr.bf16.gmra.mrb[20].mxu0 %v4191_v17  ;;  %5391 = vmatmul.mubr.bf16.gmra.mrb[20].mxu1 %v4191_v17 }
 0x71f   : > { %v4196_v62 = vpack.c.bf16 %v4166_v26, %v4165_v11  ;;  %v4040_v54 = vpop.permute.xlu0 %4039 }
 0x720   : > { %v4149_v2 = vmul.f32 %v4040_v54, %v3892_v52  ;;  %v4045_v29 = vpop.permute.xlu1 %4044 }
 0x721   : > { %v4150_v10 = vmul.f32 %v4045_v29, %v3893_v6  ;;  %5174 = vmatprep.mubr.bf16.mxu0 %v4196_v62  ;;  %5400 = vmatprep.mubr.bf16.mxu1 %v4196_v62 }
 0x723   : > { %v4195_v5 = vpack.c.bf16 %v4150_v10, %v4149_v2  ;;  %v4130_v48 = vpop.permute.xlu0 %4129 }
 0x724   : > { %v4167_v13 = vmul.f32 %v4130_v48, %v3910_v59  ;;  %v4135_v32 = vpop.permute.xlu1 %4134 }
 0x725   : > { %v4168_v46 = vmul.f32 %v4135_v32, %v3911_v30  ;;  %5175 = vmatmul.mubr.bf16.gmra.mrb[24].mxu0 %v4195_v5  ;;  %5401 = vmatmul.mubr.bf16.gmra.mrb[24].mxu1 %v4195_v5 }
 0x727   : > { %v4200_v1 = vpack.c.bf16 %v4168_v46, %v4167_v13  ;;  %v4050_v63 = vpop.permute.xlu0 %4049 }
 0x728   : > { %v4151_v40 = vmul.f32 %v4050_v63, %v3894_v27  ;;  %v4055_v45 = vpop.permute.xlu1 %4054 }
 0x729   : > { %v4152_v16 = vmul.f32 %v4055_v45, %v3895_v28  ;;  %5184 = vmatprep.mubr.bf16.mxu0 %v4200_v1  ;;  %5410 = vmatprep.mubr.bf16.mxu1 %v4200_v1 }
 0x72b   : > { %v4199_v57 = vpack.c.bf16 %v4152_v16, %v4151_v40 }
 0x72d   : > { %5185 = vmatmul.mubr.bf16.gmra.mrb[28].mxu0 %v4199_v57  ;;  %5411 = vmatmul.mubr.bf16.gmra.mrb[28].mxu1 %v4199_v57 }
 0x7c8   : > { %v5116_v49 = vpop.f32.mrb[0].mxu0  ;;  %v5342_v19 = vpop.f32.mrb[0].mxu1 }
 0x7c9   : > { %v5118_v15 = vpop.f32.mrb[1].mxu0  ;;  %v5344_v12 = vpop.f32.mrb[1].mxu1 }
 0x7ca   : > { %v6010_v23 = vpack.c.bf16 %v5118_v15, %v5116_v49  ;;  %v6011_v37 = vpack.c.bf16 %v5344_v12, %v5342_v19  ;;  %v5120_v24 = vpop.f32.mrb[2].mxu0  ;;  %v5346_v44 = vpop.f32.mrb[2].mxu1 }
 0x7cb   : > { %v5122_v35 = vpop.f32.mrb[3].mxu0  ;;  %v5348_v33 = vpop.f32.mrb[3].mxu1 }
 0x7cc   : > { %5613 = vst [vmem:[%s7385_s25] sm:$0xff] %v6010_v23  ;;  %5614 = vst [vmem:[%s7385_s25 + $0x8] sm:$0xff] %v6011_v37  ;;  %v6012_v0 = vpack.c.bf16 %v5122_v35, %v5120_v24  ;;  %v6013_v22 = vpack.c.bf16 %v5348_v33, %v5346_v44 }
 0x7ce   : > { %5615 = vst [vmem:[%s7385_s25 + $0x10] sm:$0xff] %v6012_v0  ;;  %5616 = vst [vmem:[%s7385_s25 + $0x18] sm:$0xff] %v6013_v22 }
 0x7d0   : > { %v5126_v20 = vpop.f32.mrb[4].mxu0  ;;  %v5352_v3 = vpop.f32.mrb[4].mxu1 }
 0x7d1   : > { %v5128_v39 = vpop.f32.mrb[5].mxu0  ;;  %v5354_v8 = vpop.f32.mrb[5].mxu1 }
 0x7d2   : > { %v6014_v60 = vpack.c.bf16 %v5128_v39, %v5126_v20  ;;  %v6015_v18 = vpack.c.bf16 %v5354_v8, %v5352_v3  ;;  %v5130_v14 = vpop.f32.mrb[6].mxu0  ;;  %v5356_v4 = vpop.f32.mrb[6].mxu1 }
 0x7d3   : > { %v5132_v34 = vpop.f32.mrb[7].mxu0  ;;  %v5358_v41 = vpop.f32.mrb[7].mxu1 }
 0x7d4   : > { %5617 = vst [vmem:[%s7385_s25 + $0x20] sm:$0xff] %v6014_v60  ;;  %5618 = vst [vmem:[%s7385_s25 + $0x28] sm:$0xff] %v6015_v18  ;;  %v6016_v25 = vpack.c.bf16 %v5132_v34, %v5130_v14  ;;  %v6017_v9 = vpack.c.bf16 %v5358_v41, %v5356_v4 }
 0x7d6   : > { %5619 = vst [vmem:[%s7385_s25 + $0x30] sm:$0xff] %v6016_v25  ;;  %5620 = vst [vmem:[%s7385_s25 + $0x38] sm:$0xff] %v6017_v9 }
 0x7d8   : > { %v5136_v7 = vpop.f32.mrb[8].mxu0  ;;  %v5362_v21 = vpop.f32.mrb[8].mxu1 }
 0x7d9   : > { %v5138_v56 = vpop.f32.mrb[9].mxu0  ;;  %v5364_v58 = vpop.f32.mrb[9].mxu1 }
 0x7da   : > { %v6018_v61 = vpack.c.bf16 %v5138_v56, %v5136_v7  ;;  %v6019_v43 = vpack.c.bf16 %v5364_v58, %v5362_v21  ;;  %v5140_v42 = vpop.f32.mrb[10].mxu0  ;;  %v5366_v53 = vpop.f32.mrb[10].mxu1 }
 0x7db   : > { %v5142_v50 = vpop.f32.mrb[11].mxu0  ;;  %v5368_v51 = vpop.f32.mrb[11].mxu1 }
 0x7dc   : > { %5621 = vst [vmem:[%s7385_s25 + $0x40] sm:$0xff] %v6018_v61  ;;  %5622 = vst [vmem:[%s7385_s25 + $0x48] sm:$0xff] %v6019_v43  ;;  %v6020_v38 = vpack.c.bf16 %v5142_v50, %v5140_v42  ;;  %v6021_v55 = vpack.c.bf16 %v5368_v51, %v5366_v53 }
 0x7de   : > { %5623 = vst [vmem:[%s7385_s25 + $0x50] sm:$0xff] %v6020_v38  ;;  %5624 = vst [vmem:[%s7385_s25 + $0x58] sm:$0xff] %v6021_v55 }
 0x7e0   : > { %v5146_v31 = vpop.f32.mrb[12].mxu0  ;;  %v5372_v17 = vpop.f32.mrb[12].mxu1 }
 0x7e1   : > { %v5148_v47 = vpop.f32.mrb[13].mxu0  ;;  %v5374_v11 = vpop.f32.mrb[13].mxu1 }
 0x7e2   : > { %v6022_v36 = vpack.c.bf16 %v5148_v47, %v5146_v31  ;;  %v6023_v26 = vpack.c.bf16 %v5374_v11, %v5372_v17  ;;  %v5150_v52 = vpop.f32.mrb[14].mxu0  ;;  %v5376_v6 = vpop.f32.mrb[14].mxu1 }
 0x7e3   : > { %v5152_v62 = vpop.f32.mrb[15].mxu0  ;;  %v5378_v54 = vpop.f32.mrb[15].mxu1 }
 0x7e4   : > { %5625 = vst [vmem:[%s7385_s25 + $0x60] sm:$0xff] %v6022_v36  ;;  %5626 = vst [vmem:[%s7385_s25 + $0x68] sm:$0xff] %v6023_v26  ;;  %v6024_v2 = vpack.c.bf16 %v5152_v62, %v5150_v52  ;;  %v6025_v29 = vpack.c.bf16 %v5378_v54, %v5376_v6 }
 0x7e6   : > { %5627 = vst [vmem:[%s7385_s25 + $0x70] sm:$0xff] %v6024_v2  ;;  %5628 = vst [vmem:[%s7385_s25 + $0x78] sm:$0xff] %v6025_v29 }
 0x7e8   : > { %v5156_v10 = vpop.f32.mrb[16].mxu0  ;;  %v5382_v59 = vpop.f32.mrb[16].mxu1 }
 0x7e9   : > { %v5158_v30 = vpop.f32.mrb[17].mxu0  ;;  %v5384_v5 = vpop.f32.mrb[17].mxu1 }
 0x7ea   : > { %v6026_v48 = vpack.c.bf16 %v5158_v30, %v5156_v10  ;;  %v6027_v13 = vpack.c.bf16 %v5384_v5, %v5382_v59  ;;  %v5160_v32 = vpop.f32.mrb[18].mxu0  ;;  %v5386_v46 = vpop.f32.mrb[18].mxu1 }
 0x7eb   : > { %v5162_v27 = vpop.f32.mrb[19].mxu0  ;;  %v5388_v28 = vpop.f32.mrb[19].mxu1 }
 0x7ec   : > { %5629 = vst [vmem:[%s7385_s25 + $0x80] sm:$0xff] %v6026_v48  ;;  %5630 = vst [vmem:[%s7385_s25 + $0x88] sm:$0xff] %v6027_v13  ;;  %v6028_v1 = vpack.c.bf16 %v5162_v27, %v5160_v32  ;;  %v6029_v63 = vpack.c.bf16 %v5388_v28, %v5386_v46 }
 0x7ee   : > { %5631 = vst [vmem:[%s7385_s25 + $0x90] sm:$0xff] %v6028_v1  ;;  %5632 = vst [vmem:[%s7385_s25 + $0x98] sm:$0xff] %v6029_v63 }
 0x7f0   : > { %v5166_v40 = vpop.f32.mrb[20].mxu0  ;;  %v5392_v45 = vpop.f32.mrb[20].mxu1 }
 0x7f1   : > { %v5168_v16 = vpop.f32.mrb[21].mxu0  ;;  %v5394_v57 = vpop.f32.mrb[21].mxu1 }
 0x7f2   : > { %v6030_v49 = vpack.c.bf16 %v5168_v16, %v5166_v40  ;;  %v6031_v19 = vpack.c.bf16 %v5394_v57, %v5392_v45  ;;  %v5170_v15 = vpop.f32.mrb[22].mxu0  ;;  %v5396_v12 = vpop.f32.mrb[22].mxu1 }
 0x7f3   : > { %v5172_v23 = vpop.f32.mrb[23].mxu0  ;;  %v5398_v37 = vpop.f32.mrb[23].mxu1 }
 0x7f4   : > { %5633 = vst [vmem:[%s7385_s25 + $0xa0] sm:$0xff] %v6030_v49  ;;  %5634 = vst [vmem:[%s7385_s25 + $0xa8] sm:$0xff] %v6031_v19  ;;  %v6032_v24 = vpack.c.bf16 %v5172_v23, %v5170_v15  ;;  %v6033_v44 = vpack.c.bf16 %v5398_v37, %v5396_v12 }
 0x7f6   : > { %5635 = vst [vmem:[%s7385_s25 + $0xb0] sm:$0xff] %v6032_v24  ;;  %5636 = vst [vmem:[%s7385_s25 + $0xb8] sm:$0xff] %v6033_v44 }
 0x7f8   : > { %v5176_v35 = vpop.f32.mrb[24].mxu0  ;;  %v5402_v33 = vpop.f32.mrb[24].mxu1 }
 0x7f9   : > { %v5178_v0 = vpop.f32.mrb[25].mxu0  ;;  %v5404_v22 = vpop.f32.mrb[25].mxu1 }
 0x7fa   : > { %v6034_v20 = vpack.c.bf16 %v5178_v0, %v5176_v35  ;;  %v6035_v3 = vpack.c.bf16 %v5404_v22, %v5402_v33  ;;  %v5180_v39 = vpop.f32.mrb[26].mxu0  ;;  %v5406_v8 = vpop.f32.mrb[26].mxu1 }
 0x7fb   : > { %v5182_v60 = vpop.f32.mrb[27].mxu0  ;;  %v5408_v18 = vpop.f32.mrb[27].mxu1 }
 0x7fc   : > { %5637 = vst [vmem:[%s7385_s25 + $0xc0] sm:$0xff] %v6034_v20  ;;  %5638 = vst [vmem:[%s7385_s25 + $0xc8] sm:$0xff] %v6035_v3  ;;  %v6036_v14 = vpack.c.bf16 %v5182_v60, %v5180_v39  ;;  %v6037_v4 = vpack.c.bf16 %v5408_v18, %v5406_v8 }
 0x7fe   : > { %5639 = vst [vmem:[%s7385_s25 + $0xd0] sm:$0xff] %v6036_v14  ;;  %5640 = vst [vmem:[%s7385_s25 + $0xd8] sm:$0xff] %v6037_v4 }
 0x800   : > { %v5186_v34 = vpop.f32.mrb[28].mxu0  ;;  %v5412_v41 = vpop.f32.mrb[28].mxu1 }
 0x801   : > { %v5188_v25 = vpop.f32.mrb[29].mxu0  ;;  %v5414_v9 = vpop.f32.mrb[29].mxu1 }
 0x802   : > { %v6038_v7 = vpack.c.bf16 %v5188_v25, %v5186_v34  ;;  %v6039_v21 = vpack.c.bf16 %v5414_v9, %v5412_v41  ;;  %v5190_v56 = vpop.f32.mrb[30].mxu0  ;;  %v5416_v58 = vpop.f32.mrb[30].mxu1 }
 0x803   : > { %v5192_v61 = vpop.f32.mrb[31].mxu0  ;;  %v5418_v43 = vpop.f32.mrb[31].mxu1 }
 0x804   : > { %5641 = vst [vmem:[%s7385_s25 + $0xe0] sm:$0xff] %v6038_v7  ;;  %5642 = vst [vmem:[%s7385_s25 + $0xe8] sm:$0xff] %v6039_v21  ;;  %v6040_v42 = vpack.c.bf16 %v5192_v61, %v5190_v56  ;;  %v6041_v53 = vpack.c.bf16 %v5418_v43, %v5416_v58 }
 0x806   : > { %5643 = vst [vmem:[%s7385_s25 + $0xf0] sm:$0xff] %v6040_v42  ;;  %5644 = vst [vmem:[%s7385_s25 + $0xf8] sm:$0xff] %v6041_v53 }
 0x807 PF: > { %s6043_s6 = sshll.u32 %s7249_s19, 12  ;;  %s5660_s12 = sshll.u32 %s7385_s25, 4  ;;  %s9853_s12 = int_to_ptr.vmem [resolvable:$true] %s5660_s12 }
 0x808   : > { %s9850_s11 = scalar_lea.hbm %s9913_s4, %s6043_s6  ;;  %s10244_s13 = sand.u32 1, %s7237_s16  }
 0x809   : > { %s9857_s14 = scalar_lea.sflag [#allocation6], %s10244_s13  ;;  %s7167_s23 = scalar_lea.vmem %s9853_s12, 4096 }
 0x80a   : > { %p7168_p4 = scmp.ne.s32.totalorder %s9853_s12, %s7167_s23  ;;  %s7268_s19 = smov [#allocation5]  }
 0x80b   : > { %s7171_s24 = sshll.u32 %s7268_s19, 4  ;;  %s7172_s24 = int_to_ptr.vmem [resolvable:$false] %s7171_s24 }
 0x80c   : > { %p7169_p5 = pnand %p7168_p4, %p7345_p3  ;;  %s7173_s29 = scalar_lea.vmem %s7172_s24, 8192 }
 0x80d   : > { %p7174_p7 = scmp.lt.s32.totalorder %s9853_s12, %s7172_s24  ;;  %p7175_p8 = scmp.lt.s32.totalorder %s7173_s29, %s7167_s23 }
 0x80e   : > { %p7170_p6 = pneg %p7169_p5 }
 0x80f   : > { %p7176_p10 = por %p7175_p8, %p7174_p7 }
 0x811   : > { %p7177_p11 = pnand %p7176_p10, %p7170_p6 }
 0x813   : > { %7180 = shalt.err (!%p7177_p11)
}
 0x814   : > { %s7181_s25 = scalar_lea.hbm %s9850_s11, 4096  ;;  %s7185_s7 = scalar_lea.hbm %s9913_s4, 8192 }
 0x815   : > { %p7182_p12 = scmp.ne.s32.totalorder %s9850_s11, %s7181_s25  ;;  %p7186_p1 = scmp.lt.u32.totalorder %s9850_s11, %s9913_s4 }
 0x816   : > { %p7187_p2 = scmp.lt.u32.totalorder %s7185_s7, %s7181_s25  ;;  %p7189_p5 = scmp.lt.u32.totalorder %s7181_s25, %s9850_s11 }
 0x817   : > { %p7183_p13 = pnand %p7182_p12, %p7345_p3 }
 0x818   : > { %p7188_p4 = por %p7187_p2, %p7186_p1 }
 0x819   : > { %p7184_p0 = pneg %p7183_p13 }
 0x81a   : > { %p7190_p6 = por %p7189_p5, %p7188_p4 }
 0x81c   : > { %p7191_p7 = pnand %p7190_p6, %p7184_p0 }
 0x81e   : > { %7194 = shalt.err (!%p7191_p7)
}
 0x81f   : > { %s7269_s6 = smov 256   ;;  %s7270_s9 = smov 16  }
 0x820   : > { %6412 = dma.vmem_to_hbm [thread:$0]  (%p7345_p3), %s9853_s12, 4096, %s9850_s11, %s9857_s14, %s7269_s6, %s7269_s6, %s7270_s9  }
 0x821 PF: > { %p6418_p8 = scmp.ge.s32.totalorder %s7261_s22, 2  ;;  %s5675_s10 = sand.u32 1, %s7233_s15  }
 0x822   : > { %s5676_s13 = scalar_lea.sflag [#allocation6], %s5675_s10 }
 0x823   : > { %p6415_p10 = pnand %p6418_p8, %p7355_p9 }
 0x825   : > { %7228 = dma.done.wait (!%p6415_p10), %s5676_s13, 4096  }
 0x826   : > { %7230 = vsyncadd (!%p6415_p10), %s5676_s13, 4294963200  ;;  %s17_s22 = sadd.s32 1, %s7261_s22   ;;  %s10245_s27 = sld [smem:[#allocation8_spill]] }
 0x827   : > { %p14_p11 = scmp.ge.s32.totalorder %s17_s22, 6   ;;  %s10246_s11 = sld [smem:[#allocation9_spill]] }
 0x828   : > { %s10247_s15 = smov %s7237_s16  ;;  %s10248_s16 = smov %s7241_s17 }
 0x829   : > { %s10249_s17 = smov %s7363_s5  ;;  %s10250_s18 = smov %s7253_s20 }
 0x82a   : > { %s10251_s19 = smov %s7257_s21  ;;  %16 = sbr.rel (!%p14_p11) target bundleno = 5 (0x5), region = 94 }
 0x82c   : > { %s10252_s20 = smov %s10245_s27 }
 0x82d   : > { %s10253_s21 = smov %s10246_s11 }
 0x831   :  { %5681 = vsyncpa [#allocation6], 1 }
 0x832   :  { %5683 = vsyncpa [#allocation6 + $0x1], 1 }

</bundles_post_ra>
